<compile_context>
chip_gen: v7x
topology: tpu7x:2x2x1
jax: 0.10.0
libtpu: 0.0.40
codegen_flags: <defaults>
</compile_context>

<pallas_src>
import functools

import numpy as np
import jax
import jax.numpy as jnp
from jax import lax
from jax.experimental import pallas as pl
from jax.experimental.pallas import tpu as pltpu


# ----------------------------- config ----------------------------------------
class Configs:
    seq_len = 16
    label_len = 8
    pred_len = 8            # decoder length = label_len + pred_len = 16 (= seq_len)
    enc_in = 4
    dec_in = 4
    d_model = 32
    c_out = 4
    n_heads = 8
    e_layers = 2
    d_layers = 1
    factor = 1
    dropout = 0.1           # declared in the torch module but never applied in forward
    output_attention = False
    moving_avg = 5


DEC_N_HEADS = 8  # decoder AutoCorrelation layers use the __init__ default n_heads=8


# ------------------- pick cheapest accurate matmul precision ------------------
@functools.lru_cache(maxsize=None)
def _matmul_precision():
    """HIGH (bf16x3, 3 MXU passes) if it gives ~f32 accuracy here, else HIGHEST."""
    def krn(a_ref, b_ref, o_ref):
        o_ref[...] = jnp.dot(a_ref[...], b_ref[...],
                             preferred_element_type=jnp.float32,
                             precision=lax.Precision.HIGH)
    try:
        a = jnp.linspace(0.5, 1.5, 8 * 128, dtype=jnp.float32).reshape(8, 128)
        b = jnp.linspace(-1.0, 1.0, 128 * 128, dtype=jnp.float32).reshape(128, 128)
        got = pl.pallas_call(
            krn, out_shape=jax.ShapeDtypeStruct((8, 128), jnp.float32))(a, b)
        got = np.asarray(jax.block_until_ready(got), np.float64)
        want = np.asarray(a, np.float64) @ np.asarray(b, np.float64)
        ok = np.max(np.abs(got - want) / (np.abs(want) + 1.0)) < 1e-4
        return lax.Precision.HIGH if ok else lax.Precision.HIGHEST
    except Exception:
        return lax.Precision.HIGHEST


# ----------------------------- constant slab -----------------------------------
@functools.lru_cache(maxsize=None)
def _autoformer_constants(L, E, H, moving_avg):
    """All constant matrices (float64 precompute) packed into one [R,128] f32 slab."""
    assert E % H == 0
    d = E // H
    nf = d // 2 + 1
    assert d <= L and L % d == 0 and E % L == 0
    CB = L // d
    EL = E // L
    assert EL * CB == H
    HL = H * L
    lanes = HL
    assert lanes % 128 == 0 and lanes >= max(E, L, H * nf)

    # per-head rfft over the head-channel dim (length d), block-diagonal over heads
    n = np.arange(d, dtype=np.float64)[:, None]
    f = np.arange(nf, dtype=np.float64)[None, :]
    ang = 2.0 * np.pi * n * f / d
    CR, SI = np.cos(ang), -np.sin(ang)
    DR = np.zeros((E, H * nf))
    DI = np.zeros((E, H * nf))
    for h in range(H):
        DR[h * d:(h + 1) * d, h * nf:(h + 1) * nf] = CR
        DI[h * d:(h + 1) * d, h * nf:(h + 1) * nf] = SI

    # block-diagonal one-sided irfft back to length L, lane-dense output [H*nf, H*L]
    wgt = np.full(nf, 2.0)
    wgt[0] = 1.0
    if L % 2 == 0 and (nf - 1) == L // 2:
        wgt[-1] = 1.0
    t = np.arange(L, dtype=np.float64)[None, :]
    f2 = np.arange(nf, dtype=np.float64)[:, None]
    ang2 = 2.0 * np.pi * f2 * t / L
    IC = wgt[:, None] * np.cos(ang2) / L
    IS = -wgt[:, None] * np.sin(ang2) / L
    ICB = np.zeros((H * nf, HL))
    ISB = np.zeros((H * nf, HL))
    for h in range(H):
        ICB[h * nf:(h + 1) * nf, h * L:(h + 1) * L] = IC
        ISB[h * nf:(h + 1) * nf, h * L:(h + 1) * L] = IS

    # fold "subtract mean over heads" (same lag, all heads) into the irfft matrices
    q = np.arange(HL)
    MEAN = (q[:, None] % L == q[None, :] % L).astype(np.float64) / H
    CEN = np.eye(HL) - MEAN
    ICBc = ICB @ CEN
    ISBc = ISB @ CEN

    # per-head segment sum over lags (softmax denominators), block-diag ones(L,L)
    SEG = (q[:, None] // L == q[None, :] // L).astype(np.float64)

    # aggregation routing: out = P @ ((v^T @ w) * BLK) @ Q  reproduces torch's
    # weighted value aggregation + the (B,d,H,L)->(B,L,H*d) reshape exactly.
    e = np.arange(E)
    tt = np.arange(L)
    BLK = (e[:, None] // d == q[None, :] // L).astype(np.float64)                  # [E, HL]
    QM = ((q[:, None] % L == e[None, :] % L) &
          ((q[:, None] // L) % EL == e[None, :] // L)).astype(np.float64)          # [HL, E]
    PM = ((e[None, :] % d == tt[:, None] // CB) &
          ((e[None, :] // d) // EL == tt[:, None] % CB)).astype(np.float64)        # [L, E]

    # AvgPool1d(kernel, stride=1, pad=k//2, count_include_pad=True) along time
    half = moving_avg // 2
    idx = np.arange(L)
    AVG = (np.abs(idx[:, None] - idx[None, :]) <= half).astype(np.float64) / moving_avg

    parts = [("DR", DR, E), ("DI", DI, E), ("ICB", ICBc, lanes), ("ISB", ISBc, lanes),
             ("SEG", SEG, HL), ("BLK", BLK, E), ("Q", QM, HL), ("P", PM, L),
             ("AVG", AVG, L)]
    rows, blocks, off = {}, [], 0
    for name, a, nrows in parts:
        assert nrows % 8 == 0 and a.shape[0] <= nrows and a.shape[1] <= lanes
        blk = np.zeros((nrows, lanes))
        blk[:a.shape[0], :a.shape[1]] = a
        rows[name] = off
        off += nrows
        blocks.append(blk)
    slab = jnp.asarray(np.concatenate(blocks, axis=0), jnp.float32)
    return slab, rows


# ----------------------------- fused kernel -----------------------------------
def _make_kernel(B, L, E, H, e_layers, d_layers, rows, prec):
    HL = H * L

    def kernel(x_enc_ref, x_dec_ref, we_ref, be_ref, wd_ref, bd_ref,
               wp_ref, bp_ref, cst_ref, out_ref):
        def mm(a, b):
            return jnp.dot(a, b, preferred_element_type=jnp.float32, precision=prec)

        def cst(name, nrows, ncols):
            r0 = rows[name]
            return cst_ref[r0:r0 + nrows, 0:ncols]

        DR  = cst("DR",  E,  HL)   # rfft (real);  lanes >= H*nf are zero
        DI  = cst("DI",  E,  HL)   # rfft (imag)
        ICB = cst("ICB", HL, HL)   # irfft (cos) with head-mean removal folded in
        ISB = cst("ISB", HL, HL)   # irfft (sin)   "
        SEG = cst("SEG", HL, HL)   # per-head-segment sum (softmax denominator)
        BLK = cst("BLK", E,  HL)   # head block-diagonal mask
        Q   = cst("Q",   HL, E)    # 0/1 lag->lane routing
        P   = cst("P",   L,  E)    # 0/1 output-row routing (torch reshape)
        AVG = cst("AVG", L,  L)    # moving-average matrix (series_decomp)

        we, be = we_ref[...], be_ref[...]
        wd, bd = wd_ref[...], bd_ref[...]
        wp, bp = wp_ref[...], bp_ref[...]

        def decomp(x):                            # x: [L, E]
            trend = mm(AVG, x)
            return x - trend, trend

        def softmax_lags(z):                      # z: [L, H*L] lane-dense
            # one global shift per row == a constant per head segment -> exact softmax
            z = z - jnp.max(z, axis=-1, keepdims=True)
            ez = jnp.exp(z)
            return ez / mm(ez, SEG)

        def aggregate(w, v):                      # w: [L, H*L], v: [L, E]
            m = mm(jnp.transpose(v), w) * BLK     # [E, H*L] per-head <v, w> products
            return mm(P, mm(m, Q))                # [L, E]

        def autocorr_self(x):                     # encoder: q == k == v  =>  ri == 0
            qr, qi = mm(x, DR), mm(x, DI)
            z = mm(qr * qr + qi * qi, ICB)        # irfft + head-mean removal
            return aggregate(softmax_lags(z), x)

        def autocorr_cross(qq, kr, ki, v):        # decoder: k == v == enc_seasonal
            qr, qi = mm(qq, DR), mm(qq, DI)
            z = mm(qr * kr + qi * ki, ICB) + mm(qi * kr - qr * ki, ISB)
            return aggregate(softmax_lags(z), v)

        for b in range(B):                        # B independent chains interleave on MXU
            enc_out = mm(x_enc_ref[b], we) + be   # [L, E]
            dec_out = mm(x_dec_ref[b], wd) + bd   # [L, E]

            enc_seasonal, enc_trend = decomp(enc_out)
            for _ in range(e_layers):
                enc_seasonal = autocorr_self(enc_seasonal)

            seasonal, trend = decomp(dec_out)
            kr, ki = mm(enc_seasonal, DR), mm(enc_seasonal, DI)
            for _ in range(d_layers):
                seasonal = autocorr_cross(seasonal, kr, ki, enc_seasonal)
                trend = trend + enc_trend         # enc_trend_list[-1] == enc_trend

            out_ref[b] = mm(seasonal + trend, wp) + bp

    return kernel


# ----------------------------- full model forward ------------------------------
def model_forward(params, x_enc, x_mark_enc, x_dec, x_mark_dec, cfg=Configs):
    del x_mark_enc, x_mark_dec          # unused by the torch forward
    B, L, _ = x_enc.shape
    Ld = x_dec.shape[1]
    E, H = cfg.d_model, cfg.n_heads
    assert Ld == L == cfg.seq_len       # required by the torch model's algebra
    assert H == DEC_N_HEADS             # decoder layers use default n_heads=8
    assert H * L % 128 == 0             # lane-dense layout of this kernel

    slab, rows = _autoformer_constants(L, E, H, cfg.moving_avg)
    prec = _matmul_precision()
    c_out = params["proj_w"].shape[1]
    kernel = _make_kernel(B, L, E, H, cfg.e_layers, cfg.d_layers, rows, prec)

    full3 = lambda a: pl.BlockSpec(a.shape, lambda i: (0, 0, 0))
    full2 = lambda a: pl.BlockSpec(a.shape, lambda i: (0, 0))

    inputs = (x_enc, x_dec,
              params["enc_w"], params["enc_b"],
              params["dec_w"], params["dec_b"],
              params["proj_w"], params["proj_b"],
              slab)
    in_specs = [full3(x_enc), full3(x_dec)] + [full2(a) for a in inputs[2:]]

    return pl.pallas_call(
        kernel,
        out_shape=jax.ShapeDtypeStruct((B, Ld, c_out), jnp.float32),
        grid=(1,),                                   # single invocation; batch unrolled inside
        in_specs=in_specs,
        out_specs=pl.BlockSpec((B, Ld, c_out), lambda i: (0, 0, 0)),
        compiler_params=pltpu.CompilerParams(dimension_semantics=("arbitrary",)),
    )(*inputs)


# ----------------------------- pure-JAX reference ------------------------------
def _autocorr_ref(q, k, v, H):
    B, L, E = q.shape
    S = k.shape[1]
    d = E // H
    qh = q.reshape(B, L, H, d).transpose(0, 2, 1, 3)
    kh = k.reshape(B, S, H, d).transpose(0, 2, 1, 3)
    vh = v.reshape(B, S, H, d).transpose(0, 2, 3, 1)                 # [B, H, d, S]
    qf = jnp.fft.rfft(qh, axis=-1)
    kf = jnp.fft.rfft(kh, axis=-1)
    corr = jnp.fft.irfft(qf * jnp.conj(kf), n=L, axis=-1)
    mean = jnp.mean(corr, axis=1, keepdims=True)
    w = jax.nn.softmax(corr - mean, axis=-1)
    wT = jnp.swapaxes(w, -1, -2)
    V = jnp.matmul(wT, jnp.swapaxes(vh, -1, -2),
                   precision=lax.Precision.HIGHEST)                  # [B, H, L, d]
    Vt = jnp.swapaxes(V, -1, -2)                                     # [B, H, d, L]
    return jnp.transpose(Vt, (0, 2, 1, 3)).reshape(B, L, -1)


def _decomp_ref(x, k):
    pad = k // 2
    L = x.shape[1]
    xp = jnp.pad(x, ((0, 0), (pad, pad), (0, 0)))
    trend = sum(xp[:, i:i + L, :] for i in range(k)) / k
    return x - trend, trend


def model_forward_ref(params, x_enc, x_dec, cfg=Configs):
    lin = lambda x, w, b: jnp.einsum("bli,io->blo", x, w,
                                     precision=lax.Precision.HIGHEST) + b
    enc_out = lin(x_enc, params["enc_w"], params["enc_b"])
    dec_out = lin(x_dec, params["dec_w"], params["dec_b"])
    enc_seasonal, enc_trend = _decomp_ref(enc_out, cfg.moving_avg)
    for _ in range(cfg.e_layers):
        enc_seasonal = _autocorr_ref(enc_seasonal, enc_seasonal, enc_seasonal,
                                     cfg.n_heads)
    seasonal_part, trend_part = _decomp_ref(dec_out, cfg.moving_avg)
    for _ in range(cfg.d_layers):
        seasonal_part = _autocorr_ref(seasonal_part, enc_seasonal, enc_seasonal,
                                      DEC_N_HEADS)
        trend_part = trend_part + enc_trend
    return lin(seasonal_part + trend_part, params["proj_w"], params["proj_b"])


# ----------------------------- main --------------------------------------------
if __name__ == "__main__":
    cfg = Configs
    B = 2
    dec_len = cfg.label_len + cfg.pred_len            # 16

    key = jax.random.PRNGKey(0)
    ks = jax.random.split(key, 8)
    # weights stored pre-transposed ([in, out]); biases as [1, out]
    params = {
        "enc_w": 0.1 * jax.random.normal(ks[0], (cfg.enc_in, cfg.d_model), jnp.float32),
        "enc_b": 0.1 * jax.random.normal(ks[1], (1, cfg.d_model), jnp.float32),
        "dec_w": 0.1 * jax.random.normal(ks[2], (cfg.dec_in, cfg.d_model), jnp.float32),
        "dec_b": 0.1 * jax.random.normal(ks[3], (1, cfg.d_model), jnp.float32),
        "proj_w": 0.1 * jax.random.normal(ks[4], (cfg.d_model, cfg.c_out), jnp.float32),
        "proj_b": 0.1 * jax.random.normal(ks[5], (1, cfg.c_out), jnp.float32),
    }
    x_enc = jax.random.normal(ks[6], (B, cfg.seq_len, cfg.enc_in), jnp.float32)
    x_dec = jax.random.normal(ks[7], (B, dec_len, cfg.dec_in), jnp.float32)
    x_mark_enc = jnp.zeros((B, cfg.seq_len, 1), jnp.float32)   # unused by forward
    x_mark_dec = jnp.zeros((B, dec_len, 1), jnp.float32)       # unused by forward

    fwd = jax.jit(model_forward)
    out = jax.block_until_ready(fwd(params, x_enc, x_mark_enc, x_dec, x_mark_dec))
    assert out.shape == (B, dec_len, cfg.c_out)

    ref = jax.block_until_ready(model_forward_ref(params, x_enc, x_dec))
    np.testing.assert_allclose(np.asarray(out), np.asarray(ref), rtol=2e-3, atol=3e-4)
    print("KERNEL_OK")
</pallas_src>

<mosaic_0001>
module attributes {stable_mosaic.version = 11 : i64} {
  func.func @kernel(%arg0: i32, %arg1: memref<2x16x4xf32, #tpu.memory_space<vmem>>, %arg2: memref<2x16x4xf32, #tpu.memory_space<vmem>>, %arg3: memref<4x32xf32, #tpu.memory_space<vmem>>, %arg4: memref<1x32xf32, #tpu.memory_space<vmem>>, %arg5: memref<4x32xf32, #tpu.memory_space<vmem>>, %arg6: memref<1x32xf32, #tpu.memory_space<vmem>>, %arg7: memref<32x4xf32, #tpu.memory_space<vmem>>, %arg8: memref<1x4xf32, #tpu.memory_space<vmem>>, %arg9: memref<640x128xf32, #tpu.memory_space<vmem>>, %arg10: memref<2x16x4xf32, #tpu.memory_space<vmem>>) attributes {dimension_semantics = [#tpu.dimension_semantics<arbitrary>], iteration_bounds = array<i64: 1>, scalar_prefetch = 0 : i64, scratch_operands = 0 : i64, tpu.core_type = #tpu.core_type<tc>, window_params = [{pipeline_mode = #tpu.pipeline_mode<synchronous>, transform_indices = @transform_0, window_bounds = array<i64: 2, 16, 4>}, {pipeline_mode = #tpu.pipeline_mode<synchronous>, transform_indices = @transform_1, window_bounds = array<i64: 2, 16, 4>}, {pipeline_mode = #tpu.pipeline_mode<synchronous>, transform_indices = @transform_2, window_bounds = array<i64: 4, 32>}, {pipeline_mode = #tpu.pipeline_mode<synchronous>, transform_indices = @transform_3, window_bounds = array<i64: 1, 32>}, {pipeline_mode = #tpu.pipeline_mode<synchronous>, transform_indices = @transform_4, window_bounds = array<i64: 4, 32>}, {pipeline_mode = #tpu.pipeline_mode<synchronous>, transform_indices = @transform_5, window_bounds = array<i64: 1, 32>}, {pipeline_mode = #tpu.pipeline_mode<synchronous>, transform_indices = @transform_6, window_bounds = array<i64: 32, 4>}, {pipeline_mode = #tpu.pipeline_mode<synchronous>, transform_indices = @transform_7, window_bounds = array<i64: 1, 4>}, {pipeline_mode = #tpu.pipeline_mode<synchronous>, transform_indices = @transform_8, window_bounds = array<i64: 640, 128>}, {pipeline_mode = #tpu.pipeline_mode<synchronous>, transform_indices = @transform_9, window_bounds = array<i64: 2, 16, 4>}]} {
    %c0 = arith.constant 0 : index
    %c0_0 = arith.constant 0 : index
    %0 = vector.load %arg9[%c0, %c0_0] : memref<640x128xf32, #tpu.memory_space<vmem>>, vector<32x128xf32>
    %c32 = arith.constant 32 : index
    %c0_1 = arith.constant 0 : index
    %1 = vector.load %arg9[%c32, %c0_1] : memref<640x128xf32, #tpu.memory_space<vmem>>, vector<32x128xf32>
    %c64 = arith.constant 64 : index
    %c0_2 = arith.constant 0 : index
    %2 = vector.load %arg9[%c64, %c0_2] : memref<640x128xf32, #tpu.memory_space<vmem>>, vector<128x128xf32>
    %c192 = arith.constant 192 : index
    %c0_3 = arith.constant 0 : index
    %3 = vector.load %arg9[%c192, %c0_3] : memref<640x128xf32, #tpu.memory_space<vmem>>, vector<128x128xf32>
    %c320 = arith.constant 320 : index
    %c0_4 = arith.constant 0 : index
    %4 = vector.load %arg9[%c320, %c0_4] : memref<640x128xf32, #tpu.memory_space<vmem>>, vector<128x128xf32>
    %c448 = arith.constant 448 : index
    %c0_5 = arith.constant 0 : index
    %5 = vector.load %arg9[%c448, %c0_5] : memref<640x128xf32, #tpu.memory_space<vmem>>, vector<32x128xf32>
    %c480 = arith.constant 480 : index
    %c0_6 = arith.constant 0 : index
    %6 = vector.load %arg9[%c480, %c0_6] : memref<640x128xf32, #tpu.memory_space<vmem>>, vector<128x32xf32>
    %c608 = arith.constant 608 : index
    %c0_7 = arith.constant 0 : index
    %7 = vector.load %arg9[%c608, %c0_7] : memref<640x128xf32, #tpu.memory_space<vmem>>, vector<16x32xf32>
    %c624 = arith.constant 624 : index
    %c0_8 = arith.constant 0 : index
    %8 = vector.load %arg9[%c624, %c0_8] : memref<640x128xf32, #tpu.memory_space<vmem>>, vector<16x16xf32>
    %c0_9 = arith.constant 0 : index
    %c0_10 = arith.constant 0 : index
    %9 = vector.load %arg3[%c0_9, %c0_10] : memref<4x32xf32, #tpu.memory_space<vmem>>, vector<4x32xf32>
    %c0_11 = arith.constant 0 : index
    %c0_12 = arith.constant 0 : index
    %10 = vector.load %arg4[%c0_11, %c0_12] : memref<1x32xf32, #tpu.memory_space<vmem>>, vector<1x32xf32>
    %c0_13 = arith.constant 0 : index
    %c0_14 = arith.constant 0 : index
    %11 = vector.load %arg5[%c0_13, %c0_14] : memref<4x32xf32, #tpu.memory_space<vmem>>, vector<4x32xf32>
    %c0_15 = arith.constant 0 : index
    %c0_16 = arith.constant 0 : index
    %12 = vector.load %arg6[%c0_15, %c0_16] : memref<1x32xf32, #tpu.memory_space<vmem>>, vector<1x32xf32>
    %c0_17 = arith.constant 0 : index
    %c0_18 = arith.constant 0 : index
    %13 = vector.load %arg7[%c0_17, %c0_18] : memref<32x4xf32, #tpu.memory_space<vmem>>, vector<32x4xf32>
    %c0_19 = arith.constant 0 : index
    %c0_20 = arith.constant 0 : index
    %14 = vector.load %arg8[%c0_19, %c0_20] : memref<1x4xf32, #tpu.memory_space<vmem>>, vector<1x4xf32>
    %c0_21 = arith.constant 0 : index
    %c0_22 = arith.constant 0 : index
    %c0_23 = arith.constant 0 : index
    %15 = vector.load %arg1[%c0_21, %c0_22, %c0_23] : memref<2x16x4xf32, #tpu.memory_space<vmem>>, vector<1x16x4xf32>
    %16 = vector.shape_cast %15 : vector<1x16x4xf32> to vector<16x4xf32>
    %cst = arith.constant dense<0.000000e+00> : vector<16x32xf32>
    %17 = tpu.matmul %16, %9, %cst {dimension_numbers = #tpu.dot_dimension_numbers<[1], [0], [0], [1], [0, 0, 1, 1], [], []>, precision = #tpu.contract_precision<fp32>} : vector<16x4xf32>, vector<4x32xf32>, vector<16x32xf32> -> vector<16x32xf32>
    %18 = vector.broadcast %10 : vector<1x32xf32> to vector<16x32xf32>
    %19 = arith.addf %17, %18 : vector<16x32xf32>
    %c0_24 = arith.constant 0 : index
    %c0_25 = arith.constant 0 : index
    %c0_26 = arith.constant 0 : index
    %20 = vector.load %arg2[%c0_24, %c0_25, %c0_26] : memref<2x16x4xf32, #tpu.memory_space<vmem>>, vector<1x16x4xf32>
    %21 = vector.shape_cast %20 : vector<1x16x4xf32> to vector<16x4xf32>
    %cst_27 = arith.constant dense<0.000000e+00> : vector<16x32xf32>
    %22 = tpu.matmul %21, %11, %cst_27 {dimension_numbers = #tpu.dot_dimension_numbers<[1], [0], [0], [1], [0, 0, 1, 1], [], []>, precision = #tpu.contract_precision<fp32>} : vector<16x4xf32>, vector<4x32xf32>, vector<16x32xf32> -> vector<16x32xf32>
    %23 = vector.broadcast %12 : vector<1x32xf32> to vector<16x32xf32>
    %24 = arith.addf %22, %23 : vector<16x32xf32>
    %cst_28 = arith.constant dense<0.000000e+00> : vector<16x32xf32>
    %25 = tpu.matmul %8, %19, %cst_28 {dimension_numbers = #tpu.dot_dimension_numbers<[1], [0], [0], [1], [0, 0, 1, 1], [], []>, precision = #tpu.contract_precision<fp32>} : vector<16x16xf32>, vector<16x32xf32>, vector<16x32xf32> -> vector<16x32xf32>
    %26 = arith.subf %19, %25 : vector<16x32xf32>
    %cst_29 = arith.constant dense<0.000000e+00> : vector<16x128xf32>
    %27 = tpu.matmul %26, %0, %cst_29 {dimension_numbers = #tpu.dot_dimension_numbers<[1], [0], [0], [1], [0, 0, 1, 1], [], []>, precision = #tpu.contract_precision<fp32>} : vector<16x32xf32>, vector<32x128xf32>, vector<16x128xf32> -> vector<16x128xf32>
    %cst_30 = arith.constant dense<0.000000e+00> : vector<16x128xf32>
    %28 = tpu.matmul %26, %1, %cst_30 {dimension_numbers = #tpu.dot_dimension_numbers<[1], [0], [0], [1], [0, 0, 1, 1], [], []>, precision = #tpu.contract_precision<fp32>} : vector<16x32xf32>, vector<32x128xf32>, vector<16x128xf32> -> vector<16x128xf32>
    %29 = arith.mulf %27, %27 : vector<16x128xf32>
    %30 = arith.mulf %28, %28 : vector<16x128xf32>
    %31 = arith.addf %29, %30 : vector<16x128xf32>
    %cst_31 = arith.constant dense<0.000000e+00> : vector<16x128xf32>
    %32 = tpu.matmul %31, %2, %cst_31 {dimension_numbers = #tpu.dot_dimension_numbers<[1], [0], [0], [1], [0, 0, 1, 1], [], []>, precision = #tpu.contract_precision<fp32>} : vector<16x128xf32>, vector<128x128xf32>, vector<16x128xf32> -> vector<16x128xf32>
    %cst_32 = arith.constant dense<0xFF800000> : vector<16xf32>
    %33 = vector.multi_reduction <maximumf>, %32, %cst_32 [1] : vector<16x128xf32> to vector<16xf32>
    %34 = vector.shape_cast %33 : vector<16xf32> to vector<16x1xf32>
    %35 = vector.broadcast %34 : vector<16x1xf32> to vector<16x128xf32>
    %36 = arith.subf %32, %35 : vector<16x128xf32>
    %37 = math.exp %36 : vector<16x128xf32>
    %cst_33 = arith.constant dense<0.000000e+00> : vector<16x128xf32>
    %38 = tpu.matmul %37, %4, %cst_33 {dimension_numbers = #tpu.dot_dimension_numbers<[1], [0], [0], [1], [0, 0, 1, 1], [], []>, precision = #tpu.contract_precision<fp32>} : vector<16x128xf32>, vector<128x128xf32>, vector<16x128xf32> -> vector<16x128xf32>
    %39 = arith.divf %37, %38 : vector<16x128xf32>
    %40 = tpu.transpose %26, [1, 0] : vector<16x32xf32> -> vector<32x16xf32>
    %cst_34 = arith.constant dense<0.000000e+00> : vector<32x128xf32>
    %41 = tpu.matmul %40, %39, %cst_34 {dimension_numbers = #tpu.dot_dimension_numbers<[1], [0], [0], [1], [0, 0, 1, 1], [], []>, precision = #tpu.contract_precision<fp32>} : vector<32x16xf32>, vector<16x128xf32>, vector<32x128xf32> -> vector<32x128xf32>
    %42 = arith.mulf %41, %5 : vector<32x128xf32>
    %cst_35 = arith.constant dense<0.000000e+00> : vector<32x32xf32>
    %43 = tpu.matmul %42, %6, %cst_35 {dimension_numbers = #tpu.dot_dimension_numbers<[1], [0], [0], [1], [0, 0, 1, 1], [], []>, precision = #tpu.contract_precision<fp32>} : vector<32x128xf32>, vector<128x32xf32>, vector<32x32xf32> -> vector<32x32xf32>
    %cst_36 = arith.constant dense<0.000000e+00> : vector<16x32xf32>
    %44 = tpu.matmul %7, %43, %cst_36 {dimension_numbers = #tpu.dot_dimension_numbers<[1], [0], [0], [1], [0, 0, 1, 1], [], []>, precision = #tpu.contract_precision<fp32>} : vector<16x32xf32>, vector<32x32xf32>, vector<16x32xf32> -> vector<16x32xf32>
    %cst_37 = arith.constant dense<0.000000e+00> : vector<16x128xf32>
    %45 = tpu.matmul %44, %0, %cst_37 {dimension_numbers = #tpu.dot_dimension_numbers<[1], [0], [0], [1], [0, 0, 1, 1], [], []>, precision = #tpu.contract_precision<fp32>} : vector<16x32xf32>, vector<32x128xf32>, vector<16x128xf32> -> vector<16x128xf32>
    %cst_38 = arith.constant dense<0.000000e+00> : vector<16x128xf32>
    %46 = tpu.matmul %44, %1, %cst_38 {dimension_numbers = #tpu.dot_dimension_numbers<[1], [0], [0], [1], [0, 0, 1, 1], [], []>, precision = #tpu.contract_precision<fp32>} : vector<16x32xf32>, vector<32x128xf32>, vector<16x128xf32> -> vector<16x128xf32>
    %47 = arith.mulf %45, %45 : vector<16x128xf32>
    %48 = arith.mulf %46, %46 : vector<16x128xf32>
    %49 = arith.addf %47, %48 : vector<16x128xf32>
    %cst_39 = arith.constant dense<0.000000e+00> : vector<16x128xf32>
    %50 = tpu.matmul %49, %2, %cst_39 {dimension_numbers = #tpu.dot_dimension_numbers<[1], [0], [0], [1], [0, 0, 1, 1], [], []>, precision = #tpu.contract_precision<fp32>} : vector<16x128xf32>, vector<128x128xf32>, vector<16x128xf32> -> vector<16x128xf32>
    %cst_40 = arith.constant dense<0xFF800000> : vector<16xf32>
    %51 = vector.multi_reduction <maximumf>, %50, %cst_40 [1] : vector<16x128xf32> to vector<16xf32>
    %52 = vector.shape_cast %51 : vector<16xf32> to vector<16x1xf32>
    %53 = vector.broadcast %52 : vector<16x1xf32> to vector<16x128xf32>
    %54 = arith.subf %50, %53 : vector<16x128xf32>
    %55 = math.exp %54 : vector<16x128xf32>
    %cst_41 = arith.constant dense<0.000000e+00> : vector<16x128xf32>
    %56 = tpu.matmul %55, %4, %cst_41 {dimension_numbers = #tpu.dot_dimension_numbers<[1], [0], [0], [1], [0, 0, 1, 1], [], []>, precision = #tpu.contract_precision<fp32>} : vector<16x128xf32>, vector<128x128xf32>, vector<16x128xf32> -> vector<16x128xf32>
    %57 = arith.divf %55, %56 : vector<16x128xf32>
    %58 = tpu.transpose %44, [1, 0] : vector<16x32xf32> -> vector<32x16xf32>
    %cst_42 = arith.constant dense<0.000000e+00> : vector<32x128xf32>
    %59 = tpu.matmul %58, %57, %cst_42 {dimension_numbers = #tpu.dot_dimension_numbers<[1], [0], [0], [1], [0, 0, 1, 1], [], []>, precision = #tpu.contract_precision<fp32>} : vector<32x16xf32>, vector<16x128xf32>, vector<32x128xf32> -> vector<32x128xf32>
    %60 = arith.mulf %59, %5 : vector<32x128xf32>
    %cst_43 = arith.constant dense<0.000000e+00> : vector<32x32xf32>
    %61 = tpu.matmul %60, %6, %cst_43 {dimension_numbers = #tpu.dot_dimension_numbers<[1], [0], [0], [1], [0, 0, 1, 1], [], []>, precision = #tpu.contract_precision<fp32>} : vector<32x128xf32>, vector<128x32xf32>, vector<32x32xf32> -> vector<32x32xf32>
    %cst_44 = arith.constant dense<0.000000e+00> : vector<16x32xf32>
    %62 = tpu.matmul %7, %61, %cst_44 {dimension_numbers = #tpu.dot_dimension_numbers<[1], [0], [0], [1], [0, 0, 1, 1], [], []>, precision = #tpu.contract_precision<fp32>} : vector<16x32xf32>, vector<32x32xf32>, vector<16x32xf32> -> vector<16x32xf32>
    %cst_45 = arith.constant dense<0.000000e+00> : vector<16x32xf32>
    %63 = tpu.matmul %8, %24, %cst_45 {dimension_numbers = #tpu.dot_dimension_numbers<[1], [0], [0], [1], [0, 0, 1, 1], [], []>, precision = #tpu.contract_precision<fp32>} : vector<16x16xf32>, vector<16x32xf32>, vector<16x32xf32> -> vector<16x32xf32>
    %64 = arith.subf %24, %63 : vector<16x32xf32>
    %cst_46 = arith.constant dense<0.000000e+00> : vector<16x128xf32>
    %65 = tpu.matmul %62, %0, %cst_46 {dimension_numbers = #tpu.dot_dimension_numbers<[1], [0], [0], [1], [0, 0, 1, 1], [], []>, precision = #tpu.contract_precision<fp32>} : vector<16x32xf32>, vector<32x128xf32>, vector<16x128xf32> -> vector<16x128xf32>
    %cst_47 = arith.constant dense<0.000000e+00> : vector<16x128xf32>
    %66 = tpu.matmul %62, %1, %cst_47 {dimension_numbers = #tpu.dot_dimension_numbers<[1], [0], [0], [1], [0, 0, 1, 1], [], []>, precision = #tpu.contract_precision<fp32>} : vector<16x32xf32>, vector<32x128xf32>, vector<16x128xf32> -> vector<16x128xf32>
    %cst_48 = arith.constant dense<0.000000e+00> : vector<16x128xf32>
    %67 = tpu.matmul %64, %0, %cst_48 {dimension_numbers = #tpu.dot_dimension_numbers<[1], [0], [0], [1], [0, 0, 1, 1], [], []>, precision = #tpu.contract_precision<fp32>} : vector<16x32xf32>, vector<32x128xf32>, vector<16x128xf32> -> vector<16x128xf32>
    %cst_49 = arith.constant dense<0.000000e+00> : vector<16x128xf32>
    %68 = tpu.matmul %64, %1, %cst_49 {dimension_numbers = #tpu.dot_dimension_numbers<[1], [0], [0], [1], [0, 0, 1, 1], [], []>, precision = #tpu.contract_precision<fp32>} : vector<16x32xf32>, vector<32x128xf32>, vector<16x128xf32> -> vector<16x128xf32>
    %69 = arith.mulf %67, %65 : vector<16x128xf32>
    %70 = arith.mulf %68, %66 : vector<16x128xf32>
    %71 = arith.addf %69, %70 : vector<16x128xf32>
    %cst_50 = arith.constant dense<0.000000e+00> : vector<16x128xf32>
    %72 = tpu.matmul %71, %2, %cst_50 {dimension_numbers = #tpu.dot_dimension_numbers<[1], [0], [0], [1], [0, 0, 1, 1], [], []>, precision = #tpu.contract_precision<fp32>} : vector<16x128xf32>, vector<128x128xf32>, vector<16x128xf32> -> vector<16x128xf32>
    %73 = arith.mulf %68, %65 : vector<16x128xf32>
    %74 = arith.mulf %67, %66 : vector<16x128xf32>
    %75 = arith.subf %73, %74 : vector<16x128xf32>
    %cst_51 = arith.constant dense<0.000000e+00> : vector<16x128xf32>
    %76 = tpu.matmul %75, %3, %cst_51 {dimension_numbers = #tpu.dot_dimension_numbers<[1], [0], [0], [1], [0, 0, 1, 1], [], []>, precision = #tpu.contract_precision<fp32>} : vector<16x128xf32>, vector<128x128xf32>, vector<16x128xf32> -> vector<16x128xf32>
    %77 = arith.addf %72, %76 : vector<16x128xf32>
    %cst_52 = arith.constant dense<0xFF800000> : vector<16xf32>
    %78 = vector.multi_reduction <maximumf>, %77, %cst_52 [1] : vector<16x128xf32> to vector<16xf32>
    %79 = vector.shape_cast %78 : vector<16xf32> to vector<16x1xf32>
    %80 = vector.broadcast %79 : vector<16x1xf32> to vector<16x128xf32>
    %81 = arith.subf %77, %80 : vector<16x128xf32>
    %82 = math.exp %81 : vector<16x128xf32>
    %cst_53 = arith.constant dense<0.000000e+00> : vector<16x128xf32>
    %83 = tpu.matmul %82, %4, %cst_53 {dimension_numbers = #tpu.dot_dimension_numbers<[1], [0], [0], [1], [0, 0, 1, 1], [], []>, precision = #tpu.contract_precision<fp32>} : vector<16x128xf32>, vector<128x128xf32>, vector<16x128xf32> -> vector<16x128xf32>
    %84 = arith.divf %82, %83 : vector<16x128xf32>
    %85 = tpu.transpose %62, [1, 0] : vector<16x32xf32> -> vector<32x16xf32>
    %cst_54 = arith.constant dense<0.000000e+00> : vector<32x128xf32>
    %86 = tpu.matmul %85, %84, %cst_54 {dimension_numbers = #tpu.dot_dimension_numbers<[1], [0], [0], [1], [0, 0, 1, 1], [], []>, precision = #tpu.contract_precision<fp32>} : vector<32x16xf32>, vector<16x128xf32>, vector<32x128xf32> -> vector<32x128xf32>
    %87 = arith.mulf %86, %5 : vector<32x128xf32>
    %cst_55 = arith.constant dense<0.000000e+00> : vector<32x32xf32>
    %88 = tpu.matmul %87, %6, %cst_55 {dimension_numbers = #tpu.dot_dimension_numbers<[1], [0], [0], [1], [0, 0, 1, 1], [], []>, precision = #tpu.contract_precision<fp32>} : vector<32x128xf32>, vector<128x32xf32>, vector<32x32xf32> -> vector<32x32xf32>
    %cst_56 = arith.constant dense<0.000000e+00> : vector<16x32xf32>
    %89 = tpu.matmul %7, %88, %cst_56 {dimension_numbers = #tpu.dot_dimension_numbers<[1], [0], [0], [1], [0, 0, 1, 1], [], []>, precision = #tpu.contract_precision<fp32>} : vector<16x32xf32>, vector<32x32xf32>, vector<16x32xf32> -> vector<16x32xf32>
    %90 = arith.addf %63, %25 : vector<16x32xf32>
    %91 = arith.addf %89, %90 : vector<16x32xf32>
    %cst_57 = arith.constant dense<0.000000e+00> : vector<16x4xf32>
    %92 = tpu.matmul %91, %13, %cst_57 {dimension_numbers = #tpu.dot_dimension_numbers<[1], [0], [0], [1], [0, 0, 1, 1], [], []>, precision = #tpu.contract_precision<fp32>} : vector<16x32xf32>, vector<32x4xf32>, vector<16x4xf32> -> vector<16x4xf32>
    %93 = vector.broadcast %14 : vector<1x4xf32> to vector<16x4xf32>
    %94 = arith.addf %92, %93 : vector<16x4xf32>
    %c0_58 = arith.constant 0 : index
    %c0_59 = arith.constant 0 : index
    %c0_60 = arith.constant 0 : index
    %95 = vector.load %arg10[%c0_58, %c0_59, %c0_60] : memref<2x16x4xf32, #tpu.memory_space<vmem>>, vector<1x16x4xf32>
    %96 = vector.shape_cast %95 : vector<1x16x4xf32> to vector<16x4xf32>
    %97 = vector.shape_cast %94 : vector<16x4xf32> to vector<1x16x4xf32>
    tpu.vector_store %arg10[%c0_58, %c0_59, %c0_60], %97 {strides = array<i32>} : memref<2x16x4xf32, #tpu.memory_space<vmem>>, vector<1x16x4xf32>,
    %c1 = arith.constant 1 : index
    %c0_61 = arith.constant 0 : index
    %c0_62 = arith.constant 0 : index
    %98 = vector.load %arg1[%c1, %c0_61, %c0_62] : memref<2x16x4xf32, #tpu.memory_space<vmem>>, vector<1x16x4xf32>
    %99 = vector.shape_cast %98 : vector<1x16x4xf32> to vector<16x4xf32>
    %cst_63 = arith.constant dense<0.000000e+00> : vector<16x32xf32>
    %100 = tpu.matmul %99, %9, %cst_63 {dimension_numbers = #tpu.dot_dimension_numbers<[1], [0], [0], [1], [0, 0, 1, 1], [], []>, precision = #tpu.contract_precision<fp32>} : vector<16x4xf32>, vector<4x32xf32>, vector<16x32xf32> -> vector<16x32xf32>
    %101 = vector.broadcast %10 : vector<1x32xf32> to vector<16x32xf32>
    %102 = arith.addf %100, %101 : vector<16x32xf32>
    %c1_64 = arith.constant 1 : index
    %c0_65 = arith.constant 0 : index
    %c0_66 = arith.constant 0 : index
    %103 = vector.load %arg2[%c1_64, %c0_65, %c0_66] : memref<2x16x4xf32, #tpu.memory_space<vmem>>, vector<1x16x4xf32>
    %104 = vector.shape_cast %103 : vector<1x16x4xf32> to vector<16x4xf32>
    %cst_67 = arith.constant dense<0.000000e+00> : vector<16x32xf32>
    %105 = tpu.matmul %104, %11, %cst_67 {dimension_numbers = #tpu.dot_dimension_numbers<[1], [0], [0], [1], [0, 0, 1, 1], [], []>, precision = #tpu.contract_precision<fp32>} : vector<16x4xf32>, vector<4x32xf32>, vector<16x32xf32> -> vector<16x32xf32>
    %106 = vector.broadcast %12 : vector<1x32xf32> to vector<16x32xf32>
    %107 = arith.addf %105, %106 : vector<16x32xf32>
    %cst_68 = arith.constant dense<0.000000e+00> : vector<16x32xf32>
    %108 = tpu.matmul %8, %102, %cst_68 {dimension_numbers = #tpu.dot_dimension_numbers<[1], [0], [0], [1], [0, 0, 1, 1], [], []>, precision = #tpu.contract_precision<fp32>} : vector<16x16xf32>, vector<16x32xf32>, vector<16x32xf32> -> vector<16x32xf32>
    %109 = arith.subf %102, %108 : vector<16x32xf32>
    %cst_69 = arith.constant dense<0.000000e+00> : vector<16x128xf32>
    %110 = tpu.matmul %109, %0, %cst_69 {dimension_numbers = #tpu.dot_dimension_numbers<[1], [0], [0], [1], [0, 0, 1, 1], [], []>, precision = #tpu.contract_precision<fp32>} : vector<16x32xf32>, vector<32x128xf32>, vector<16x128xf32> -> vector<16x128xf32>
    %cst_70 = arith.constant dense<0.000000e+00> : vector<16x128xf32>
    %111 = tpu.matmul %109, %1, %cst_70 {dimension_numbers = #tpu.dot_dimension_numbers<[1], [0], [0], [1], [0, 0, 1, 1], [], []>, precision = #tpu.contract_precision<fp32>} : vector<16x32xf32>, vector<32x128xf32>, vector<16x128xf32> -> vector<16x128xf32>
    %112 = arith.mulf %110, %110 : vector<16x128xf32>
    %113 = arith.mulf %111, %111 : vector<16x128xf32>
    %114 = arith.addf %112, %113 : vector<16x128xf32>
    %cst_71 = arith.constant dense<0.000000e+00> : vector<16x128xf32>
    %115 = tpu.matmul %114, %2, %cst_71 {dimension_numbers = #tpu.dot_dimension_numbers<[1], [0], [0], [1], [0, 0, 1, 1], [], []>, precision = #tpu.contract_precision<fp32>} : vector<16x128xf32>, vector<128x128xf32>, vector<16x128xf32> -> vector<16x128xf32>
    %cst_72 = arith.constant dense<0xFF800000> : vector<16xf32>
    %116 = vector.multi_reduction <maximumf>, %115, %cst_72 [1] : vector<16x128xf32> to vector<16xf32>
    %117 = vector.shape_cast %116 : vector<16xf32> to vector<16x1xf32>
    %118 = vector.broadcast %117 : vector<16x1xf32> to vector<16x128xf32>
    %119 = arith.subf %115, %118 : vector<16x128xf32>
    %120 = math.exp %119 : vector<16x128xf32>
    %cst_73 = arith.constant dense<0.000000e+00> : vector<16x128xf32>
    %121 = tpu.matmul %120, %4, %cst_73 {dimension_numbers = #tpu.dot_dimension_numbers<[1], [0], [0], [1], [0, 0, 1, 1], [], []>, precision = #tpu.contract_precision<fp32>} : vector<16x128xf32>, vector<128x128xf32>, vector<16x128xf32> -> vector<16x128xf32>
    %122 = arith.divf %120, %121 : vector<16x128xf32>
    %123 = tpu.transpose %109, [1, 0] : vector<16x32xf32> -> vector<32x16xf32>
    %cst_74 = arith.constant dense<0.000000e+00> : vector<32x128xf32>
    %124 = tpu.matmul %123, %122, %cst_74 {dimension_numbers = #tpu.dot_dimension_numbers<[1], [0], [0], [1], [0, 0, 1, 1], [], []>, precision = #tpu.contract_precision<fp32>} : vector<32x16xf32>, vector<16x128xf32>, vector<32x128xf32> -> vector<32x128xf32>
    %125 = arith.mulf %124, %5 : vector<32x128xf32>
    %cst_75 = arith.constant dense<0.000000e+00> : vector<32x32xf32>
    %126 = tpu.matmul %125, %6, %cst_75 {dimension_numbers = #tpu.dot_dimension_numbers<[1], [0], [0], [1], [0, 0, 1, 1], [], []>, precision = #tpu.contract_precision<fp32>} : vector<32x128xf32>, vector<128x32xf32>, vector<32x32xf32> -> vector<32x32xf32>
    %cst_76 = arith.constant dense<0.000000e+00> : vector<16x32xf32>
    %127 = tpu.matmul %7, %126, %cst_76 {dimension_numbers = #tpu.dot_dimension_numbers<[1], [0], [0], [1], [0, 0, 1, 1], [], []>, precision = #tpu.contract_precision<fp32>} : vector<16x32xf32>, vector<32x32xf32>, vector<16x32xf32> -> vector<16x32xf32>
    %cst_77 = arith.constant dense<0.000000e+00> : vector<16x128xf32>
    %128 = tpu.matmul %127, %0, %cst_77 {dimension_numbers = #tpu.dot_dimension_numbers<[1], [0], [0], [1], [0, 0, 1, 1], [], []>, precision = #tpu.contract_precision<fp32>} : vector<16x32xf32>, vector<32x128xf32>, vector<16x128xf32> -> vector<16x128xf32>
    %cst_78 = arith.constant dense<0.000000e+00> : vector<16x128xf32>
    %129 = tpu.matmul %127, %1, %cst_78 {dimension_numbers = #tpu.dot_dimension_numbers<[1], [0], [0], [1], [0, 0, 1, 1], [], []>, precision = #tpu.contract_precision<fp32>} : vector<16x32xf32>, vector<32x128xf32>, vector<16x128xf32> -> vector<16x128xf32>
    %130 = arith.mulf %128, %128 : vector<16x128xf32>
    %131 = arith.mulf %129, %129 : vector<16x128xf32>
    %132 = arith.addf %130, %131 : vector<16x128xf32>
    %cst_79 = arith.constant dense<0.000000e+00> : vector<16x128xf32>
    %133 = tpu.matmul %132, %2, %cst_79 {dimension_numbers = #tpu.dot_dimension_numbers<[1], [0], [0], [1], [0, 0, 1, 1], [], []>, precision = #tpu.contract_precision<fp32>} : vector<16x128xf32>, vector<128x128xf32>, vector<16x128xf32> -> vector<16x128xf32>
    %cst_80 = arith.constant dense<0xFF800000> : vector<16xf32>
    %134 = vector.multi_reduction <maximumf>, %133, %cst_80 [1] : vector<16x128xf32> to vector<16xf32>
    %135 = vector.shape_cast %134 : vector<16xf32> to vector<16x1xf32>
    %136 = vector.broadcast %135 : vector<16x1xf32> to vector<16x128xf32>
    %137 = arith.subf %133, %136 : vector<16x128xf32>
    %138 = math.exp %137 : vector<16x128xf32>
    %cst_81 = arith.constant dense<0.000000e+00> : vector<16x128xf32>
    %139 = tpu.matmul %138, %4, %cst_81 {dimension_numbers = #tpu.dot_dimension_numbers<[1], [0], [0], [1], [0, 0, 1, 1], [], []>, precision = #tpu.contract_precision<fp32>} : vector<16x128xf32>, vector<128x128xf32>, vector<16x128xf32> -> vector<16x128xf32>
    %140 = arith.divf %138, %139 : vector<16x128xf32>
    %141 = tpu.transpose %127, [1, 0] : vector<16x32xf32> -> vector<32x16xf32>
    %cst_82 = arith.constant dense<0.000000e+00> : vector<32x128xf32>
    %142 = tpu.matmul %141, %140, %cst_82 {dimension_numbers = #tpu.dot_dimension_numbers<[1], [0], [0], [1], [0, 0, 1, 1], [], []>, precision = #tpu.contract_precision<fp32>} : vector<32x16xf32>, vector<16x128xf32>, vector<32x128xf32> -> vector<32x128xf32>
    %143 = arith.mulf %142, %5 : vector<32x128xf32>
    %cst_83 = arith.constant dense<0.000000e+00> : vector<32x32xf32>
    %144 = tpu.matmul %143, %6, %cst_83 {dimension_numbers = #tpu.dot_dimension_numbers<[1], [0], [0], [1], [0, 0, 1, 1], [], []>, precision = #tpu.contract_precision<fp32>} : vector<32x128xf32>, vector<128x32xf32>, vector<32x32xf32> -> vector<32x32xf32>
    %cst_84 = arith.constant dense<0.000000e+00> : vector<16x32xf32>
    %145 = tpu.matmul %7, %144, %cst_84 {dimension_numbers = #tpu.dot_dimension_numbers<[1], [0], [0], [1], [0, 0, 1, 1], [], []>, precision = #tpu.contract_precision<fp32>} : vector<16x32xf32>, vector<32x32xf32>, vector<16x32xf32> -> vector<16x32xf32>
    %cst_85 = arith.constant dense<0.000000e+00> : vector<16x32xf32>
    %146 = tpu.matmul %8, %107, %cst_85 {dimension_numbers = #tpu.dot_dimension_numbers<[1], [0], [0], [1], [0, 0, 1, 1], [], []>, precision = #tpu.contract_precision<fp32>} : vector<16x16xf32>, vector<16x32xf32>, vector<16x32xf32> -> vector<16x32xf32>
    %147 = arith.subf %107, %146 : vector<16x32xf32>
    %cst_86 = arith.constant dense<0.000000e+00> : vector<16x128xf32>
    %148 = tpu.matmul %145, %0, %cst_86 {dimension_numbers = #tpu.dot_dimension_numbers<[1], [0], [0], [1], [0, 0, 1, 1], [], []>, precision = #tpu.contract_precision<fp32>} : vector<16x32xf32>, vector<32x128xf32>, vector<16x128xf32> -> vector<16x128xf32>
    %cst_87 = arith.constant dense<0.000000e+00> : vector<16x128xf32>
    %149 = tpu.matmul %145, %1, %cst_87 {dimension_numbers = #tpu.dot_dimension_numbers<[1], [0], [0], [1], [0, 0, 1, 1], [], []>, precision = #tpu.contract_precision<fp32>} : vector<16x32xf32>, vector<32x128xf32>, vector<16x128xf32> -> vector<16x128xf32>
    %cst_88 = arith.constant dense<0.000000e+00> : vector<16x128xf32>
    %150 = tpu.matmul %147, %0, %cst_88 {dimension_numbers = #tpu.dot_dimension_numbers<[1], [0], [0], [1], [0, 0, 1, 1], [], []>, precision = #tpu.contract_precision<fp32>} : vector<16x32xf32>, vector<32x128xf32>, vector<16x128xf32> -> vector<16x128xf32>
    %cst_89 = arith.constant dense<0.000000e+00> : vector<16x128xf32>
    %151 = tpu.matmul %147, %1, %cst_89 {dimension_numbers = #tpu.dot_dimension_numbers<[1], [0], [0], [1], [0, 0, 1, 1], [], []>, precision = #tpu.contract_precision<fp32>} : vector<16x32xf32>, vector<32x128xf32>, vector<16x128xf32> -> vector<16x128xf32>
    %152 = arith.mulf %150, %148 : vector<16x128xf32>
    %153 = arith.mulf %151, %149 : vector<16x128xf32>
    %154 = arith.addf %152, %153 : vector<16x128xf32>
    %cst_90 = arith.constant dense<0.000000e+00> : vector<16x128xf32>
    %155 = tpu.matmul %154, %2, %cst_90 {dimension_numbers = #tpu.dot_dimension_numbers<[1], [0], [0], [1], [0, 0, 1, 1], [], []>, precision = #tpu.contract_precision<fp32>} : vector<16x128xf32>, vector<128x128xf32>, vector<16x128xf32> -> vector<16x128xf32>
    %156 = arith.mulf %151, %148 : vector<16x128xf32>
    %157 = arith.mulf %150, %149 : vector<16x128xf32>
    %158 = arith.subf %156, %157 : vector<16x128xf32>
    %cst_91 = arith.constant dense<0.000000e+00> : vector<16x128xf32>
    %159 = tpu.matmul %158, %3, %cst_91 {dimension_numbers = #tpu.dot_dimension_numbers<[1], [0], [0], [1], [0, 0, 1, 1], [], []>, precision = #tpu.contract_precision<fp32>} : vector<16x128xf32>, vector<128x128xf32>, vector<16x128xf32> -> vector<16x128xf32>
    %160 = arith.addf %155, %159 : vector<16x128xf32>
    %cst_92 = arith.constant dense<0xFF800000> : vector<16xf32>
    %161 = vector.multi_reduction <maximumf>, %160, %cst_92 [1] : vector<16x128xf32> to vector<16xf32>
    %162 = vector.shape_cast %161 : vector<16xf32> to vector<16x1xf32>
    %163 = vector.broadcast %162 : vector<16x1xf32> to vector<16x128xf32>
    %164 = arith.subf %160, %163 : vector<16x128xf32>
    %165 = math.exp %164 : vector<16x128xf32>
    %cst_93 = arith.constant dense<0.000000e+00> : vector<16x128xf32>
    %166 = tpu.matmul %165, %4, %cst_93 {dimension_numbers = #tpu.dot_dimension_numbers<[1], [0], [0], [1], [0, 0, 1, 1], [], []>, precision = #tpu.contract_precision<fp32>} : vector<16x128xf32>, vector<128x128xf32>, vector<16x128xf32> -> vector<16x128xf32>
    %167 = arith.divf %165, %166 : vector<16x128xf32>
    %168 = tpu.transpose %145, [1, 0] : vector<16x32xf32> -> vector<32x16xf32>
    %cst_94 = arith.constant dense<0.000000e+00> : vector<32x128xf32>
    %169 = tpu.matmul %168, %167, %cst_94 {dimension_numbers = #tpu.dot_dimension_numbers<[1], [0], [0], [1], [0, 0, 1, 1], [], []>, precision = #tpu.contract_precision<fp32>} : vector<32x16xf32>, vector<16x128xf32>, vector<32x128xf32> -> vector<32x128xf32>
    %170 = arith.mulf %169, %5 : vector<32x128xf32>
    %cst_95 = arith.constant dense<0.000000e+00> : vector<32x32xf32>
    %171 = tpu.matmul %170, %6, %cst_95 {dimension_numbers = #tpu.dot_dimension_numbers<[1], [0], [0], [1], [0, 0, 1, 1], [], []>, precision = #tpu.contract_precision<fp32>} : vector<32x128xf32>, vector<128x32xf32>, vector<32x32xf32> -> vector<32x32xf32>
    %cst_96 = arith.constant dense<0.000000e+00> : vector<16x32xf32>
    %172 = tpu.matmul %7, %171, %cst_96 {dimension_numbers = #tpu.dot_dimension_numbers<[1], [0], [0], [1], [0, 0, 1, 1], [], []>, precision = #tpu.contract_precision<fp32>} : vector<16x32xf32>, vector<32x32xf32>, vector<16x32xf32> -> vector<16x32xf32>
    %173 = arith.addf %146, %108 : vector<16x32xf32>
    %174 = arith.addf %172, %173 : vector<16x32xf32>
    %cst_97 = arith.constant dense<0.000000e+00> : vector<16x4xf32>
    %175 = tpu.matmul %174, %13, %cst_97 {dimension_numbers = #tpu.dot_dimension_numbers<[1], [0], [0], [1], [0, 0, 1, 1], [], []>, precision = #tpu.contract_precision<fp32>} : vector<16x32xf32>, vector<32x4xf32>, vector<16x4xf32> -> vector<16x4xf32>
    %176 = vector.broadcast %14 : vector<1x4xf32> to vector<16x4xf32>
    %177 = arith.addf %175, %176 : vector<16x4xf32>
    %c1_98 = arith.constant 1 : index
    %c0_99 = arith.constant 0 : index
    %c0_100 = arith.constant 0 : index
    %178 = vector.load %arg10[%c1_98, %c0_99, %c0_100] : memref<2x16x4xf32, #tpu.memory_space<vmem>>, vector<1x16x4xf32>
    %179 = vector.shape_cast %178 : vector<1x16x4xf32> to vector<16x4xf32>
    %180 = vector.shape_cast %177 : vector<16x4xf32> to vector<1x16x4xf32>
    tpu.vector_store %arg10[%c1_98, %c0_99, %c0_100], %180 {strides = array<i32>} : memref<2x16x4xf32, #tpu.memory_space<vmem>>, vector<1x16x4xf32>,
    return
  }
  func.func @transform_0(%arg0: i32) -> (i32, i32, i32) {
    %c0_i32 = arith.constant 0 : i32
    %c0_i32_0 = arith.constant 0 : i32
    %c0_i32_1 = arith.constant 0 : i32
    %c0_i32_2 = arith.constant 0 : i32
    return %c0_i32, %c0_i32_0, %c0_i32_1 : i32, i32, i32
  }
  func.func @transform_1(%arg0: i32) -> (i32, i32, i32) {
    %c0_i32 = arith.constant 0 : i32
    %c0_i32_0 = arith.constant 0 : i32
    %c0_i32_1 = arith.constant 0 : i32
    %c0_i32_2 = arith.constant 0 : i32
    return %c0_i32, %c0_i32_0, %c0_i32_1 : i32, i32, i32
  }
  func.func @transform_2(%arg0: i32) -> (i32, i32) {
    %c0_i32 = arith.constant 0 : i32
    %c0_i32_0 = arith.constant 0 : i32
    %c0_i32_1 = arith.constant 0 : i32
    return %c0_i32, %c0_i32_0 : i32, i32
  }
  func.func @transform_3(%arg0: i32) -> (i32, i32) {
    %c0_i32 = arith.constant 0 : i32
    %c0_i32_0 = arith.constant 0 : i32
    %c0_i32_1 = arith.constant 0 : i32
    return %c0_i32, %c0_i32_0 : i32, i32
  }
  func.func @transform_4(%arg0: i32) -> (i32, i32) {
    %c0_i32 = arith.constant 0 : i32
    %c0_i32_0 = arith.constant 0 : i32
    %c0_i32_1 = arith.constant 0 : i32
    return %c0_i32, %c0_i32_0 : i32, i32
  }
  func.func @transform_5(%arg0: i32) -> (i32, i32) {
    %c0_i32 = arith.constant 0 : i32
    %c0_i32_0 = arith.constant 0 : i32
    %c0_i32_1 = arith.constant 0 : i32
    return %c0_i32, %c0_i32_0 : i32, i32
  }
  func.func @transform_6(%arg0: i32) -> (i32, i32) {
    %c0_i32 = arith.constant 0 : i32
    %c0_i32_0 = arith.constant 0 : i32
    %c0_i32_1 = arith.constant 0 : i32
    return %c0_i32, %c0_i32_0 : i32, i32
  }
  func.func @transform_7(%arg0: i32) -> (i32, i32) {
    %c0_i32 = arith.constant 0 : i32
    %c0_i32_0 = arith.constant 0 : i32
    %c0_i32_1 = arith.constant 0 : i32
    return %c0_i32, %c0_i32_0 : i32, i32
  }
  func.func @transform_8(%arg0: i32) -> (i32, i32) {
    %c0_i32 = arith.constant 0 : i32
    %c0_i32_0 = arith.constant 0 : i32
    %c0_i32_1 = arith.constant 0 : i32
    return %c0_i32, %c0_i32_0 : i32, i32
  }
  func.func @transform_9(%arg0: i32) -> (i32, i32, i32) {
    %c0_i32 = arith.constant 0 : i32
    %c0_i32_0 = arith.constant 0 : i32
    %c0_i32_1 = arith.constant 0 : i32
    %c0_i32_2 = arith.constant 0 : i32
    return %c0_i32, %c0_i32_0, %c0_i32_1 : i32, i32, i32
  }
}

</mosaic_0001>

<bundles_post_ra>
// kernel: model_forward.1
= control target key start
LH: loop header
LB: loop body
LE: loop exit
PB: predicated region body
PF: predicated region fallthrough
CT: control target
= control target key end

     0   :  { %14 = vsyncpa [#allocation3], 0  ;;  %s51151_s30 = smov [#allocation2]   ;;  %s56265_s0 = inlined_call_operand.vmem [shape: f32[2,16,4], index: 0, kind: input, shape index: {}]   ;;  %s56266_s1 = inlined_call_operand.vmem [shape: f32[2,16,4], index: 1, kind: input, shape index: {}]   ;;  %s56267_s2 = inlined_call_operand.vmem [shape: f32[4,32], index: 2, kind: input, shape index: {}]   ;;  %s56268_s3 = inlined_call_operand.vmem [shape: f32[1,32], index: 3, kind: input, shape index: {}]   ;;  %s56269_s4 = inlined_call_operand.vmem [shape: f32[4,32], index: 4, kind: input, shape index: {}]   ;;  %s56270_s5 = inlined_call_operand.vmem [shape: f32[1,32], index: 5, kind: input, shape index: {}]   ;;  %s56271_s6 = inlined_call_operand.vmem [shape: f32[32,4], index: 6, kind: input, shape index: {}]   ;;  %s56272_s7 = inlined_call_operand.vmem [shape: f32[1,4], index: 7, kind: input, shape index: {}]   ;;  %s56273_s8 = inlined_call_operand.hbm [shape: f32[640,128], index: 8, kind: input, shape index: {}]   ;;  %s56274_s9 = inlined_call_operand.vmem [shape: f32[2,16,4], index: 9, kind: output, shape index: {}]  }
   0x1   :  { %s36_s10 = sshll.u32 %s51151_s30, 4  ;;  %s51127_s13 = scalar_lea.hbm %s56273_s8, 10240  ;;  %s37_s10 = int_to_ptr.vmem [resolvable:$true] %s36_s10 }
   0x2   :  { %p51128_p0 = scmp.ne.s32.totalorder %s56273_s8, %s51127_s13  ;;  %p51131_p1 = scmp.lt.u32.totalorder %s51127_s13, %s56273_s8 }
   0x4   :  { %p51133_p2 = pnand %p51131_p1, %p51128_p0 }
   0x6   :  { %51136 = shalt.err (!%p51133_p2)
}
   0x7   :  { %s51137_s18 = scalar_lea.vmem %s37_s10, 10240  ;;  %p51142_p4 = scmp.lt.s32.totalorder %s37_s10, %s37_s10 }
   0x8   :  { %p51138_p3 = scmp.ne.s32.totalorder %s37_s10, %s51137_s18  ;;  %p51143_p5 = scmp.lt.s32.totalorder %s51137_s18, %s51137_s18 }
   0xa   :  { %p51144_p6 = por %p51143_p5, %p51142_p4 }
   0xc   :  { %p51145_p7 = pnand %p51144_p6, %p51138_p3 }
   0xe   :  { %51148 = shalt.err (!%p51145_p7)
}
   0xf   :  { %s51152_s19 = smov 128   ;;  %s51153_s20 = smov 8  }
  0x10   :  { %42 = dma.hbm_to_vmem [thread:$0]  %s56273_s8, 10240, %s37_s10, [#allocation3], %s51152_s19, %s51152_s19, %s51153_s20  }
  0x11   :  { %51149 = dma.done.wait [#allocation3], 10240  }
  0x12   :  { %51150 = vsyncadd [#allocation3], 4294957056  ;;  %vm150_vm0 = vcmask 1043456   ;;  %vm143_vm1 = vcmask 31744   ;;  %v126_v0 = vld [vmem:[%s56267_s2] sm:$0xf] }
  0x13   :  { %v135_v1 = vld [vmem:[%s56265_s0] sm:$0xff]  ;;  %v136_v2 = vld [vmem:[%s56265_s0 + $0x8] sm:$0xff]  ;;  %v152_v3 = vsel %vm150_vm0, %v126_v0, 0  ;;  %v124_v21 = vld [vmem:[#allocation2 + $0x270] sm:$0xff]  ;;  %vm1149_vm2 = vcmask 130048   ;;  %vm1660_vm3 = vcmask 261120  }
  0x14   :  { %v145_v4 = vsel %vm143_vm1, %v135_v1, 0  ;;  %v148_v5 = vsel %vm143_vm1, %v136_v2, 0  ;;  %v51228_v6 = vand.u32 4294901760, %v152_v3  ;;  %v1151_v22 = vsel %vm1149_vm2, %v124_v21, 0  ;;  %v128_v28 = vld [vmem:[%s56269_s4] sm:$0xf] }
  0x15   :  { %v220_v7 = vand.u32 4294901760, %v145_v4  ;;  %v230_v8 = vand.u32 4294901760, %v148_v5  ;;  %v51253_v23 = vand.u32 4294901760, %v1151_v22  ;;  %v643_v29 = vld [vmem:[%s56266_s1] sm:$0xff]  ;;  %v644_v30 = vld [vmem:[%s56266_s1 + $0x8] sm:$0xff]  ;;  %v658_v31 = vsel %vm150_vm0, %v128_v28, 0 }
  0x16   :  { %57048 = vst [vmem:[#allocation5_spill] sm:$0xff] %v51228_v6  ;;  %38560 = vmatprep.subr.mxu0 %v51228_v6  ;;  %v51232_v11 = vsub.f32 %v152_v3, %v51228_v6  ;;  %v652_v32 = vsel %vm143_vm1, %v643_v29, 0  ;;  %v655_v33 = vsel %vm143_vm1, %v644_v30, 0  ;;  %v51278_v34 = vand.u32 4294901760, %v658_v31  ;;  %v125_v49 = vld [vmem:[#allocation2 + $0x278] sm:$0xff]  ;;  %v52_v21 = vld [vmem:[#allocation2 + $0x30] sm:$0xff] }
  0x17   :  { %v221_v9 = vsub.f32 %v145_v4, %v220_v7  ;;  %v231_v10 = vsub.f32 %v148_v5, %v230_v8  ;;  %38561 = vmatpush3.msra.mxu0 %v51228_v6  ;;  %57052 = vst [vmem:[#allocation9_spill] sm:$0xff] %v51253_v23  ;;  %v51256_v24 = vsub.f32 %v1151_v22, %v51253_v23  ;;  %v726_v35 = vand.u32 4294901760, %v652_v32  ;;  %v35071_v53 = vld [vmem:[%s56268_s3] ss:$0 sm:$0xff]  ;;  %v53_v22 = vld [vmem:[#allocation2 + $0x38] sm:$0xff] }
  0x18   :  { %57049 = vst [vmem:[#allocation6_spill] sm:$0xff] %v51232_v11  ;;  %v51236_v14 = vand.u32 4294901760, %v51232_v11  ;;  %57056 = vst [vmem:[#allocation13_spill] sm:$0xff] %v51278_v34  ;;  %v736_v36 = vand.u32 4294901760, %v655_v33  ;;  %38590 = vmatprep.subr.mxu1 %v51278_v34  ;;  %v51282_v39 = vsub.f32 %v658_v31, %v51278_v34  ;;  %v1154_v50 = vsel %vm1149_vm2, %v125_v49, 0 }
  0x19   :  { %v222_v12 = vand.u32 4294901760, %v221_v9  ;;  %v232_v13 = vand.u32 4294901760, %v231_v10  ;;  %57053 = vst [vmem:[#allocation10_spill] sm:$0xff] %v51256_v24  ;;  %v51259_v25 = vand.u32 4294901760, %v51256_v24  ;;  %v727_v37 = vsub.f32 %v652_v32, %v726_v35  ;;  %38591 = vmatpush3.msra.mxu1 %v51278_v34 }
  0x1a   :  { %57050 = vst [vmem:[#allocation7_spill] sm:$0xff] %v51236_v14  ;;  %v244_v17 = vsub.f32 %v51232_v11, %v51236_v14  ;;  %v737_v38 = vsub.f32 %v655_v33, %v736_v36  ;;  %57057 = vst [vmem:[#allocation14_spill] sm:$0xff] %v51282_v39  ;;  %v51286_v42 = vand.u32 4294901760, %v51282_v39  ;;  %v51303_v51 = vand.u32 4294901760, %v1154_v50 }
  0x1b   :  { %v223_v15 = vsub.f32 %v221_v9, %v222_v12  ;;  %v233_v16 = vsub.f32 %v231_v10, %v232_v13  ;;  %57054 = vst [vmem:[#allocation11_spill] sm:$0xff] %v51259_v25  ;;  %v1226_v26 = vsub.f32 %v51256_v24, %v51259_v25  ;;  %v728_v40 = vand.u32 4294901760, %v727_v37 }
  0x1c   :  { %v51240_v20 = vand.u32 4294901760, %v244_v17  ;;  %v738_v41 = vand.u32 4294901760, %v737_v38  ;;  %57058 = vst [vmem:[#allocation15_spill] sm:$0xff] %v51286_v42  ;;  %v750_v45 = vsub.f32 %v51282_v39, %v51286_v42  ;;  %57060 = vst [vmem:[#allocation17_spill] sm:$0xff] %v51303_v51  ;;  %v51306_v52 = vsub.f32 %v1154_v50, %v51303_v51  ;;  %v46_v50 = vld [vmem:[#allocation2] sm:$0xff] }
  0x1d   :  { %v224_v18 = vand.u32 4294901760, %v223_v15  ;;  %v234_v19 = vand.u32 4294901760, %v233_v16  ;;  %v51263_v27 = vand.u32 4294901760, %v1226_v26  ;;  %v729_v43 = vsub.f32 %v727_v37, %v728_v40  ;;  %v51_v15 = vld [vmem:[#allocation2 + $0x28] sm:$0xff] }
  0x1e   :  { %57051 = vst [vmem:[#allocation8_spill] sm:$0xff] %v51240_v20  ;;  %38565 = vmatprep.subr.mxu0 %v51240_v20  ;;  %v739_v44 = vsub.f32 %v737_v38, %v738_v41  ;;  %v51290_v48 = vand.u32 4294901760, %v750_v45  ;;  %57061 = vst [vmem:[#allocation18_spill] sm:$0xff] %v51306_v52  ;;  %v51312_v55 = vand.u32 4294901760, %v51306_v52  ;;  %v2199_v17 = vand.u32 4294901760, %v51_v15 }
  0x1f   :  { %38562 = vmatprep.mubr.f32.mxu0 %v224_v18  ;;  %57055 = vst [vmem:[#allocation12_spill] sm:$0xff] %v51263_v27  ;;  %v730_v46 = vand.u32 4294901760, %v729_v43  ;;  %v2202_v29 = vand.u32 4294901760, %v52_v21  ;;  %v2205_v30 = vand.u32 4294901760, %v53_v22 }
  0x20   :  { %38563 = vmatmul.mubr.f32.vlgmr.msra.gmra.mrb[0].mxu0 %v234_v19  ;;  %v740_v47 = vand.u32 4294901760, %v739_v44  ;;  %57059 = vst [vmem:[#allocation16_spill] sm:$0xff] %v51290_v48  ;;  %38595 = vmatprep.subr.mxu1 %v51290_v48  ;;  %57062 = vst [vmem:[#allocation19_spill] sm:$0xff] %v51312_v55  ;;  %v1236_v61 = vsub.f32 %v51306_v52, %v51312_v55  ;;  %v51339_v19 = vsub.f32 %v51_v15, %v2199_v17 }
  0x21   :  { %38566 = vmatpush3.msra.mxu0 %v51240_v20  ;;  %38567 = vmatprep.mubr.f32.mxu0 %v220_v7  ;;  %v2300_v33 = vsub.f32 %v52_v21, %v2202_v29 }
  0x22   :  { %38570 = vmatprep.subr.mxu0 %v51232_v11  ;;  %38592 = vmatprep.mubr.f32.mxu1 %v730_v46  ;;  %v51324_v2 = vand.u32 4294901760, %v1236_v61  ;;  %v2294_v28 = vand.u32 4294901760, %v51339_v19 }
  0x23   :  { %38593 = vmatmul.mubr.f32.vlgmr.msra.gmra.mrb[0].mxu1 %v740_v47 }
  0x24   :  { %38596 = vmatpush3.msra.mxu1 %v51290_v48  ;;  %38597 = vmatprep.mubr.f32.mxu1 %v726_v35  ;;  %57063 = vst [vmem:[#allocation20_spill] sm:$0xff] %v51324_v2  ;;  %v2295_v32 = vsub.f32 %v51339_v19, %v2294_v28 }
  0x25   :  { %38600 = vmatprep.subr.mxu1 %v51282_v39 }
  0x28   :  { %38568 = vmatmul.mubr.f32.vlgmr.msra.gmra.mrb[0].mxu0 %v230_v8 }
  0x29   :  { %38571 = vmatpush3.msra.mxu0 %v51232_v11  ;;  %38572 = vmatprep.mubr.f32.mxu0 %v221_v9 }
  0x2a   :  { %38575 = vmatprep.subr.mxu0 %v51228_v6 }
  0x2b   :  { %38598 = vmatmul.mubr.f32.vlgmr.msra.gmra.mrb[0].mxu1 %v736_v36 }
  0x2c   :  { %38601 = vmatpush3.msra.mxu1 %v51282_v39  ;;  %38602 = vmatprep.mubr.f32.mxu1 %v727_v37  ;;  %v2296_v37 = vand.u32 4294901760, %v2295_v32 }
  0x2d   :  { %38605 = vmatprep.subr.mxu1 %v51278_v34 }
  0x30   :  { %38573 = vmatmul.mubr.f32.vlgmr.msra.gmra.mrb[0].mxu0 %v231_v10 }
  0x31   :  { %38576 = vmatpush3.msra.mxu0 %v51228_v6  ;;  %38577 = vmatprep.mubr.f32.mxu0 %v222_v12 }
  0x32   :  { %38580 = vmatprep.subr.mxu0 %v51236_v14 }
  0x33   :  { %38603 = vmatmul.mubr.f32.vlgmr.msra.gmra.mrb[0].mxu1 %v737_v38  ;;  %v2301_v38 = vand.u32 4294901760, %v2300_v33 }
  0x34   :  { %38606 = vmatpush3.msra.mxu1 %v51278_v34  ;;  %38607 = vmatprep.mubr.f32.mxu1 %v728_v40 }
  0x35   :  { %38610 = vmatprep.subr.mxu1 %v51286_v42  ;;  %v2302_v43 = vsub.f32 %v2300_v33, %v2301_v38 }
  0x37   :  { %v2303_v46 = vand.u32 4294901760, %v2302_v43 }
  0x38   :  { %38578 = vmatmul.mubr.f32.vlgmr.msra.gmra.mrb[0].mxu0 %v232_v13  ;;  %v50_v13 = vld [vmem:[#allocation2 + $0x20] sm:$0xff] }
  0x39   :  { %38581 = vmatpush3.msra.mxu0 %v51236_v14  ;;  %38582 = vmatprep.mubr.f32.mxu0 %v220_v7  ;;  %v2196_v16 = vand.u32 4294901760, %v50_v13 }
  0x3a   :  { %38585 = vmatprep.subr.mxu0 %v51228_v6 }
  0x3b   :  { %38608 = vmatmul.mubr.f32.vlgmr.msra.gmra.mrb[0].mxu1 %v738_v41  ;;  %v51337_v18 = vsub.f32 %v50_v13, %v2196_v16  ;;  %v51347_v45 = vpack.c.bf16 %v2199_v17, %v2196_v16 }
  0x3c   :  { %38611 = vmatpush3.msra.mxu1 %v51286_v42  ;;  %38612 = vmatprep.mubr.f32.mxu1 %v726_v35 }
  0x3d   :  { %38615 = vmatprep.subr.mxu1 %v51278_v34  ;;  %v2287_v26 = vand.u32 4294901760, %v51337_v18  ;;  %57065 = vst [vmem:[#allocation22_spill] sm:$0xff] %v51347_v45 }
  0x3f   :  { %v2288_v31 = vsub.f32 %v51337_v18, %v2287_v26 }
  0x40   :  { %38583 = vmatmul.mubr.f32.vlgmr.msra.gmra.mrb[0].mxu0 %v230_v8 }
  0x41   :  { %38586 = vmatpush3.msra.mxu0 %v51228_v6  ;;  %38587 = vmatprep.mubr.f32.mxu0 %v220_v7 }
  0x43   :  { %38613 = vmatmul.mubr.f32.vlgmr.msra.gmra.mrb[0].mxu1 %v736_v36 }
  0x44   :  { %38616 = vmatpush3.msra.mxu1 %v51278_v34  ;;  %38617 = vmatprep.mubr.f32.mxu1 %v726_v35  ;;  %v2307_v35 = vsub.f32 %v53_v22, %v2205_v30 }
  0x46   :  { %v2308_v40 = vand.u32 4294901760, %v2307_v35 }
  0x48   :  { %38588 = vmatmul.mubr.f32.vlgmr.msra.gmra.mrb[0].mxu0 %v230_v8  ;;  %v2309_v44 = vsub.f32 %v2307_v35, %v2308_v40 }
  0x49   :  { %38624 = vmatprep.mubr.f32.mxu0 %v51263_v27 }
  0x4a   :  { %v2310_v47 = vand.u32 4294901760, %v2309_v44 }
  0x4b   :  { %38618 = vmatmul.mubr.f32.vlgmr.msra.gmra.mrb[0].mxu1 %v736_v36  ;;  %v2289_v36 = vand.u32 4294901760, %v2288_v31 }
  0x4c   :  { %v51351_v49 = vpack.c.bf16 %v2310_v47, %v2303_v46 }
  0x4d   :  { %v51345_v41 = vpack.c.bf16 %v2296_v37, %v2289_v36  ;;  %v51383_v37 = vpack.c.bf16 %v2308_v40, %v2301_v38 }
  0x4e   :  { %57066 = vst [vmem:[#allocation23_spill] sm:$0xff] %v51351_v49 }
  0x4f   :  { %57064 = vst [vmem:[#allocation21_spill] sm:$0xff] %v51345_v41  ;;  %57077 = vst [vmem:[#allocation34_spill] sm:$0xff] %v51383_v37 }
 0x11b   :  { %v38589_v54 = vpop.f32.mrb[0].mxu0 }
 0x11c   :  { %v51314_v56 = vadd.f32 %v38589_v54, %v35071_v53  ;;  %v633_v57 = vpop.f32.mrb[1].mxu0  ;;  %v1668_v54 = vand.u32 4294901760, %v46_v50 }
 0x11d   :  { %v51316_v58 = vadd.f32 %v35071_v53, %v633_v57  ;;  %v47_v53 = vld [vmem:[#allocation2 + $0x8] sm:$0xff] }
 0x11e   :  { %v1160_v59 = vand.u32 4294901760, %v51314_v56  ;;  %v1671_v57 = vand.u32 4294901760, %v47_v53  ;;  %v51389_v46 = vpop.f32.mrb[0].mxu1 }
 0x11f   :  { %v1157_v60 = vand.u32 4294901760, %v51316_v58  ;;  %57080 = vst [vmem:[#allocation37_spill] sm:$0xff] %v51389_v46  ;;  %v51391_v47 = vpop.f32.mrb[1].mxu1 }
 0x120   :  { %v1252_v62 = vsub.f32 %v51314_v56, %v1160_v59  ;;  %v1765_v61 = vsub.f32 %v47_v53, %v1671_v57  ;;  %57081 = vst [vmem:[#allocation38_spill] sm:$0xff] %v51391_v47 }
 0x121   :  { %v45100_v63 = vpack.c.bf16 %v1160_v59, %v1157_v60  ;;  %v1245_v0 = vsub.f32 %v51316_v58, %v1157_v60  ;;  %v51355_v59 = vpack.c.bf16 %v1671_v57, %v1668_v54  ;;  %v1758_v60 = vsub.f32 %v46_v50, %v1668_v54 }
 0x122   :  { %v1253_v1 = vand.u32 4294901760, %v1252_v62 }
 0x123   :  { %45101 = vmatprep.subr.bf16.mxu0 %v45100_v63  ;;  %v1246_v3 = vand.u32 4294901760, %v1245_v0  ;;  %v45108_v10 = vpack.c.bf16 %v1252_v62, %v1245_v0  ;;  %57067 = vst [vmem:[#allocation24_spill] sm:$0xff] %v51355_v59  ;;  %45125 = vmatprep.subr.bf16.mxu1 %v51355_v59 }
 0x124   :  { %45103 = vmatpush3.bf16.msra.mxu0 %v45100_v63  ;;  %v1254_v4 = vsub.f32 %v1252_v62, %v1253_v1  ;;  %v51357_v62 = vpack.c.bf16 %v2205_v30, %v2202_v29  ;;  %45127 = vmatpush3.bf16.msra.mxu1 %v51355_v59 }
 0x125   :  { %v1247_v5 = vsub.f32 %v1245_v0, %v1246_v3  ;;  %v45116_v12 = vpack.c.bf16 %v1253_v1, %v1246_v3  ;;  %v48_v0 = vld [vmem:[#allocation2 + $0x10] sm:$0xff]  ;;  %v49_v1 = vld [vmem:[#allocation2 + $0x18] sm:$0xff] }
 0x126   :  { %v1255_v7 = vand.u32 4294901760, %v1254_v4  ;;  %57068 = vst [vmem:[#allocation25_spill] sm:$0xff] %v51357_v62  ;;  %v1674_v3 = vand.u32 4294901760, %v48_v0  ;;  %v1677_v4 = vand.u32 4294901760, %v49_v1 }
 0x127   :  { %38625 = vmatmul.mubr.f32.vlgmr.msra.gmra.mrb[2].mxu0 %v51324_v2  ;;  %v1248_v8 = vand.u32 4294901760, %v1247_v5  ;;  %v1759_v5 = vand.u32 4294901760, %v1758_v60 }
 0x128   :  { %38631 = vmatprep.mubr.f32.mxu0 %v51253_v23  ;;  %v1772_v13 = vsub.f32 %v48_v0, %v1674_v3  ;;  %v1779_v15 = vsub.f32 %v49_v1, %v1677_v4 }
 0x129   :  { %v45104_v9 = vpack.c.bf16 %v1255_v7, %v1248_v8  ;;  %v1766_v7 = vand.u32 4294901760, %v1765_v61  ;;  %v51366_v8 = vpack.c.bf16 %v2307_v35, %v2300_v33  ;;  %v51377_v33 = vpack.c.bf16 %v1765_v61, %v1758_v60 }
 0x12a   :  { %v51379_v35 = vpack.c.bf16 %v2294_v28, %v2287_v26  ;;  %v51381_v36 = vpack.c.bf16 %v1779_v15, %v1772_v13 }
 0x12b   :  { %45105 = vmatprep.subr.bf16.mxu0 %v45104_v9  ;;  %57070 = vst [vmem:[#allocation27_spill] sm:$0xff] %v51366_v8  ;;  %57074 = vst [vmem:[#allocation31_spill] sm:$0xff] %v51377_v33  ;;  %v51385_v43 = vpack.c.bf16 %v1766_v7, %v1759_v5 }
 0x12c   :  { %45107 = vmatpush3.bf16.msra.mxu0 %v45104_v9  ;;  %v51368_v9 = vpack.c.bf16 %v1677_v4, %v1674_v3  ;;  %57075 = vst [vmem:[#allocation32_spill] sm:$0xff] %v51379_v35  ;;  %57076 = vst [vmem:[#allocation33_spill] sm:$0xff] %v51381_v36 }
 0x12d   :  { %45109 = vmatprep.subr.bf16.mxu0 %v45108_v10  ;;  %57078 = vst [vmem:[#allocation35_spill] sm:$0xff] %v51385_v43 }
 0x12e   :  { %57071 = vst [vmem:[#allocation28_spill] sm:$0xff] %v51368_v9  ;;  %45129 = vmatprep.subr.bf16.mxu1 %v51368_v9 }
 0x12f   :  { %38632 = vmatmul.mubr.f32.vlgmr.msra.gmra.mrb[2].mxu0 %v51303_v51  ;;  %45131 = vmatpush3.bf16.msra.mxu1 %v51368_v9 }
 0x130   :  { %45111 = vmatpush3.bf16.msra.mxu0 %v45108_v10  ;;  %38638 = vmatprep.mubr.f32.mxu0 %v51256_v24  ;;  %v1760_v10 = vsub.f32 %v1758_v60, %v1759_v5  ;;  %v54_v5 = vld [vmem:[#allocation2 + $0x40] sm:$0xff] }
 0x131   :  { %45113 = vmatprep.subr.bf16.mxu0 %v45100_v63 }
 0x132   :  { %v1761_v16 = vand.u32 4294901760, %v1760_v10  ;;  %v2730_v10 = vand.u32 4294901760, %v54_v5 }
 0x137   :  { %38639 = vmatmul.mubr.f32.vlgmr.msra.gmra.mrb[2].mxu0 %v51306_v52 }
 0x138   :  { %45115 = vmatpush3.bf16.msra.mxu0 %v45100_v63  ;;  %38645 = vmatprep.mubr.f32.mxu0 %v51259_v25 }
 0x139   :  { %45117 = vmatprep.subr.bf16.mxu0 %v45116_v12 }
 0x13f   :  { %38646 = vmatmul.mubr.f32.vlgmr.msra.gmra.mrb[2].mxu0 %v51312_v55  ;;  %v69_v55 = vld [vmem:[#allocation2 + $0xb8] sm:$0xff] }
 0x140   :  { %45119 = vmatpush3.bf16.msra.mxu0 %v45116_v12  ;;  %38652 = vmatprep.mubr.f32.mxu0 %v51253_v23  ;;  %v1767_v12 = vsub.f32 %v1765_v61, %v1766_v7  ;;  %v55_v7 = vld [vmem:[#allocation2 + $0x48] sm:$0xff] }
 0x141   :  { %45121 = vmatprep.subr.bf16.mxu0 %v45100_v63 }
 0x142   :  { %v1768_v17 = vand.u32 4294901760, %v1767_v12  ;;  %v2733_v12 = vand.u32 4294901760, %v55_v7 }
 0x144   :  { %v51372_v21 = vpack.c.bf16 %v1768_v17, %v1761_v16  ;;  %v56_v16 = vld [vmem:[#allocation2 + $0x50] sm:$0xff]  ;;  %v57_v17 = vld [vmem:[#allocation2 + $0x58] sm:$0xff] }
 0x146   :  { %57072 = vst [vmem:[#allocation29_spill] sm:$0xff] %v51372_v21  ;;  %45133 = vmatprep.subr.bf16.mxu1 %v51372_v21 }
 0x147   :  { %38653 = vmatmul.mubr.f32.vlgmr.msra.gmra.mrb[2].mxu0 %v51303_v51 }
 0x148   :  { %45123 = vmatpush3.bf16.msra.mxu0 %v45100_v63  ;;  %38659 = vmatprep.mubr.f32.mxu0 %v51253_v23  ;;  %v51361_v63 = vpack.c.bf16 %v51339_v19, %v51337_v18  ;;  %v1773_v18 = vand.u32 4294901760, %v1772_v13  ;;  %v1780_v19 = vand.u32 4294901760, %v1779_v15 }
 0x149   :  { %45181 = vmatprep.subr.bf16.mxu0 %v51345_v41 }
 0x14a   :  { %57069 = vst [vmem:[#allocation26_spill] sm:$0xff] %v51361_v63  ;;  %v1774_v22 = vsub.f32 %v1772_v13, %v1773_v18  ;;  %v1781_v29 = vsub.f32 %v1779_v15, %v1780_v19  ;;  %v51387_v44 = vpack.c.bf16 %v1780_v19, %v1773_v18  ;;  %v51450_v13 = vsub.f32 %v54_v5, %v2730_v10 }
 0x14b   :  { %v51452_v15 = vsub.f32 %v55_v7, %v2733_v12 }
 0x14c   :  { %v1775_v30 = vand.u32 4294901760, %v1774_v22  ;;  %v1782_v31 = vand.u32 4294901760, %v1781_v29  ;;  %57079 = vst [vmem:[#allocation36_spill] sm:$0xff] %v51387_v44  ;;  %v56279_v18 = vand.u32 4294901760, %v51450_v13  ;;  %v2736_v22 = vand.u32 4294901760, %v56_v16 }
 0x14d   :  { %v56278_v19 = vand.u32 4294901760, %v51452_v15  ;;  %v2739_v29 = vand.u32 4294901760, %v57_v17 }
 0x14e   :  { %v51375_v32 = vpack.c.bf16 %v1782_v31, %v1775_v30  ;;  %v2834_v30 = vsub.f32 %v51450_v13, %v56279_v18 }
 0x14f   :  { %38660 = vmatmul.mubr.f32.vlgmr.msra.gmra.mrb[2].mxu0 %v51303_v51  ;;  %v2841_v31 = vsub.f32 %v51452_v15, %v56278_v19  ;;  %v51478_v5 = vpack.c.bf16 %v2739_v29, %v2736_v22 }
 0x150   :  { %45183 = vmatpush3.bf16.msra.mxu0 %v51345_v41  ;;  %57073 = vst [vmem:[#allocation30_spill] sm:$0xff] %v51375_v32 }
 0x151   :  { %45185 = vmatprep.subr.bf16.mxu0 %v51351_v49  ;;  %57086 = vst [vmem:[#allocation43_spill] sm:$0xff] %v51478_v5 }
 0x154   :  { %45187 = vmatpush3.bf16.msra.mxu0 %v51351_v49 }
 0x155   :  { %45189 = vmatprep.subr.bf16.mxu0 %v51361_v63 }
 0x222   :  { %v51393_v50 = vpop.f32.mrb[2].mxu0 }
 0x223   :  { %57082 = vst [vmem:[#allocation39_spill] sm:$0xff] %v51393_v50  ;;  %v51395_v53 = vpop.f32.mrb[3].mxu0  ;;  %v1659_v26 = vsub.f32 %v51314_v56, %v51393_v50 }
 0x224   :  { %57083 = vst [vmem:[#allocation40_spill] sm:$0xff] %v51395_v53  ;;  %v1658_v28 = vsub.f32 %v51316_v58, %v51395_v53 }
 0x225   :  { %v1665_v38 = vsel %vm1660_vm3, %v1659_v26, 0 }
 0x226   :  { %4111 = vxpose.xlu1.b32.start [1/2] (short) (narrow) %v1658_v28, 32  ;;  %v1662_v40 = vsel %vm1660_vm3, %v1658_v28, 0  ;;  %v51403_v54 = vand.u32 4294901760, %v1665_v38  ;;  %v51464_v28 = vsub.f32 %v57_v17, %v2739_v29  ;;  %v61_v17 = vld [vmem:[#allocation2 + $0x78] sm:$0xff] }
 0x227   :  { %v1736_v57 = vand.u32 4294901760, %v1662_v40 }
 0x228   :  { %v1747_v60 = vsub.f32 %v1665_v38, %v51403_v54  ;;  %v58_v38 = vld [vmem:[#allocation2 + $0x60] sm:$0xff] }
 0x229   :  { %v1737_v61 = vsub.f32 %v1662_v40, %v1736_v57  ;;  %38747 = vmatprep.mubr.f32.mxu0 %v1736_v57  ;;  %v59_v40 = vld [vmem:[#allocation2 + $0x68] sm:$0xff] }
 0x22a   :  { %4112 = vxpose.xlu1.b32.end [2/2] (short) (narrow) %v1659_v26, 32  ;;  %38748 = vmatmul.mubr.f32.vlgmr.msra.gmra.mrb[4].mxu0 %v51403_v54  ;;  %v1748_v0 = vand.u32 4294901760, %v1747_v60  ;;  %v51462_v26 = vsub.f32 %v56_v16, %v2736_v22  ;;  %v60_v16 = vld [vmem:[#allocation2 + $0x70] sm:$0xff] }
 0x22b   :  { %45191 = vmatpush3.bf16.msra.mxu0 %v51361_v63  ;;  %38758 = vmatprep.mubr.f32.mxu0 %v1737_v61  ;;  %v1738_v56 = vand.u32 4294901760, %v1737_v61 }
 0x22c   :  { %45193 = vmatprep.subr.bf16.mxu0 %v51366_v8  ;;  %v1749_v58 = vsub.f32 %v1747_v60, %v1748_v0 }
 0x22d   :  { %v1739_v1 = vsub.f32 %v1737_v61, %v1738_v56 }
 0x22e   :  { %v1750_v4 = vand.u32 4294901760, %v1749_v58 }
 0x22f   :  { %45195 = vmatpush3.bf16.msra.mxu0 %v51366_v8  ;;  %v1740_v3 = vand.u32 4294901760, %v1739_v1 }
 0x230   :  { %45197 = vmatprep.subr.bf16.mxu0 %v51347_v45 }
 0x231   :  { %38670 = vmatprep.mubr.f32.mxu1 %v1740_v3 }
 0x232   :  { %38671 = vmatmul.mubr.f32.vlgmr.msra.gmra.mrb[2].mxu1 %v1750_v4  ;;  %38759 = vmatmul.mubr.f32.vlgmr.msra.gmra.mrb[4].mxu0 %v1747_v60 }
 0x233   :  { %45135 = vmatpush3.bf16.msra.mxu1 %v51372_v21  ;;  %38681 = vmatprep.mubr.f32.mxu1 %v1736_v57 }
 0x234   :  { %45199 = vmatpush3.bf16.msra.mxu0 %v51347_v45  ;;  %38769 = vmatprep.mubr.f32.mxu0 %v1738_v56 }
 0x235   :  { %45137 = vmatprep.subr.bf16.mxu1 %v51375_v32  ;;  %45201 = vmatprep.subr.bf16.mxu0 %v51357_v62 }
 0x237   :  { %45139 = vmatpush3.bf16.msra.mxu1 %v51375_v32 }
 0x238   :  { %45203 = vmatpush3.bf16.msra.mxu0 %v51357_v62  ;;  %45141 = vmatprep.subr.bf16.mxu1 %v51377_v33 }
 0x239   :  { %45205 = vmatprep.subr.bf16.mxu0 %v51379_v35 }
 0x23a   :  { %38682 = vmatmul.mubr.f32.vlgmr.msra.gmra.mrb[2].mxu1 %v51403_v54 }
 0x23b   :  { %45143 = vmatpush3.bf16.msra.mxu1 %v51377_v33  ;;  %38770 = vmatmul.mubr.f32.vlgmr.msra.gmra.mrb[4].mxu0 %v1748_v0 }
 0x23c   :  { %38692 = vmatprep.mubr.f32.mxu1 %v1737_v61  ;;  %45207 = vmatpush3.bf16.msra.mxu0 %v51379_v35  ;;  %v56276_v61 = vand.u32 4294901760, %v51464_v28 }
 0x23d   :  { %38780 = vmatprep.mubr.f32.mxu0 %v1736_v57  ;;  %45145 = vmatprep.subr.bf16.mxu1 %v51381_v36 }
 0x23e   :  { %45209 = vmatprep.subr.bf16.mxu0 %v51383_v37 }
 0x23f   :  { %45147 = vmatpush3.bf16.msra.mxu1 %v51381_v36 }
 0x240   :  { %45211 = vmatpush3.bf16.msra.mxu0 %v51383_v37  ;;  %45149 = vmatprep.subr.bf16.mxu1 %v51355_v59 }
 0x241   :  { %45213 = vmatprep.subr.bf16.mxu0 %v51347_v45 }
 0x242   :  { %38693 = vmatmul.mubr.f32.vlgmr.msra.gmra.mrb[2].mxu1 %v1747_v60  ;;  %v56275_v60 = vand.u32 4294901760, %v51462_v26 }
 0x243   :  { %45151 = vmatpush3.bf16.msra.mxu1 %v51355_v59  ;;  %38781 = vmatmul.mubr.f32.vlgmr.msra.gmra.mrb[4].mxu0 %v51403_v54 }
 0x244   :  { %38703 = vmatprep.mubr.f32.mxu1 %v1738_v56  ;;  %45215 = vmatpush3.bf16.msra.mxu0 %v51347_v45  ;;  %v2745_v56 = vand.u32 4294901760, %v59_v40  ;;  %v2848_v1 = vsub.f32 %v51462_v26, %v56275_v60 }
 0x245   :  { %38791 = vmatprep.mubr.f32.mxu0 %v1736_v57  ;;  %45153 = vmatprep.subr.bf16.mxu1 %v51368_v9 }
 0x246   :  { %45217 = vmatprep.subr.bf16.mxu0 %v51357_v62 }
 0x247   :  { %45155 = vmatpush3.bf16.msra.mxu1 %v51368_v9 }
 0x248   :  { %45219 = vmatpush3.bf16.msra.mxu0 %v51357_v62  ;;  %45157 = vmatprep.subr.bf16.mxu1 %v51385_v43 }
 0x24a   :  { %38704 = vmatmul.mubr.f32.vlgmr.msra.gmra.mrb[2].mxu1 %v1748_v0  ;;  %v2742_v0 = vand.u32 4294901760, %v58_v38 }
 0x24b   :  { %45159 = vmatpush3.bf16.msra.mxu1 %v51385_v43  ;;  %38792 = vmatmul.mubr.f32.vlgmr.msra.gmra.mrb[4].mxu0 %v51403_v54 }
 0x24c   :  { %38714 = vmatprep.mubr.f32.mxu1 %v1736_v57  ;;  %45161 = vmatprep.subr.bf16.mxu1 %v51387_v44  ;;  %v51480_v7 = vsub.f32 %v58_v38, %v2742_v0  ;;  %v51494_v38 = vpack.c.bf16 %v2745_v56, %v2742_v0 }
 0x24e   :  { %v56277_v60 = vand.u32 4294901760, %v51480_v7  ;;  %57088 = vst [vmem:[#allocation45_spill] sm:$0xff] %v51494_v38 }
 0x24f   :  { %45163 = vmatpush3.bf16.msra.mxu1 %v51387_v44 }
 0x250   :  { %45165 = vmatprep.subr.bf16.mxu1 %v51355_v59 }
 0x252   :  { %38715 = vmatmul.mubr.f32.vlgmr.msra.gmra.mrb[2].mxu1 %v51403_v54 }
 0x253   :  { %45167 = vmatpush3.bf16.msra.mxu1 %v51355_v59  ;;  %38725 = vmatprep.mubr.f32.mxu1 %v1736_v57  ;;  %v2842_v57 = vand.u32 4294901760, %v2841_v31 }
 0x254   :  { %45169 = vmatprep.subr.bf16.mxu1 %v51368_v9 }
 0x257   :  { %45171 = vmatpush3.bf16.msra.mxu1 %v51368_v9 }
 0x258   :  { %45173 = vmatprep.subr.bf16.mxu1 %v51347_v45 }
 0x25a   :  { %38726 = vmatmul.mubr.f32.vlgmr.msra.gmra.mrb[2].mxu1 %v51403_v54  ;;  %v2835_v54 = vand.u32 4294901760, %v2834_v30  ;;  %v2849_v30 = vand.u32 4294901760, %v2848_v1 }
 0x25b   :  { %45175 = vmatpush3.bf16.msra.mxu1 %v51347_v45  ;;  %38736 = vmatprep.mubr.f32.mxu1 %v1740_v3  ;;  %v2855_v3 = vsub.f32 %v51464_v28, %v56276_v61  ;;  %v63_v61 = vld [vmem:[#allocation2 + $0x88] sm:$0xff] }
 0x25c   :  { %45177 = vmatprep.subr.bf16.mxu1 %v51357_v62  ;;  %v51468_v58 = vpack.c.bf16 %v2842_v57, %v2835_v54  ;;  %v51483_v54 = vsub.f32 %v59_v40, %v2745_v56  ;;  %v2748_v57 = vand.u32 4294901760, %v60_v16  ;;  %v2862_v40 = vsub.f32 %v51480_v7, %v56277_v60 }
 0x25d   :  { %v2856_v31 = vand.u32 4294901760, %v2855_v3  ;;  %v62_v3 = vld [vmem:[#allocation2 + $0x80] sm:$0xff]  ;;  %v2757_v56 = vand.u32 4294901760, %v63_v61 }
 0x25e   :  { %57084 = vst [vmem:[#allocation41_spill] sm:$0xff] %v51468_v58  ;;  %v56282_v22 = vand.u32 4294901760, %v51483_v54  ;;  %v51492_v29 = vsub.f32 %v60_v16, %v2748_v57  ;;  %v2754_v0 = vand.u32 4294901760, %v62_v3 }
 0x25f   :  { %45179 = vmatpush3.bf16.msra.mxu1 %v51357_v62  ;;  %v51515_v42 = vsub.f32 %v63_v61, %v2757_v56 }
 0x260   :  { %45253 = vmatprep.subr.bf16.mxu1 %v51468_v58  ;;  %v56289_v16 = vand.u32 4294901760, %v51492_v29  ;;  %v51513_v18 = vsub.f32 %v62_v3, %v2754_v0 }
 0x261   :  { %v56301_v3 = vand.u32 4294901760, %v51515_v42 }
 0x262   :  { %38737 = vmatmul.mubr.f32.vlgmr.msra.gmra.mrb[4].mxu1 %v1750_v4  ;;  %v51476_v4 = vpack.c.bf16 %v2733_v12, %v2730_v10  ;;  %v2751_v10 = vand.u32 4294901760, %v61_v17  ;;  %v51488_v12 = vpack.c.bf16 %v2856_v31, %v2849_v30  ;;  %v2869_v30 = vsub.f32 %v51483_v54, %v56282_v22 }
 0x263   :  { %45255 = vmatpush3.bf16.msra.mxu1 %v51468_v58  ;;  %v2863_v31 = vand.u32 4294901760, %v2862_v40  ;;  %v2876_v19 = vsub.f32 %v51492_v29, %v56289_v16  ;;  %v64_v40 = vld [vmem:[#allocation2 + $0x90] sm:$0xff]  ;;  %v56297_v16 = vand.u32 4294901760, %v51513_v18 }
 0x264   :  { %57085 = vst [vmem:[#allocation42_spill] sm:$0xff] %v51476_v4  ;;  %45221 = vmatprep.subr.bf16.mxu0 %v51476_v4  ;;  %57087 = vst [vmem:[#allocation44_spill] sm:$0xff] %v51488_v12  ;;  %v51499_v1 = vsub.f32 %v61_v17, %v2751_v10  ;;  %45257 = vmatprep.subr.bf16.mxu1 %v51488_v12  ;;  %v2870_v60 = vand.u32 4294901760, %v2869_v30  ;;  %v51517_v22 = vpack.c.bf16 %v2751_v10, %v2748_v57  ;;  %v65_v30 = vld [vmem:[#allocation2 + $0x98] sm:$0xff] }
 0x265   :  { %45223 = vmatpush3.bf16.msra.mxu0 %v51476_v4  ;;  %v2877_v34 = vand.u32 4294901760, %v2876_v19  ;;  %v2760_v61 = vand.u32 4294901760, %v64_v40  ;;  %v2763_v11 = vand.u32 4294901760, %v65_v30  ;;  %v2890_v57 = vsub.f32 %v51513_v18, %v56297_v16 }
 0x266   :  { %45225 = vmatprep.subr.bf16.mxu0 %v51478_v5  ;;  %v56294_v17 = vand.u32 4294901760, %v51499_v1  ;;  %57089 = vst [vmem:[#allocation46_spill] sm:$0xff] %v51517_v22  ;;  %v51523_v48 = vpack.c.bf16 %v2870_v60, %v2863_v31  ;;  %v2897_v10 = vsub.f32 %v51515_v42, %v56301_v3  ;;  %v66_v31 = vld [vmem:[#allocation2 + $0xa0] sm:$0xff] }
 0x267   :  { %45259 = vmatpush3.bf16.msra.mxu1 %v51488_v12  ;;  %v51538_v60 = vsub.f32 %v64_v40, %v2760_v61  ;;  %v2891_v20 = vand.u32 4294901760, %v2890_v57  ;;  %v2766_v6 = vand.u32 4294901760, %v66_v31  ;;  %v51556_v57 = vpack.c.bf16 %v2763_v11, %v2760_v61 }
 0x268   :  { %v2883_v39 = vsub.f32 %v51499_v1, %v56294_v17  ;;  %57090 = vst [vmem:[#allocation47_spill] sm:$0xff] %v51523_v48  ;;  %45261 = vmatprep.subr.bf16.mxu1 %v51523_v48  ;;  %v67_v17 = vld [vmem:[#allocation2 + $0xa8] sm:$0xff]  ;;  %v2898_v16 = vand.u32 4294901760, %v2897_v10 }
 0x269   :  { %45227 = vmatpush3.bf16.msra.mxu0 %v51478_v5  ;;  %v2769_v53 = vand.u32 4294901760, %v67_v17  ;;  %v56305_v3 = vand.u32 4294901760, %v51538_v60  ;;  %57094 = vst [vmem:[#allocation51_spill] sm:$0xff] %v51556_v57 }
 0x26a   :  { %45229 = vmatprep.subr.bf16.mxu0 %v51494_v38  ;;  %v2884_v14 = vand.u32 4294901760, %v2883_v39  ;;  %v51540_v39 = vsub.f32 %v65_v30, %v2763_v11  ;;  %v51554_v30 = vpack.c.bf16 %v2757_v56, %v2754_v0  ;;  %v2775_v56 = vand.u32 4294901760, %v69_v55 }
 0x26b   :  { %45263 = vmatpush3.bf16.msra.mxu1 %v51523_v48  ;;  %v51551_v40 = vsub.f32 %v67_v17, %v2769_v53  ;;  %v2904_v10 = vsub.f32 %v51538_v60, %v56305_v3 }
 0x26c   :  { %v51536_v19 = vpack.c.bf16 %v2884_v14, %v2877_v34  ;;  %v56306_v50 = vand.u32 4294901760, %v51540_v39  ;;  %v51546_v14 = vpack.c.bf16 %v2898_v16, %v2891_v20  ;;  %v51549_v34 = vsub.f32 %v66_v31, %v2766_v6  ;;  %57093 = vst [vmem:[#allocation50_spill] sm:$0xff] %v51554_v30  ;;  %v68_v16 = vld [vmem:[#allocation2 + $0xb0] sm:$0xff] }
 0x26d   :  { %45231 = vmatpush3.bf16.msra.mxu0 %v51494_v38  ;;  %v56316_v31 = vand.u32 4294901760, %v51551_v40  ;;  %v2772_v0 = vand.u32 4294901760, %v68_v16  ;;  %v2905_v11 = vand.u32 4294901760, %v2904_v10  ;;  %v51577_v52 = vsub.f32 %v69_v55, %v2775_v56 }
 0x26e   :  { %57091 = vst [vmem:[#allocation48_spill] sm:$0xff] %v51536_v19  ;;  %45233 = vmatprep.subr.bf16.mxu0 %v51517_v22  ;;  %45265 = vmatprep.subr.bf16.mxu1 %v51536_v19  ;;  %57092 = vst [vmem:[#allocation49_spill] sm:$0xff] %v51546_v14  ;;  %v2911_v20 = vsub.f32 %v51540_v39, %v56306_v50  ;;  %v56313_v17 = vand.u32 4294901760, %v51549_v34 }
 0x26f   :  { %45267 = vmatpush3.bf16.msra.mxu1 %v51536_v19  ;;  %v2925_v50 = vsub.f32 %v51551_v40, %v56316_v31  ;;  %v51575_v25 = vsub.f32 %v68_v16, %v2772_v0  ;;  %v56317_v51 = vand.u32 4294901760, %v51577_v52 }
 0x270   :  { %45269 = vmatprep.subr.bf16.mxu1 %v51546_v14  ;;  %v2912_v61 = vand.u32 4294901760, %v2911_v20  ;;  %v2918_v3 = vsub.f32 %v51549_v34, %v56313_v17 }
 0x271   :  { %45235 = vmatpush3.bf16.msra.mxu0 %v51517_v22  ;;  %v2926_v24 = vand.u32 4294901760, %v2925_v50  ;;  %v56318_v17 = vand.u32 4294901760, %v51575_v25  ;;  %v2939_v16 = vsub.f32 %v51577_v52, %v56317_v51 }
 0x272   :  { %45237 = vmatprep.subr.bf16.mxu0 %v51554_v30  ;;  %v51580_v10 = vpack.c.bf16 %v2912_v61, %v2905_v11  ;;  %v2919_v20 = vand.u32 4294901760, %v2918_v3  ;;  %v51605_v61 = vpack.c.bf16 %v2769_v53, %v2766_v6  ;;  %v51621_v6 = vpack.c.bf16 %v51483_v54, %v51480_v7 }
 0x273   :  { %45271 = vmatpush3.bf16.msra.mxu1 %v51546_v14  ;;  %v2932_v55 = vsub.f32 %v51575_v25, %v56318_v17  ;;  %v2940_v3 = vand.u32 4294901760, %v2939_v16  ;;  %v51625_v53 = vpack.c.bf16 %v51499_v1, %v51492_v29  ;;  %v51637_v16 = vpack.c.bf16 %v51551_v40, %v51549_v34 }
 0x274   :  { %57095 = vst [vmem:[#allocation52_spill] sm:$0xff] %v51580_v10  ;;  %45273 = vmatprep.subr.bf16.mxu1 %v51580_v10  ;;  %v51586_v31 = vpack.c.bf16 %v2926_v24, %v2919_v20  ;;  %v51603_v24 = vpack.c.bf16 %v51452_v15, %v51450_v13  ;;  %57099 = vst [vmem:[#allocation56_spill] sm:$0xff] %v51605_v61  ;;  %v51608_v20 = vpack.c.bf16 %v2775_v56, %v2772_v0 }
 0x275   :  { %45239 = vmatpush3.bf16.msra.mxu0 %v51554_v30  ;;  %v2933_v50 = vand.u32 4294901760, %v2932_v55  ;;  %v51614_v55 = vpack.c.bf16 %v51464_v28, %v51462_v26  ;;  %57102 = vst [vmem:[#allocation59_spill] sm:$0xff] %v51621_v6  ;;  %57103 = vst [vmem:[#allocation60_spill] sm:$0xff] %v51625_v53  ;;  %v51629_v0 = vpack.c.bf16 %v51515_v42, %v51513_v18 }
 0x276   :  { %45241 = vmatprep.subr.bf16.mxu0 %v51556_v57  ;;  %57096 = vst [vmem:[#allocation53_spill] sm:$0xff] %v51586_v31  ;;  %57098 = vst [vmem:[#allocation55_spill] sm:$0xff] %v51603_v24  ;;  %v51633_v56 = vpack.c.bf16 %v51540_v39, %v51538_v60 }
 0x277   :  { %45275 = vmatpush3.bf16.msra.mxu1 %v51580_v10  ;;  %v51597_v11 = vpack.c.bf16 %v2940_v3, %v2933_v50  ;;  %57100 = vst [vmem:[#allocation57_spill] sm:$0xff] %v51608_v20  ;;  %57101 = vst [vmem:[#allocation58_spill] sm:$0xff] %v51614_v55  ;;  %v51641_v50 = vpack.c.bf16 %v51577_v52, %v51575_v25 }
 0x278   :  { %45277 = vmatprep.subr.bf16.mxu1 %v51586_v31  ;;  %57104 = vst [vmem:[#allocation61_spill] sm:$0xff] %v51629_v0  ;;  %57105 = vst [vmem:[#allocation62_spill] sm:$0xff] %v51633_v56 }
 0x279   :  { %45243 = vmatpush3.bf16.msra.mxu0 %v51556_v57  ;;  %57097 = vst [vmem:[#allocation54_spill] sm:$0xff] %v51597_v11  ;;  %57106 = vst [vmem:[#allocation63_spill] sm:$0xff] %v51637_v16 }
 0x27a   :  { %45245 = vmatprep.subr.bf16.mxu0 %v51605_v61  ;;  %57107 = vst [vmem:[#allocation64_spill] sm:$0xff] %v51641_v50 }
 0x27b   :  { %45279 = vmatpush3.bf16.msra.mxu1 %v51586_v31 }
 0x27c   :  { %45281 = vmatprep.subr.bf16.mxu1 %v51597_v11 }
 0x27d   :  { %45247 = vmatpush3.bf16.msra.mxu0 %v51605_v61 }
 0x27e   :  { %45249 = vmatprep.subr.bf16.mxu0 %v51608_v20 }
 0x27f   :  { %45283 = vmatpush3.bf16.msra.mxu1 %v51597_v11 }
 0x280   :  { %45285 = vmatprep.subr.bf16.mxu1 %v51603_v24 }
 0x281   :  { %45251 = vmatpush3.bf16.msra.mxu0 %v51608_v20 }
 0x31e   :  { %v38793_v3 = vpop.f32.mrb[4].mxu0 }
 0x31f   :  { %v2713_v51 = vpop.f32.mrb[5].mxu0 }
 0x32d   :  { %v38727_v17 = vpop.f32.mrb[2].mxu1 }
 0x32e   :  { %v2185_v23 = vpop.f32.mrb[3].mxu1  ;;  %v2724_v11 = vmul.f32 %v38727_v17, %v38727_v17 }
 0x32f   :  { %v2723_v10 = vmul.f32 %v2185_v23, %v2185_v23 }
 0x335   :  { %v38738_v2 = vpop.f32.mrb[4].mxu1 }
 0x336   :  { %v50336_v27 = vadd.f32 %v38793_v3, %v38738_v2  ;;  %v2270_v47 = vpop.f32.mrb[5].mxu1 }
 0x337   :  { %v50337_v46 = vadd.f32 %v2713_v51, %v2270_v47  ;;  %v57111_v47 = vand.u32 4294901760, %v51462_v26  ;;  %v57117_v26 = vand.u32 4294901760, %v51492_v29  ;;  %v57123_v29 = vand.u32 4294901760, %v51538_v60 }
 0x338   :  { %v2726_v31 = vmul.f32 %v50336_v27, %v50336_v27  ;;  %v57129_v60 = vand.u32 4294901760, %v51575_v25 }
 0x339   :  { %v2725_v14 = vmul.f32 %v50337_v46, %v50337_v46 }
 0x33a   :  { %v2728_v19 = vadd.f32 %v2726_v31, %v2724_v11 }
 0x33b   :  { %v2727_v48 = vadd.f32 %v2725_v14, %v2723_v10 }
 0x33c   :  { %v51643_v12 = vand.u32 4294901760, %v2728_v19 }
 0x33d   :  { %v51645_v58 = vand.u32 4294901760, %v2727_v48 }
 0x33e   :  { %v2821_v37 = vsub.f32 %v2728_v19, %v51643_v12  ;;  %v57112_v19 = vand.u32 4294901760, %v51464_v28 }
 0x33f   :  { %38861 = vmatprep.mubr.f32.mxu1 %v51645_v58  ;;  %v2811_v35 = vsub.f32 %v2727_v48, %v51645_v58  ;;  %v57108_v48 = vand.u32 4294901760, %v51450_v13  ;;  %v57114_v13 = vand.u32 4294901760, %v51480_v7  ;;  %v57120_v7 = vand.u32 4294901760, %v51513_v18 }
 0x340   :  { %v2822_v8 = vand.u32 4294901760, %v2821_v37  ;;  %38862 = vmatmul.mubr.f32.vlgmr.msra.gmra.mrb[6].mxu1 %v51643_v12  ;;  %v51693_v14 = vpack.c.bf16 %v57112_v19, %v57111_v47  ;;  %v57126_v18 = vand.u32 4294901760, %v51549_v34 }
 0x341   :  { %45287 = vmatpush3.bf16.msra.mxu1 %v51603_v24  ;;  %38896 = vmatprep.mubr.f32.mxu1 %v2811_v35  ;;  %v2812_v23 = vand.u32 4294901760, %v2811_v35 }
 0x342   :  { %45289 = vmatprep.subr.bf16.mxu1 %v51614_v55  ;;  %v2823_v27 = vsub.f32 %v2821_v37, %v2822_v8  ;;  %57113 = vst [vmem:[#allocation66_spill] sm:$0xff] %v51693_v14 }
 0x343   :  { %v2813_v51 = vsub.f32 %v2811_v35, %v2812_v23  ;;  %v57109_v35 = vand.u32 4294901760, %v51452_v15  ;;  %v57115_v15 = vand.u32 4294901760, %v51483_v54  ;;  %v57121_v54 = vand.u32 4294901760, %v51515_v42 }
 0x344   :  { %v2824_v46 = vand.u32 4294901760, %v2823_v27  ;;  %v57127_v42 = vand.u32 4294901760, %v51551_v40 }
 0x345   :  { %45291 = vmatpush3.bf16.msra.mxu1 %v51614_v55  ;;  %v2814_v2 = vand.u32 4294901760, %v2813_v51  ;;  %v51702_v17 = vpack.c.bf16 %v57115_v15, %v57114_v13  ;;  %v51718_v31 = vpack.c.bf16 %v57121_v54, %v57120_v7  ;;  %v90_v15 = vld [vmem:[#allocation2 + $0x160] sm:$0xff] }
 0x346   :  { %45293 = vmatprep.subr.bf16.mxu1 %v51621_v6  ;;  %v51734_v11 = vpack.c.bf16 %v57127_v42, %v57126_v18 }
 0x347   :  { %38826 = vmatprep.mubr.f32.mxu0 %v2814_v2  ;;  %57116 = vst [vmem:[#allocation67_spill] sm:$0xff] %v51702_v17  ;;  %57122 = vst [vmem:[#allocation69_spill] sm:$0xff] %v51718_v31 }
 0x348   :  { %38827 = vmatmul.mubr.f32.vlgmr.msra.gmra.mrb[6].mxu0 %v2824_v46  ;;  %57128 = vst [vmem:[#allocation71_spill] sm:$0xff] %v51734_v11 }
 0x349   :  { %45295 = vmatpush3.bf16.msra.mxu1 %v51621_v6 }
 0x34a   :  { %45297 = vmatprep.subr.bf16.mxu1 %v51625_v53 }
 0x34d   :  { %45299 = vmatpush3.bf16.msra.mxu1 %v51625_v53 }
 0x34e   :  { %45301 = vmatprep.subr.bf16.mxu1 %v51629_v0 }
 0x351   :  { %45303 = vmatpush3.bf16.msra.mxu1 %v51629_v0 }
 0x352   :  { %45305 = vmatprep.subr.bf16.mxu1 %v51633_v56 }
 0x355   :  { %45307 = vmatpush3.bf16.msra.mxu1 %v51633_v56  ;;  %v51816_v56 = vld [vmem:[#allocation2 + $0x1b8] sm:$0xff] }
 0x356   :  { %45309 = vmatprep.subr.bf16.mxu1 %v51637_v16 }
 0x359   :  { %45311 = vmatpush3.bf16.msra.mxu1 %v51637_v16  ;;  %v51814_v16 = vld [vmem:[#allocation2 + $0x1b0] sm:$0xff] }
 0x35a   :  { %45313 = vmatprep.subr.bf16.mxu1 %v51641_v50  ;;  %v56384_v53 = vand.u32 4294901760, %v51814_v16 }
 0x35d   :  { %45315 = vmatpush3.bf16.msra.mxu1 %v51641_v50 }
 0x35e   :  { %45317 = vmatprep.subr.bf16.mxu1 %v51476_v4 }
 0x360   :  { %38897 = vmatmul.mubr.f32.vlgmr.msra.gmra.mrb[6].mxu1 %v2821_v37  ;;  %v51685_v37 = vpack.c.bf16 %v57109_v35, %v57108_v48  ;;  %v89_v35 = vld [vmem:[#allocation2 + $0x158] sm:$0xff] }
 0x361   :  { %45319 = vmatpush3.bf16.msra.mxu1 %v51476_v4  ;;  %38931 = vmatprep.mubr.f32.mxu1 %v2812_v23  ;;  %v3433_v19 = vand.u32 4294901760, %v89_v35 }
 0x362   :  { %45321 = vmatprep.subr.bf16.mxu1 %v51478_v5  ;;  %57110 = vst [vmem:[#allocation65_spill] sm:$0xff] %v51685_v37 }
 0x365   :  { %45323 = vmatpush3.bf16.msra.mxu1 %v51478_v5 }
 0x366   :  { %45325 = vmatprep.subr.bf16.mxu1 %v51494_v38 }
 0x369   :  { %45327 = vmatpush3.bf16.msra.mxu1 %v51494_v38 }
 0x36a   :  { %45329 = vmatprep.subr.bf16.mxu1 %v51517_v22 }
 0x36d   :  { %45331 = vmatpush3.bf16.msra.mxu1 %v51517_v22 }
 0x36e   :  { %45333 = vmatprep.subr.bf16.mxu1 %v51554_v30 }
 0x371   :  { %45335 = vmatpush3.bf16.msra.mxu1 %v51554_v30 }
 0x372   :  { %45337 = vmatprep.subr.bf16.mxu1 %v51556_v57 }
 0x375   :  { %45339 = vmatpush3.bf16.msra.mxu1 %v51556_v57 }
 0x376   :  { %45341 = vmatprep.subr.bf16.mxu1 %v51605_v61 }
 0x379   :  { %45343 = vmatpush3.bf16.msra.mxu1 %v51605_v61 }
 0x37a   :  { %45345 = vmatprep.subr.bf16.mxu1 %v51608_v20 }
 0x37d   :  { %45347 = vmatpush3.bf16.msra.mxu1 %v51608_v20 }
 0x37e   :  { %45349 = vmatprep.subr.bf16.mxu1 %v51685_v37 }
 0x380   :  { %38932 = vmatmul.mubr.f32.vlgmr.msra.gmra.mrb[6].mxu1 %v2822_v8  ;;  %v57118_v8 = vand.u32 4294901760, %v51499_v1  ;;  %v57124_v1 = vand.u32 4294901760, %v51540_v39  ;;  %v57130_v39 = vand.u32 4294901760, %v51577_v52  ;;  %v86_v52 = vld [vmem:[#allocation2 + $0x140] sm:$0xff] }
 0x381   :  { %45351 = vmatpush3.bf16.msra.mxu1 %v51685_v37  ;;  %38966 = vmatprep.mubr.f32.mxu1 %v51645_v58  ;;  %v3424_v40 = vand.u32 4294901760, %v86_v52 }
 0x382   :  { %45353 = vmatprep.subr.bf16.mxu1 %v51693_v14  ;;  %v51710_v28 = vpack.c.bf16 %v57118_v8, %v57117_v26  ;;  %v51726_v10 = vpack.c.bf16 %v57124_v1, %v57123_v29  ;;  %v51742_v3 = vpack.c.bf16 %v57130_v39, %v57129_v60  ;;  %v91_v26 = vld [vmem:[#allocation2 + $0x168] sm:$0xff]  ;;  %v3436_v8 = vand.u32 4294901760, %v90_v15  ;;  %v92_v29 = vld [vmem:[#allocation2 + $0x170] sm:$0xff]  ;;  %v93_v1 = vld [vmem:[#allocation2 + $0x178] sm:$0xff] }
 0x383   :  { %v3439_v7 = vand.u32 4294901760, %v91_v26  ;;  %v3442_v18 = vand.u32 4294901760, %v92_v29  ;;  %v3445_v42 = vand.u32 4294901760, %v93_v1  ;;  %v51786_v39 = vld [vmem:[#allocation2 + $0x180] sm:$0xff]  ;;  %v51837_v6 = vsub.f32 %v86_v52, %v3424_v40 }
 0x384   :  { %57119 = vst [vmem:[#allocation68_spill] sm:$0xff] %v51710_v28  ;;  %57125 = vst [vmem:[#allocation70_spill] sm:$0xff] %v51726_v10 }
 0x385   :  { %45355 = vmatpush3.bf16.msra.mxu1 %v51693_v14  ;;  %57131 = vst [vmem:[#allocation72_spill] sm:$0xff] %v51742_v3  ;;  %v51780_v54 = vpack.c.bf16 %v3439_v7, %v3436_v8  ;;  %v51784_v60 = vpack.c.bf16 %v3445_v42, %v3442_v18 }
 0x386   :  { %45357 = vmatprep.subr.bf16.mxu1 %v51702_v17 }
 0x387   :  { %57134 = vst [vmem:[#allocation75_spill] sm:$0xff] %v51780_v54  ;;  %57135 = vst [vmem:[#allocation76_spill] sm:$0xff] %v51784_v60 }
 0x389   :  { %45359 = vmatpush3.bf16.msra.mxu1 %v51702_v17 }
 0x38a   :  { %45361 = vmatprep.subr.bf16.mxu1 %v51710_v28 }
 0x38d   :  { %45363 = vmatpush3.bf16.msra.mxu1 %v51710_v28  ;;  %v51802_v28 = vld [vmem:[#allocation2 + $0x1a8] sm:$0xff] }
 0x38e   :  { %45365 = vmatprep.subr.bf16.mxu1 %v51718_v31  ;;  %v56379_v37 = vand.u32 4294901760, %v51802_v28 }
 0x391   :  { %45367 = vmatpush3.bf16.msra.mxu1 %v51718_v31 }
 0x392   :  { %45369 = vmatprep.subr.bf16.mxu1 %v51726_v10 }
 0x395   :  { %45371 = vmatpush3.bf16.msra.mxu1 %v51726_v10 }
 0x396   :  { %45373 = vmatprep.subr.bf16.mxu1 %v51734_v11 }
 0x399   :  { %45375 = vmatpush3.bf16.msra.mxu1 %v51734_v11  ;;  %v51797_v11 = vld [vmem:[#allocation2 + $0x1a0] sm:$0xff] }
 0x39a   :  { %45377 = vmatprep.subr.bf16.mxu1 %v51742_v3  ;;  %v56380_v14 = vand.u32 4294901760, %v51797_v11 }
 0x39c   :  { %v51825_v0 = vpack.c.bf16 %v56379_v37, %v56380_v14  ;;  %v56389_v37 = vand.u32 4294901760, %v51837_v6 }
 0x39d   :  { %45379 = vmatpush3.bf16.msra.mxu1 %v51742_v3  ;;  %v51795_v3 = vld [vmem:[#allocation2 + $0x198] sm:$0xff] }
 0x39e   :  { %45381 = vmatprep.subr.bf16.mxu1 %v51476_v4  ;;  %v56373_v31 = vand.u32 4294901760, %v51795_v3  ;;  %57138 = vst [vmem:[#allocation79_spill] sm:$0xff] %v51825_v0  ;;  %v3528_v24 = vsub.f32 %v51837_v6, %v56389_v37 }
 0x3a0   :  { %38967 = vmatmul.mubr.f32.vlgmr.msra.gmra.mrb[6].mxu1 %v51643_v12 }
 0x3a1   :  { %45383 = vmatpush3.bf16.msra.mxu1 %v51476_v4  ;;  %39001 = vmatprep.mubr.f32.mxu1 %v51645_v58  ;;  %v87_v58 = vld [vmem:[#allocation2 + $0x148] sm:$0xff] }
 0x3a2   :  { %45385 = vmatprep.subr.bf16.mxu1 %v51478_v5  ;;  %v3427_v23 = vand.u32 4294901760, %v87_v58 }
 0x3a4   :  { %v51766_v27 = vpack.c.bf16 %v3427_v23, %v3424_v40  ;;  %v51839_v55 = vsub.f32 %v87_v58, %v3427_v23  ;;  %v51853_v58 = vsub.f32 %v89_v35, %v3433_v19  ;;  %v3529_v40 = vand.u32 4294901760, %v3528_v24 }
 0x3a5   :  { %45387 = vmatpush3.bf16.msra.mxu1 %v51478_v5  ;;  %v51866_v35 = vsub.f32 %v90_v15, %v3436_v8  ;;  %v51868_v24 = vsub.f32 %v91_v26, %v3439_v7  ;;  %v51881_v26 = vsub.f32 %v92_v29, %v3442_v18  ;;  %v51883_v8 = vsub.f32 %v93_v1, %v3445_v42 }
 0x3a6   :  { %45389 = vmatprep.subr.bf16.mxu1 %v51494_v38  ;;  %57132 = vst [vmem:[#allocation73_spill] sm:$0xff] %v51766_v27  ;;  %45413 = vmatprep.subr.bf16.mxu0 %v51766_v27  ;;  %v56401_v14 = vand.u32 4294901760, %v51839_v55 }
 0x3a7   :  { %45415 = vmatpush3.bf16.msra.mxu0 %v51766_v27 }
 0x3a9   :  { %45391 = vmatpush3.bf16.msra.mxu1 %v51494_v38 }
 0x3aa   :  { %45393 = vmatprep.subr.bf16.mxu1 %v51517_v22 }
 0x3ad   :  { %45395 = vmatpush3.bf16.msra.mxu1 %v51517_v22 }
 0x3ae   :  { %45397 = vmatprep.subr.bf16.mxu1 %v51554_v30 }
 0x3b1   :  { %45399 = vmatpush3.bf16.msra.mxu1 %v51554_v30 }
 0x3b2   :  { %45401 = vmatprep.subr.bf16.mxu1 %v51556_v57 }
 0x3b5   :  { %45403 = vmatpush3.bf16.msra.mxu1 %v51556_v57 }
 0x3b6   :  { %45405 = vmatprep.subr.bf16.mxu1 %v51605_v61 }
 0x3b9   :  { %45407 = vmatpush3.bf16.msra.mxu1 %v51605_v61 }
 0x3ba   :  { %45409 = vmatprep.subr.bf16.mxu1 %v51608_v20 }
 0x3bd   :  { %45411 = vmatpush3.bf16.msra.mxu1 %v51608_v20  ;;  %v56391_v20 = vand.u32 4294901760, %v51853_v58 }
 0x3c0   :  { %39002 = vmatmul.mubr.f32.vlgmr.msra.gmra.mrb[6].mxu1 %v51643_v12  ;;  %v88_v12 = vld [vmem:[#allocation2 + $0x150] sm:$0xff] }
 0x3c1   :  { %v3430_v47 = vand.u32 4294901760, %v88_v12 }
 0x3c3   :  { %v51776_v13 = vpack.c.bf16 %v3433_v19, %v3430_v47  ;;  %v51851_v52 = vsub.f32 %v88_v12, %v3430_v47  ;;  %v3549_v12 = vsub.f32 %v51853_v58, %v56391_v20  ;;  %v56392_v19 = vand.u32 4294901760, %v51866_v35 }
 0x3c4   :  { %v56393_v20 = vand.u32 4294901760, %v51883_v8 }
 0x3c5   :  { %57133 = vst [vmem:[#allocation74_spill] sm:$0xff] %v51776_v13  ;;  %45417 = vmatprep.subr.bf16.mxu0 %v51776_v13  ;;  %v3550_v47 = vand.u32 4294901760, %v3549_v12  ;;  %v56395_v12 = vand.u32 4294901760, %v51881_v26 }
 0x3c6   :  { %45419 = vmatpush3.bf16.msra.mxu0 %v51776_v13 }
 0x3c7   :  { %45421 = vmatprep.subr.bf16.mxu0 %v51780_v54 }
 0x3ca   :  { %45423 = vmatpush3.bf16.msra.mxu0 %v51780_v54 }
 0x3cb   :  { %45425 = vmatprep.subr.bf16.mxu0 %v51784_v60 }
 0x3ce   :  { %45427 = vmatpush3.bf16.msra.mxu0 %v51784_v60 }
 0x41b   :  { %v38828_v25 = vpop.f32.mrb[6].mxu0 }
 0x41c   :  { %v2816_v34 = vpop.f32.mrb[7].mxu0 }
 0x493   :  { %v39003_v51 = vpop.f32.mrb[6].mxu1 }
 0x494   :  { %v51770_v2 = vadd.f32 %v39003_v51, %v38828_v25  ;;  %v3403_v46 = vpop.f32.mrb[7].mxu1  ;;  %v51788_v25 = vld [vmem:[#allocation2 + $0x188] sm:$0xff] }
 0x495   :  { %v51772_v48 = vadd.f32 %v3403_v46, %v2816_v34  ;;  %v3448_v34 = vand.u32 4294901760, %v51786_v39  ;;  %v3451_v51 = vand.u32 4294901760, %v51788_v25  ;;  %v51793_v46 = vld [vmem:[#allocation2 + $0x190] sm:$0xff] }
 0x496   :  { %v56374_v10 = vand.u32 4294901760, %v51793_v46 }
 0x497   :  { %3413 = vmax.xlane.f32.xlu0 %v51772_v48  ;;  %v51804_v17 = vpack.c.bf16 %v3451_v51, %v3448_v34  ;;  %v51896_v29 = vsub.f32 %v51788_v25, %v3451_v51  ;;  %v57143_v25 = vand.u32 4294901760, %v51793_v46  ;;  %v57144_v51 = vand.u32 4294901760, %v51795_v3 }
 0x498   :  { %v51812_v50 = vpack.c.bf16 %v56373_v31, %v56374_v10  ;;  %v56383_v31 = vand.u32 4294901760, %v51816_v56 }
 0x499   :  { %57136 = vst [vmem:[#allocation77_spill] sm:$0xff] %v51804_v17  ;;  %45429 = vmatprep.subr.bf16.mxu0 %v51804_v17  ;;  %v56400_v42 = vand.u32 4294901760, %v51896_v29 }
 0x49a   :  { %57137 = vst [vmem:[#allocation78_spill] sm:$0xff] %v51812_v50  ;;  %45431 = vmatpush3.bf16.msra.mxu0 %v51804_v17  ;;  %v51835_v10 = vpack.c.bf16 %v56383_v31, %v56384_v53  ;;  %v3535_v31 = vsub.f32 %v51839_v55, %v56401_v14  ;;  %v56390_v53 = vand.u32 4294901760, %v51851_v52 }
 0x49b   :  { %3415 = vmax.xlane.f32.xlu0 %v51770_v2  ;;  %45433 = vmatprep.subr.bf16.mxu0 %v51812_v50 }
 0x49c   :  { %57139 = vst [vmem:[#allocation80_spill] sm:$0xff] %v51835_v10  ;;  %v3536_v23 = vand.u32 4294901760, %v3535_v31  ;;  %v3542_v37 = vsub.f32 %v51851_v52, %v56390_v53  ;;  %v3556_v53 = vsub.f32 %v51866_v35, %v56392_v19  ;;  %v51893_v19 = vsub.f32 %v51786_v39, %v3448_v34 }
 0x49d   :  { %v3591_v39 = vsub.f32 %v51896_v29, %v56400_v42  ;;  %v51912_v34 = vsub.f32 %v51793_v46, %v57143_v25 }
 0x49e   :  { %45435 = vmatpush3.bf16.msra.mxu0 %v51812_v50  ;;  %v51858_v61 = vpack.c.bf16 %v3536_v23, %v3529_v40  ;;  %v3543_v31 = vand.u32 4294901760, %v3542_v37  ;;  %v56396_v40 = vand.u32 4294901760, %v51868_v24  ;;  %v3557_v37 = vand.u32 4294901760, %v3556_v53 }
 0x49f   :  { %45437 = vmatprep.subr.bf16.mxu0 %v51825_v0  ;;  %v3577_v53 = vsub.f32 %v51883_v8, %v56393_v20  ;;  %v56394_v18 = vand.u32 4294901760, %v51893_v19  ;;  %v3592_v20 = vand.u32 4294901760, %v3591_v39 }
 0x4a0   :  { %57140 = vst [vmem:[#allocation81_spill] sm:$0xff] %v51858_v61  ;;  %v51873_v23 = vpack.c.bf16 %v3550_v47, %v3543_v31  ;;  %v3563_v15 = vsub.f32 %v51868_v24, %v56396_v40  ;;  %v3570_v47 = vsub.f32 %v51881_v26, %v56395_v12 }
 0x4a2   :  { %45439 = vmatpush3.bf16.msra.mxu0 %v51825_v0  ;;  %57141 = vst [vmem:[#allocation82_spill] sm:$0xff] %v51873_v23  ;;  %v3564_v7 = vand.u32 4294901760, %v3563_v15  ;;  %v3571_v1 = vand.u32 4294901760, %v3570_v47  ;;  %v3578_v15 = vand.u32 4294901760, %v3577_v53 }
 0x4a3   :  { %45441 = vmatprep.subr.bf16.mxu0 %v51835_v10 }
 0x4a4   :  { %v51887_v31 = vpack.c.bf16 %v3564_v7, %v3557_v37  ;;  %v3584_v37 = vsub.f32 %v51893_v19, %v56394_v18  ;;  %v51917_v7 = vsub.f32 %v51795_v3, %v57144_v51  ;;  %v51919_v47 = vpack.c.bf16 %v3578_v15, %v3571_v1 }
 0x4a5   :  { %v56397_v18 = vand.u32 4294901760, %v51912_v34  ;;  %v57147_v3 = vand.u32 4294901760, %v51797_v11  ;;  %v57148_v15 = vand.u32 4294901760, %v51802_v28 }
 0x4a6   :  { %45443 = vmatpush3.bf16.msra.mxu0 %v51835_v10  ;;  %57142 = vst [vmem:[#allocation83_spill] sm:$0xff] %v51887_v31  ;;  %57145 = vst [vmem:[#allocation84_spill] sm:$0xff] %v51919_v47  ;;  %v3585_v53 = vand.u32 4294901760, %v3584_v37  ;;  %v56398_v12 = vand.u32 4294901760, %v51917_v7 }
 0x4a7   :  { %45445 = vmatprep.subr.bf16.mxu0 %v51858_v61  ;;  %v3598_v46 = vsub.f32 %v51912_v34, %v56397_v18  ;;  %v51934_v1 = vsub.f32 %v51797_v11, %v57147_v3  ;;  %v51939_v37 = vsub.f32 %v51802_v28, %v57148_v15  ;;  %v57150_v11 = vand.u32 4294901760, %v51814_v16 }
 0x4a8   :  { %v51923_v40 = vpack.c.bf16 %v3592_v20, %v3585_v53  ;;  %v3605_v25 = vsub.f32 %v51917_v7, %v56398_v12  ;;  %v57151_v28 = vand.u32 4294901760, %v51816_v56 }
 0x4a9   :  { %v3599_v20 = vand.u32 4294901760, %v3598_v46  ;;  %v56399_v51 = vand.u32 4294901760, %v51934_v1  ;;  %v56404_v53 = vand.u32 4294901760, %v51939_v37  ;;  %v51951_v3 = vsub.f32 %v51814_v16, %v57150_v11 }
 0x4aa   :  { %57146 = vst [vmem:[#allocation85_spill] sm:$0xff] %v51923_v40  ;;  %v3606_v39 = vand.u32 4294901760, %v3605_v25  ;;  %v51956_v46 = vsub.f32 %v51816_v56, %v57151_v28 }
 0x4ab   :  { %v3612_v12 = vsub.f32 %v51934_v1, %v56399_v51  ;;  %v3619_v25 = vsub.f32 %v51939_v37, %v56404_v53 }
 0x4ac   :  { %v51943_v18 = vpack.c.bf16 %v3606_v39, %v3599_v20  ;;  %v56402_v20 = vand.u32 4294901760, %v51951_v3  ;;  %v56403_v39 = vand.u32 4294901760, %v51956_v46 }
 0x4ad   :  { %v3613_v15 = vand.u32 4294901760, %v3612_v12  ;;  %v3620_v51 = vand.u32 4294901760, %v3619_v25  ;;  %v51975_v12 = vpack.c.bf16 %v51839_v55, %v51837_v6  ;;  %v51979_v25 = vpack.c.bf16 %v51853_v58, %v51851_v52 }
 0x4ae   :  { %57149 = vst [vmem:[#allocation86_spill] sm:$0xff] %v51943_v18  ;;  %v3626_v16 = vsub.f32 %v51951_v3, %v56402_v20  ;;  %v3633_v11 = vsub.f32 %v51956_v46, %v56403_v39  ;;  %v51983_v20 = vpack.c.bf16 %v51868_v24, %v51866_v35 }
 0x4af   :  { %v51969_v56 = vpack.c.bf16 %v3620_v51, %v3613_v15  ;;  %57154 = vst [vmem:[#allocation89_spill] sm:$0xff] %v51975_v12  ;;  %57155 = vst [vmem:[#allocation90_spill] sm:$0xff] %v51979_v25  ;;  %v51987_v51 = vpack.c.bf16 %v51883_v8, %v51881_v26  ;;  %v51995_v15 = vpack.c.bf16 %v51917_v7, %v51912_v34 }
 0x4b0   :  { %v3627_v28 = vand.u32 4294901760, %v3626_v16  ;;  %v3634_v42 = vand.u32 4294901760, %v3633_v11  ;;  %57156 = vst [vmem:[#allocation91_spill] sm:$0xff] %v51983_v20  ;;  %v51999_v16 = vpack.c.bf16 %v51939_v37, %v51934_v1  ;;  %v52003_v11 = vpack.c.bf16 %v51956_v46, %v51951_v3 }
 0x4b1   :  { %57152 = vst [vmem:[#allocation87_spill] sm:$0xff] %v51969_v56  ;;  %57157 = vst [vmem:[#allocation92_spill] sm:$0xff] %v51987_v51 }
 0x4b2   :  { %v51971_v14 = vpack.c.bf16 %v3634_v42, %v3627_v28  ;;  %v51991_v42 = vpack.c.bf16 %v51896_v29, %v51893_v19  ;;  %57159 = vst [vmem:[#allocation94_spill] sm:$0xff] %v51995_v15  ;;  %57160 = vst [vmem:[#allocation95_spill] sm:$0xff] %v51999_v16 }
 0x4b3   :  { %57161 = vst [vmem:[#allocation96_spill] sm:$0xff] %v52003_v11 }
 0x4b4   :  { %57153 = vst [vmem:[#allocation88_spill] sm:$0xff] %v51971_v14  ;;  %57158 = vst [vmem:[#allocation93_spill] sm:$0xff] %v51991_v42 }
 0x524   :  { %v3414_v28 = vpop.xlane.xlu0 %3413 }
 0x525   :  { %v3417_v39 = vsub.f32 %v51772_v48, %v3414_v28 }
 0x527   :  { %v3419_v53 = vmul.f32 1.442695, %v3417_v39 }
 0x528   :  { %v3416_v57 = vpop.xlane.xlu0 %3415 }
 0x529   :  { %51056 = vpow2.f32 %v3419_v53  ;;  %v3418_v30 = vsub.f32 %v51770_v2, %v3416_v57 }
 0x52b   :  { %v3421_v22 = vmul.f32 1.442695, %v3418_v30 }
 0x52d   :  { %51058 = vpow2.f32 %v3421_v22 }
 0x533   :  { %v52007_v38 = vpop.eup %51056 }
 0x534   :  { %v52010_v5 = vand.u32 4294901760, %v52007_v38 }
 0x536   :  { %v3505_v4 = vsub.f32 %v52007_v38, %v52010_v5 }
 0x537   :  { %v52014_v63 = vpop.eup %51058 }
 0x538   :  { %v3506_v49 = vand.u32 4294901760, %v3505_v4  ;;  %v52017_v48 = vand.u32 4294901760, %v52014_v63 }
 0x53a   :  { %v3507_v39 = vsub.f32 %v3505_v4, %v3506_v49  ;;  %v3515_v57 = vsub.f32 %v52014_v63, %v52017_v48 }
 0x53c   :  { %v3508_v30 = vand.u32 4294901760, %v3507_v39  ;;  %v3516_v22 = vand.u32 4294901760, %v3515_v57  ;;  %v57165_v39 = vand.u32 4294901760, %v51851_v52  ;;  %v57171_v52 = vand.u32 4294901760, %v51881_v26 }
 0x53d   :  { %v57177_v26 = vand.u32 4294901760, %v51912_v34  ;;  %v57183_v34 = vand.u32 4294901760, %v51951_v3 }
 0x53e   :  { %39036 = vmatprep.mubr.f32.mxu0 %v3508_v30  ;;  %v3517_v2 = vsub.f32 %v3515_v57, %v3516_v22 }
 0x540   :  { %v3518_v53 = vand.u32 4294901760, %v3517_v2 }
 0x542   :  { %39037 = vmatmul.mubr.f32.vlgmr.msra.gmra.mrb[8].mxu0 %v3518_v53 }
 0x543   :  { %45447 = vmatpush3.bf16.msra.mxu0 %v51858_v61  ;;  %39071 = vmatprep.mubr.f32.mxu0 %v52010_v5 }
 0x544   :  { %45449 = vmatprep.subr.bf16.mxu0 %v51873_v23 }
 0x547   :  { %45451 = vmatpush3.bf16.msra.mxu0 %v51873_v23 }
 0x548   :  { %45453 = vmatprep.subr.bf16.mxu0 %v51887_v31 }
 0x54b   :  { %45455 = vmatpush3.bf16.msra.mxu0 %v51887_v31 }
 0x54c   :  { %45457 = vmatprep.subr.bf16.mxu0 %v51919_v47 }
 0x54f   :  { %45459 = vmatpush3.bf16.msra.mxu0 %v51919_v47 }
 0x550   :  { %45461 = vmatprep.subr.bf16.mxu0 %v51923_v40 }
 0x553   :  { %45463 = vmatpush3.bf16.msra.mxu0 %v51923_v40 }
 0x554   :  { %45465 = vmatprep.subr.bf16.mxu0 %v51943_v18 }
 0x557   :  { %45467 = vmatpush3.bf16.msra.mxu0 %v51943_v18 }
 0x558   :  { %45469 = vmatprep.subr.bf16.mxu0 %v51969_v56 }
 0x55b   :  { %45471 = vmatpush3.bf16.msra.mxu0 %v51969_v56 }
 0x55c   :  { %45473 = vmatprep.subr.bf16.mxu0 %v51971_v14 }
 0x55f   :  { %45475 = vmatpush3.bf16.msra.mxu0 %v51971_v14 }
 0x560   :  { %45477 = vmatprep.subr.bf16.mxu0 %v51975_v12 }
 0x562   :  { %39072 = vmatmul.mubr.f32.vlgmr.msra.gmra.mrb[8].mxu0 %v52017_v48 }
 0x563   :  { %45479 = vmatpush3.bf16.msra.mxu0 %v51975_v12  ;;  %39106 = vmatprep.mubr.f32.mxu0 %v3505_v4  ;;  %v57163_v4 = vand.u32 4294901760, %v51839_v55  ;;  %v57168_v55 = vand.u32 4294901760, %v51866_v35  ;;  %v57174_v35 = vand.u32 4294901760, %v51893_v19  ;;  %v57180_v19 = vand.u32 4294901760, %v51934_v1 }
 0x564   :  { %45481 = vmatprep.subr.bf16.mxu0 %v51979_v25 }
 0x567   :  { %45483 = vmatpush3.bf16.msra.mxu0 %v51979_v25 }
 0x568   :  { %45485 = vmatprep.subr.bf16.mxu0 %v51983_v20 }
 0x56b   :  { %45487 = vmatpush3.bf16.msra.mxu0 %v51983_v20 }
 0x56c   :  { %45489 = vmatprep.subr.bf16.mxu0 %v51987_v51 }
 0x56f   :  { %45491 = vmatpush3.bf16.msra.mxu0 %v51987_v51 }
 0x570   :  { %45493 = vmatprep.subr.bf16.mxu0 %v51991_v42 }
 0x573   :  { %45495 = vmatpush3.bf16.msra.mxu0 %v51991_v42 }
 0x574   :  { %45497 = vmatprep.subr.bf16.mxu0 %v51995_v15 }
 0x577   :  { %45499 = vmatpush3.bf16.msra.mxu0 %v51995_v15 }
 0x578   :  { %45501 = vmatprep.subr.bf16.mxu0 %v51999_v16 }
 0x57b   :  { %45503 = vmatpush3.bf16.msra.mxu0 %v51999_v16 }
 0x57c   :  { %45505 = vmatprep.subr.bf16.mxu0 %v52003_v11 }
 0x57f   :  { %45507 = vmatpush3.bf16.msra.mxu0 %v52003_v11 }
 0x580   :  { %45509 = vmatprep.subr.bf16.mxu0 %v51766_v27 }
 0x582   :  { %39107 = vmatmul.mubr.f32.vlgmr.msra.gmra.mrb[8].mxu0 %v3515_v57  ;;  %v57166_v57 = vand.u32 4294901760, %v51853_v58  ;;  %v57172_v58 = vand.u32 4294901760, %v51883_v8  ;;  %v57178_v8 = vand.u32 4294901760, %v51917_v7  ;;  %v57184_v7 = vand.u32 4294901760, %v51956_v46 }
 0x583   :  { %45511 = vmatpush3.bf16.msra.mxu0 %v51766_v27  ;;  %39141 = vmatprep.mubr.f32.mxu0 %v3506_v49  ;;  %v57162_v49 = vand.u32 4294901760, %v51837_v6  ;;  %v57169_v6 = vand.u32 4294901760, %v51868_v24  ;;  %v57175_v24 = vand.u32 4294901760, %v51896_v29  ;;  %v57181_v29 = vand.u32 4294901760, %v51939_v37 }
 0x584   :  { %45513 = vmatprep.subr.bf16.mxu0 %v51776_v13  ;;  %v52081_v30 = vpack.c.bf16 %v57166_v57, %v57165_v39  ;;  %v52130_v39 = vpack.c.bf16 %v57184_v7, %v57183_v34 }
 0x585   :  { %v52073_v28 = vpack.c.bf16 %v57163_v4, %v57162_v49  ;;  %v52090_v2 = vpack.c.bf16 %v57169_v6, %v57168_v55  ;;  %v52106_v53 = vpack.c.bf16 %v57175_v24, %v57174_v35  ;;  %v52114_v49 = vpack.c.bf16 %v57178_v8, %v57177_v26  ;;  %v52164_v6 = vld [vmem:[#allocation2 + $0x1e0] sm:$0xff]  ;;  %v52172_v24 = vld [vmem:[#allocation2 + $0x1f8] sm:$0xff] }
 0x586   :  { %57167 = vst [vmem:[#allocation98_spill] sm:$0xff] %v52081_v30  ;;  %v52122_v4 = vpack.c.bf16 %v57181_v29, %v57180_v19  ;;  %57185 = vst [vmem:[#allocation104_spill] sm:$0xff] %v52130_v39  ;;  %v52175_v8 = vld [vmem:[#allocation2 + $0x200] sm:$0xff]  ;;  %v52177_v19 = vld [vmem:[#allocation2 + $0x208] sm:$0xff]  ;;  %v56423_v29 = vand.u32 4294901760, %v52172_v24 }
 0x587   :  { %45515 = vmatpush3.bf16.msra.mxu0 %v51776_v13  ;;  %57164 = vst [vmem:[#allocation97_spill] sm:$0xff] %v52073_v28  ;;  %57170 = vst [vmem:[#allocation99_spill] sm:$0xff] %v52090_v2  ;;  %v56429_v7 = vand.u32 4294901760, %v52175_v8 }
 0x588   :  { %45517 = vmatprep.subr.bf16.mxu0 %v51780_v54  ;;  %57176 = vst [vmem:[#allocation101_spill] sm:$0xff] %v52106_v53  ;;  %57179 = vst [vmem:[#allocation102_spill] sm:$0xff] %v52114_v49 }
 0x589   :  { %57182 = vst [vmem:[#allocation103_spill] sm:$0xff] %v52122_v4 }
 0x58b   :  { %45519 = vmatpush3.bf16.msra.mxu0 %v51780_v54 }
 0x58c   :  { %45521 = vmatprep.subr.bf16.mxu0 %v51784_v60 }
 0x58f   :  { %45523 = vmatpush3.bf16.msra.mxu0 %v51784_v60 }
 0x590   :  { %45525 = vmatprep.subr.bf16.mxu0 %v51804_v17 }
 0x593   :  { %45527 = vmatpush3.bf16.msra.mxu0 %v51804_v17 }
 0x594   :  { %45529 = vmatprep.subr.bf16.mxu0 %v51812_v50 }
 0x597   :  { %45531 = vmatpush3.bf16.msra.mxu0 %v51812_v50 }
 0x598   :  { %45533 = vmatprep.subr.bf16.mxu0 %v51825_v0 }
 0x59b   :  { %45535 = vmatpush3.bf16.msra.mxu0 %v51825_v0 }
 0x59c   :  { %45537 = vmatprep.subr.bf16.mxu0 %v51835_v10 }
 0x59f   :  { %45539 = vmatpush3.bf16.msra.mxu0 %v51835_v10 }
 0x5a0   :  { %45541 = vmatprep.subr.bf16.mxu0 %v52073_v28 }
 0x5a2   :  { %39142 = vmatmul.mubr.f32.vlgmr.msra.gmra.mrb[8].mxu0 %v3516_v22  ;;  %v52098_v22 = vpack.c.bf16 %v57172_v58, %v57171_v52  ;;  %v52166_v52 = vld [vmem:[#allocation2 + $0x1e8] sm:$0xff]  ;;  %v56422_v58 = vand.u32 4294901760, %v52164_v6 }
 0x5a3   :  { %45543 = vmatpush3.bf16.msra.mxu0 %v52073_v28  ;;  %39176 = vmatprep.mubr.f32.mxu0 %v52010_v5  ;;  %v56421_v35 = vand.u32 4294901760, %v52166_v52 }
 0x5a4   :  { %45545 = vmatprep.subr.bf16.mxu0 %v52081_v30  ;;  %57173 = vst [vmem:[#allocation100_spill] sm:$0xff] %v52098_v22 }
 0x5a5   :  { %v52184_v34 = vpack.c.bf16 %v56421_v35, %v56422_v58 }
 0x5a7   :  { %45547 = vmatpush3.bf16.msra.mxu0 %v52081_v30  ;;  %57186 = vst [vmem:[#allocation105_spill] sm:$0xff] %v52184_v34 }
 0x5a8   :  { %45549 = vmatprep.subr.bf16.mxu0 %v52090_v2 }
 0x5ab   :  { %45551 = vmatpush3.bf16.msra.mxu0 %v52090_v2 }
 0x5ac   :  { %45553 = vmatprep.subr.bf16.mxu0 %v52098_v22 }
 0x5af   :  { %45555 = vmatpush3.bf16.msra.mxu0 %v52098_v22 }
 0x5b0   :  { %45557 = vmatprep.subr.bf16.mxu0 %v52106_v53 }
 0x5b3   :  { %45559 = vmatpush3.bf16.msra.mxu0 %v52106_v53 }
 0x5b4   :  { %45561 = vmatprep.subr.bf16.mxu0 %v52114_v49 }
 0x5b7   :  { %45563 = vmatpush3.bf16.msra.mxu0 %v52114_v49 }
 0x5b8   :  { %45565 = vmatprep.subr.bf16.mxu0 %v52122_v4 }
 0x5bb   :  { %45567 = vmatpush3.bf16.msra.mxu0 %v52122_v4 }
 0x5bc   :  { %45569 = vmatprep.subr.bf16.mxu0 %v52130_v39 }
 0x5bf   :  { %45571 = vmatpush3.bf16.msra.mxu0 %v52130_v39 }
 0x5c0   :  { %45573 = vmatprep.subr.bf16.mxu0 %v51766_v27 }
 0x5c2   :  { %39177 = vmatmul.mubr.f32.vlgmr.msra.gmra.mrb[8].mxu0 %v52017_v48 }
 0x5c3   :  { %45575 = vmatpush3.bf16.msra.mxu0 %v51766_v27  ;;  %39211 = vmatprep.mubr.f32.mxu0 %v52010_v5  ;;  %v4127_v5 = vpop.trf.xlu1 }
 0x5c4   :  { %45577 = vmatprep.subr.bf16.mxu0 %v51776_v13  ;;  %v4144_v1 = vsel %vm1149_vm2, %v4127_v5, 0  ;;  %v56428_v5 = vand.u32 4294901760, %v52177_v19 }
 0x5c5   :  { %v52155_v37 = vand.u32 4294901760, %v4144_v1 }
 0x5c6   :  { %v52205_v35 = vpack.c.bf16 %v56428_v5, %v56429_v7 }
 0x5c7   :  { %45579 = vmatpush3.bf16.msra.mxu0 %v51776_v13  ;;  %v52158_v3 = vsub.f32 %v4144_v1, %v52155_v37 }
 0x5c8   :  { %45581 = vmatprep.subr.bf16.mxu0 %v51780_v54  ;;  %57188 = vst [vmem:[#allocation107_spill] sm:$0xff] %v52205_v35 }
 0x5c9   :  { %v56425_v46 = vand.u32 4294901760, %v52158_v3 }
 0x5cb   :  { %45583 = vmatpush3.bf16.msra.mxu0 %v51780_v54  ;;  %v4225_v57 = vsub.f32 %v52158_v3, %v56425_v46  ;;  %v52211_v46 = vld [vmem:[#allocation2 + $0x228] sm:$0xff] }
 0x5cc   :  { %45585 = vmatprep.subr.bf16.mxu0 %v51784_v60  ;;  %v56446_v7 = vand.u32 4294901760, %v52211_v46 }
 0x5cd   :  { %v4226_v55 = vand.u32 4294901760, %v4225_v57  ;;  %v52194_v57 = vld [vmem:[#allocation2 + $0x210] sm:$0xff] }
 0x5ce   :  { %v56433_v58 = vand.u32 4294901760, %v52194_v57 }
 0x5cf   :  { %45587 = vmatpush3.bf16.msra.mxu0 %v51784_v60  ;;  %39218 = vmatprep.mubr.f32.mxu1 %v4226_v55  ;;  %v52196_v55 = vld [vmem:[#allocation2 + $0x218] sm:$0xff] }
 0x5d0   :  { %45589 = vmatprep.subr.bf16.mxu0 %v51804_v17 }
 0x5d3   :  { %45591 = vmatpush3.bf16.msra.mxu0 %v51804_v17 }
 0x5d4   :  { %45593 = vmatprep.subr.bf16.mxu0 %v51812_v50 }
 0x5d7   :  { %45595 = vmatpush3.bf16.msra.mxu0 %v51812_v50 }
 0x5d8   :  { %45597 = vmatprep.subr.bf16.mxu0 %v51825_v0 }
 0x5db   :  { %45599 = vmatpush3.bf16.msra.mxu0 %v51825_v0 }
 0x5dc   :  { %45601 = vmatprep.subr.bf16.mxu0 %v51835_v10 }
 0x5df   :  { %45603 = vmatpush3.bf16.msra.mxu0 %v51835_v10 }
 0x5e0   :  { %45629 = vmatprep.subr.bf16.mxu0 %v52184_v34 }
 0x5e2   :  { %39212 = vmatmul.mubr.f32.vlgmr.msra.gmra.mrb[8].mxu0 %v52017_v48  ;;  %v52168_v48 = vld [vmem:[#allocation2 + $0x1f0] sm:$0xff] }
 0x5e3   :  { %v56424_v26 = vand.u32 4294901760, %v52168_v48  ;;  %45631 = vmatpush3.bf16.msra.mxu0 %v52184_v34 }
 0x5e5   :  { %v52192_v1 = vpack.c.bf16 %v56423_v29, %v56424_v26  ;;  %v56432_v29 = vand.u32 4294901760, %v52196_v55  ;;  %v52209_v26 = vld [vmem:[#allocation2 + $0x220] sm:$0xff] }
 0x5e6   :  { %v56447_v5 = vand.u32 4294901760, %v52209_v26 }
 0x5e7   :  { %57187 = vst [vmem:[#allocation106_spill] sm:$0xff] %v52192_v1  ;;  %45633 = vmatprep.subr.bf16.mxu0 %v52192_v1  ;;  %v52219_v39 = vpack.c.bf16 %v56432_v29, %v56433_v58  ;;  %v4128_v29 = vpop.trf.xlu1 }
 0x5e8   :  { %45635 = vmatpush3.bf16.msra.mxu0 %v52192_v1  ;;  %v52229_v4 = vpack.c.bf16 %v56446_v7, %v56447_v5  ;;  %v4147_v22 = vsel %vm1149_vm2, %v4128_v29, 0 }
 0x5e9   :  { %45637 = vmatprep.subr.bf16.mxu0 %v52205_v35  ;;  %57189 = vst [vmem:[#allocation108_spill] sm:$0xff] %v52219_v39  ;;  %v52236_v28 = vand.u32 4294901760, %v4147_v22 }
 0x5ea   :  { %57190 = vst [vmem:[#allocation109_spill] sm:$0xff] %v52229_v4 }
 0x5eb   :  { %v4129_v58 = vpop.trf.xlu1  ;;  %v4233_v11 = vsub.f32 %v4147_v22, %v52236_v28 }
 0x5ec   :  { %45639 = vmatpush3.bf16.msra.mxu0 %v52205_v35  ;;  %v4150_v2 = vsel %vm1149_vm2, %v4129_v58, 0 }
 0x5ed   :  { %45641 = vmatprep.subr.bf16.mxu0 %v52219_v39  ;;  %v52238_v7 = vand.u32 4294901760, %v4150_v2  ;;  %v4234_v58 = vand.u32 4294901760, %v4233_v11 }
 0x5ef   :  { %v4130_v30 = vpop.trf.xlu1  ;;  %v4243_v15 = vsub.f32 %v4150_v2, %v52238_v7  ;;  %v4235_v56 = vsub.f32 %v4233_v11, %v4234_v58 }
 0x5f0   :  { %45643 = vmatpush3.bf16.msra.mxu0 %v52219_v39  ;;  %v4153_v5 = vsel %vm1149_vm2, %v4130_v30, 0 }
 0x5f1   :  { %45645 = vmatprep.subr.bf16.mxu0 %v52229_v4  ;;  %v52242_v16 = vand.u32 4294901760, %v4153_v5  ;;  %v4244_v25 = vand.u32 4294901760, %v4243_v15 }
 0x5f3   :  { %v4253_v51 = vsub.f32 %v4153_v5, %v52242_v16  ;;  %v4245_v40 = vsub.f32 %v4243_v15, %v4244_v25 }
 0x5f4   :  { %45647 = vmatpush3.bf16.msra.mxu0 %v52229_v4 }
 0x5f5   :  { %v4254_v22 = vand.u32 4294901760, %v4253_v51  ;;  %v4246_v5 = vand.u32 4294901760, %v4245_v40 }
 0x6b5   :  { %v39213_v49 = vpop.f32.mrb[8].mxu0 }
 0x6b6   :  { %51060 = vrcp.f32 %v39213_v49  ;;  %v4097_v53 = vpop.f32.mrb[9].mxu0 }
 0x6b7   :  { %51062 = vrcp.f32 %v4097_v53 }
 0x6c0   :  { %v51061_v49 = vpop.eup %51060 }
 0x6c1   :  { %v51063_v42 = vpop.eup %51062  ;;  %v4110_v53 = vmul.f32 %v51061_v49, %v52014_v63  ;;  %v4236_v49 = vand.u32 4294901760, %v4235_v56 }
 0x6c2   :  { %v4108_v29 = vmul.f32 %v51063_v42, %v52007_v38  ;;  %v4255_v38 = vsub.f32 %v4253_v51, %v4254_v22 }
 0x6c3   :  { %v4159_v20 = vand.u32 4294901760, %v4110_v53 }
 0x6c4   :  { %v4156_v12 = vand.u32 4294901760, %v4108_v29 }
 0x6c5   :  { %v4271_v14 = vsub.f32 %v4110_v53, %v4159_v20 }
 0x6c6   :  { %v45604_v30 = vpack.c.bf16 %v4159_v20, %v4156_v12  ;;  %v4264_v18 = vsub.f32 %v4108_v29, %v4156_v12  ;;  %v4256_v20 = vand.u32 4294901760, %v4255_v38 }
 0x6c7   :  { %v4272_v47 = vand.u32 4294901760, %v4271_v14 }
 0x6c8   :  { %45605 = vmatprep.subr.bf16.mxu1 %v45604_v30  ;;  %v4265_v2 = vand.u32 4294901760, %v4264_v18  ;;  %v45612_v31 = vpack.c.bf16 %v4271_v14, %v4264_v18 }
 0x6c9   :  { %45607 = vmatpush3.bf16.msra.mxu1 %v45604_v30  ;;  %v4273_v63 = vsub.f32 %v4271_v14, %v4272_v47  ;;  %v117_v14 = vld [vmem:[#allocation2 + $0x238] sm:$0xff] }
 0x6ca   :  { %v4266_v42 = vsub.f32 %v4264_v18, %v4265_v2  ;;  %v45620_v23 = vpack.c.bf16 %v4272_v47, %v4265_v2  ;;  %v118_v18 = vld [vmem:[#allocation2 + $0x240] sm:$0xff]  ;;  %v119_v47 = vld [vmem:[#allocation2 + $0x248] sm:$0xff] }
 0x6cb   :  { %v4274_v41 = vand.u32 4294901760, %v4273_v63  ;;  %v4784_v56 = vand.u32 4294901760, %v118_v18  ;;  %v4787_v12 = vand.u32 4294901760, %v119_v47 }
 0x6cc   :  { %39219 = vmatmul.mubr.f32.vlgmr.msra.gmra.mrb[8].mxu1 %v4236_v49  ;;  %v4267_v62 = vand.u32 4294901760, %v4266_v42 }
 0x6cd   :  { %39221 = vmatprep.mubr.f32.mxu1 %v4246_v5 }
 0x6ce   :  { %v45608_v53 = vpack.c.bf16 %v4274_v41, %v4267_v62  ;;  %v57191_v41 = vand.u32 4294901760, %v52158_v3  ;;  %v116_v62 = vld [vmem:[#allocation2 + $0x230] sm:$0xff] }
 0x6cf   :  { %v4778_v40 = vand.u32 4294901760, %v116_v62 }
 0x6d0   :  { %39222 = vmatmul.mubr.f32.gmra.mrb[10].mxu1 %v4256_v20  ;;  %45609 = vmatprep.subr.bf16.mxu1 %v45608_v53 }
 0x6d1   :  { %45611 = vmatpush3.bf16.msra.mxu1 %v45608_v53  ;;  %39228 = vmatprep.mubr.f32.mxu1 %v52155_v37  ;;  %v52296_v49 = vsub.f32 %v116_v62, %v4778_v40 }
 0x6d2   :  { %45613 = vmatprep.subr.bf16.mxu1 %v45612_v31 }
 0x6d3   :  { %v56487_v42 = vand.u32 4294901760, %v52296_v49 }
 0x6d4   :  { %39229 = vmatmul.mubr.f32.vlgmr.msra.gmra.mrb[8].mxu1 %v52236_v28 }
 0x6d5   :  { %39231 = vmatprep.mubr.f32.mxu1 %v52238_v7  ;;  %45615 = vmatpush3.bf16.msra.mxu1 %v45612_v31  ;;  %v4942_v20 = vsub.f32 %v52296_v49, %v56487_v42 }
 0x6d6   :  { %45617 = vmatprep.subr.bf16.mxu1 %v45604_v30 }
 0x6d7   :  { %v4943_v62 = vand.u32 4294901760, %v4942_v20 }
 0x6d8   :  { %39232 = vmatmul.mubr.f32.gmra.mrb[10].mxu1 %v52242_v16 }
 0x6d9   :  { %39238 = vmatprep.mubr.f32.mxu1 %v52158_v3 }
 0x6dc   :  { %39239 = vmatmul.mubr.f32.vlgmr.msra.gmra.mrb[8].mxu1 %v4233_v11 }
 0x6dd   :  { %45619 = vmatpush3.bf16.msra.mxu1 %v45604_v30  ;;  %39241 = vmatprep.mubr.f32.mxu1 %v4243_v15 }
 0x6de   :  { %45621 = vmatprep.subr.bf16.mxu1 %v45620_v23 }
 0x6e0   :  { %39242 = vmatmul.mubr.f32.gmra.mrb[10].mxu1 %v4253_v51  ;;  %v57194_v51 = vand.u32 4294901760, %v52164_v6 }
 0x6e1   :  { %39248 = vmatprep.mubr.f32.mxu1 %v57191_v41  ;;  %v52308_v41 = vsub.f32 %v118_v18, %v4784_v56 }
 0x6e2   :  { %v52272_v15 = vsub.f32 %v52164_v6, %v57194_v51  ;;  %v52310_v51 = vsub.f32 %v119_v47, %v4787_v12 }
 0x6e4   :  { %39249 = vmatmul.mubr.f32.vlgmr.msra.gmra.mrb[8].mxu1 %v4234_v58  ;;  %v56489_v29 = vand.u32 4294901760, %v52272_v15 }
 0x6e5   :  { %45623 = vmatpush3.bf16.msra.mxu1 %v45620_v23  ;;  %39251 = vmatprep.mubr.f32.mxu1 %v4244_v25  ;;  %v4781_v23 = vand.u32 4294901760, %v117_v14  ;;  %v52267_v25 = vpack.c.bf16 %v4787_v12, %v4784_v56 }
 0x6e6   :  { %45625 = vmatprep.subr.bf16.mxu1 %v45604_v30  ;;  %v4872_v6 = vsub.f32 %v52272_v15, %v56489_v29 }
 0x6e7   :  { %v52263_v31 = vpack.c.bf16 %v4781_v23, %v4778_v40  ;;  %57193 = vst [vmem:[#allocation111_spill] sm:$0xff] %v52267_v25  ;;  %v52298_v38 = vsub.f32 %v117_v14, %v4781_v23  ;;  %v56485_v14 = vand.u32 4294901760, %v52308_v41  ;;  %v56484_v23 = vand.u32 4294901760, %v52310_v51 }
 0x6e8   :  { %39252 = vmatmul.mubr.f32.gmra.mrb[10].mxu1 %v4254_v22  ;;  %v4873_v22 = vand.u32 4294901760, %v4872_v6 }
 0x6e9   :  { %39258 = vmatprep.mubr.f32.mxu1 %v52155_v37  ;;  %57192 = vst [vmem:[#allocation110_spill] sm:$0xff] %v52263_v31  ;;  %45649 = vmatprep.subr.bf16.mxu0 %v52263_v31  ;;  %v56486_v5 = vand.u32 4294901760, %v52298_v38  ;;  %v4956_v6 = vsub.f32 %v52308_v41, %v56485_v14 }
 0x6ea   :  { %45651 = vmatpush3.bf16.msra.mxu0 %v52263_v31 }
 0x6eb   :  { %45653 = vmatprep.subr.bf16.mxu0 %v52267_v25  ;;  %v4949_v53 = vsub.f32 %v52298_v38, %v56486_v5  ;;  %v4957_v56 = vand.u32 4294901760, %v4956_v6  ;;  %v52348_v6 = vpack.c.bf16 %v52310_v51, %v52308_v41  ;;  %v57208_v5 = vand.u32 4294901760, %v52177_v19 }
 0x6ec   :  { %39259 = vmatmul.mubr.f32.vlgmr.msra.gmra.mrb[8].mxu1 %v52236_v28 }
 0x6ed   :  { %45627 = vmatpush3.bf16.msra.mxu1 %v45604_v30  ;;  %39261 = vmatprep.mubr.f32.mxu1 %v52238_v7  ;;  %v4950_v40 = vand.u32 4294901760, %v4949_v53  ;;  %57203 = vst [vmem:[#allocation119_spill] sm:$0xff] %v52348_v6 }
 0x6ee   :  { %45655 = vmatpush3.bf16.msra.mxu0 %v52267_v25 }
 0x6f0   :  { %39262 = vmatmul.mubr.f32.gmra.mrb[10].mxu1 %v52242_v16 }
 0x6f1   :  { %39268 = vmatprep.mubr.f32.mxu1 %v52155_v37  ;;  %v121_v37 = vld [vmem:[#allocation2 + $0x258] sm:$0xff] }
 0x6f4   :  { %39269 = vmatmul.mubr.f32.vlgmr.msra.gmra.mrb[8].mxu1 %v52236_v28  ;;  %v120_v28 = vld [vmem:[#allocation2 + $0x250] sm:$0xff] }
 0x6f5   :  { %39271 = vmatprep.mubr.f32.mxu1 %v52238_v7  ;;  %v4790_v3 = vand.u32 4294901760, %v120_v28  ;;  %v4793_v7 = vand.u32 4294901760, %v121_v37 }
 0x6f7   :  { %v52283_v30 = vpack.c.bf16 %v4793_v7, %v4790_v3  ;;  %v52322_v18 = vsub.f32 %v120_v28, %v4790_v3  ;;  %v52324_v47 = vsub.f32 %v121_v37, %v4793_v7 }
 0x6f8   :  { %39272 = vmatmul.mubr.f32.gmra.mrb[10].mxu1 %v52242_v16  ;;  %v57195_v16 = vand.u32 4294901760, %v52166_v52 }
 0x6f9   :  { %57196 = vst [vmem:[#allocation112_spill] sm:$0xff] %v52283_v30  ;;  %45657 = vmatprep.subr.bf16.mxu0 %v52283_v30 }
 0x6fa   :  { %v52277_v11 = vsub.f32 %v52166_v52, %v57195_v16  ;;  %45659 = vmatpush3.bf16.msra.mxu0 %v52283_v30  ;;  %v52314_v16 = vpack.c.bf16 %v4950_v40, %v4943_v62  ;;  %v52344_v40 = vpack.c.bf16 %v52298_v38, %v52296_v49 }
 0x6fc   :  { %v56488_v58 = vand.u32 4294901760, %v52277_v11  ;;  %57198 = vst [vmem:[#allocation114_spill] sm:$0xff] %v52314_v16  ;;  %v52340_v7 = vpack.c.bf16 %v52277_v11, %v52272_v15  ;;  %57202 = vst [vmem:[#allocation118_spill] sm:$0xff] %v52344_v40 }
 0x6fe   :  { %v4879_v52 = vsub.f32 %v52277_v11, %v56488_v58  ;;  %57201 = vst [vmem:[#allocation117_spill] sm:$0xff] %v52340_v7  ;;  %v105_v58 = vld [vmem:[#allocation2 + $0x1d8] sm:$0xff] }
 0x700   :  { %v4880_v2 = vand.u32 4294901760, %v4879_v52  ;;  %v4963_v52 = vsub.f32 %v52310_v51, %v56484_v23  ;;  %v57207_v23 = vand.u32 4294901760, %v52175_v8 }
 0x702   :  { %v52293_v63 = vpack.c.bf16 %v4880_v2, %v4873_v22  ;;  %v4964_v12 = vand.u32 4294901760, %v4963_v52  ;;  %v56483_v22 = vand.u32 4294901760, %v52322_v18  ;;  %v56482_v2 = vand.u32 4294901760, %v52324_v47 }
 0x703   :  { %v52352_v52 = vpack.c.bf16 %v52324_v47, %v52322_v18  ;;  %v52369_v14 = vsub.f32 %v52175_v8, %v57207_v23  ;;  %v104_v23 = vld [vmem:[#allocation2 + $0x1d0] sm:$0xff] }
 0x704   :  { %57197 = vst [vmem:[#allocation113_spill] sm:$0xff] %v52293_v63  ;;  %45661 = vmatprep.subr.bf16.mxu0 %v52293_v63  ;;  %v52328_v20 = vpack.c.bf16 %v4964_v12, %v4957_v56  ;;  %v4970_v53 = vsub.f32 %v52322_v18, %v56483_v22  ;;  %v4977_v62 = vsub.f32 %v52324_v47, %v56482_v2  ;;  %v57205_v56 = vand.u32 4294901760, %v52168_v48  ;;  %v102_v22 = vld [vmem:[#allocation2 + $0x1c0] sm:$0xff] }
 0x705   :  { %57204 = vst [vmem:[#allocation120_spill] sm:$0xff] %v52352_v52 }
 0x706   :  { %57199 = vst [vmem:[#allocation115_spill] sm:$0xff] %v52328_v20  ;;  %v4971_v28 = vand.u32 4294901760, %v4970_v53  ;;  %v4978_v3 = vand.u32 4294901760, %v4977_v62  ;;  %v52357_v12 = vsub.f32 %v52168_v48, %v57205_v56  ;;  %v57206_v53 = vand.u32 4294901760, %v52172_v24 }
 0x707   :  { %v52374_v48 = vsub.f32 %v52177_v19, %v57208_v5 }
 0x708   :  { %v52336_v37 = vpack.c.bf16 %v4978_v3, %v4971_v28  ;;  %v52362_v62 = vsub.f32 %v52172_v24, %v57206_v53  ;;  %v103_v28 = vld [vmem:[#allocation2 + $0x1c8] sm:$0xff]  ;;  %v56494_v3 = vand.u32 4294901760, %v52357_v12 }
 0x70a   :  { %57200 = vst [vmem:[#allocation116_spill] sm:$0xff] %v52336_v37  ;;  %v56495_v2 = vand.u32 4294901760, %v52362_v62  ;;  %v4886_v29 = vsub.f32 %v52357_v12, %v56494_v3 }
 0x70c   :  { %v4893_v45 = vsub.f32 %v52362_v62, %v56495_v2  ;;  %v4887_v33 = vand.u32 4294901760, %v4886_v29 }
 0x70e   :  { %v4894_v32 = vand.u32 4294901760, %v4893_v45 }
 0x710   :  { %v52440_v9 = vpack.c.bf16 %v4894_v32, %v4887_v33 }
 0x712   :  { %57216 = vst [vmem:[#allocation121_spill] sm:$0xff] %v52440_v9 }
 0x7c7   :  { %v39270_v56 = vpop.f32.mrb[8].mxu1 }
 0x7c8   :  { %v4744_v42 = vmul.f32 %v39270_v56, %v103_v28  ;;  %v4721_v24 = vpop.f32.mrb[9].mxu1 }
 0x7c9   :  { %v4743_v53 = vmul.f32 %v4721_v24, %v102_v22  ;;  %v57209_v22 = vand.u32 4294901760, %v52194_v57  ;;  %v57210_v24 = vand.u32 4294901760, %v52196_v55 }
 0x7ca   :  { %v52382_v8 = vand.u32 4294901760, %v4744_v42 }
 0x7cb   :  { %v52386_v5 = vand.u32 4294901760, %v4743_v53  ;;  %v39273_v28 = vpop.f32.mrb[10].mxu1  ;;  %v52391_v56 = vsub.f32 %v52194_v57, %v57209_v22  ;;  %v52396_v3 = vsub.f32 %v52196_v55, %v57210_v24  ;;  %v57211_v22 = vand.u32 4294901760, %v52369_v14 }
 0x7cc   :  { %v52399_v2 = vsub.f32 %v4744_v42, %v52382_v8  ;;  %v4746_v43 = vmul.f32 %v39273_v28, %v105_v58  ;;  %v4733_v44 = vpop.f32.mrb[11].mxu1  ;;  %v57212_v24 = vand.u32 4294901760, %v52374_v48  ;;  %v57213_v28 = vand.u32 4294901760, %v52209_v26 }
 0x7cd   :  { %v52402_v19 = vsub.f32 %v4743_v53, %v52386_v5  ;;  %v4745_v36 = vmul.f32 %v4733_v44, %v104_v23  ;;  %v4900_v55 = vsub.f32 %v52369_v14, %v57211_v22  ;;  %v57217_v10 = vand.u32 4294901760, %v52391_v56 }
 0x7ce   :  { %v56506_v21 = vand.u32 4294901760, %v52399_v2  ;;  %v52405_v57 = vand.u32 4294901760, %v4746_v43  ;;  %v4907_v42 = vsub.f32 %v52374_v48, %v57212_v24  ;;  %v52427_v22 = vsub.f32 %v52209_v26, %v57213_v28 }
 0x7cf   :  { %v52413_v58 = vand.u32 4294901760, %v4745_v36  ;;  %v57214_v24 = vand.u32 4294901760, %v52211_v46  ;;  %v57215_v45 = vand.u32 4294901760, %v52402_v19  ;;  %v4901_v59 = vand.u32 4294901760, %v4900_v55 }
 0x7d0   :  { %v4841_v29 = vsub.f32 %v52399_v2, %v56506_v21  ;;  %v52422_v23 = vsub.f32 %v4746_v43, %v52405_v57  ;;  %v4908_v61 = vand.u32 4294901760, %v4907_v42  ;;  %v4927_v33 = vand.u32 4294901760, %v52427_v22 }
 0x7d1   :  { %v52432_v53 = vsub.f32 %v52211_v46, %v57214_v24  ;;  %v52435_v44 = vsub.f32 %v4745_v36, %v52413_v58  ;;  %v4831_v21 = vsub.f32 %v52402_v19, %v57215_v45  ;;  %v4914_v46 = vsub.f32 %v52391_v56, %v57217_v10 }
 0x7d2   :  { %v56517_v43 = vand.u32 4294901760, %v52422_v23  ;;  %v57218_v36 = vand.u32 4294901760, %v52396_v3  ;;  %v4842_v0 = vand.u32 4294901760, %v4841_v29  ;;  %v52459_v42 = vpack.c.bf16 %v4908_v61, %v4901_v59 }
 0x7d3   :  { %v4832_v26 = vand.u32 4294901760, %v4831_v21  ;;  %v4850_v28 = vand.u32 4294901760, %v52435_v44  ;;  %v4934_v55 = vand.u32 4294901760, %v52432_v53  ;;  %v4915_v45 = vand.u32 4294901760, %v4914_v46 }
 0x7d4   :  { %v4921_v24 = vsub.f32 %v52396_v3, %v57218_v36  ;;  %v4861_v32 = vsub.f32 %v52422_v23, %v56517_v43  ;;  %57219 = vst [vmem:[#allocation122_spill] sm:$0xff] %v52459_v42  ;;  %v4928_v43 = vsub.f32 %v52427_v22, %v4927_v33 }
 0x7d5   :  { %39306 = vmatprep.mubr.f32.mxu0 %v4832_v26  ;;  %v4851_v21 = vsub.f32 %v52435_v44, %v4850_v28  ;;  %v4935_v26 = vsub.f32 %v52432_v53, %v4934_v55 }
 0x7d6   :  { %39307 = vmatmul.mubr.f32.vlgmr.msra.gmra.mrb[10].mxu0 %v4842_v0  ;;  %v4862_v29 = vand.u32 4294901760, %v4861_v32  ;;  %v4922_v36 = vand.u32 4294901760, %v4921_v24  ;;  %v4929_v61 = vand.u32 4294901760, %v4928_v43  ;;  %v52489_v43 = vpack.c.bf16 %v52362_v62, %v52357_v12 }
 0x7d7   :  { %45663 = vmatpush3.bf16.msra.mxu0 %v52293_v63  ;;  %v4852_v10 = vand.u32 4294901760, %v4851_v21  ;;  %v4936_v0 = vand.u32 4294901760, %v4935_v26  ;;  %v52497_v24 = vpack.c.bf16 %v52374_v48, %v52369_v14  ;;  %v52505_v32 = vpack.c.bf16 %v52396_v3, %v52391_v56 }
 0x7d8   :  { %45665 = vmatprep.subr.bf16.mxu0 %v52440_v9  ;;  %v52471_v59 = vpack.c.bf16 %v4922_v36, %v4915_v45  ;;  %57222 = vst [vmem:[#allocation125_spill] sm:$0xff] %v52489_v43  ;;  %v52511_v21 = vpack.c.bf16 %v52432_v53, %v52427_v22  ;;  %v57228_v45 = vand.u32 4294901760, %v52277_v11  ;;  %v57230_v36 = vand.u32 4294901760, %v52357_v12 }
 0x7d9   :  { %39309 = vmatprep.mubr.f32.mxu0 %v4852_v10  ;;  %v52475_v46 = vpack.c.bf16 %v4936_v0, %v4929_v61  ;;  %57223 = vst [vmem:[#allocation126_spill] sm:$0xff] %v52497_v24  ;;  %57224 = vst [vmem:[#allocation127_spill] sm:$0xff] %v52505_v32  ;;  %v57226_v10 = vand.u32 4294901760, %v52402_v19  ;;  %v57231_v26 = vand.u32 4294901760, %v52362_v62  ;;  %v57233_v0 = vand.u32 4294901760, %v52399_v2 }
 0x7da   :  { %39310 = vmatmul.mubr.f32.gmra.mrb[12].mxu0 %v4862_v29  ;;  %57220 = vst [vmem:[#allocation123_spill] sm:$0xff] %v52471_v59  ;;  %57225 = vst [vmem:[#allocation128_spill] sm:$0xff] %v52511_v21  ;;  %v57235_v11 = vand.u32 4294901760, %v52374_v48  ;;  %v57237_v12 = vand.u32 4294901760, %v52422_v23  ;;  %v57239_v62 = vand.u32 4294901760, %v52396_v3  ;;  %v57242_v48 = vand.u32 4294901760, %v52296_v49 }
 0x7db   :  { %45667 = vmatpush3.bf16.msra.mxu0 %v52440_v9  ;;  %39344 = vmatprep.mubr.f32.mxu0 %v52386_v5  ;;  %57221 = vst [vmem:[#allocation124_spill] sm:$0xff] %v52475_v46  ;;  %v52554_v61 = vpack.c.bf16 %v57231_v26, %v57230_v36  ;;  %v57243_v3 = vand.u32 4294901760, %v52298_v38  ;;  %v57246_v53 = vand.u32 4294901760, %v52310_v51  ;;  %v57248_v49 = vand.u32 4294901760, %v52322_v18  ;;  %v57252_v51 = vld [vmem:[#allocation80_spill] sm:$0xff]  ;;  %v57253_v18 = vld [vmem:[#allocation81_spill] sm:$0xff] }
 0x7dc   :  { %45669 = vmatprep.subr.bf16.mxu0 %v52459_v42  ;;  %v57249_v38 = vand.u32 4294901760, %v52324_v47  ;;  %v122_v47 = vld [vmem:[#allocation2 + $0x260] sm:$0xff] }
 0x7dd   :  { %57232 = vst [vmem:[#allocation130_spill] sm:$0xff] %v52554_v61 }
 0x7df   :  { %45671 = vmatpush3.bf16.msra.mxu0 %v52459_v42 }
 0x7e0   :  { %45673 = vmatprep.subr.bf16.mxu0 %v52471_v59 }
 0x7e3   :  { %45675 = vmatpush3.bf16.msra.mxu0 %v52471_v59 }
 0x7e4   :  { %45677 = vmatprep.subr.bf16.mxu0 %v52475_v46 }
 0x7e7   :  { %45679 = vmatpush3.bf16.msra.mxu0 %v52475_v46 }
 0x7e8   :  { %45681 = vmatprep.subr.bf16.mxu0 %v52314_v16 }
 0x7eb   :  { %45683 = vmatpush3.bf16.msra.mxu0 %v52314_v16 }
 0x7ec   :  { %45685 = vmatprep.subr.bf16.mxu0 %v52328_v20 }
 0x7ef   :  { %45687 = vmatpush3.bf16.msra.mxu0 %v52328_v20 }
 0x7f0   :  { %45689 = vmatprep.subr.bf16.mxu0 %v52336_v37 }
 0x7f3   :  { %45691 = vmatpush3.bf16.msra.mxu0 %v52336_v37 }
 0x7f4   :  { %45693 = vmatprep.subr.bf16.mxu0 %v52340_v7 }
 0x7f6   :  { %39345 = vmatmul.mubr.f32.vlgmr.msra.gmra.mrb[10].mxu0 %v52382_v8 }
 0x7f7   :  { %39347 = vmatprep.mubr.f32.mxu0 %v52413_v58  ;;  %45695 = vmatpush3.bf16.msra.mxu0 %v52340_v7 }
 0x7f8   :  { %45697 = vmatprep.subr.bf16.mxu0 %v52489_v43 }
 0x7fa   :  { %39348 = vmatmul.mubr.f32.gmra.mrb[12].mxu0 %v52405_v57 }
 0x7fb   :  { %45699 = vmatpush3.bf16.msra.mxu0 %v52489_v43  ;;  %39382 = vmatprep.mubr.f32.mxu0 %v52402_v19  ;;  %v57227_v19 = vand.u32 4294901760, %v52272_v15  ;;  %v57234_v15 = vand.u32 4294901760, %v52369_v14  ;;  %v52585_v14 = vpack.c.bf16 %v4934_v55, %v4927_v33 }
 0x7fc   :  { %45701 = vmatprep.subr.bf16.mxu0 %v52497_v24 }
 0x7fd   :  { %v52546_v29 = vpack.c.bf16 %v57228_v45, %v57227_v19  ;;  %57241 = vst [vmem:[#allocation133_spill] sm:$0xff] %v52585_v14  ;;  %v123_v19 = vld [vmem:[#allocation2 + $0x268] sm:$0xff] }
 0x7fe   :  { %v5521_v45 = vsel %vm1660_vm3, %v123_v19, 0 }
 0x7ff   :  { %45703 = vmatpush3.bf16.msra.mxu0 %v52497_v24  ;;  %57229 = vst [vmem:[#allocation129_spill] sm:$0xff] %v52546_v29  ;;  %v52669_v36 = vand.u32 4294901760, %v5521_v45 }
 0x800   :  { %45705 = vmatprep.subr.bf16.mxu0 %v52505_v32 }
 0x801   :  { %57258 = vst [vmem:[#allocation141_spill] sm:$0xff] %v52669_v36  ;;  %v52672_v26 = vsub.f32 %v5521_v45, %v52669_v36 }
 0x803   :  { %45707 = vmatpush3.bf16.msra.mxu0 %v52505_v32  ;;  %57259 = vst [vmem:[#allocation142_spill] sm:$0xff] %v52672_v26 }
 0x804   :  { %45709 = vmatprep.subr.bf16.mxu0 %v52511_v21 }
 0x807   :  { %45711 = vmatpush3.bf16.msra.mxu0 %v52511_v21 }
 0x808   :  { %45713 = vmatprep.subr.bf16.mxu0 %v52344_v40 }
 0x80b   :  { %45715 = vmatpush3.bf16.msra.mxu0 %v52344_v40 }
 0x80c   :  { %45717 = vmatprep.subr.bf16.mxu0 %v52348_v6 }
 0x80f   :  { %45719 = vmatpush3.bf16.msra.mxu0 %v52348_v6 }
 0x810   :  { %45721 = vmatprep.subr.bf16.mxu0 %v52352_v52 }
 0x813   :  { %45723 = vmatpush3.bf16.msra.mxu0 %v52352_v52 }
 0x814   :  { %45725 = vmatprep.subr.bf16.mxu0 %v52184_v34 }
 0x816   :  { %39383 = vmatmul.mubr.f32.vlgmr.msra.gmra.mrb[10].mxu0 %v52399_v2  ;;  %v57238_v2 = vand.u32 4294901760, %v52391_v56  ;;  %v52593_v56 = vpack.c.bf16 %v57243_v3, %v57242_v48 }
 0x817   :  { %39385 = vmatprep.mubr.f32.mxu0 %v52435_v44  ;;  %45727 = vmatpush3.bf16.msra.mxu0 %v52184_v34 }
 0x818   :  { %45729 = vmatprep.subr.bf16.mxu0 %v52192_v1  ;;  %v52577_v44 = vpack.c.bf16 %v57239_v62, %v57238_v2  ;;  %57244 = vst [vmem:[#allocation134_spill] sm:$0xff] %v52593_v56  ;;  %v52675_v2 = vand.u32 4294901760, %v52672_v26 }
 0x81a   :  { %39386 = vmatmul.mubr.f32.gmra.mrb[12].mxu0 %v52422_v23  ;;  %57240 = vst [vmem:[#allocation132_spill] sm:$0xff] %v52577_v44  ;;  %v57245_v23 = vand.u32 4294901760, %v52308_v41  ;;  %v57251_v41 = vld [vmem:[#allocation79_spill] sm:$0xff]  ;;  %57260 = vst [vmem:[#allocation143_spill] sm:$0xff] %v52675_v2 }
 0x81b   :  { %45731 = vmatpush3.bf16.msra.mxu0 %v52192_v1  ;;  %39420 = vmatprep.mubr.f32.mxu0 %v57226_v10  ;;  %v52566_v10 = vpack.c.bf16 %v57235_v11, %v57234_v15 }
 0x81c   :  { %45733 = vmatprep.subr.bf16.mxu0 %v52205_v35  ;;  %v52601_v22 = vpack.c.bf16 %v57246_v53, %v57245_v23 }
 0x81d   :  { %57236 = vst [vmem:[#allocation131_spill] sm:$0xff] %v52566_v10 }
 0x81e   :  { %57247 = vst [vmem:[#allocation135_spill] sm:$0xff] %v52601_v22 }
 0x81f   :  { %45735 = vmatpush3.bf16.msra.mxu0 %v52205_v35 }
 0x820   :  { %45737 = vmatprep.subr.bf16.mxu0 %v52219_v39 }
 0x823   :  { %45739 = vmatpush3.bf16.msra.mxu0 %v52219_v39 }
 0x824   :  { %45741 = vmatprep.subr.bf16.mxu0 %v52229_v4 }
 0x827   :  { %45743 = vmatpush3.bf16.msra.mxu0 %v52229_v4 }
 0x828   :  { %45745 = vmatprep.subr.bf16.mxu0 %v52263_v31 }
 0x82b   :  { %45747 = vmatpush3.bf16.msra.mxu0 %v52263_v31 }
 0x82c   :  { %45749 = vmatprep.subr.bf16.mxu0 %v52267_v25 }
 0x82f   :  { %45751 = vmatpush3.bf16.msra.mxu0 %v52267_v25 }
 0x830   :  { %45753 = vmatprep.subr.bf16.mxu0 %v52283_v30 }
 0x833   :  { %45755 = vmatpush3.bf16.msra.mxu0 %v52283_v30 }
 0x834   :  { %45757 = vmatprep.subr.bf16.mxu0 %v52546_v29 }
 0x836   :  { %39421 = vmatmul.mubr.f32.vlgmr.msra.gmra.mrb[10].mxu0 %v57233_v0 }
 0x837   :  { %39423 = vmatprep.mubr.f32.mxu0 %v4850_v28  ;;  %45759 = vmatpush3.bf16.msra.mxu0 %v52546_v29  ;;  %v52609_v28 = vpack.c.bf16 %v57249_v38, %v57248_v49 }
 0x838   :  { %45761 = vmatprep.subr.bf16.mxu0 %v52554_v61 }
 0x839   :  { %57250 = vst [vmem:[#allocation136_spill] sm:$0xff] %v52609_v28 }
 0x83a   :  { %39424 = vmatmul.mubr.f32.gmra.mrb[12].mxu0 %v57237_v12 }
 0x83b   :  { %45763 = vmatpush3.bf16.msra.mxu0 %v52554_v61  ;;  %39458 = vmatprep.mubr.f32.mxu0 %v52386_v5 }
 0x83c   :  { %45765 = vmatprep.subr.bf16.mxu0 %v52566_v10 }
 0x83f   :  { %45767 = vmatpush3.bf16.msra.mxu0 %v52566_v10 }
 0x840   :  { %45769 = vmatprep.subr.bf16.mxu0 %v52577_v44 }
 0x843   :  { %45771 = vmatpush3.bf16.msra.mxu0 %v52577_v44 }
 0x844   :  { %45773 = vmatprep.subr.bf16.mxu0 %v52585_v14 }
 0x847   :  { %45775 = vmatpush3.bf16.msra.mxu0 %v52585_v14 }
 0x848   :  { %45777 = vmatprep.subr.bf16.mxu0 %v52593_v56 }
 0x84b   :  { %45779 = vmatpush3.bf16.msra.mxu0 %v52593_v56 }
 0x84c   :  { %45781 = vmatprep.subr.bf16.mxu0 %v52601_v22 }
 0x84f   :  { %45783 = vmatpush3.bf16.msra.mxu0 %v52601_v22 }
 0x850   :  { %45785 = vmatprep.subr.bf16.mxu0 %v52609_v28 }
 0x853   :  { %45787 = vmatpush3.bf16.msra.mxu0 %v52609_v28 }
 0x854   :  { %45789 = vmatprep.subr.bf16.mxu0 %v52184_v34 }
 0x856   :  { %39459 = vmatmul.mubr.f32.vlgmr.msra.gmra.mrb[10].mxu0 %v52382_v8 }
 0x857   :  { %39461 = vmatprep.mubr.f32.mxu0 %v52413_v58  ;;  %45791 = vmatpush3.bf16.msra.mxu0 %v52184_v34 }
 0x858   :  { %45793 = vmatprep.subr.bf16.mxu0 %v52192_v1 }
 0x85a   :  { %39462 = vmatmul.mubr.f32.gmra.mrb[12].mxu0 %v52405_v57 }
 0x85b   :  { %45795 = vmatpush3.bf16.msra.mxu0 %v52192_v1  ;;  %39496 = vmatprep.mubr.f32.mxu0 %v52386_v5 }
 0x85c   :  { %45797 = vmatprep.subr.bf16.mxu0 %v52205_v35 }
 0x85f   :  { %45799 = vmatpush3.bf16.msra.mxu0 %v52205_v35 }
 0x860   :  { %45801 = vmatprep.subr.bf16.mxu0 %v52219_v39 }
 0x863   :  { %45803 = vmatpush3.bf16.msra.mxu0 %v52219_v39 }
 0x864   :  { %45805 = vmatprep.subr.bf16.mxu0 %v52229_v4 }
 0x867   :  { %45807 = vmatpush3.bf16.msra.mxu0 %v52229_v4 }
 0x868   :  { %45809 = vmatprep.subr.bf16.mxu0 %v52263_v31 }
 0x86b   :  { %45811 = vmatpush3.bf16.msra.mxu0 %v52263_v31 }
 0x86c   :  { %45813 = vmatprep.subr.bf16.mxu0 %v52267_v25 }
 0x86f   :  { %45815 = vmatpush3.bf16.msra.mxu0 %v52267_v25 }
 0x870   :  { %45817 = vmatprep.subr.bf16.mxu0 %v52283_v30 }
 0x873   :  { %45819 = vmatpush3.bf16.msra.mxu0 %v52283_v30 }
 0x874   :  { %46157 = vmatprep.subr.bf16.mxu0 %v51766_v27 }
 0x876   :  { %39497 = vmatmul.mubr.f32.vlgmr.msra.gmra.mrb[10].mxu0 %v52382_v8  ;;  %v5518_v8 = vsel %vm1660_vm3, %v122_v47, 0 }
 0x877   :  { %39499 = vmatprep.mubr.f32.mxu0 %v52413_v58  ;;  %46159 = vmatpush3.bf16.msra.mxu0 %v51766_v27  ;;  %v52655_v5 = vand.u32 4294901760, %v5518_v8 }
 0x878   :  { %46161 = vmatprep.subr.bf16.mxu0 %v51776_v13 }
 0x879   :  { %57254 = vst [vmem:[#allocation137_spill] sm:$0xff] %v52655_v5 }
 0x87a   :  { %39500 = vmatmul.mubr.f32.gmra.mrb[12].mxu0 %v52405_v57  ;;  %v52658_v57 = vsub.f32 %v5518_v8, %v52655_v5 }
 0x87b   :  { %46163 = vmatpush3.bf16.msra.mxu0 %v51776_v13 }
 0x87c   :  { %46165 = vmatprep.subr.bf16.mxu0 %v51780_v54  ;;  %57255 = vst [vmem:[#allocation138_spill] sm:$0xff] %v52658_v57  ;;  %v52661_v58 = vand.u32 4294901760, %v52658_v57 }
 0x87e   :  { %57256 = vst [vmem:[#allocation139_spill] sm:$0xff] %v52661_v58  ;;  %v5595_v33 = vsub.f32 %v52658_v57, %v52661_v58 }
 0x87f   :  { %46167 = vmatpush3.bf16.msra.mxu0 %v51780_v54 }
 0x880   :  { %46169 = vmatprep.subr.bf16.mxu0 %v51784_v60  ;;  %v52665_v55 = vand.u32 4294901760, %v5595_v33  ;;  %v5605_v33 = vsub.f32 %v52672_v26, %v52675_v2 }
 0x882   :  { %57257 = vst [vmem:[#allocation140_spill] sm:$0xff] %v52665_v55  ;;  %39510 = vmatprep.mubr.f32.mxu1 %v52665_v55  ;;  %v52679_v44 = vand.u32 4294901760, %v5605_v33 }
 0x883   :  { %46171 = vmatpush3.bf16.msra.mxu0 %v51784_v60 }
 0x884   :  { %46173 = vmatprep.subr.bf16.mxu0 %v51804_v17  ;;  %57261 = vst [vmem:[#allocation144_spill] sm:$0xff] %v52679_v44 }
 0x887   :  { %46175 = vmatpush3.bf16.msra.mxu0 %v51804_v17 }
 0x888   :  { %46177 = vmatprep.subr.bf16.mxu0 %v51812_v50 }
 0x88b   :  { %46179 = vmatpush3.bf16.msra.mxu0 %v51812_v50 }
 0x88c   :  { %46181 = vmatprep.subr.bf16.mxu0 %v57251_v41 }
 0x88f   :  { %46183 = vmatpush3.bf16.msra.mxu0 %v57251_v41 }
 0x890   :  { %46185 = vmatprep.subr.bf16.mxu0 %v57252_v51 }
 0x893   :  { %46187 = vmatpush3.bf16.msra.mxu0 %v57252_v51 }
 0x894   :  { %46189 = vmatprep.subr.bf16.mxu0 %v57253_v18 }
 0x949   :  { %v39498_v0 = vpop.f32.mrb[10].mxu0 }
 0x94a   :  { %v5527_v15 = vand.u32 4294901760, %v39498_v0  ;;  %v5495_v11 = vpop.f32.mrb[11].mxu0 }
 0x94b   :  { %v5524_v12 = vand.u32 4294901760, %v5495_v11 }
 0x94c   :  { %v5621_v62 = vsub.f32 %v39498_v0, %v5527_v15 }
 0x94d   :  { %v45820_v48 = vpack.c.bf16 %v5527_v15, %v5524_v12  ;;  %v5614_v3 = vsub.f32 %v5495_v11, %v5524_v12  ;;  %v39501_v23 = vpop.f32.mrb[12].mxu0 }
 0x94e   :  { %v5622_v53 = vand.u32 4294901760, %v5621_v62  ;;  %v5533_v49 = vand.u32 4294901760, %v39501_v23  ;;  %v5507_v38 = vpop.f32.mrb[13].mxu0 }
 0x94f   :  { %v5615_v47 = vand.u32 4294901760, %v5614_v3  ;;  %v5530_v8 = vand.u32 4294901760, %v5507_v38  ;;  %45821 = vmatprep.subr.bf16.mxu1 %v45820_v48  ;;  %v45836_v19 = vpack.c.bf16 %v5621_v62, %v5614_v3 }
 0x950   :  { %v5623_v45 = vsub.f32 %v5621_v62, %v5622_v53  ;;  %v5635_v28 = vsub.f32 %v39501_v23, %v5533_v49  ;;  %45823 = vmatpush3.bf16.msra.mxu1 %v45820_v48 }
 0x951   :  { %v5616_v22 = vsub.f32 %v5614_v3, %v5615_v47  ;;  %v45824_v56 = vpack.c.bf16 %v5533_v49, %v5530_v8  ;;  %v5628_v14 = vsub.f32 %v5507_v38, %v5530_v8  ;;  %v45852_v0 = vpack.c.bf16 %v5622_v53, %v5615_v47 }
 0x952   :  { %v5636_v15 = vand.u32 4294901760, %v5635_v28  ;;  %v5624_v11 = vand.u32 4294901760, %v5623_v45  ;;  %v57266_v45 = vld [vmem:[#allocation31_spill] sm:$0xff] }
 0x953   :  { %v5629_v12 = vand.u32 4294901760, %v5628_v14  ;;  %45825 = vmatprep.subr.bf16.mxu1 %v45824_v56  ;;  %v5617_v10 = vand.u32 4294901760, %v5616_v22  ;;  %v45840_v61 = vpack.c.bf16 %v5635_v28, %v5628_v14 }
 0x954   :  { %v5637_v29 = vsub.f32 %v5635_v28, %v5636_v15  ;;  %45827 = vmatpush3.bf16.msra.mxu1 %v45824_v56 }
 0x955   :  { %v5630_v52 = vsub.f32 %v5628_v14, %v5629_v12  ;;  %v45828_v6 = vpack.c.bf16 %v5624_v11, %v5617_v10  ;;  %v45856_v40 = vpack.c.bf16 %v5636_v15, %v5629_v12  ;;  %v57268_v15 = vld [vmem:[#allocation35_spill] sm:$0xff]  ;;  %v57269_v11 = vld [vmem:[#allocation36_spill] sm:$0xff]  ;;  %v57270_v12 = vld [vmem:[#allocation22_spill] sm:$0xff] }
 0x956   :  { %v5638_v62 = vand.u32 4294901760, %v5637_v29  ;;  %v57264_v29 = vld [vmem:[#allocation29_spill] sm:$0xff] }
 0x957   :  { %39511 = vmatmul.mubr.f32.vlgmr.msra.gmra.mrb[12].mxu1 %v52679_v44  ;;  %45829 = vmatprep.subr.bf16.mxu1 %v45828_v6  ;;  %v5631_v3 = vand.u32 4294901760, %v5630_v52  ;;  %v57263_v52 = vld [vmem:[#allocation28_spill] sm:$0xff] }
 0x958   :  { %45831 = vmatpush3.bf16.msra.mxu1 %v45828_v6  ;;  %39521 = vmatprep.mubr.f32.mxu1 %v52655_v5  ;;  %v57262_v6 = vld [vmem:[#allocation24_spill] sm:$0xff] }
 0x959   :  { %v45832_v23 = vpack.c.bf16 %v5638_v62, %v5631_v3  ;;  %v57271_v62 = vld [vmem:[#allocation25_spill] sm:$0xff] }
 0x95a   :  { %v57272_v3 = vld [vmem:[#allocation21_spill] sm:$0xff] }
 0x95b   :  { %45833 = vmatprep.subr.bf16.mxu1 %v45832_v23 }
 0x95c   :  { %45835 = vmatpush3.bf16.msra.mxu1 %v45832_v23  ;;  %v57273_v23 = vld [vmem:[#allocation23_spill] sm:$0xff] }
 0x95d   :  { %45837 = vmatprep.subr.bf16.mxu1 %v45836_v19 }
 0x95f   :  { %39522 = vmatmul.mubr.f32.vlgmr.msra.gmra.mrb[12].mxu1 %v52669_v36 }
 0x960   :  { %45839 = vmatpush3.bf16.msra.mxu1 %v45836_v19  ;;  %39532 = vmatprep.mubr.f32.mxu1 %v52658_v57  ;;  %v57265_v19 = vld [vmem:[#allocation30_spill] sm:$0xff] }
 0x961   :  { %45841 = vmatprep.subr.bf16.mxu1 %v45840_v61 }
 0x964   :  { %45843 = vmatpush3.bf16.msra.mxu1 %v45840_v61 }
 0x965   :  { %45845 = vmatprep.subr.bf16.mxu1 %v45820_v48 }
 0x967   :  { %39533 = vmatmul.mubr.f32.vlgmr.msra.gmra.mrb[12].mxu1 %v52672_v26 }
 0x968   :  { %45847 = vmatpush3.bf16.msra.mxu1 %v45820_v48  ;;  %39543 = vmatprep.mubr.f32.mxu1 %v52661_v58 }
 0x969   :  { %45849 = vmatprep.subr.bf16.mxu1 %v45824_v56 }
 0x96c   :  { %45851 = vmatpush3.bf16.msra.mxu1 %v45824_v56 }
 0x96d   :  { %45853 = vmatprep.subr.bf16.mxu1 %v45852_v0 }
 0x96f   :  { %39544 = vmatmul.mubr.f32.vlgmr.msra.gmra.mrb[12].mxu1 %v52675_v2 }
 0x970   :  { %45855 = vmatpush3.bf16.msra.mxu1 %v45852_v0  ;;  %39554 = vmatprep.mubr.f32.mxu1 %v52655_v5  ;;  %v57267_v0 = vld [vmem:[#allocation33_spill] sm:$0xff] }
 0x971   :  { %45857 = vmatprep.subr.bf16.mxu1 %v45856_v40 }
 0x974   :  { %45859 = vmatpush3.bf16.msra.mxu1 %v45856_v40 }
 0x975   :  { %45861 = vmatprep.subr.bf16.mxu1 %v45820_v48 }
 0x977   :  { %39555 = vmatmul.mubr.f32.vlgmr.msra.gmra.mrb[12].mxu1 %v52669_v36 }
 0x978   :  { %45863 = vmatpush3.bf16.msra.mxu1 %v45820_v48  ;;  %39565 = vmatprep.mubr.f32.mxu1 %v52655_v5 }
 0x979   :  { %45865 = vmatprep.subr.bf16.mxu1 %v45824_v56 }
 0x97c   :  { %45867 = vmatpush3.bf16.msra.mxu1 %v45824_v56 }
 0x97d   :  { %45869 = vmatprep.subr.bf16.mxu1 %v57262_v6 }
 0x97f   :  { %39566 = vmatmul.mubr.f32.vlgmr.msra.gmra.mrb[12].mxu1 %v52669_v36 }
 0x980   :  { %45871 = vmatpush3.bf16.msra.mxu1 %v57262_v6 }
 0x981   :  { %45873 = vmatprep.subr.bf16.mxu1 %v57263_v52 }
 0x984   :  { %45875 = vmatpush3.bf16.msra.mxu1 %v57263_v52 }
 0x985   :  { %45877 = vmatprep.subr.bf16.mxu1 %v57264_v29 }
 0xa52   :  { %v52697_v40 = vpop.f32.mrb[12].mxu1 }
 0xa53   :  { %v6055_v61 = vsel %vm1660_vm3, %v52697_v40, 0  ;;  %v52701_v10 = vpop.f32.mrb[13].mxu1 }
 0xa54   :  { %v52703_v14 = vand.u32 4294901760, %v6055_v61  ;;  %v6052_v56 = vsel %vm1660_vm3, %v52701_v10, 0 }
 0xa55   :  { %v52707_v22 = vand.u32 4294901760, %v6052_v56 }
 0xa56   :  { %v6137_v28 = vsub.f32 %v6055_v61, %v52703_v14  ;;  %v57274_v61 = vld [vmem:[#allocation26_spill] sm:$0xff] }
 0xa57   :  { %v6127_v48 = vsub.f32 %v6052_v56, %v52707_v22  ;;  %v57275_v56 = vld [vmem:[#allocation27_spill] sm:$0xff] }
 0xa58   :  { %v6138_v53 = vand.u32 4294901760, %v6137_v28 }
 0xa59   :  { %v6128_v49 = vand.u32 4294901760, %v6127_v48 }
 0xa5a   :  { %v6139_v38 = vsub.f32 %v6137_v28, %v6138_v53 }
 0xa5b   :  { %v6129_v47 = vsub.f32 %v6127_v48, %v6128_v49 }
 0xa5c   :  { %v6140_v33 = vand.u32 4294901760, %v6139_v38  ;;  %v57276_v38 = vld [vmem:[#allocation32_spill] sm:$0xff] }
 0xa5d   :  { %v6130_v8 = vand.u32 4294901760, %v6129_v47  ;;  %v57281_v47 = vld [vmem:[#allocation46_spill] sm:$0xff] }
 0xa5f   :  { %39576 = vmatprep.mubr.f32.mxu1 %v6130_v8 }
 0xa60   :  { %39577 = vmatmul.mubr.f32.vlgmr.msra.gmra.mrb[14].mxu1 %v6140_v33 }
 0xa61   :  { %45879 = vmatpush3.bf16.msra.mxu1 %v57264_v29  ;;  %39587 = vmatprep.mubr.f32.mxu1 %v52707_v22 }
 0xa62   :  { %45881 = vmatprep.subr.bf16.mxu1 %v57265_v19 }
 0xa65   :  { %45883 = vmatpush3.bf16.msra.mxu1 %v57265_v19 }
 0xa66   :  { %45885 = vmatprep.subr.bf16.mxu1 %v57266_v45 }
 0xa68   :  { %39588 = vmatmul.mubr.f32.vlgmr.msra.gmra.mrb[14].mxu1 %v52703_v14 }
 0xa69   :  { %45887 = vmatpush3.bf16.msra.mxu1 %v57266_v45  ;;  %39598 = vmatprep.mubr.f32.mxu1 %v6127_v48 }
 0xa6a   :  { %45889 = vmatprep.subr.bf16.mxu1 %v57267_v0 }
 0xa6d   :  { %45891 = vmatpush3.bf16.msra.mxu1 %v57267_v0 }
 0xa6e   :  { %45893 = vmatprep.subr.bf16.mxu1 %v57262_v6 }
 0xa70   :  { %39599 = vmatmul.mubr.f32.vlgmr.msra.gmra.mrb[14].mxu1 %v6137_v28 }
 0xa71   :  { %45895 = vmatpush3.bf16.msra.mxu1 %v57262_v6  ;;  %39609 = vmatprep.mubr.f32.mxu1 %v6128_v49 }
 0xa72   :  { %45897 = vmatprep.subr.bf16.mxu1 %v57263_v52 }
 0xa75   :  { %45899 = vmatpush3.bf16.msra.mxu1 %v57263_v52 }
 0xa76   :  { %45901 = vmatprep.subr.bf16.mxu1 %v57268_v15 }
 0xa78   :  { %39610 = vmatmul.mubr.f32.vlgmr.msra.gmra.mrb[14].mxu1 %v6138_v53 }
 0xa79   :  { %45903 = vmatpush3.bf16.msra.mxu1 %v57268_v15  ;;  %39620 = vmatprep.mubr.f32.mxu1 %v52707_v22 }
 0xa7a   :  { %45905 = vmatprep.subr.bf16.mxu1 %v57269_v11 }
 0xa7d   :  { %45907 = vmatpush3.bf16.msra.mxu1 %v57269_v11 }
 0xa7e   :  { %45909 = vmatprep.subr.bf16.mxu1 %v57262_v6 }
 0xa80   :  { %39621 = vmatmul.mubr.f32.vlgmr.msra.gmra.mrb[14].mxu1 %v52703_v14 }
 0xa81   :  { %45911 = vmatpush3.bf16.msra.mxu1 %v57262_v6  ;;  %39631 = vmatprep.mubr.f32.mxu1 %v52707_v22 }
 0xa82   :  { %45913 = vmatprep.subr.bf16.mxu1 %v57263_v52 }
 0xa85   :  { %45915 = vmatpush3.bf16.msra.mxu1 %v57263_v52 }
 0xa86   :  { %45917 = vmatprep.subr.bf16.mxu1 %v57270_v12 }
 0xa88   :  { %39632 = vmatmul.mubr.f32.vlgmr.msra.gmra.mrb[14].mxu1 %v52703_v14 }
 0xa89   :  { %45919 = vmatpush3.bf16.msra.mxu1 %v57270_v12  ;;  %39642 = vmatprep.mubr.f32.mxu1 %v6130_v8  ;;  %v57283_v8 = vld [vmem:[#allocation51_spill] sm:$0xff] }
 0xa8a   :  { %45921 = vmatprep.subr.bf16.mxu1 %v57271_v62 }
 0xa8d   :  { %45923 = vmatpush3.bf16.msra.mxu1 %v57271_v62 }
 0xa8e   :  { %45925 = vmatprep.subr.bf16.mxu1 %v57272_v3 }
 0xa90   :  { %39643 = vmatmul.mubr.f32.vlgmr.msra.gmra.mrb[16].mxu1 %v6140_v33  ;;  %v57285_v33 = vld [vmem:[#allocation57_spill] sm:$0xff] }
 0xa91   :  { %45927 = vmatpush3.bf16.msra.mxu1 %v57272_v3  ;;  %39653 = vmatprep.mubr.f32.mxu1 %v52707_v22 }
 0xa92   :  { %45929 = vmatprep.subr.bf16.mxu1 %v57273_v23 }
 0xa95   :  { %45931 = vmatpush3.bf16.msra.mxu1 %v57273_v23 }
 0xa96   :  { %45933 = vmatprep.subr.bf16.mxu1 %v57274_v61 }
 0xa98   :  { %39654 = vmatmul.mubr.f32.vlgmr.msra.gmra.mrb[16].mxu1 %v52703_v14 }
 0xa99   :  { %45935 = vmatpush3.bf16.msra.mxu1 %v57274_v61  ;;  %39664 = vmatprep.mubr.f32.mxu1 %v6127_v48  ;;  %v57277_v48 = vld [vmem:[#allocation34_spill] sm:$0xff] }
 0xa9a   :  { %45937 = vmatprep.subr.bf16.mxu1 %v57275_v56 }
 0xa9d   :  { %45939 = vmatpush3.bf16.msra.mxu1 %v57275_v56 }
 0xa9e   :  { %45941 = vmatprep.subr.bf16.mxu1 %v57270_v12 }
 0xaa0   :  { %39665 = vmatmul.mubr.f32.vlgmr.msra.gmra.mrb[16].mxu1 %v6137_v28  ;;  %v57278_v28 = vld [vmem:[#allocation42_spill] sm:$0xff] }
 0xaa1   :  { %45943 = vmatpush3.bf16.msra.mxu1 %v57270_v12  ;;  %39675 = vmatprep.mubr.f32.mxu1 %v6128_v49  ;;  %v57280_v49 = vld [vmem:[#allocation45_spill] sm:$0xff] }
 0xaa2   :  { %45945 = vmatprep.subr.bf16.mxu1 %v57271_v62 }
 0xaa5   :  { %45947 = vmatpush3.bf16.msra.mxu1 %v57271_v62 }
 0xaa6   :  { %45949 = vmatprep.subr.bf16.mxu1 %v57276_v38 }
 0xaa8   :  { %39676 = vmatmul.mubr.f32.vlgmr.msra.gmra.mrb[16].mxu1 %v6138_v53  ;;  %v57279_v53 = vld [vmem:[#allocation43_spill] sm:$0xff] }
 0xaa9   :  { %45951 = vmatpush3.bf16.msra.mxu1 %v57276_v38  ;;  %39686 = vmatprep.mubr.f32.mxu1 %v52707_v22 }
 0xaaa   :  { %45953 = vmatprep.subr.bf16.mxu1 %v57277_v48 }
 0xaad   :  { %45955 = vmatpush3.bf16.msra.mxu1 %v57277_v48  ;;  %v57286_v48 = vld [vmem:[#allocation41_spill] sm:$0xff] }
 0xaae   :  { %45957 = vmatprep.subr.bf16.mxu1 %v57270_v12 }
 0xab0   :  { %39687 = vmatmul.mubr.f32.vlgmr.msra.gmra.mrb[16].mxu1 %v52703_v14 }
 0xab1   :  { %45959 = vmatpush3.bf16.msra.mxu1 %v57270_v12  ;;  %39697 = vmatprep.mubr.f32.mxu1 %v52707_v22  ;;  %v57282_v22 = vld [vmem:[#allocation50_spill] sm:$0xff] }
 0xab2   :  { %45961 = vmatprep.subr.bf16.mxu1 %v57271_v62 }
 0xab5   :  { %45963 = vmatpush3.bf16.msra.mxu1 %v57271_v62 }
 0xab6   :  { %45965 = vmatprep.subr.bf16.mxu1 %v57278_v28 }
 0xab8   :  { %39698 = vmatmul.mubr.f32.vlgmr.msra.gmra.mrb[16].mxu1 %v52703_v14  ;;  %v57284_v14 = vld [vmem:[#allocation56_spill] sm:$0xff] }
 0xab9   :  { %45967 = vmatpush3.bf16.msra.mxu1 %v57278_v28 }
 0xaba   :  { %45969 = vmatprep.subr.bf16.mxu1 %v57279_v53 }
 0xabd   :  { %45971 = vmatpush3.bf16.msra.mxu1 %v57279_v53 }
 0xabe   :  { %45973 = vmatprep.subr.bf16.mxu1 %v57280_v49 }
 0xac1   :  { %45975 = vmatpush3.bf16.msra.mxu1 %v57280_v49 }
 0xac2   :  { %45977 = vmatprep.subr.bf16.mxu1 %v57281_v47 }
 0xac5   :  { %45979 = vmatpush3.bf16.msra.mxu1 %v57281_v47 }
 0xac6   :  { %45981 = vmatprep.subr.bf16.mxu1 %v57282_v22 }
 0xac9   :  { %45983 = vmatpush3.bf16.msra.mxu1 %v57282_v22 }
 0xaca   :  { %45985 = vmatprep.subr.bf16.mxu1 %v57283_v8 }
 0xacd   :  { %45987 = vmatpush3.bf16.msra.mxu1 %v57283_v8 }
 0xace   :  { %45989 = vmatprep.subr.bf16.mxu1 %v57284_v14 }
 0xad1   :  { %45991 = vmatpush3.bf16.msra.mxu1 %v57284_v14 }
 0xad2   :  { %45993 = vmatprep.subr.bf16.mxu1 %v57285_v33 }
 0xad5   :  { %45995 = vmatpush3.bf16.msra.mxu1 %v57285_v33 }
 0xad6   :  { %45997 = vmatprep.subr.bf16.mxu1 %v57286_v48 }
 0xb5b   :  { %v39633_v38 = vpop.f32.mrb[14].mxu1 }
 0xb5c   :  { %v6575_v56 = vpop.f32.mrb[15].mxu1  ;;  %v7114_v23 = vmul.f32 %v39633_v38, %v39633_v38 }
 0xb5d   :  { %v7113_v0 = vmul.f32 %v6575_v56, %v6575_v56 }
 0xb8b   :  { %v39699_v61 = vpop.f32.mrb[16].mxu1 }
 0xb8c   :  { %v7116_v11 = vmul.f32 %v39699_v61, %v39699_v61  ;;  %v7103_v15 = vpop.f32.mrb[17].mxu1 }
 0xb8d   :  { %v7115_v45 = vmul.f32 %v7103_v15, %v7103_v15  ;;  %v57292_v15 = vld [vmem:[#allocation53_spill] sm:$0xff] }
 0xb8e   :  { %v7118_v19 = vadd.f32 %v7116_v11, %v7114_v23  ;;  %v57293_v11 = vld [vmem:[#allocation54_spill] sm:$0xff]  ;;  %v57294_v23 = vld [vmem:[#allocation55_spill] sm:$0xff] }
 0xb8f   :  { %v7117_v29 = vadd.f32 %v7115_v45, %v7113_v0  ;;  %v57287_v45 = vld [vmem:[#allocation44_spill] sm:$0xff]  ;;  %v57290_v0 = vld [vmem:[#allocation49_spill] sm:$0xff] }
 0xb90   :  { %v52783_v52 = vand.u32 4294901760, %v7118_v19 }
 0xb91   :  { %v52785_v6 = vand.u32 4294901760, %v7117_v29 }
 0xb92   :  { %v52788_v2 = vsub.f32 %v7118_v19, %v52783_v52  ;;  %v57288_v19 = vld [vmem:[#allocation47_spill] sm:$0xff] }
 0xb93   :  { %v7201_v58 = vsub.f32 %v7117_v29, %v52785_v6  ;;  %v57289_v29 = vld [vmem:[#allocation48_spill] sm:$0xff] }
 0xb94   :  { %v7212_v26 = vand.u32 4294901760, %v52788_v2 }
 0xb95   :  { %v7202_v57 = vand.u32 4294901760, %v7201_v58 }
 0xb96   :  { %v7213_v38 = vsub.f32 %v52788_v2, %v7212_v26 }
 0xb97   :  { %v7203_v61 = vsub.f32 %v7201_v58, %v7202_v57 }
 0xb98   :  { %v7214_v56 = vand.u32 4294901760, %v7213_v38  ;;  %v57295_v38 = vld [vmem:[#allocation58_spill] sm:$0xff] }
 0xb99   :  { %v7204_v36 = vand.u32 4294901760, %v7203_v61  ;;  %v57296_v61 = vld [vmem:[#allocation59_spill] sm:$0xff] }
 0xb9b   :  { %39732 = vmatprep.mubr.f32.mxu1 %v7204_v36  ;;  %v57291_v36 = vld [vmem:[#allocation52_spill] sm:$0xff] }
 0xb9c   :  { %39733 = vmatmul.mubr.f32.vlgmr.msra.gmra.mrb[18].mxu1 %v7214_v56  ;;  %v57297_v56 = vld [vmem:[#allocation60_spill] sm:$0xff] }
 0xb9d   :  { %45999 = vmatpush3.bf16.msra.mxu1 %v57286_v48  ;;  %39767 = vmatprep.mubr.f32.mxu1 %v52785_v6 }
 0xb9e   :  { %46001 = vmatprep.subr.bf16.mxu1 %v57287_v45 }
 0xba1   :  { %46003 = vmatpush3.bf16.msra.mxu1 %v57287_v45 }
 0xba2   :  { %46005 = vmatprep.subr.bf16.mxu1 %v57288_v19 }
 0xba5   :  { %46007 = vmatpush3.bf16.msra.mxu1 %v57288_v19 }
 0xba6   :  { %46009 = vmatprep.subr.bf16.mxu1 %v57289_v29 }
 0xba9   :  { %46011 = vmatpush3.bf16.msra.mxu1 %v57289_v29 }
 0xbaa   :  { %46013 = vmatprep.subr.bf16.mxu1 %v57290_v0 }
 0xbad   :  { %46015 = vmatpush3.bf16.msra.mxu1 %v57290_v0 }
 0xbae   :  { %46017 = vmatprep.subr.bf16.mxu1 %v57291_v36 }
 0xbb1   :  { %46019 = vmatpush3.bf16.msra.mxu1 %v57291_v36  ;;  %v57312_v36 = vld [vmem:[#allocation84_spill] sm:$0xff] }
 0xbb2   :  { %46021 = vmatprep.subr.bf16.mxu1 %v57292_v15 }
 0xbb5   :  { %46023 = vmatpush3.bf16.msra.mxu1 %v57292_v15  ;;  %v57299_v15 = vld [vmem:[#allocation62_spill] sm:$0xff] }
 0xbb6   :  { %46025 = vmatprep.subr.bf16.mxu1 %v57293_v11 }
 0xbb9   :  { %46027 = vmatpush3.bf16.msra.mxu1 %v57293_v11  ;;  %v57298_v11 = vld [vmem:[#allocation61_spill] sm:$0xff] }
 0xbba   :  { %46029 = vmatprep.subr.bf16.mxu1 %v57294_v23 }
 0xbbc   :  { %39768 = vmatmul.mubr.f32.vlgmr.msra.gmra.mrb[18].mxu1 %v52783_v52 }
 0xbbd   :  { %46031 = vmatpush3.bf16.msra.mxu1 %v57294_v23  ;;  %39802 = vmatprep.mubr.f32.mxu1 %v7201_v58  ;;  %v57300_v58 = vld [vmem:[#allocation63_spill] sm:$0xff] }
 0xbbe   :  { %46033 = vmatprep.subr.bf16.mxu1 %v57295_v38 }
 0xbc1   :  { %46035 = vmatpush3.bf16.msra.mxu1 %v57295_v38  ;;  %v57301_v38 = vld [vmem:[#allocation64_spill] sm:$0xff] }
 0xbc2   :  { %46037 = vmatprep.subr.bf16.mxu1 %v57296_v61 }
 0xbc5   :  { %46039 = vmatpush3.bf16.msra.mxu1 %v57296_v61 }
 0xbc6   :  { %46041 = vmatprep.subr.bf16.mxu1 %v57297_v56 }
 0xbc9   :  { %46043 = vmatpush3.bf16.msra.mxu1 %v57297_v56 }
 0xbca   :  { %46045 = vmatprep.subr.bf16.mxu1 %v57298_v11 }
 0xbcd   :  { %46047 = vmatpush3.bf16.msra.mxu1 %v57298_v11 }
 0xbce   :  { %46049 = vmatprep.subr.bf16.mxu1 %v57299_v15 }
 0xbd1   :  { %46051 = vmatpush3.bf16.msra.mxu1 %v57299_v15  ;;  %v57306_v15 = vld [vmem:[#allocation69_spill] sm:$0xff] }
 0xbd2   :  { %46053 = vmatprep.subr.bf16.mxu1 %v57300_v58 }
 0xbd5   :  { %46055 = vmatpush3.bf16.msra.mxu1 %v57300_v58  ;;  %v57305_v58 = vld [vmem:[#allocation68_spill] sm:$0xff] }
 0xbd6   :  { %46057 = vmatprep.subr.bf16.mxu1 %v57301_v38 }
 0xbd9   :  { %46059 = vmatpush3.bf16.msra.mxu1 %v57301_v38  ;;  %v57304_v38 = vld [vmem:[#allocation67_spill] sm:$0xff] }
 0xbda   :  { %46061 = vmatprep.subr.bf16.mxu1 %v57278_v28 }
 0xbdc   :  { %39803 = vmatmul.mubr.f32.vlgmr.msra.gmra.mrb[18].mxu1 %v52788_v2  ;;  %v57303_v2 = vld [vmem:[#allocation66_spill] sm:$0xff] }
 0xbdd   :  { %46063 = vmatpush3.bf16.msra.mxu1 %v57278_v28  ;;  %39837 = vmatprep.mubr.f32.mxu1 %v7202_v57  ;;  %v57302_v57 = vld [vmem:[#allocation65_spill] sm:$0xff] }
 0xbde   :  { %46065 = vmatprep.subr.bf16.mxu1 %v57279_v53 }
 0xbe1   :  { %46067 = vmatpush3.bf16.msra.mxu1 %v57279_v53 }
 0xbe2   :  { %46069 = vmatprep.subr.bf16.mxu1 %v57280_v49 }
 0xbe5   :  { %46071 = vmatpush3.bf16.msra.mxu1 %v57280_v49 }
 0xbe6   :  { %46073 = vmatprep.subr.bf16.mxu1 %v57281_v47 }
 0xbe9   :  { %46075 = vmatpush3.bf16.msra.mxu1 %v57281_v47 }
 0xbea   :  { %46077 = vmatprep.subr.bf16.mxu1 %v57282_v22 }
 0xbed   :  { %46079 = vmatpush3.bf16.msra.mxu1 %v57282_v22 }
 0xbee   :  { %46081 = vmatprep.subr.bf16.mxu1 %v57283_v8 }
 0xbf1   :  { %46083 = vmatpush3.bf16.msra.mxu1 %v57283_v8 }
 0xbf2   :  { %46085 = vmatprep.subr.bf16.mxu1 %v57284_v14 }
 0xbf5   :  { %46087 = vmatpush3.bf16.msra.mxu1 %v57284_v14 }
 0xbf6   :  { %46089 = vmatprep.subr.bf16.mxu1 %v57285_v33 }
 0xbf9   :  { %46091 = vmatpush3.bf16.msra.mxu1 %v57285_v33 }
 0xbfa   :  { %46093 = vmatprep.subr.bf16.mxu1 %v57302_v57 }
 0xbfc   :  { %39838 = vmatmul.mubr.f32.vlgmr.msra.gmra.mrb[18].mxu1 %v7212_v26  ;;  %v57307_v26 = vld [vmem:[#allocation70_spill] sm:$0xff] }
 0xbfd   :  { %46095 = vmatpush3.bf16.msra.mxu1 %v57302_v57  ;;  %39872 = vmatprep.mubr.f32.mxu1 %v52785_v6  ;;  %v57308_v57 = vld [vmem:[#allocation71_spill] sm:$0xff] }
 0xbfe   :  { %46097 = vmatprep.subr.bf16.mxu1 %v57303_v2 }
 0xc01   :  { %46099 = vmatpush3.bf16.msra.mxu1 %v57303_v2  ;;  %v57309_v2 = vld [vmem:[#allocation72_spill] sm:$0xff] }
 0xc02   :  { %46101 = vmatprep.subr.bf16.mxu1 %v57304_v38 }
 0xc05   :  { %46103 = vmatpush3.bf16.msra.mxu1 %v57304_v38 }
 0xc06   :  { %46105 = vmatprep.subr.bf16.mxu1 %v57305_v58 }
 0xc09   :  { %46107 = vmatpush3.bf16.msra.mxu1 %v57305_v58 }
 0xc0a   :  { %46109 = vmatprep.subr.bf16.mxu1 %v57306_v15 }
 0xc0d   :  { %46111 = vmatpush3.bf16.msra.mxu1 %v57306_v15 }
 0xc0e   :  { %46113 = vmatprep.subr.bf16.mxu1 %v57307_v26 }
 0xc11   :  { %46115 = vmatpush3.bf16.msra.mxu1 %v57307_v26 }
 0xc12   :  { %46117 = vmatprep.subr.bf16.mxu1 %v57308_v57 }
 0xc15   :  { %46119 = vmatpush3.bf16.msra.mxu1 %v57308_v57 }
 0xc16   :  { %46121 = vmatprep.subr.bf16.mxu1 %v57309_v2 }
 0xc19   :  { %46123 = vmatpush3.bf16.msra.mxu1 %v57309_v2 }
 0xc1a   :  { %46125 = vmatprep.subr.bf16.mxu1 %v57278_v28 }
 0xc1c   :  { %39873 = vmatmul.mubr.f32.vlgmr.msra.gmra.mrb[18].mxu1 %v52783_v52 }
 0xc1d   :  { %46127 = vmatpush3.bf16.msra.mxu1 %v57278_v28  ;;  %39907 = vmatprep.mubr.f32.mxu1 %v52785_v6 }
 0xc1e   :  { %46129 = vmatprep.subr.bf16.mxu1 %v57279_v53 }
 0xc21   :  { %46131 = vmatpush3.bf16.msra.mxu1 %v57279_v53 }
 0xc22   :  { %46133 = vmatprep.subr.bf16.mxu1 %v57280_v49 }
 0xc25   :  { %46135 = vmatpush3.bf16.msra.mxu1 %v57280_v49 }
 0xc26   :  { %46137 = vmatprep.subr.bf16.mxu1 %v57281_v47 }
 0xc29   :  { %46139 = vmatpush3.bf16.msra.mxu1 %v57281_v47 }
 0xc2a   :  { %46141 = vmatprep.subr.bf16.mxu1 %v57282_v22 }
 0xc2d   :  { %46143 = vmatpush3.bf16.msra.mxu1 %v57282_v22 }
 0xc2e   :  { %46145 = vmatprep.subr.bf16.mxu1 %v57283_v8 }
 0xc31   :  { %46147 = vmatpush3.bf16.msra.mxu1 %v57283_v8 }
 0xc32   :  { %46149 = vmatprep.subr.bf16.mxu1 %v57284_v14 }
 0xc35   :  { %46151 = vmatpush3.bf16.msra.mxu1 %v57284_v14 }
 0xc36   :  { %46153 = vmatprep.subr.bf16.mxu1 %v57285_v33 }
 0xc39   :  { %46155 = vmatpush3.bf16.msra.mxu1 %v57285_v33 }
 0xc3c   :  { %39908 = vmatmul.mubr.f32.vlgmr.msra.gmra.mrb[18].mxu1 %v52783_v52 }
 0xd0f   :  { %v39909_v6 = vpop.f32.mrb[18].mxu1 }
 0xd10   :  { %7805 = vmax.xlane.f32.xlu1 %v39909_v6  ;;  %v7793_v2 = vpop.f32.mrb[19].mxu1 }
 0xd11   :  { %7803 = vmax.xlane.f32.xlu0 %v7793_v2 }
 0xd3e   :  { %8501 = vxpose.xlu0.b32.start [1/2] (short) (narrow) %v52701_v10, 32 }
 0xd42   :  { %8502 = vxpose.xlu0.b32.end [2/2] (short) (narrow) %v52697_v40, 32 }
 0xd9d   :  { %v7806_v57 = vpop.xlane.xlu1 %7805 }
 0xd9e   :  { %v7808_v26 = vsub.f32 %v39909_v6, %v7806_v57  ;;  %v7804_v15 = vpop.xlane.xlu0 %7803  ;;  %v57311_v6 = vld [vmem:[#allocation83_spill] sm:$0xff] }
 0xd9f   :  { %v7807_v58 = vsub.f32 %v7793_v2, %v7804_v15 }
 0xda0   :  { %v7811_v38 = vmul.f32 1.442695, %v7808_v26  ;;  %v57310_v26 = vld [vmem:[#allocation82_spill] sm:$0xff] }
 0xda1   :  { %v7809_v11 = vmul.f32 1.442695, %v7807_v58 }
 0xda2   :  { %51064 = vpow2.f32 %v7811_v38 }
 0xda3   :  { %51066 = vpow2.f32 %v7809_v11 }
 0xdac   :  { %v52881_v56 = vpop.eup %51064 }
 0xdad   :  { %v52883_v61 = vpop.eup %51066  ;;  %v52886_v52 = vand.u32 4294901760, %v52881_v56 }
 0xdae   :  { %v52889_v23 = vand.u32 4294901760, %v52883_v61 }
 0xdaf   :  { %v52893_v40 = vsub.f32 %v52881_v56, %v52886_v52 }
 0xdb0   :  { %v7895_v10 = vsub.f32 %v52883_v61, %v52889_v23 }
 0xdb1   :  { %v7906_v15 = vand.u32 4294901760, %v52893_v40 }
 0xdb2   :  { %v7896_v11 = vand.u32 4294901760, %v7895_v10 }
 0xdb3   :  { %v7907_v38 = vsub.f32 %v52893_v40, %v7906_v15 }
 0xdb4   :  { %v7897_v58 = vsub.f32 %v7895_v10, %v7896_v11 }
 0xdb5   :  { %v7908_v2 = vand.u32 4294901760, %v7907_v38  ;;  %v57314_v38 = vld [vmem:[#allocation86_spill] sm:$0xff] }
 0xdb6   :  { %v7898_v57 = vand.u32 4294901760, %v7897_v58  ;;  %v57313_v58 = vld [vmem:[#allocation85_spill] sm:$0xff] }
 0xdb8   :  { %39942 = vmatprep.mubr.f32.mxu0 %v7898_v57  ;;  %v57315_v57 = vld [vmem:[#allocation87_spill] sm:$0xff] }
 0xdb9   :  { %39943 = vmatmul.mubr.f32.vlgmr.msra.gmra.mrb[14].mxu0 %v7908_v2  ;;  %v57316_v2 = vld [vmem:[#allocation88_spill] sm:$0xff] }
 0xdba   :  { %46191 = vmatpush3.bf16.msra.mxu0 %v57253_v18  ;;  %39977 = vmatprep.mubr.f32.mxu0 %v52889_v23 }
 0xdbb   :  { %46193 = vmatprep.subr.bf16.mxu0 %v57310_v26 }
 0xdbe   :  { %46195 = vmatpush3.bf16.msra.mxu0 %v57310_v26 }
 0xdbf   :  { %46197 = vmatprep.subr.bf16.mxu0 %v57311_v6 }
 0xdc2   :  { %46199 = vmatpush3.bf16.msra.mxu0 %v57311_v6  ;;  %v57317_v6 = vld [vmem:[#allocation89_spill] sm:$0xff] }
 0xdc3   :  { %46201 = vmatprep.subr.bf16.mxu0 %v57312_v36 }
 0xdc6   :  { %46203 = vmatpush3.bf16.msra.mxu0 %v57312_v36  ;;  %v57322_v36 = vld [vmem:[#allocation94_spill] sm:$0xff] }
 0xdc7   :  { %46205 = vmatprep.subr.bf16.mxu0 %v57313_v58 }
 0xdca   :  { %46207 = vmatpush3.bf16.msra.mxu0 %v57313_v58  ;;  %v57318_v58 = vld [vmem:[#allocation90_spill] sm:$0xff] }
 0xdcb   :  { %46209 = vmatprep.subr.bf16.mxu0 %v57314_v38 }
 0xdce   :  { %46211 = vmatpush3.bf16.msra.mxu0 %v57314_v38  ;;  %v57319_v38 = vld [vmem:[#allocation91_spill] sm:$0xff] }
 0xdcf   :  { %46213 = vmatprep.subr.bf16.mxu0 %v57315_v57 }
 0xdd2   :  { %46215 = vmatpush3.bf16.msra.mxu0 %v57315_v57  ;;  %v57320_v57 = vld [vmem:[#allocation92_spill] sm:$0xff] }
 0xdd3   :  { %46217 = vmatprep.subr.bf16.mxu0 %v57316_v2 }
 0xdd6   :  { %46219 = vmatpush3.bf16.msra.mxu0 %v57316_v2  ;;  %v57321_v2 = vld [vmem:[#allocation93_spill] sm:$0xff] }
 0xdd7   :  { %46221 = vmatprep.subr.bf16.mxu0 %v57317_v6 }
 0xdd9   :  { %39978 = vmatmul.mubr.f32.vlgmr.msra.gmra.mrb[14].mxu0 %v52886_v52 }
 0xdda   :  { %46223 = vmatpush3.bf16.msra.mxu0 %v57317_v6  ;;  %40012 = vmatprep.mubr.f32.mxu0 %v7895_v10  ;;  %v57323_v10 = vld [vmem:[#allocation95_spill] sm:$0xff] }
 0xddb   :  { %46225 = vmatprep.subr.bf16.mxu0 %v57318_v58 }
 0xdde   :  { %46227 = vmatpush3.bf16.msra.mxu0 %v57318_v58  ;;  %v57324_v58 = vld [vmem:[#allocation96_spill] sm:$0xff] }
 0xddf   :  { %46229 = vmatprep.subr.bf16.mxu0 %v57319_v38 }
 0xde2   :  { %46231 = vmatpush3.bf16.msra.mxu0 %v57319_v38 }
 0xde3   :  { %46233 = vmatprep.subr.bf16.mxu0 %v57320_v57 }
 0xde6   :  { %46235 = vmatpush3.bf16.msra.mxu0 %v57320_v57 }
 0xde7   :  { %46237 = vmatprep.subr.bf16.mxu0 %v57321_v2 }
 0xdea   :  { %46239 = vmatpush3.bf16.msra.mxu0 %v57321_v2 }
 0xdeb   :  { %46241 = vmatprep.subr.bf16.mxu0 %v57322_v36 }
 0xdee   :  { %46243 = vmatpush3.bf16.msra.mxu0 %v57322_v36  ;;  %v57329_v36 = vld [vmem:[#allocation101_spill] sm:$0xff] }
 0xdef   :  { %46245 = vmatprep.subr.bf16.mxu0 %v57323_v10 }
 0xdf2   :  { %46247 = vmatpush3.bf16.msra.mxu0 %v57323_v10  ;;  %v57328_v10 = vld [vmem:[#allocation100_spill] sm:$0xff] }
 0xdf3   :  { %46249 = vmatprep.subr.bf16.mxu0 %v57324_v58 }
 0xdf6   :  { %46251 = vmatpush3.bf16.msra.mxu0 %v57324_v58  ;;  %v57327_v58 = vld [vmem:[#allocation99_spill] sm:$0xff] }
 0xdf7   :  { %46253 = vmatprep.subr.bf16.mxu0 %v51766_v27 }
 0xdf9   :  { %40013 = vmatmul.mubr.f32.vlgmr.msra.gmra.mrb[14].mxu0 %v52893_v40  ;;  %v57325_v40 = vld [vmem:[#allocation97_spill] sm:$0xff] }
 0xdfa   :  { %46255 = vmatpush3.bf16.msra.mxu0 %v51766_v27  ;;  %40047 = vmatprep.mubr.f32.mxu0 %v7896_v11  ;;  %v57326_v11 = vld [vmem:[#allocation98_spill] sm:$0xff] }
 0xdfb   :  { %46257 = vmatprep.subr.bf16.mxu0 %v51776_v13 }
 0xdfe   :  { %46259 = vmatpush3.bf16.msra.mxu0 %v51776_v13 }
 0xdff   :  { %46261 = vmatprep.subr.bf16.mxu0 %v51780_v54 }
 0xe02   :  { %46263 = vmatpush3.bf16.msra.mxu0 %v51780_v54 }
 0xe03   :  { %46265 = vmatprep.subr.bf16.mxu0 %v51784_v60 }
 0xe06   :  { %46267 = vmatpush3.bf16.msra.mxu0 %v51784_v60 }
 0xe07   :  { %46269 = vmatprep.subr.bf16.mxu0 %v51804_v17 }
 0xe0a   :  { %46271 = vmatpush3.bf16.msra.mxu0 %v51804_v17 }
 0xe0b   :  { %46273 = vmatprep.subr.bf16.mxu0 %v51812_v50 }
 0xe0e   :  { %46275 = vmatpush3.bf16.msra.mxu0 %v51812_v50 }
 0xe0f   :  { %46277 = vmatprep.subr.bf16.mxu0 %v57251_v41 }
 0xe12   :  { %46279 = vmatpush3.bf16.msra.mxu0 %v57251_v41 }
 0xe13   :  { %46281 = vmatprep.subr.bf16.mxu0 %v57252_v51 }
 0xe16   :  { %46283 = vmatpush3.bf16.msra.mxu0 %v57252_v51 }
 0xe17   :  { %46285 = vmatprep.subr.bf16.mxu0 %v57325_v40 }
 0xe19   :  { %40048 = vmatmul.mubr.f32.vlgmr.msra.gmra.mrb[14].mxu0 %v7906_v15  ;;  %v57330_v15 = vld [vmem:[#allocation102_spill] sm:$0xff] }
 0xe1a   :  { %46287 = vmatpush3.bf16.msra.mxu0 %v57325_v40  ;;  %40082 = vmatprep.mubr.f32.mxu0 %v52889_v23  ;;  %v57331_v40 = vld [vmem:[#allocation103_spill] sm:$0xff] }
 0xe1b   :  { %46289 = vmatprep.subr.bf16.mxu0 %v57326_v11 }
 0xe1e   :  { %46291 = vmatpush3.bf16.msra.mxu0 %v57326_v11  ;;  %v57332_v11 = vld [vmem:[#allocation104_spill] sm:$0xff] }
 0xe1f   :  { %46293 = vmatprep.subr.bf16.mxu0 %v57327_v58 }
 0xe22   :  { %46295 = vmatpush3.bf16.msra.mxu0 %v57327_v58 }
 0xe23   :  { %46297 = vmatprep.subr.bf16.mxu0 %v57328_v10 }
 0xe26   :  { %46299 = vmatpush3.bf16.msra.mxu0 %v57328_v10 }
 0xe27   :  { %46301 = vmatprep.subr.bf16.mxu0 %v57329_v36 }
 0xe2a   :  { %46303 = vmatpush3.bf16.msra.mxu0 %v57329_v36 }
 0xe2b   :  { %46305 = vmatprep.subr.bf16.mxu0 %v57330_v15 }
 0xe2e   :  { %46307 = vmatpush3.bf16.msra.mxu0 %v57330_v15 }
 0xe2f   :  { %46309 = vmatprep.subr.bf16.mxu0 %v57331_v40 }
 0xe32   :  { %46311 = vmatpush3.bf16.msra.mxu0 %v57331_v40 }
 0xe33   :  { %46313 = vmatprep.subr.bf16.mxu0 %v57332_v11 }
 0xe36   :  { %46315 = vmatpush3.bf16.msra.mxu0 %v57332_v11 }
 0xe37   :  { %46317 = vmatprep.subr.bf16.mxu0 %v51766_v27 }
 0xe39   :  { %40083 = vmatmul.mubr.f32.vlgmr.msra.gmra.mrb[14].mxu0 %v52886_v52 }
 0xe3a   :  { %46319 = vmatpush3.bf16.msra.mxu0 %v51766_v27  ;;  %40117 = vmatprep.mubr.f32.mxu0 %v52889_v23  ;;  %v8517_v23 = vpop.trf.xlu0 }
 0xe3b   :  { %46321 = vmatprep.subr.bf16.mxu0 %v51776_v13 }
 0xe3e   :  { %46323 = vmatpush3.bf16.msra.mxu0 %v51776_v13  ;;  %v8518_v58 = vpop.trf.xlu0 }
 0xe3f   :  { %46325 = vmatprep.subr.bf16.mxu0 %v51780_v54 }
 0xe42   :  { %46327 = vmatpush3.bf16.msra.mxu0 %v51780_v54  ;;  %v8519_v2 = vpop.trf.xlu0 }
 0xe43   :  { %46329 = vmatprep.subr.bf16.mxu0 %v51784_v60  ;;  %v8540_v6 = vsel %vm1149_vm2, %v8519_v2, 0 }
 0xe44   :  { %v53016_v0 = vand.u32 4294901760, %v8540_v6 }
 0xe46   :  { %46331 = vmatpush3.bf16.msra.mxu0 %v51784_v60 }
 0xe47   :  { %46333 = vmatprep.subr.bf16.mxu0 %v51804_v17 }
 0xe4a   :  { %46335 = vmatpush3.bf16.msra.mxu0 %v51804_v17 }
 0xe4b   :  { %46337 = vmatprep.subr.bf16.mxu0 %v51812_v50 }
 0xe4e   :  { %46339 = vmatpush3.bf16.msra.mxu0 %v51812_v50 }
 0xe4f   :  { %46341 = vmatprep.subr.bf16.mxu0 %v57251_v41 }
 0xe52   :  { %46343 = vmatpush3.bf16.msra.mxu0 %v57251_v41 }
 0xe53   :  { %46345 = vmatprep.subr.bf16.mxu0 %v57252_v51 }
 0xe56   :  { %46347 = vmatpush3.bf16.msra.mxu0 %v57252_v51 }
 0xe57   :  { %46373 = vmatprep.subr.bf16.mxu0 %v52184_v34 }
 0xe59   :  { %40118 = vmatmul.mubr.f32.vlgmr.msra.gmra.mrb[14].mxu0 %v52886_v52  ;;  %v8534_v52 = vsel %vm1149_vm2, %v8517_v23, 0  ;;  %v8537_v23 = vsel %vm1149_vm2, %v8518_v58, 0 }
 0xe5a   :  { %46375 = vmatpush3.bf16.msra.mxu0 %v52184_v34  ;;  %v53003_v11 = vand.u32 4294901760, %v8534_v52  ;;  %v53014_v26 = vand.u32 4294901760, %v8537_v23 }
 0xe5b   :  { %46377 = vmatprep.subr.bf16.mxu0 %v52192_v1 }
 0xe5c   :  { %v53006_v40 = vsub.f32 %v8534_v52, %v53003_v11  ;;  %v8520_v52 = vpop.trf.xlu0 }
 0xe5d   :  { %v8543_v29 = vsel %vm1149_vm2, %v8520_v52, 0 }
 0xe5e   :  { %46379 = vmatpush3.bf16.msra.mxu0 %v52192_v1  ;;  %v56607_v15 = vand.u32 4294901760, %v53006_v40 }
 0xe5f   :  { %46381 = vmatprep.subr.bf16.mxu0 %v52205_v35 }
 0xe60   :  { %v8615_v36 = vsub.f32 %v53006_v40, %v56607_v15  ;;  %v8633_v15 = vsub.f32 %v8540_v6, %v53016_v0 }
 0xe62   :  { %46383 = vmatpush3.bf16.msra.mxu0 %v52205_v35  ;;  %v8616_v10 = vand.u32 4294901760, %v8615_v36  ;;  %v8623_v36 = vsub.f32 %v8537_v23, %v53014_v26  ;;  %v8634_v33 = vand.u32 4294901760, %v8633_v15 }
 0xe63   :  { %46385 = vmatprep.subr.bf16.mxu0 %v52219_v39 }
 0xe64   :  { %40124 = vmatprep.mubr.f32.mxu1 %v8616_v10  ;;  %v53020_v10 = vand.u32 4294901760, %v8543_v29  ;;  %v8624_v2 = vand.u32 4294901760, %v8623_v36  ;;  %v8635_v49 = vsub.f32 %v8633_v15, %v8634_v33 }
 0xe66   :  { %46387 = vmatpush3.bf16.msra.mxu0 %v52219_v39  ;;  %v8643_v45 = vsub.f32 %v8543_v29, %v53020_v10  ;;  %v8625_v22 = vsub.f32 %v8623_v36, %v8624_v2  ;;  %v8636_v29 = vand.u32 4294901760, %v8635_v49  ;;  %v51105_v49 = vld [vmem:[#allocation2 + $0x1c0] sm:$0xff] }
 0xe67   :  { %46389 = vmatprep.subr.bf16.mxu0 %v52229_v4 }
 0xe68   :  { %v8644_v23 = vand.u32 4294901760, %v8643_v45 }
 0xe6a   :  { %46391 = vmatpush3.bf16.msra.mxu0 %v52229_v4 }
 0xe6b   :  { %46393 = vmatprep.subr.bf16.mxu0 %v52263_v31 }
 0xe6e   :  { %46395 = vmatpush3.bf16.msra.mxu0 %v52263_v31 }
 0xe6f   :  { %46397 = vmatprep.subr.bf16.mxu0 %v52267_v25 }
 0xe72   :  { %46399 = vmatpush3.bf16.msra.mxu0 %v52267_v25 }
 0xe73   :  { %46401 = vmatprep.subr.bf16.mxu0 %v52283_v30 }
 0xe76   :  { %46403 = vmatpush3.bf16.msra.mxu0 %v52283_v30 }
 0xe77   :  { %46405 = vmatprep.subr.bf16.mxu0 %v52293_v63 }
 0xf2c   :  { %v40119_v57 = vpop.f32.mrb[14].mxu0 }
 0xf2d   :  { %51068 = vrcp.f32 %v40119_v57  ;;  %v8487_v38 = vpop.f32.mrb[15].mxu0 }
 0xf2e   :  { %51070 = vrcp.f32 %v8487_v38 }
 0xf37   :  { %v51069_v57 = vpop.eup %51068 }
 0xf38   :  { %v51071_v19 = vpop.eup %51070  ;;  %v8500_v38 = vmul.f32 %v51069_v57, %v52881_v56  ;;  %v8626_v57 = vand.u32 4294901760, %v8625_v22 }
 0xf39   :  { %v8498_v58 = vmul.f32 %v51071_v19, %v52883_v61  ;;  %v8645_v19 = vsub.f32 %v8643_v45, %v8644_v23 }
 0xf3a   :  { %v8549_v48 = vand.u32 4294901760, %v8500_v38 }
 0xf3b   :  { %v8546_v14 = vand.u32 4294901760, %v8498_v58 }
 0xf3c   :  { %v8661_v8 = vsub.f32 %v8500_v38, %v8549_v48 }
 0xf3d   :  { %v46348_v52 = vpack.c.bf16 %v8549_v48, %v8546_v14  ;;  %v8654_v47 = vsub.f32 %v8498_v58, %v8546_v14  ;;  %v8646_v48 = vand.u32 4294901760, %v8645_v19 }
 0xf3e   :  { %v8662_v53 = vand.u32 4294901760, %v8661_v8 }
 0xf3f   :  { %46349 = vmatprep.subr.bf16.mxu1 %v46348_v52  ;;  %v8655_v6 = vand.u32 4294901760, %v8654_v47  ;;  %v46356_v28 = vpack.c.bf16 %v8661_v8, %v8654_v47 }
 0xf40   :  { %46351 = vmatpush3.bf16.msra.mxu1 %v46348_v52  ;;  %v8663_v56 = vsub.f32 %v8661_v8, %v8662_v53 }
 0xf41   :  { %v8656_v61 = vsub.f32 %v8654_v47, %v8655_v6  ;;  %v46364_v18 = vpack.c.bf16 %v8662_v53, %v8655_v6 }
 0xf42   :  { %v8664_v51 = vand.u32 4294901760, %v8663_v56 }
 0xf43   :  { %40125 = vmatmul.mubr.f32.vlgmr.msra.gmra.mrb[20].mxu1 %v8626_v57  ;;  %v8657_v41 = vand.u32 4294901760, %v8656_v61 }
 0xf44   :  { %40127 = vmatprep.mubr.f32.mxu1 %v8636_v29 }
 0xf45   :  { %v46352_v38 = vpack.c.bf16 %v8664_v51, %v8657_v41  ;;  %v57333_v41 = vand.u32 4294901760, %v53006_v40 }
 0xf47   :  { %40128 = vmatmul.mubr.f32.gmra.mrb[22].mxu1 %v8646_v48  ;;  %46353 = vmatprep.subr.bf16.mxu1 %v46352_v38 }
 0xf48   :  { %46355 = vmatpush3.bf16.msra.mxu1 %v46352_v38  ;;  %40134 = vmatprep.mubr.f32.mxu1 %v53003_v11 }
 0xf49   :  { %46357 = vmatprep.subr.bf16.mxu1 %v46356_v28 }
 0xf4b   :  { %40135 = vmatmul.mubr.f32.vlgmr.msra.gmra.mrb[20].mxu1 %v53014_v26 }
 0xf4c   :  { %40137 = vmatprep.mubr.f32.mxu1 %v53016_v0  ;;  %46359 = vmatpush3.bf16.msra.mxu1 %v46356_v28 }
 0xf4d   :  { %46361 = vmatprep.subr.bf16.mxu1 %v46348_v52 }
 0xf4f   :  { %40138 = vmatmul.mubr.f32.gmra.mrb[22].mxu1 %v53020_v10 }
 0xf50   :  { %40144 = vmatprep.mubr.f32.mxu1 %v53006_v40 }
 0xf53   :  { %40145 = vmatmul.mubr.f32.vlgmr.msra.gmra.mrb[20].mxu1 %v8623_v36 }
 0xf54   :  { %46363 = vmatpush3.bf16.msra.mxu1 %v46348_v52  ;;  %40147 = vmatprep.mubr.f32.mxu1 %v8633_v15 }
 0xf55   :  { %46365 = vmatprep.subr.bf16.mxu1 %v46364_v18 }
 0xf57   :  { %40148 = vmatmul.mubr.f32.gmra.mrb[22].mxu1 %v8643_v45  ;;  %v51106_v45 = vld [vmem:[#allocation2 + $0x1d8] sm:$0xff] }
 0xf58   :  { %40154 = vmatprep.mubr.f32.mxu1 %v57333_v41 }
 0xf5b   :  { %40155 = vmatmul.mubr.f32.vlgmr.msra.gmra.mrb[20].mxu1 %v8624_v2 }
 0xf5c   :  { %46367 = vmatpush3.bf16.msra.mxu1 %v46364_v18  ;;  %40157 = vmatprep.mubr.f32.mxu1 %v8634_v33  ;;  %v51104_v18 = vld [vmem:[#allocation2 + $0x1c8] sm:$0xff] }
 0xf5d   :  { %46369 = vmatprep.subr.bf16.mxu1 %v46348_v52 }
 0xf5f   :  { %40158 = vmatmul.mubr.f32.gmra.mrb[22].mxu1 %v8644_v23 }
 0xf60   :  { %40164 = vmatprep.mubr.f32.mxu1 %v53003_v11 }
 0xf63   :  { %40165 = vmatmul.mubr.f32.vlgmr.msra.gmra.mrb[20].mxu1 %v53014_v26 }
 0xf64   :  { %46371 = vmatpush3.bf16.msra.mxu1 %v46348_v52  ;;  %40167 = vmatprep.mubr.f32.mxu1 %v53016_v0 }
 0xf67   :  { %40168 = vmatmul.mubr.f32.gmra.mrb[22].mxu1 %v53020_v10 }
 0xf68   :  { %40174 = vmatprep.mubr.f32.mxu1 %v53003_v11  ;;  %v51107_v11 = vld [vmem:[#allocation2 + $0x1d0] sm:$0xff] }
 0xf6b   :  { %40175 = vmatmul.mubr.f32.vlgmr.msra.gmra.mrb[20].mxu1 %v53014_v26 }
 0xf6c   :  { %40177 = vmatprep.mubr.f32.mxu1 %v53016_v0 }
 0xf6f   :  { %40178 = vmatmul.mubr.f32.gmra.mrb[22].mxu1 %v53020_v10 }
 0xf70   :  { %40416 = vmatprep.mubr.f32.mxu1 %v52665_v55 }
0x103e   :  { %v40176_v51 = vpop.f32.mrb[20].mxu1 }
0x103f   :  { %v9134_v28 = vmul.f32 %v51104_v18, %v40176_v51  ;;  %v9111_v53 = vpop.f32.mrb[21].mxu1  ;;  %v57334_v18 = vld [vmem:[#allocation118_spill] sm:$0xff] }
0x1040   :  { %v9133_v47 = vmul.f32 %v51105_v49, %v9111_v53  ;;  %v57336_v53 = vld [vmem:[#allocation120_spill] sm:$0xff]  ;;  %v57337_v49 = vld [vmem:[#allocation129_spill] sm:$0xff] }
0x1041   :  { %v53042_v22 = vand.u32 4294901760, %v9134_v28 }
0x1042   :  { %v53044_v8 = vand.u32 4294901760, %v9133_v47  ;;  %v40179_v14 = vpop.f32.mrb[22].mxu1 }
0x1043   :  { %v53047_v33 = vsub.f32 %v9134_v28, %v53042_v22  ;;  %v9136_v0 = vmul.f32 %v51106_v45, %v40179_v14  ;;  %v9123_v26 = vpop.f32.mrb[23].mxu1  ;;  %v57335_v28 = vld [vmem:[#allocation119_spill] sm:$0xff]  ;;  %v57341_v45 = vld [vmem:[#allocation133_spill] sm:$0xff] }
0x1044   :  { %v53050_v40 = vsub.f32 %v9133_v47, %v53044_v8  ;;  %v9135_v15 = vmul.f32 %v51107_v11, %v9123_v26  ;;  %v57338_v47 = vld [vmem:[#allocation130_spill] sm:$0xff]  ;;  %v57339_v14 = vld [vmem:[#allocation131_spill] sm:$0xff] }
0x1045   :  { %v9230_v36 = vand.u32 4294901760, %v53047_v33  ;;  %v53053_v10 = vand.u32 4294901760, %v9136_v0  ;;  %v57343_v26 = vld [vmem:[#allocation135_spill] sm:$0xff] }
0x1046   :  { %v53055_v58 = vand.u32 4294901760, %v9135_v15  ;;  %v9220_v2 = vand.u32 4294901760, %v53050_v40 }
0x1047   :  { %v9231_v52 = vsub.f32 %v53047_v33, %v9230_v36  ;;  %v53062_v23 = vsub.f32 %v9136_v0, %v53053_v10  ;;  %v57342_v0 = vld [vmem:[#allocation134_spill] sm:$0xff] }
0x1048   :  { %v53065_v6 = vsub.f32 %v9135_v15, %v53055_v58  ;;  %v9221_v56 = vsub.f32 %v53050_v40, %v9220_v2 }
0x1049   :  { %v9250_v57 = vand.u32 4294901760, %v53062_v23  ;;  %v9232_v29 = vand.u32 4294901760, %v9231_v52 }
0x104a   :  { %v9222_v19 = vand.u32 4294901760, %v9221_v56  ;;  %v9240_v61 = vand.u32 4294901760, %v53065_v6 }
0x104b   :  { %v9251_v48 = vsub.f32 %v53062_v23, %v9250_v57 }
0x104c   :  { %40212 = vmatprep.mubr.f32.mxu0 %v9222_v19  ;;  %v9241_v38 = vsub.f32 %v53065_v6, %v9240_v61 }
0x104d   :  { %40213 = vmatmul.mubr.f32.vlgmr.msra.gmra.mrb[16].mxu0 %v9232_v29  ;;  %v9252_v51 = vand.u32 4294901760, %v9251_v48 }
0x104e   :  { %46407 = vmatpush3.bf16.msra.mxu0 %v52293_v63  ;;  %v9242_v41 = vand.u32 4294901760, %v9241_v38 }
0x104f   :  { %46409 = vmatprep.subr.bf16.mxu0 %v52440_v9 }
0x1050   :  { %40215 = vmatprep.mubr.f32.mxu0 %v9242_v41 }
0x1051   :  { %40216 = vmatmul.mubr.f32.gmra.mrb[18].mxu0 %v9252_v51 }
0x1052   :  { %46411 = vmatpush3.bf16.msra.mxu0 %v52440_v9  ;;  %40250 = vmatprep.mubr.f32.mxu0 %v53044_v8 }
0x1053   :  { %46413 = vmatprep.subr.bf16.mxu0 %v52459_v42 }
0x1056   :  { %46415 = vmatpush3.bf16.msra.mxu0 %v52459_v42 }
0x1057   :  { %46417 = vmatprep.subr.bf16.mxu0 %v52471_v59 }
0x105a   :  { %46419 = vmatpush3.bf16.msra.mxu0 %v52471_v59 }
0x105b   :  { %46421 = vmatprep.subr.bf16.mxu0 %v52475_v46 }
0x105e   :  { %46423 = vmatpush3.bf16.msra.mxu0 %v52475_v46 }
0x105f   :  { %46425 = vmatprep.subr.bf16.mxu0 %v52314_v16 }
0x1062   :  { %46427 = vmatpush3.bf16.msra.mxu0 %v52314_v16 }
0x1063   :  { %46429 = vmatprep.subr.bf16.mxu0 %v52328_v20 }
0x1066   :  { %46431 = vmatpush3.bf16.msra.mxu0 %v52328_v20 }
0x1067   :  { %46433 = vmatprep.subr.bf16.mxu0 %v52336_v37 }
0x106a   :  { %46435 = vmatpush3.bf16.msra.mxu0 %v52336_v37  ;;  %v53494_v37 = vld [vmem:[#allocation2 + $0x138] sm:$0xff] }
0x106b   :  { %46437 = vmatprep.subr.bf16.mxu0 %v52340_v7  ;;  %v56680_v16 = vand.u32 4294901760, %v53494_v37 }
0x106d   :  { %40251 = vmatmul.mubr.f32.vlgmr.msra.gmra.mrb[16].mxu0 %v53042_v22 }
0x106e   :  { %40253 = vmatprep.mubr.f32.mxu0 %v53055_v58  ;;  %46439 = vmatpush3.bf16.msra.mxu0 %v52340_v7  ;;  %v53492_v7 = vld [vmem:[#allocation2 + $0x130] sm:$0xff] }
0x106f   :  { %46441 = vmatprep.subr.bf16.mxu0 %v52489_v43  ;;  %v56681_v20 = vand.u32 4294901760, %v53492_v7 }
0x1071   :  { %40254 = vmatmul.mubr.f32.gmra.mrb[18].mxu0 %v53053_v10 }
0x1072   :  { %46443 = vmatpush3.bf16.msra.mxu0 %v52489_v43  ;;  %40288 = vmatprep.mubr.f32.mxu0 %v53050_v40  ;;  %v57344_v40 = vld [vmem:[#allocation136_spill] sm:$0xff] }
0x1073   :  { %46445 = vmatprep.subr.bf16.mxu0 %v52497_v24 }
0x1076   :  { %46447 = vmatpush3.bf16.msra.mxu0 %v52497_v24 }
0x1077   :  { %46449 = vmatprep.subr.bf16.mxu0 %v52505_v32 }
0x107a   :  { %46451 = vmatpush3.bf16.msra.mxu0 %v52505_v32 }
0x107b   :  { %46453 = vmatprep.subr.bf16.mxu0 %v52511_v21 }
0x107e   :  { %46455 = vmatpush3.bf16.msra.mxu0 %v52511_v21 }
0x107f   :  { %46457 = vmatprep.subr.bf16.mxu0 %v57334_v18 }
0x1082   :  { %46459 = vmatpush3.bf16.msra.mxu0 %v57334_v18 }
0x1083   :  { %46461 = vmatprep.subr.bf16.mxu0 %v57335_v28 }
0x1086   :  { %46463 = vmatpush3.bf16.msra.mxu0 %v57335_v28  ;;  %v53476_v28 = vld [vmem:[#allocation2 + $0x128] sm:$0xff] }
0x1087   :  { %46465 = vmatprep.subr.bf16.mxu0 %v57336_v53  ;;  %v56676_v21 = vand.u32 4294901760, %v53476_v28 }
0x108a   :  { %46467 = vmatpush3.bf16.msra.mxu0 %v57336_v53  ;;  %v53474_v53 = vld [vmem:[#allocation2 + $0x120] sm:$0xff] }
0x108b   :  { %46469 = vmatprep.subr.bf16.mxu0 %v52184_v34  ;;  %v56677_v18 = vand.u32 4294901760, %v53474_v53 }
0x108d   :  { %40289 = vmatmul.mubr.f32.vlgmr.msra.gmra.mrb[16].mxu0 %v53047_v33  ;;  %v57340_v33 = vld [vmem:[#allocation132_spill] sm:$0xff]  ;;  %v53486_v32 = vpack.c.bf16 %v56676_v21, %v56677_v18 }
0x108e   :  { %40291 = vmatprep.mubr.f32.mxu0 %v53065_v6  ;;  %46471 = vmatpush3.bf16.msra.mxu0 %v52184_v34 }
0x108f   :  { %46473 = vmatprep.subr.bf16.mxu0 %v52192_v1  ;;  %57386 = vst [vmem:[#allocation149_spill] sm:$0xff] %v53486_v32 }
0x1091   :  { %40292 = vmatmul.mubr.f32.gmra.mrb[18].mxu0 %v53062_v23 }
0x1092   :  { %46475 = vmatpush3.bf16.msra.mxu0 %v52192_v1  ;;  %40326 = vmatprep.mubr.f32.mxu0 %v9220_v2 }
0x1093   :  { %46477 = vmatprep.subr.bf16.mxu0 %v52205_v35 }
0x1096   :  { %46479 = vmatpush3.bf16.msra.mxu0 %v52205_v35 }
0x1097   :  { %46481 = vmatprep.subr.bf16.mxu0 %v52219_v39 }
0x109a   :  { %46483 = vmatpush3.bf16.msra.mxu0 %v52219_v39 }
0x109b   :  { %46485 = vmatprep.subr.bf16.mxu0 %v52229_v4 }
0x109e   :  { %46487 = vmatpush3.bf16.msra.mxu0 %v52229_v4 }
0x109f   :  { %46489 = vmatprep.subr.bf16.mxu0 %v52263_v31 }
0x10a2   :  { %46491 = vmatpush3.bf16.msra.mxu0 %v52263_v31 }
0x10a3   :  { %46493 = vmatprep.subr.bf16.mxu0 %v52267_v25 }
0x10a6   :  { %46495 = vmatpush3.bf16.msra.mxu0 %v52267_v25 }
0x10a7   :  { %46497 = vmatprep.subr.bf16.mxu0 %v52283_v30 }
0x10aa   :  { %46499 = vmatpush3.bf16.msra.mxu0 %v52283_v30 }
0x10ab   :  { %46501 = vmatprep.subr.bf16.mxu0 %v57337_v49 }
0x10ad   :  { %40327 = vmatmul.mubr.f32.vlgmr.msra.gmra.mrb[16].mxu0 %v9230_v36 }
0x10ae   :  { %40329 = vmatprep.mubr.f32.mxu0 %v9240_v61  ;;  %46503 = vmatpush3.bf16.msra.mxu0 %v57337_v49 }
0x10af   :  { %46505 = vmatprep.subr.bf16.mxu0 %v57338_v47 }
0x10b1   :  { %40330 = vmatmul.mubr.f32.gmra.mrb[18].mxu0 %v9250_v57 }
0x10b2   :  { %46507 = vmatpush3.bf16.msra.mxu0 %v57338_v47  ;;  %40364 = vmatprep.mubr.f32.mxu0 %v53044_v8 }
0x10b3   :  { %46509 = vmatprep.subr.bf16.mxu0 %v57339_v14 }
0x10b6   :  { %46511 = vmatpush3.bf16.msra.mxu0 %v57339_v14 }
0x10b7   :  { %46513 = vmatprep.subr.bf16.mxu0 %v57340_v33 }
0x10ba   :  { %46515 = vmatpush3.bf16.msra.mxu0 %v57340_v33 }
0x10bb   :  { %46517 = vmatprep.subr.bf16.mxu0 %v57341_v45 }
0x10be   :  { %46519 = vmatpush3.bf16.msra.mxu0 %v57341_v45 }
0x10bf   :  { %46521 = vmatprep.subr.bf16.mxu0 %v57342_v0 }
0x10c2   :  { %46523 = vmatpush3.bf16.msra.mxu0 %v57342_v0 }
0x10c3   :  { %46525 = vmatprep.subr.bf16.mxu0 %v57343_v26 }
0x10c6   :  { %46527 = vmatpush3.bf16.msra.mxu0 %v57343_v26 }
0x10c7   :  { %46529 = vmatprep.subr.bf16.mxu0 %v57344_v40 }
0x10ca   :  { %46531 = vmatpush3.bf16.msra.mxu0 %v57344_v40 }
0x10cb   :  { %46533 = vmatprep.subr.bf16.mxu0 %v52184_v34 }
0x10cd   :  { %40365 = vmatmul.mubr.f32.vlgmr.msra.gmra.mrb[16].mxu0 %v53042_v22 }
0x10ce   :  { %40367 = vmatprep.mubr.f32.mxu0 %v53055_v58  ;;  %46535 = vmatpush3.bf16.msra.mxu0 %v52184_v34 }
0x10cf   :  { %46537 = vmatprep.subr.bf16.mxu0 %v52192_v1 }
0x10d1   :  { %40368 = vmatmul.mubr.f32.gmra.mrb[18].mxu0 %v53053_v10 }
0x10d2   :  { %46539 = vmatpush3.bf16.msra.mxu0 %v52192_v1  ;;  %40402 = vmatprep.mubr.f32.mxu0 %v53044_v8 }
0x10d3   :  { %46541 = vmatprep.subr.bf16.mxu0 %v52205_v35 }
0x10d6   :  { %46543 = vmatpush3.bf16.msra.mxu0 %v52205_v35 }
0x10d7   :  { %46545 = vmatprep.subr.bf16.mxu0 %v52219_v39 }
0x10da   :  { %46547 = vmatpush3.bf16.msra.mxu0 %v52219_v39 }
0x10db   :  { %46549 = vmatprep.subr.bf16.mxu0 %v52229_v4 }
0x10de   :  { %46551 = vmatpush3.bf16.msra.mxu0 %v52229_v4 }
0x10df   :  { %46553 = vmatprep.subr.bf16.mxu0 %v52263_v31 }
0x10e2   :  { %46555 = vmatpush3.bf16.msra.mxu0 %v52263_v31 }
0x10e3   :  { %46557 = vmatprep.subr.bf16.mxu0 %v52267_v25 }
0x10e6   :  { %46559 = vmatpush3.bf16.msra.mxu0 %v52267_v25 }
0x10e7   :  { %46561 = vmatprep.subr.bf16.mxu0 %v52283_v30 }
0x10ea   :  { %46563 = vmatpush3.bf16.msra.mxu0 %v52283_v30 }
0x10eb   :  { %46781 = vmatprep.subr.bf16.mxu0 %v57270_v12 }
0x10ed   :  { %40403 = vmatmul.mubr.f32.vlgmr.msra.gmra.mrb[16].mxu0 %v53042_v22 }
0x10ee   :  { %40405 = vmatprep.mubr.f32.mxu0 %v53055_v58  ;;  %46783 = vmatpush3.bf16.msra.mxu0 %v57270_v12 }
0x10ef   :  { %46785 = vmatprep.subr.bf16.mxu0 %v57271_v62 }
0x10f1   :  { %40406 = vmatmul.mubr.f32.gmra.mrb[18].mxu0 %v53053_v10 }
0x10f2   :  { %46787 = vmatpush3.bf16.msra.mxu0 %v57271_v62 }
0x10f3   :  { %46789 = vmatprep.subr.bf16.mxu0 %v57272_v3 }
0x11c0   :  { %v40404_v8 = vpop.f32.mrb[16].mxu0 }
0x11c1   :  { %v9911_v11 = vand.u32 4294901760, %v40404_v8  ;;  %v9885_v15 = vpop.f32.mrb[17].mxu0 }
0x11c2   :  { %v9908_v36 = vand.u32 4294901760, %v9885_v15 }
0x11c3   :  { %v10005_v2 = vsub.f32 %v40404_v8, %v9911_v11 }
0x11c4   :  { %v53182_v52 = vpack.c.bf16 %v9911_v11, %v9908_v36  ;;  %v9998_v22 = vsub.f32 %v9885_v15, %v9908_v36  ;;  %v40407_v23 = vpop.f32.mrb[18].mxu0 }
0x11c5   :  { %v10006_v58 = vand.u32 4294901760, %v10005_v2  ;;  %v9917_v6 = vand.u32 4294901760, %v40407_v23  ;;  %v9897_v56 = vpop.f32.mrb[19].mxu0 }
0x11c6   :  { %v9999_v57 = vand.u32 4294901760, %v9998_v22  ;;  %v9914_v19 = vand.u32 4294901760, %v9897_v56  ;;  %46565 = vmatprep.subr.bf16.mxu1 %v53182_v52  ;;  %v46580_v10 = vpack.c.bf16 %v10005_v2, %v9998_v22 }
0x11c7   :  { %v10007_v61 = vsub.f32 %v10005_v2, %v10006_v58  ;;  %v10019_v29 = vsub.f32 %v40407_v23, %v9917_v6  ;;  %46567 = vmatpush3.bf16.msra.mxu1 %v53182_v52  ;;  %v57345_v23 = vld [vmem:[#allocation141_spill] sm:$0xff] }
0x11c8   :  { %v10000_v48 = vsub.f32 %v9998_v22, %v9999_v57  ;;  %v46568_v38 = vpack.c.bf16 %v9917_v6, %v9914_v19  ;;  %v10012_v41 = vsub.f32 %v9897_v56, %v9914_v19  ;;  %v46596_v51 = vpack.c.bf16 %v10006_v58, %v9999_v57  ;;  %v57346_v58 = vld [vmem:[#allocation138_spill] sm:$0xff]  ;;  %v57350_v57 = vld [vmem:[#allocation139_spill] sm:$0xff] }
0x11c9   :  { %v10020_v8 = vand.u32 4294901760, %v10019_v29  ;;  %v10008_v11 = vand.u32 4294901760, %v10007_v61  ;;  %v57349_v56 = vld [vmem:[#allocation142_spill] sm:$0xff] }
0x11ca   :  { %v10013_v15 = vand.u32 4294901760, %v10012_v41  ;;  %46569 = vmatprep.subr.bf16.mxu1 %v46568_v38  ;;  %v10001_v36 = vand.u32 4294901760, %v10000_v48  ;;  %v46584_v40 = vpack.c.bf16 %v10019_v29, %v10012_v41 }
0x11cb   :  { %v10021_v26 = vsub.f32 %v10019_v29, %v10020_v8  ;;  %46571 = vmatpush3.bf16.msra.mxu1 %v46568_v38  ;;  %v57351_v29 = vld [vmem:[#allocation143_spill] sm:$0xff] }
0x11cc   :  { %v10014_v0 = vsub.f32 %v10012_v41, %v10013_v15  ;;  %v46572_v45 = vpack.c.bf16 %v10008_v11, %v10001_v36  ;;  %v46600_v33 = vpack.c.bf16 %v10020_v8, %v10013_v15 }
0x11cd   :  { %v10022_v14 = vand.u32 4294901760, %v10021_v26  ;;  %v35072_v26 = vld [vmem:[%s56270_s5] ss:$0 sm:$0xff] }
0x11ce   :  { %40417 = vmatmul.mubr.f32.vlgmr.msra.gmra.mrb[24].mxu1 %v52679_v44  ;;  %46573 = vmatprep.subr.bf16.mxu1 %v46572_v45  ;;  %v10015_v2 = vand.u32 4294901760, %v10014_v0 }
0x11cf   :  { %46575 = vmatpush3.bf16.msra.mxu1 %v46572_v45  ;;  %40427 = vmatprep.mubr.f32.mxu1 %v52655_v5  ;;  %v57347_v45 = vld [vmem:[#allocation37_spill] sm:$0xff] }
0x11d0   :  { %v46576_v22 = vpack.c.bf16 %v10022_v14, %v10015_v2  ;;  %v53195_v0 = vadd.f32 %v57347_v45, %v35072_v26  ;;  %v57348_v14 = vld [vmem:[#allocation38_spill] sm:$0xff]  ;;  %v57355_v45 = vld [vmem:[#allocation17_spill] sm:$0xff] }
0x11d1   :  { %v53198_v6 = vadd.f32 %v35072_v26, %v57348_v14  ;;  %v57356_v14 = vld [vmem:[#allocation10_spill] sm:$0xff] }
0x11d2   :  { %46577 = vmatprep.subr.bf16.mxu1 %v46576_v22  ;;  %v10439_v19 = vand.u32 4294901760, %v53195_v0 }
0x11d3   :  { %46579 = vmatpush3.bf16.msra.mxu1 %v46576_v22  ;;  %v57353_v22 = vld [vmem:[#allocation20_spill] sm:$0xff] }
0x11d4   :  { %46581 = vmatprep.subr.bf16.mxu1 %v46580_v10 }
0x11d6   :  { %40428 = vmatmul.mubr.f32.vlgmr.msra.gmra.mrb[24].mxu1 %v57345_v23 }
0x11d7   :  { %46583 = vmatpush3.bf16.msra.mxu1 %v46580_v10  ;;  %40438 = vmatprep.mubr.f32.mxu1 %v57346_v58  ;;  %v10436_v10 = vand.u32 4294901760, %v53198_v6  ;;  %v57370_v58 = vld [vmem:[#allocation40_spill] sm:$0xff] }
0x11d8   :  { %46585 = vmatprep.subr.bf16.mxu1 %v46584_v40 }
0x11d9   :  { %v10524_v61 = vsub.f32 %v53198_v6, %v10436_v10  ;;  %v46612_v15 = vpack.c.bf16 %v10439_v19, %v10436_v10  ;;  %v57358_v10 = vld [vmem:[#allocation11_spill] sm:$0xff] }
0x11db   :  { %46587 = vmatpush3.bf16.msra.mxu1 %v46584_v40  ;;  %v10531_v40 = vsub.f32 %v53195_v0, %v10439_v19  ;;  %v10525_v48 = vand.u32 4294901760, %v10524_v61 }
0x11dc   :  { %46589 = vmatprep.subr.bf16.mxu1 %v53182_v52 }
0x11dd   :  { %v10532_v41 = vand.u32 4294901760, %v10531_v40  ;;  %v10526_v8 = vsub.f32 %v10524_v61, %v10525_v48  ;;  %v46620_v26 = vpack.c.bf16 %v10531_v40, %v10524_v61  ;;  %v57361_v61 = vld [vmem:[#allocation28_spill] sm:$0xff] }
0x11de   :  { %40439 = vmatmul.mubr.f32.vlgmr.msra.gmra.mrb[24].mxu1 %v57349_v56 }
0x11df   :  { %46591 = vmatpush3.bf16.msra.mxu1 %v53182_v52  ;;  %40449 = vmatprep.mubr.f32.mxu1 %v57350_v57  ;;  %v10533_v11 = vsub.f32 %v10531_v40, %v10532_v41  ;;  %v10527_v36 = vand.u32 4294901760, %v10526_v8  ;;  %v46628_v19 = vpack.c.bf16 %v10532_v41, %v10525_v48  ;;  %v57359_v8 = vld [vmem:[#allocation19_spill] sm:$0xff]  ;;  %v57360_v40 = vld [vmem:[#allocation24_spill] sm:$0xff]  ;;  %v57362_v48 = vld [vmem:[#allocation29_spill] sm:$0xff] }
0x11e0   :  { %46593 = vmatprep.subr.bf16.mxu1 %v46568_v38 }
0x11e3   :  { %46595 = vmatpush3.bf16.msra.mxu1 %v46568_v38 }
0x11e4   :  { %46597 = vmatprep.subr.bf16.mxu1 %v46596_v51 }
0x11e6   :  { %40450 = vmatmul.mubr.f32.vlgmr.msra.gmra.mrb[24].mxu1 %v57351_v29 }
0x11e7   :  { %46599 = vmatpush3.bf16.msra.mxu1 %v46596_v51  ;;  %40460 = vmatprep.mubr.f32.mxu1 %v52655_v5  ;;  %v10534_v51 = vand.u32 4294901760, %v10533_v11 }
0x11e8   :  { %46601 = vmatprep.subr.bf16.mxu1 %v46600_v33 }
0x11e9   :  { %v46616_v2 = vpack.c.bf16 %v10534_v51, %v10527_v36 }
0x11eb   :  { %46603 = vmatpush3.bf16.msra.mxu1 %v46600_v33  ;;  %v57352_v33 = vld [vmem:[#allocation12_spill] sm:$0xff] }
0x11ec   :  { %46605 = vmatprep.subr.bf16.mxu1 %v53182_v52 }
0x11ee   :  { %40461 = vmatmul.mubr.f32.vlgmr.msra.gmra.mrb[24].mxu1 %v57345_v23 }
0x11ef   :  { %46607 = vmatpush3.bf16.msra.mxu1 %v53182_v52  ;;  %40471 = vmatprep.mubr.f32.mxu1 %v52655_v5  ;;  %v57354_v52 = vld [vmem:[#allocation9_spill] sm:$0xff] }
0x11f0   :  { %46609 = vmatprep.subr.bf16.mxu1 %v46568_v38 }
0x11f3   :  { %46611 = vmatpush3.bf16.msra.mxu1 %v46568_v38  ;;  %v57357_v38 = vld [vmem:[#allocation18_spill] sm:$0xff] }
0x11f4   :  { %46613 = vmatprep.subr.bf16.mxu1 %v46612_v15 }
0x11f6   :  { %40472 = vmatmul.mubr.f32.vlgmr.msra.gmra.mrb[24].mxu1 %v57345_v23 }
0x11f7   :  { %46615 = vmatpush3.bf16.msra.mxu1 %v46612_v15  ;;  %40478 = vmatprep.mubr.f32.mxu1 %v57352_v33  ;;  %v57368_v33 = vld [vmem:[#allocation39_spill] sm:$0xff] }
0x11f8   :  { %46617 = vmatprep.subr.bf16.mxu1 %v46616_v2 }
0x11fa   :  { %40479 = vmatmul.mubr.f32.vlgmr.msra.gmra.mrb[26].mxu1 %v57353_v22 }
0x11fb   :  { %46619 = vmatpush3.bf16.msra.mxu1 %v46616_v2  ;;  %40485 = vmatprep.mubr.f32.mxu1 %v57354_v52 }
0x11fc   :  { %46621 = vmatprep.subr.bf16.mxu1 %v46620_v26 }
0x1202   :  { %40486 = vmatmul.mubr.f32.vlgmr.msra.gmra.mrb[26].mxu1 %v57355_v45 }
0x1203   :  { %46623 = vmatpush3.bf16.msra.mxu1 %v46620_v26  ;;  %40492 = vmatprep.mubr.f32.mxu1 %v57356_v14 }
0x1204   :  { %46625 = vmatprep.subr.bf16.mxu1 %v46612_v15 }
0x120a   :  { %40493 = vmatmul.mubr.f32.vlgmr.msra.gmra.mrb[26].mxu1 %v57357_v38 }
0x120b   :  { %46627 = vmatpush3.bf16.msra.mxu1 %v46612_v15  ;;  %40499 = vmatprep.mubr.f32.mxu1 %v57358_v10 }
0x120c   :  { %46629 = vmatprep.subr.bf16.mxu1 %v46628_v19 }
0x1212   :  { %40500 = vmatmul.mubr.f32.vlgmr.msra.gmra.mrb[26].mxu1 %v57359_v8 }
0x1213   :  { %46631 = vmatpush3.bf16.msra.mxu1 %v46628_v19  ;;  %40506 = vmatprep.mubr.f32.mxu1 %v57354_v52 }
0x1214   :  { %46633 = vmatprep.subr.bf16.mxu1 %v46612_v15 }
0x121a   :  { %40507 = vmatmul.mubr.f32.vlgmr.msra.gmra.mrb[26].mxu1 %v57355_v45 }
0x121b   :  { %46635 = vmatpush3.bf16.msra.mxu1 %v46612_v15  ;;  %40513 = vmatprep.mubr.f32.mxu1 %v57354_v52 }
0x121c   :  { %46637 = vmatprep.subr.bf16.mxu1 %v57360_v40 }
0x1222   :  { %40514 = vmatmul.mubr.f32.vlgmr.msra.gmra.mrb[26].mxu1 %v57355_v45 }
0x1223   :  { %46639 = vmatpush3.bf16.msra.mxu1 %v57360_v40 }
0x1224   :  { %46641 = vmatprep.subr.bf16.mxu1 %v57361_v61 }
0x1227   :  { %46643 = vmatpush3.bf16.msra.mxu1 %v57361_v61 }
0x1228   :  { %46645 = vmatprep.subr.bf16.mxu1 %v57362_v48 }
0x12c9   :  { %v40473_v41 = vpop.f32.mrb[24].mxu1 }
0x12ca   :  { %v10943_v11 = vsel %vm1660_vm3, %v40473_v41, 0  ;;  %v10425_v36 = vpop.f32.mrb[25].mxu1 }
0x12cb   :  { %v53232_v51 = vand.u32 4294901760, %v10943_v11  ;;  %v10940_v15 = vsel %vm1660_vm3, %v10425_v36, 0  ;;  %15141 = vxpose.xlu0.b32.start [1/2] (short) (narrow) %v10425_v36, 32 }
0x12cc   :  { %v53235_v2 = vand.u32 4294901760, %v10940_v15 }
0x12cd   :  { %v53238_v26 = vsub.f32 %v10943_v11, %v53232_v51  ;;  %v57363_v11 = vld [vmem:[#allocation30_spill] sm:$0xff] }
0x12ce   :  { %v53241_v19 = vsub.f32 %v10940_v15, %v53235_v2  ;;  %v57365_v15 = vld [vmem:[#allocation33_spill] sm:$0xff] }
0x12cf   :  { %v53244_v8 = vand.u32 4294901760, %v53238_v26  ;;  %15142 = vxpose.xlu0.b32.end [2/2] (short) (narrow) %v40473_v41, 32  ;;  %v57364_v41 = vld [vmem:[#allocation31_spill] sm:$0xff] }
0x12d0   :  { %v53247_v10 = vand.u32 4294901760, %v53241_v19 }
0x12d1   :  { %v11027_v38 = vsub.f32 %v53238_v26, %v53244_v8 }
0x12d2   :  { %v11017_v36 = vsub.f32 %v53241_v19, %v53247_v10 }
0x12d3   :  { %v11028_v45 = vand.u32 4294901760, %v11027_v38  ;;  %v57366_v38 = vld [vmem:[#allocation35_spill] sm:$0xff] }
0x12d4   :  { %v11018_v14 = vand.u32 4294901760, %v11017_v36  ;;  %v57367_v36 = vld [vmem:[#allocation36_spill] sm:$0xff] }
0x12d6   :  { %40524 = vmatprep.mubr.f32.mxu1 %v11018_v14 }
0x12d7   :  { %40525 = vmatmul.mubr.f32.vlgmr.msra.gmra.mrb[28].mxu1 %v11028_v45 }
0x12d8   :  { %46647 = vmatpush3.bf16.msra.mxu1 %v57362_v48  ;;  %40535 = vmatprep.mubr.f32.mxu1 %v53235_v2 }
0x12d9   :  { %46649 = vmatprep.subr.bf16.mxu1 %v57363_v11 }
0x12dc   :  { %46651 = vmatpush3.bf16.msra.mxu1 %v57363_v11 }
0x12dd   :  { %46653 = vmatprep.subr.bf16.mxu1 %v57364_v41 }
0x12df   :  { %40536 = vmatmul.mubr.f32.vlgmr.msra.gmra.mrb[28].mxu1 %v53232_v51 }
0x12e0   :  { %46655 = vmatpush3.bf16.msra.mxu1 %v57364_v41  ;;  %40546 = vmatprep.mubr.f32.mxu1 %v53241_v19 }
0x12e1   :  { %46657 = vmatprep.subr.bf16.mxu1 %v57365_v15 }
0x12e4   :  { %46659 = vmatpush3.bf16.msra.mxu1 %v57365_v15 }
0x12e5   :  { %46661 = vmatprep.subr.bf16.mxu1 %v57360_v40 }
0x12e7   :  { %40547 = vmatmul.mubr.f32.vlgmr.msra.gmra.mrb[28].mxu1 %v53238_v26 }
0x12e8   :  { %46663 = vmatpush3.bf16.msra.mxu1 %v57360_v40  ;;  %40557 = vmatprep.mubr.f32.mxu1 %v53247_v10 }
0x12e9   :  { %46665 = vmatprep.subr.bf16.mxu1 %v57361_v61 }
0x12ec   :  { %46667 = vmatpush3.bf16.msra.mxu1 %v57361_v61 }
0x12ed   :  { %46669 = vmatprep.subr.bf16.mxu1 %v57366_v38 }
0x12ef   :  { %40558 = vmatmul.mubr.f32.vlgmr.msra.gmra.mrb[28].mxu1 %v53244_v8 }
0x12f0   :  { %46671 = vmatpush3.bf16.msra.mxu1 %v57366_v38  ;;  %40568 = vmatprep.mubr.f32.mxu1 %v53235_v2 }
0x12f1   :  { %46673 = vmatprep.subr.bf16.mxu1 %v57367_v36 }
0x12f4   :  { %46675 = vmatpush3.bf16.msra.mxu1 %v57367_v36 }
0x12f5   :  { %v40515_v52 = vpop.f32.mrb[26].mxu1  ;;  %46677 = vmatprep.subr.bf16.mxu1 %v57360_v40 }
0x12f6   :  { %v10938_v22 = vsub.f32 %v53195_v0, %v40515_v52  ;;  %v53278_v29 = vadd.f32 %v40515_v52, %v57368_v33  ;;  %v10927_v57 = vpop.f32.mrb[27].mxu1 }
0x12f7   :  { %v10937_v56 = vsub.f32 %v53198_v6, %v10927_v57  ;;  %v53282_v23 = vadd.f32 %v10927_v57, %v57370_v58  ;;  %40569 = vmatmul.mubr.f32.vlgmr.msra.gmra.mrb[28].mxu1 %v53232_v51 }
0x12f8   :  { %57369 = vst [vmem:[#allocation37_spill] sm:$0xff] %v53278_v29  ;;  %v12005_v5 = vsel %vm1660_vm3, %v10938_v22, 0  ;;  %46679 = vmatpush3.bf16.msra.mxu1 %v57360_v40  ;;  %40579 = vmatprep.mubr.f32.mxu1 %v53235_v2 }
0x12f9   :  { %57371 = vst [vmem:[#allocation38_spill] sm:$0xff] %v53282_v23  ;;  %v53288_v44 = vand.u32 4294901760, %v12005_v5  ;;  %v12002_v0 = vsel %vm1660_vm3, %v10937_v56, 0  ;;  %46681 = vmatprep.subr.bf16.mxu1 %v57361_v61  ;;  %v53466_v23 = vld [vmem:[#allocation2 + $0x118] sm:$0xff] }
0x12fa   :  { %v53292_v33 = vand.u32 4294901760, %v12002_v0  ;;  %v13109_v47 = vand.u32 4294901760, %v53466_v23 }
0x12fb   :  { %v53295_v6 = vsub.f32 %v12005_v5, %v53288_v44 }
0x12fc   :  { %v53298_v58 = vsub.f32 %v12002_v0, %v53292_v33  ;;  %46683 = vmatpush3.bf16.msra.mxu1 %v57361_v61 }
0x12fd   :  { %v53302_v57 = vand.u32 4294901760, %v53295_v6  ;;  %46685 = vmatprep.subr.bf16.mxu1 %v57270_v12 }
0x12fe   :  { %v53306_v22 = vand.u32 4294901760, %v53298_v58 }
0x12ff   :  { %40580 = vmatmul.mubr.f32.vlgmr.msra.gmra.mrb[28].mxu1 %v53232_v51  ;;  %v12089_v56 = vsub.f32 %v53295_v6, %v53302_v57 }
0x1300   :  { %46687 = vmatpush3.bf16.msra.mxu1 %v57270_v12  ;;  %40590 = vmatprep.mubr.f32.mxu1 %v11018_v14  ;;  %v12079_v5 = vsub.f32 %v53298_v58, %v53306_v22  ;;  %v57372_v14 = vld [vmem:[#allocation23_spill] sm:$0xff] }
0x1301   :  { %46689 = vmatprep.subr.bf16.mxu1 %v57271_v62  ;;  %v53317_v0 = vand.u32 4294901760, %v12089_v56  ;;  %v57373_v56 = vld [vmem:[#allocation26_spill] sm:$0xff] }
0x1302   :  { %v53315_v52 = vand.u32 4294901760, %v12079_v5  ;;  %v73_v5 = vld [vmem:[#allocation2 + $0xd8] sm:$0xff] }
0x1304   :  { %46691 = vmatpush3.bf16.msra.mxu1 %v57271_v62  ;;  %40722 = vmatprep.mubr.f32.mxu0 %v53315_v52 }
0x1305   :  { %40723 = vmatmul.mubr.f32.vlgmr.msra.gmra.mrb[20].mxu0 %v53317_v0  ;;  %46693 = vmatprep.subr.bf16.mxu1 %v57272_v3 }
0x1306   :  { %46791 = vmatpush3.bf16.msra.mxu0 %v57272_v3  ;;  %40733 = vmatprep.mubr.f32.mxu0 %v53292_v33 }
0x1307   :  { %40591 = vmatmul.mubr.f32.vlgmr.msra.gmra.mrb[30].mxu1 %v11028_v45  ;;  %46793 = vmatprep.subr.bf16.mxu0 %v57372_v14  ;;  %v57374_v45 = vld [vmem:[#allocation27_spill] sm:$0xff] }
0x1308   :  { %46695 = vmatpush3.bf16.msra.mxu1 %v57272_v3  ;;  %40601 = vmatprep.mubr.f32.mxu1 %v53235_v2  ;;  %v78_v3 = vld [vmem:[#allocation2 + $0x100] sm:$0xff] }
0x1309   :  { %46697 = vmatprep.subr.bf16.mxu1 %v57372_v14 }
0x130a   :  { %46795 = vmatpush3.bf16.msra.mxu0 %v57372_v14 }
0x130b   :  { %46797 = vmatprep.subr.bf16.mxu0 %v57373_v56 }
0x130c   :  { %46699 = vmatpush3.bf16.msra.mxu1 %v57372_v14 }
0x130d   :  { %40734 = vmatmul.mubr.f32.vlgmr.msra.gmra.mrb[20].mxu0 %v53288_v44  ;;  %46701 = vmatprep.subr.bf16.mxu1 %v57373_v56 }
0x130e   :  { %46799 = vmatpush3.bf16.msra.mxu0 %v57373_v56  ;;  %40744 = vmatprep.mubr.f32.mxu0 %v53298_v58 }
0x130f   :  { %40602 = vmatmul.mubr.f32.vlgmr.msra.gmra.mrb[30].mxu1 %v53232_v51  ;;  %46801 = vmatprep.subr.bf16.mxu0 %v57374_v45 }
0x1310   :  { %46703 = vmatpush3.bf16.msra.mxu1 %v57373_v56  ;;  %40612 = vmatprep.mubr.f32.mxu1 %v53241_v19  ;;  %v57375_v19 = vld [vmem:[#allocation32_spill] sm:$0xff] }
0x1311   :  { %46705 = vmatprep.subr.bf16.mxu1 %v57374_v45 }
0x1312   :  { %46803 = vmatpush3.bf16.msra.mxu0 %v57374_v45 }
0x1313   :  { %46805 = vmatprep.subr.bf16.mxu0 %v57270_v12 }
0x1314   :  { %46707 = vmatpush3.bf16.msra.mxu1 %v57374_v45 }
0x1315   :  { %40745 = vmatmul.mubr.f32.vlgmr.msra.gmra.mrb[20].mxu0 %v53295_v6  ;;  %46709 = vmatprep.subr.bf16.mxu1 %v57270_v12 }
0x1316   :  { %46807 = vmatpush3.bf16.msra.mxu0 %v57270_v12  ;;  %40755 = vmatprep.mubr.f32.mxu0 %v53306_v22 }
0x1317   :  { %40613 = vmatmul.mubr.f32.vlgmr.msra.gmra.mrb[30].mxu1 %v53238_v26  ;;  %46809 = vmatprep.subr.bf16.mxu0 %v57271_v62  ;;  %v57376_v26 = vld [vmem:[#allocation34_spill] sm:$0xff] }
0x1318   :  { %46711 = vmatpush3.bf16.msra.mxu1 %v57270_v12  ;;  %40623 = vmatprep.mubr.f32.mxu1 %v53247_v10  ;;  %v57377_v10 = vld [vmem:[#allocation79_spill] sm:$0xff] }
0x1319   :  { %46713 = vmatprep.subr.bf16.mxu1 %v57271_v62 }
0x131a   :  { %46811 = vmatpush3.bf16.msra.mxu0 %v57271_v62 }
0x131b   :  { %46813 = vmatprep.subr.bf16.mxu0 %v57375_v19 }
0x131c   :  { %46715 = vmatpush3.bf16.msra.mxu1 %v57271_v62 }
0x131d   :  { %40756 = vmatmul.mubr.f32.vlgmr.msra.gmra.mrb[20].mxu0 %v53302_v57  ;;  %46717 = vmatprep.subr.bf16.mxu1 %v57375_v19 }
0x131e   :  { %46815 = vmatpush3.bf16.msra.mxu0 %v57375_v19  ;;  %40766 = vmatprep.mubr.f32.mxu0 %v53292_v33 }
0x131f   :  { %40624 = vmatmul.mubr.f32.vlgmr.msra.gmra.mrb[30].mxu1 %v53244_v8  ;;  %46817 = vmatprep.subr.bf16.mxu0 %v57376_v26  ;;  %v57378_v8 = vld [vmem:[#allocation80_spill] sm:$0xff] }
0x1320   :  { %46719 = vmatpush3.bf16.msra.mxu1 %v57375_v19  ;;  %40634 = vmatprep.mubr.f32.mxu1 %v53235_v2 }
0x1321   :  { %46721 = vmatprep.subr.bf16.mxu1 %v57376_v26 }
0x1322   :  { %46819 = vmatpush3.bf16.msra.mxu0 %v57376_v26 }
0x1323   :  { %46821 = vmatprep.subr.bf16.mxu0 %v57270_v12 }
0x1324   :  { %46723 = vmatpush3.bf16.msra.mxu1 %v57376_v26  ;;  %v53436_v26 = vld [vmem:[#allocation2 + $0xe8] sm:$0xff] }
0x1325   :  { %40767 = vmatmul.mubr.f32.vlgmr.msra.gmra.mrb[20].mxu0 %v53288_v44  ;;  %46725 = vmatprep.subr.bf16.mxu1 %v57270_v12 }
0x1326   :  { %46823 = vmatpush3.bf16.msra.mxu0 %v57270_v12  ;;  %40777 = vmatprep.mubr.f32.mxu0 %v53292_v33 }
0x1327   :  { %40635 = vmatmul.mubr.f32.vlgmr.msra.gmra.mrb[30].mxu1 %v53232_v51  ;;  %46825 = vmatprep.subr.bf16.mxu0 %v57271_v62 }
0x1328   :  { %46727 = vmatpush3.bf16.msra.mxu1 %v57270_v12  ;;  %40645 = vmatprep.mubr.f32.mxu1 %v53235_v2  ;;  %v70_v2 = vld [vmem:[#allocation2 + $0xc0] sm:$0xff]  ;;  %v13100_v12 = vand.u32 4294901760, %v78_v3 }
0x1329   :  { %46729 = vmatprep.subr.bf16.mxu1 %v57271_v62 }
0x132a   :  { %46827 = vmatpush3.bf16.msra.mxu0 %v57271_v62 }
0x132b   :  { %47213 = vmatprep.subr.bf16.mxu0 %v51766_v27 }
0x132c   :  { %46731 = vmatpush3.bf16.msra.mxu1 %v57271_v62  ;;  %v79_v62 = vld [vmem:[#allocation2 + $0x108] sm:$0xff] }
0x132d   :  { %40778 = vmatmul.mubr.f32.vlgmr.msra.gmra.mrb[20].mxu0 %v53288_v44  ;;  %46733 = vmatprep.subr.bf16.mxu1 %v57360_v40 }
0x132e   :  { %47215 = vmatpush3.bf16.msra.mxu0 %v51766_v27 }
0x132f   :  { %40646 = vmatmul.mubr.f32.vlgmr.msra.gmra.mrb[30].mxu1 %v53232_v51  ;;  %47217 = vmatprep.subr.bf16.mxu0 %v51776_v13  ;;  %v57379_v51 = vld [vmem:[#allocation81_spill] sm:$0xff] }
0x1330   :  { %46735 = vmatpush3.bf16.msra.mxu1 %v57360_v40  ;;  %40656 = vmatprep.mubr.f32.mxu1 %v53315_v52 }
0x1331   :  { %46737 = vmatprep.subr.bf16.mxu1 %v57361_v61 }
0x1332   :  { %47219 = vmatpush3.bf16.msra.mxu0 %v51776_v13 }
0x1333   :  { %47221 = vmatprep.subr.bf16.mxu0 %v51780_v54 }
0x1334   :  { %46739 = vmatpush3.bf16.msra.mxu1 %v57361_v61 }
0x1335   :  { %46741 = vmatprep.subr.bf16.mxu1 %v57362_v48 }
0x1336   :  { %47223 = vmatpush3.bf16.msra.mxu0 %v51780_v54 }
0x1337   :  { %40657 = vmatmul.mubr.f32.vlgmr.msra.gmra.mrb[32].mxu1 %v53317_v0  ;;  %47225 = vmatprep.subr.bf16.mxu0 %v51784_v60  ;;  %v53434_v0 = vld [vmem:[#allocation2 + $0xe0] sm:$0xff] }
0x1338   :  { %46743 = vmatpush3.bf16.msra.mxu1 %v57362_v48  ;;  %40667 = vmatprep.mubr.f32.mxu1 %v53292_v33  ;;  %v13103_v48 = vand.u32 4294901760, %v79_v62 }
0x1339   :  { %46745 = vmatprep.subr.bf16.mxu1 %v57363_v11 }
0x133a   :  { %47227 = vmatpush3.bf16.msra.mxu0 %v51784_v60 }
0x133b   :  { %47229 = vmatprep.subr.bf16.mxu0 %v51804_v17 }
0x133c   :  { %46747 = vmatpush3.bf16.msra.mxu1 %v57363_v11 }
0x133d   :  { %46749 = vmatprep.subr.bf16.mxu1 %v57364_v41 }
0x133e   :  { %47231 = vmatpush3.bf16.msra.mxu0 %v51804_v17 }
0x133f   :  { %40668 = vmatmul.mubr.f32.vlgmr.msra.gmra.mrb[32].mxu1 %v53288_v44  ;;  %47233 = vmatprep.subr.bf16.mxu0 %v51812_v50 }
0x1340   :  { %46751 = vmatpush3.bf16.msra.mxu1 %v57364_v41  ;;  %40678 = vmatprep.mubr.f32.mxu1 %v53298_v58  ;;  %v72_v58 = vld [vmem:[#allocation2 + $0xd0] sm:$0xff] }
0x1341   :  { %46753 = vmatprep.subr.bf16.mxu1 %v57365_v15  ;;  %v13082_v52 = vand.u32 4294901760, %v72_v58 }
0x1342   :  { %47235 = vmatpush3.bf16.msra.mxu0 %v51812_v50 }
0x1343   :  { %47237 = vmatprep.subr.bf16.mxu0 %v57377_v10 }
0x1344   :  { %46755 = vmatpush3.bf16.msra.mxu1 %v57365_v15  ;;  %v53446_v15 = vld [vmem:[#allocation2 + $0xf8] sm:$0xff] }
0x1345   :  { %46757 = vmatprep.subr.bf16.mxu1 %v57360_v40  ;;  %v13097_v14 = vand.u32 4294901760, %v53446_v15 }
0x1346   :  { %47239 = vmatpush3.bf16.msra.mxu0 %v57377_v10 }
0x1347   :  { %40679 = vmatmul.mubr.f32.vlgmr.msra.gmra.mrb[32].mxu1 %v53295_v6  ;;  %47241 = vmatprep.subr.bf16.mxu0 %v57378_v8  ;;  %v71_v6 = vld [vmem:[#allocation2 + $0xc8] sm:$0xff] }
0x1348   :  { %46759 = vmatpush3.bf16.msra.mxu1 %v57360_v40  ;;  %40689 = vmatprep.mubr.f32.mxu1 %v53306_v22  ;;  %v13079_v22 = vand.u32 4294901760, %v71_v6 }
0x1349   :  { %46761 = vmatprep.subr.bf16.mxu1 %v57361_v61 }
0x134a   :  { %47243 = vmatpush3.bf16.msra.mxu0 %v57378_v8  ;;  %v53490_v43 = vsub.f32 %v71_v6, %v13079_v22 }
0x134b   :  { %47245 = vmatprep.subr.bf16.mxu0 %v57379_v51 }
0x134c   :  { %46763 = vmatpush3.bf16.msra.mxu1 %v57361_v61  ;;  %v56684_v59 = vand.u32 4294901760, %v53490_v43 }
0x134d   :  { %46765 = vmatprep.subr.bf16.mxu1 %v57366_v38 }
0x134f   :  { %40690 = vmatmul.mubr.f32.vlgmr.msra.gmra.mrb[32].mxu1 %v53302_v57  ;;  %v13076_v57 = vand.u32 4294901760, %v70_v2 }
0x1350   :  { %46767 = vmatpush3.bf16.msra.mxu1 %v57366_v38  ;;  %40700 = vmatprep.mubr.f32.mxu1 %v53292_v33  ;;  %v13091_v38 = vand.u32 4294901760, %v53436_v26 }
0x1351   :  { %46769 = vmatprep.subr.bf16.mxu1 %v57367_v36  ;;  %v53438_v19 = vpack.c.bf16 %v13079_v22, %v13076_v57  ;;  %v53488_v24 = vsub.f32 %v70_v2, %v13076_v57  ;;  %v53506_v2 = vpack.c.bf16 %v56680_v16, %v56681_v20  ;;  %v13187_v57 = vsub.f32 %v53490_v43, %v56684_v59 }
0x1352   :  { %v53514_v22 = vsub.f32 %v72_v58, %v13082_v52 }
0x1353   :  { %57380 = vst [vmem:[#allocation39_spill] sm:$0xff] %v53438_v19  ;;  %v56696_v46 = vand.u32 4294901760, %v53488_v24  ;;  %57387 = vst [vmem:[#allocation150_spill] sm:$0xff] %v53506_v2  ;;  %v13188_v42 = vand.u32 4294901760, %v13187_v57 }
0x1354   :  { %46771 = vmatpush3.bf16.msra.mxu1 %v57367_v36  ;;  %v13085_v36 = vand.u32 4294901760, %v73_v5  ;;  %v56687_v16 = vand.u32 4294901760, %v53514_v22 }
0x1355   :  { %46773 = vmatprep.subr.bf16.mxu1 %v57360_v40  ;;  %v13180_v6 = vsub.f32 %v53488_v24, %v56696_v46 }
0x1356   :  { %v53442_v45 = vpack.c.bf16 %v13085_v36, %v13082_v52  ;;  %v53516_v21 = vsub.f32 %v73_v5, %v13085_v36  ;;  %v13194_v59 = vsub.f32 %v53514_v22, %v56687_v16  ;;  %v53534_v5 = vsub.f32 %v53436_v26, %v13091_v38 }
0x1357   :  { %40701 = vmatmul.mubr.f32.vlgmr.msra.gmra.mrb[32].mxu1 %v53288_v44  ;;  %v13181_v18 = vand.u32 4294901760, %v13180_v6  ;;  %v53560_v16 = vsub.f32 %v78_v3, %v13100_v12  ;;  %v53579_v3 = vsub.f32 %v53466_v23, %v13109_v47 }
0x1358   :  { %46775 = vmatpush3.bf16.msra.mxu1 %v57360_v40  ;;  %40711 = vmatprep.mubr.f32.mxu1 %v53292_v33  ;;  %v13088_v33 = vand.u32 4294901760, %v53434_v0  ;;  %57381 = vst [vmem:[#allocation40_spill] sm:$0xff] %v53442_v45  ;;  %v53464_v40 = vld [vmem:[#allocation2 + $0x110] sm:$0xff]  ;;  %v56685_v20 = vand.u32 4294901760, %v53516_v21  ;;  %v13195_v52 = vand.u32 4294901760, %v13194_v59  ;;  %v53551_v59 = vsub.f32 %v53446_v15, %v13097_v14 }
0x1359   :  { %46777 = vmatprep.subr.bf16.mxu1 %v57361_v61  ;;  %v13106_v29 = vand.u32 4294901760, %v53464_v40  ;;  %v53522_v9 = vpack.c.bf16 %v13188_v42, %v13181_v18  ;;  %v56688_v18 = vand.u32 4294901760, %v53534_v5  ;;  %v56692_v15 = vand.u32 4294901760, %v53560_v16 }
0x135a   :  { %v53451_v56 = vpack.c.bf16 %v13091_v38, %v13088_v33  ;;  %v13201_v36 = vsub.f32 %v53516_v21, %v56685_v20  ;;  %v53531_v58 = vsub.f32 %v53434_v0, %v13088_v33 }
0x135b   :  { %v53472_v49 = vpack.c.bf16 %v13109_v47, %v13106_v29  ;;  %57388 = vst [vmem:[#allocation151_spill] sm:$0xff] %v53522_v9  ;;  %v13215_v0 = vsub.f32 %v53534_v5, %v56688_v18  ;;  %v53562_v18 = vsub.f32 %v79_v62, %v13103_v48  ;;  %v53576_v62 = vsub.f32 %v53464_v40, %v13106_v29 }
0x135c   :  { %46779 = vmatpush3.bf16.msra.mxu1 %v57361_v61  ;;  %57382 = vst [vmem:[#allocation145_spill] sm:$0xff] %v53451_v56  ;;  %v53462_v61 = vpack.c.bf16 %v13103_v48, %v13100_v12  ;;  %v13202_v6 = vand.u32 4294901760, %v13201_v36  ;;  %v56686_v42 = vand.u32 4294901760, %v53531_v58  ;;  %v57393_v47 = vand.u32 4294901760, %v53474_v53 }
0x135d   :  { %46829 = vmatprep.subr.bf16.mxu1 %v53438_v19  ;;  %57385 = vst [vmem:[#allocation148_spill] sm:$0xff] %v53472_v49  ;;  %v13216_v33 = vand.u32 4294901760, %v13215_v0  ;;  %v13236_v0 = vsub.f32 %v53560_v16, %v56692_v15 }
0x135e   :  { %57384 = vst [vmem:[#allocation147_spill] sm:$0xff] %v53462_v61  ;;  %v53539_v57 = vpack.c.bf16 %v13202_v6, %v13195_v52  ;;  %v13208_v20 = vsub.f32 %v53531_v58, %v56686_v42  ;;  %v56689_v52 = vand.u32 4294901760, %v53551_v59  ;;  %v53596_v23 = vsub.f32 %v53474_v53, %v57393_v47 }
0x135f   :  { %40712 = vmatmul.mubr.f32.vlgmr.msra.gmra.mrb[32].mxu1 %v53288_v44  ;;  %v53444_v44 = vld [vmem:[#allocation2 + $0xf0] sm:$0xff]  ;;  %v57396_v47 = vand.u32 4294901760, %v53492_v7 }
0x1360   :  { %46831 = vmatpush3.bf16.msra.mxu1 %v53438_v19  ;;  %v13094_v41 = vand.u32 4294901760, %v53444_v44  ;;  %57389 = vst [vmem:[#allocation152_spill] sm:$0xff] %v53539_v57  ;;  %v13209_v26 = vand.u32 4294901760, %v13208_v20 }
0x1361   :  { %46833 = vmatprep.subr.bf16.mxu1 %v53442_v45 }
0x1362   :  { %v53457_v11 = vpack.c.bf16 %v13097_v14, %v13094_v41  ;;  %v53548_v38 = vsub.f32 %v53444_v44, %v13094_v41  ;;  %v53555_v6 = vpack.c.bf16 %v13216_v33, %v13209_v26  ;;  %v13229_v41 = vsub.f32 %v53551_v59, %v56689_v52 }
0x1363   :  { %v56690_v14 = vand.u32 4294901760, %v53562_v18  ;;  %v56691_v33 = vand.u32 4294901760, %v53576_v62 }
0x1364   :  { %46835 = vmatpush3.bf16.msra.mxu1 %v53442_v45  ;;  %57383 = vst [vmem:[#allocation146_spill] sm:$0xff] %v53457_v11  ;;  %v56695_v36 = vand.u32 4294901760, %v53548_v38  ;;  %57390 = vst [vmem:[#allocation153_spill] sm:$0xff] %v53555_v6  ;;  %v13230_v44 = vand.u32 4294901760, %v13229_v41  ;;  %v56693_v41 = vand.u32 4294901760, %v53579_v3 }
0x1365   :  { %46837 = vmatprep.subr.bf16.mxu1 %v53451_v56  ;;  %v13243_v12 = vsub.f32 %v53562_v18, %v56690_v14  ;;  %v13250_v14 = vsub.f32 %v53576_v62, %v56691_v33 }
0x1366   :  { %v13222_v42 = vsub.f32 %v53548_v38, %v56695_v36  ;;  %v13257_v29 = vsub.f32 %v53579_v3, %v56693_v41  ;;  %v53613_v41 = vsub.f32 %v53492_v7, %v57396_v47 }
0x1367   :  { %v13244_v26 = vand.u32 4294901760, %v13243_v12  ;;  %v13251_v12 = vand.u32 4294901760, %v13250_v14 }
0x1368   :  { %46839 = vmatpush3.bf16.msra.mxu1 %v53451_v56  ;;  %v13223_v20 = vand.u32 4294901760, %v13222_v42  ;;  %v13237_v42 = vand.u32 4294901760, %v13236_v0 }
0x1369   :  { %46841 = vmatprep.subr.bf16.mxu1 %v53457_v11 }
0x136a   :  { %v53581_v48 = vpack.c.bf16 %v13230_v44, %v13223_v20  ;;  %v53585_v52 = vpack.c.bf16 %v13244_v26, %v13237_v42  ;;  %v57394_v20 = vand.u32 4294901760, %v53476_v28  ;;  %v13258_v42 = vand.u32 4294901760, %v13257_v29 }
0x136b   :  { %v56694_v26 = vand.u32 4294901760, %v53596_v23 }
0x136c   :  { %46843 = vmatpush3.bf16.msra.mxu1 %v53457_v11  ;;  %57391 = vst [vmem:[#allocation154_spill] sm:$0xff] %v53581_v48  ;;  %57392 = vst [vmem:[#allocation155_spill] sm:$0xff] %v53585_v52  ;;  %v53601_v44 = vsub.f32 %v53476_v28, %v57394_v20  ;;  %v53605_v15 = vpack.c.bf16 %v13258_v42, %v13251_v12  ;;  %v57397_v28 = vand.u32 4294901760, %v53494_v37  ;;  %v56697_v12 = vand.u32 4294901760, %v53613_v41 }
0x136d   :  { %46845 = vmatprep.subr.bf16.mxu1 %v53462_v61  ;;  %v13264_v53 = vsub.f32 %v53596_v23, %v56694_v26 }
0x136e   :  { %v56699_v33 = vand.u32 4294901760, %v53601_v44  ;;  %57395 = vst [vmem:[#allocation156_spill] sm:$0xff] %v53605_v15  ;;  %v53618_v14 = vsub.f32 %v53494_v37, %v57397_v28  ;;  %v13278_v7 = vsub.f32 %v53613_v41, %v56697_v12  ;;  %v53645_v12 = vpack.c.bf16 %v53534_v5, %v53531_v58 }
0x136f   :  { %v13265_v20 = vand.u32 4294901760, %v13264_v53  ;;  %v53637_v53 = vpack.c.bf16 %v53490_v43, %v53488_v24 }
0x1370   :  { %46847 = vmatpush3.bf16.msra.mxu1 %v53462_v61  ;;  %v13271_v29 = vsub.f32 %v53601_v44, %v56699_v33  ;;  %v56698_v42 = vand.u32 4294901760, %v53618_v14  ;;  %v13279_v28 = vand.u32 4294901760, %v13278_v7  ;;  %57402 = vst [vmem:[#allocation161_spill] sm:$0xff] %v53645_v12  ;;  %v53661_v7 = vpack.c.bf16 %v53601_v44, %v53596_v23 }
0x1371   :  { %46849 = vmatprep.subr.bf16.mxu1 %v53472_v49  ;;  %57400 = vst [vmem:[#allocation159_spill] sm:$0xff] %v53637_v53 }
0x1372   :  { %v13272_v26 = vand.u32 4294901760, %v13271_v29  ;;  %v13285_v47 = vsub.f32 %v53618_v14, %v56698_v42  ;;  %v53641_v29 = vpack.c.bf16 %v53516_v21, %v53514_v22  ;;  %57406 = vst [vmem:[#allocation165_spill] sm:$0xff] %v53661_v7 }
0x1374   :  { %46851 = vmatpush3.bf16.msra.mxu1 %v53472_v49  ;;  %v53631_v37 = vpack.c.bf16 %v13272_v26, %v13265_v20  ;;  %v13286_v36 = vand.u32 4294901760, %v13285_v47  ;;  %57401 = vst [vmem:[#allocation160_spill] sm:$0xff] %v53641_v29  ;;  %v53649_v26 = vpack.c.bf16 %v53551_v59, %v53548_v38  ;;  %v53657_v20 = vpack.c.bf16 %v53579_v3, %v53576_v62 }
0x1375   :  { %46853 = vmatprep.subr.bf16.mxu1 %v53486_v32  ;;  %v53665_v47 = vpack.c.bf16 %v53618_v14, %v53613_v41 }
0x1376   :  { %57398 = vst [vmem:[#allocation157_spill] sm:$0xff] %v53631_v37  ;;  %v53633_v46 = vpack.c.bf16 %v13286_v36, %v13279_v28  ;;  %57403 = vst [vmem:[#allocation162_spill] sm:$0xff] %v53649_v26  ;;  %v53653_v36 = vpack.c.bf16 %v53562_v18, %v53560_v16 }
0x1377   :  { %57405 = vst [vmem:[#allocation164_spill] sm:$0xff] %v53657_v20  ;;  %57407 = vst [vmem:[#allocation166_spill] sm:$0xff] %v53665_v47 }
0x1378   :  { %46855 = vmatpush3.bf16.msra.mxu1 %v53486_v32  ;;  %57399 = vst [vmem:[#allocation158_spill] sm:$0xff] %v53633_v46  ;;  %57404 = vst [vmem:[#allocation163_spill] sm:$0xff] %v53653_v36 }
0x1379   :  { %46857 = vmatprep.subr.bf16.mxu1 %v53506_v2 }
0x137c   :  { %46859 = vmatpush3.bf16.msra.mxu1 %v53506_v2 }
0x137d   :  { %46861 = vmatprep.subr.bf16.mxu1 %v53522_v9 }
0x13d2   :  { %v40581_v40 = vpop.f32.mrb[28].mxu1 }
0x13d3   :  { %v11463_v0 = vpop.f32.mrb[29].mxu1 }
0x1400   :  { %v40779_v28 = vpop.f32.mrb[20].mxu0 }
0x1401   :  { %v13070_v42 = vmul.f32 %v40779_v28, %v40581_v40  ;;  %v13053_v33 = vpop.f32.mrb[21].mxu0 }
0x1402   :  { %v40647_v63 = vpop.f32.mrb[30].mxu1  ;;  %v13069_v30 = vmul.f32 %v13053_v33, %v11463_v0 }
0x1403   :  { %v13066_v25 = vmul.f32 %v40779_v28, %v40647_v63  ;;  %v11991_v31 = vpop.f32.mrb[31].mxu1 }
0x1404   :  { %v13065_v4 = vmul.f32 %v13053_v33, %v11991_v31 }
0x1432   :  { %v40713_v39 = vpop.f32.mrb[32].mxu1 }
0x1433   :  { %v13064_v35 = vmul.f32 %v40713_v39, %v40581_v40  ;;  %v13072_v1 = vmul.f32 %v40713_v39, %v40647_v63  ;;  %v12525_v34 = vpop.f32.mrb[33].mxu1 }
0x1434   :  { %v13063_v8 = vmul.f32 %v12525_v34, %v11463_v0  ;;  %v13071_v10 = vmul.f32 %v12525_v34, %v11991_v31 }
0x1435   :  { %v53667_v50 = vadd.f32 %v13066_v25, %v13064_v35  ;;  %v13074_v17 = vsub.f32 %v13070_v42, %v13072_v1  ;;  %v57411_v25 = vand.u32 4294901760, %v53514_v22  ;;  %v57418_v22 = vand.u32 4294901760, %v53551_v59 }
0x1436   :  { %v53669_v60 = vadd.f32 %v13065_v4, %v13063_v8  ;;  %v13073_v54 = vsub.f32 %v13069_v30, %v13071_v10  ;;  %v57412_v30 = vand.u32 4294901760, %v53516_v21  ;;  %v57417_v21 = vand.u32 4294901760, %v53548_v38 }
0x1437   :  { %v53671_v13 = vand.u32 4294901760, %v13074_v17  ;;  %v57423_v38 = vand.u32 4294901760, %v53576_v62  ;;  %v57424_v59 = vand.u32 4294901760, %v53579_v3  ;;  %v57429_v62 = vand.u32 4294901760, %v53613_v41 }
0x1438   :  { %v53673_v27 = vand.u32 4294901760, %v13073_v54  ;;  %v53744_v10 = vpack.c.bf16 %v57412_v30, %v57411_v25  ;;  %v53763_v40 = vpack.c.bf16 %v57418_v22, %v57417_v21  ;;  %v57430_v3 = vand.u32 4294901760, %v53618_v14  ;;  %v57432_v14 = vld [vmem:[#allocation42_spill] sm:$0xff]  ;;  %v57439_v25 = vld [vmem:[#allocation57_spill] sm:$0xff]  ;;  %v57442_v21 = vld [vmem:[#allocation47_spill] sm:$0xff] }
0x1439   :  { %v53676_v28 = vsub.f32 %v13074_v17, %v53671_v13  ;;  %v57408_v17 = vand.u32 4294901760, %v53488_v24  ;;  %v57415_v24 = vand.u32 4294901760, %v53534_v5  ;;  %v57421_v5 = vand.u32 4294901760, %v53562_v18  ;;  %v57443_v22 = vld [vmem:[#allocation48_spill] sm:$0xff] }
0x143a   :  { %v13157_v33 = vsub.f32 %v13073_v54, %v53673_v27  ;;  %v57409_v54 = vand.u32 4294901760, %v53490_v43  ;;  %57413 = vst [vmem:[#allocation168_spill] sm:$0xff] %v53744_v10  ;;  %v57414_v43 = vand.u32 4294901760, %v53531_v58  ;;  %57419 = vst [vmem:[#allocation170_spill] sm:$0xff] %v53763_v40  ;;  %v57420_v58 = vand.u32 4294901760, %v53560_v16 }
0x143b   :  { %v13168_v39 = vand.u32 4294901760, %v53676_v28  ;;  %v53779_v42 = vpack.c.bf16 %v57424_v59, %v57423_v38  ;;  %v57426_v16 = vand.u32 4294901760, %v53596_v23  ;;  %v57427_v18 = vand.u32 4294901760, %v53601_v44  ;;  %v57446_v38 = vld [vmem:[#allocation53_spill] sm:$0xff]  ;;  %v57447_v59 = vld [vmem:[#allocation54_spill] sm:$0xff] }
0x143c   :  { %v13158_v63 = vand.u32 4294901760, %v13157_v33  ;;  %v53736_v31 = vpack.c.bf16 %v57409_v54, %v57408_v17  ;;  %v53755_v8 = vpack.c.bf16 %v57415_v24, %v57414_v43  ;;  %v53771_v0 = vpack.c.bf16 %v57421_v5, %v57420_v58  ;;  %v57438_v17 = vld [vmem:[#allocation56_spill] sm:$0xff]  ;;  %v57440_v24 = vld [vmem:[#allocation41_spill] sm:$0xff] }
0x143d   :  { %v13169_v35 = vsub.f32 %v53676_v28, %v13168_v39  ;;  %57425 = vst [vmem:[#allocation172_spill] sm:$0xff] %v53779_v42  ;;  %v53812_v41 = vand.u32 4294901760, %v53669_v60  ;;  %v57444_v58 = vld [vmem:[#allocation49_spill] sm:$0xff]  ;;  %v57445_v5 = vld [vmem:[#allocation52_spill] sm:$0xff] }
0x143e   :  { %v13159_v34 = vsub.f32 %v13157_v33, %v13158_v63  ;;  %57410 = vst [vmem:[#allocation167_spill] sm:$0xff] %v53736_v31  ;;  %57416 = vst [vmem:[#allocation169_spill] sm:$0xff] %v53755_v8 }
0x143f   :  { %v13170_v1 = vand.u32 4294901760, %v13169_v35  ;;  %57422 = vst [vmem:[#allocation171_spill] sm:$0xff] %v53771_v0  ;;  %v57435_v35 = vld [vmem:[#allocation46_spill] sm:$0xff] }
0x1440   :  { %v13160_v4 = vand.u32 4294901760, %v13159_v34  ;;  %v53839_v34 = vand.u32 4294901760, %v53667_v50 }
0x1442   :  { %40812 = vmatprep.mubr.f32.mxu1 %v13160_v4  ;;  %v57436_v4 = vld [vmem:[#allocation50_spill] sm:$0xff] }
0x1443   :  { %40813 = vmatmul.mubr.f32.vlgmr.msra.gmra.mrb[34].mxu1 %v13170_v1  ;;  %v57437_v1 = vld [vmem:[#allocation51_spill] sm:$0xff] }
0x1444   :  { %46863 = vmatpush3.bf16.msra.mxu1 %v53522_v9  ;;  %40847 = vmatprep.mubr.f32.mxu1 %v53673_v27  ;;  %v57478_v9 = vld [vmem:[#allocation96_spill] sm:$0xff] }
0x1445   :  { %46865 = vmatprep.subr.bf16.mxu1 %v53539_v57 }
0x1448   :  { %46867 = vmatpush3.bf16.msra.mxu1 %v53539_v57  ;;  %v57476_v57 = vld [vmem:[#allocation94_spill] sm:$0xff] }
0x1449   :  { %46869 = vmatprep.subr.bf16.mxu1 %v53555_v6 }
0x144c   :  { %46871 = vmatpush3.bf16.msra.mxu1 %v53555_v6  ;;  %v57475_v6 = vld [vmem:[#allocation93_spill] sm:$0xff] }
0x144d   :  { %46873 = vmatprep.subr.bf16.mxu1 %v53581_v48 }
0x1450   :  { %46875 = vmatpush3.bf16.msra.mxu1 %v53581_v48  ;;  %v57474_v48 = vld [vmem:[#allocation92_spill] sm:$0xff] }
0x1451   :  { %46877 = vmatprep.subr.bf16.mxu1 %v53585_v52 }
0x1454   :  { %46879 = vmatpush3.bf16.msra.mxu1 %v53585_v52  ;;  %v57473_v52 = vld [vmem:[#allocation91_spill] sm:$0xff] }
0x1455   :  { %46881 = vmatprep.subr.bf16.mxu1 %v53605_v15 }
0x1458   :  { %46883 = vmatpush3.bf16.msra.mxu1 %v53605_v15  ;;  %v57472_v15 = vld [vmem:[#allocation90_spill] sm:$0xff] }
0x1459   :  { %46885 = vmatprep.subr.bf16.mxu1 %v53631_v37 }
0x145c   :  { %46887 = vmatpush3.bf16.msra.mxu1 %v53631_v37  ;;  %v57471_v37 = vld [vmem:[#allocation89_spill] sm:$0xff] }
0x145d   :  { %46889 = vmatprep.subr.bf16.mxu1 %v53633_v46 }
0x1460   :  { %46891 = vmatpush3.bf16.msra.mxu1 %v53633_v46  ;;  %v57466_v46 = vld [vmem:[#allocation84_spill] sm:$0xff] }
0x1461   :  { %46893 = vmatprep.subr.bf16.mxu1 %v53637_v53 }
0x1463   :  { %40848 = vmatmul.mubr.f32.vlgmr.msra.gmra.mrb[34].mxu1 %v53671_v13 }
0x1464   :  { %46895 = vmatpush3.bf16.msra.mxu1 %v53637_v53  ;;  %40882 = vmatprep.mubr.f32.mxu1 %v13157_v33  ;;  %v53795_v33 = vpack.c.bf16 %v57430_v3, %v57429_v62  ;;  %v57450_v62 = vld [vmem:[#allocation59_spill] sm:$0xff]  ;;  %v57451_v3 = vld [vmem:[#allocation60_spill] sm:$0xff] }
0x1465   :  { %46897 = vmatprep.subr.bf16.mxu1 %v53641_v29 }
0x1466   :  { %57431 = vst [vmem:[#allocation174_spill] sm:$0xff] %v53795_v33 }
0x1468   :  { %46899 = vmatpush3.bf16.msra.mxu1 %v53641_v29 }
0x1469   :  { %46901 = vmatprep.subr.bf16.mxu1 %v53645_v12 }
0x146c   :  { %46903 = vmatpush3.bf16.msra.mxu1 %v53645_v12 }
0x146d   :  { %46905 = vmatprep.subr.bf16.mxu1 %v53649_v26 }
0x1470   :  { %46907 = vmatpush3.bf16.msra.mxu1 %v53649_v26 }
0x1471   :  { %46909 = vmatprep.subr.bf16.mxu1 %v53653_v36 }
0x1474   :  { %46911 = vmatpush3.bf16.msra.mxu1 %v53653_v36 }
0x1475   :  { %46913 = vmatprep.subr.bf16.mxu1 %v53657_v20 }
0x1478   :  { %46915 = vmatpush3.bf16.msra.mxu1 %v53657_v20 }
0x1479   :  { %46917 = vmatprep.subr.bf16.mxu1 %v53661_v7 }
0x147c   :  { %46919 = vmatpush3.bf16.msra.mxu1 %v53661_v7 }
0x147d   :  { %46921 = vmatprep.subr.bf16.mxu1 %v53665_v47 }
0x1480   :  { %46923 = vmatpush3.bf16.msra.mxu1 %v53665_v47 }
0x1481   :  { %46925 = vmatprep.subr.bf16.mxu1 %v53438_v19 }
0x1483   :  { %40883 = vmatmul.mubr.f32.vlgmr.msra.gmra.mrb[34].mxu1 %v53676_v28  ;;  %v53787_v28 = vpack.c.bf16 %v57427_v18, %v57426_v16  ;;  %v57448_v16 = vld [vmem:[#allocation55_spill] sm:$0xff]  ;;  %v57449_v18 = vld [vmem:[#allocation58_spill] sm:$0xff] }
0x1484   :  { %46927 = vmatpush3.bf16.msra.mxu1 %v53438_v19  ;;  %40917 = vmatprep.mubr.f32.mxu1 %v13158_v63  ;;  %v57434_v63 = vld [vmem:[#allocation45_spill] sm:$0xff] }
0x1485   :  { %46929 = vmatprep.subr.bf16.mxu1 %v53442_v45  ;;  %57428 = vst [vmem:[#allocation173_spill] sm:$0xff] %v53787_v28 }
0x1488   :  { %46931 = vmatpush3.bf16.msra.mxu1 %v53442_v45 }
0x1489   :  { %46933 = vmatprep.subr.bf16.mxu1 %v53451_v56 }
0x148c   :  { %46935 = vmatpush3.bf16.msra.mxu1 %v53451_v56 }
0x148d   :  { %46937 = vmatprep.subr.bf16.mxu1 %v53457_v11 }
0x1490   :  { %46939 = vmatpush3.bf16.msra.mxu1 %v53457_v11 }
0x1491   :  { %46941 = vmatprep.subr.bf16.mxu1 %v53462_v61 }
0x1494   :  { %46943 = vmatpush3.bf16.msra.mxu1 %v53462_v61 }
0x1495   :  { %46945 = vmatprep.subr.bf16.mxu1 %v53472_v49 }
0x1498   :  { %46947 = vmatpush3.bf16.msra.mxu1 %v53472_v49 }
0x1499   :  { %46949 = vmatprep.subr.bf16.mxu1 %v53486_v32 }
0x149c   :  { %46951 = vmatpush3.bf16.msra.mxu1 %v53486_v32 }
0x149d   :  { %46953 = vmatprep.subr.bf16.mxu1 %v53506_v2 }
0x14a0   :  { %46955 = vmatpush3.bf16.msra.mxu1 %v53506_v2 }
0x14a1   :  { %46957 = vmatprep.subr.bf16.mxu1 %v53736_v31 }
0x14a3   :  { %40918 = vmatmul.mubr.f32.vlgmr.msra.gmra.mrb[34].mxu1 %v13168_v39  ;;  %v57433_v39 = vld [vmem:[#allocation43_spill] sm:$0xff] }
0x14a4   :  { %46959 = vmatpush3.bf16.msra.mxu1 %v53736_v31  ;;  %40952 = vmatprep.mubr.f32.mxu1 %v53673_v27 }
0x14a5   :  { %46961 = vmatprep.subr.bf16.mxu1 %v53744_v10 }
0x14a8   :  { %46963 = vmatpush3.bf16.msra.mxu1 %v53744_v10 }
0x14a9   :  { %46965 = vmatprep.subr.bf16.mxu1 %v53755_v8 }
0x14ac   :  { %46967 = vmatpush3.bf16.msra.mxu1 %v53755_v8 }
0x14ad   :  { %46969 = vmatprep.subr.bf16.mxu1 %v53763_v40 }
0x14b0   :  { %46971 = vmatpush3.bf16.msra.mxu1 %v53763_v40 }
0x14b1   :  { %46973 = vmatprep.subr.bf16.mxu1 %v53771_v0 }
0x14b4   :  { %46975 = vmatpush3.bf16.msra.mxu1 %v53771_v0  ;;  %v57463_v0 = vld [vmem:[#allocation72_spill] sm:$0xff] }
0x14b5   :  { %46977 = vmatprep.subr.bf16.mxu1 %v53779_v42 }
0x14b8   :  { %46979 = vmatpush3.bf16.msra.mxu1 %v53779_v42  ;;  %v57462_v42 = vld [vmem:[#allocation71_spill] sm:$0xff] }
0x14b9   :  { %46981 = vmatprep.subr.bf16.mxu1 %v53787_v28 }
0x14bc   :  { %46983 = vmatpush3.bf16.msra.mxu1 %v53787_v28  ;;  %v57460_v28 = vld [vmem:[#allocation69_spill] sm:$0xff] }
0x14bd   :  { %46985 = vmatprep.subr.bf16.mxu1 %v53795_v33 }
0x14c0   :  { %46987 = vmatpush3.bf16.msra.mxu1 %v53795_v33  ;;  %v57459_v33 = vld [vmem:[#allocation68_spill] sm:$0xff] }
0x14c1   :  { %46989 = vmatprep.subr.bf16.mxu1 %v53438_v19 }
0x14c3   :  { %40953 = vmatmul.mubr.f32.vlgmr.msra.gmra.mrb[34].mxu1 %v53671_v13 }
0x14c4   :  { %46991 = vmatpush3.bf16.msra.mxu1 %v53438_v19  ;;  %40987 = vmatprep.mubr.f32.mxu1 %v53673_v27  ;;  %v53818_v27 = vsub.f32 %v53669_v60, %v53812_v41  ;;  %v57488_v19 = vld [vmem:[#allocation98_spill] sm:$0xff] }
0x14c5   :  { %46993 = vmatprep.subr.bf16.mxu1 %v53442_v45 }
0x14c6   :  { %v13842_v23 = vand.u32 4294901760, %v53818_v27 }
0x14c8   :  { %46995 = vmatpush3.bf16.msra.mxu1 %v53442_v45  ;;  %v13843_v44 = vsub.f32 %v53818_v27, %v13842_v23  ;;  %v57487_v45 = vld [vmem:[#allocation97_spill] sm:$0xff] }
0x14c9   :  { %46997 = vmatprep.subr.bf16.mxu1 %v53451_v56 }
0x14ca   :  { %v13844_v60 = vand.u32 4294901760, %v13843_v44  ;;  %v57452_v44 = vld [vmem:[#allocation61_spill] sm:$0xff] }
0x14cc   :  { %46999 = vmatpush3.bf16.msra.mxu1 %v53451_v56  ;;  %v57486_v56 = vld [vmem:[#allocation80_spill] sm:$0xff] }
0x14cd   :  { %47001 = vmatprep.subr.bf16.mxu1 %v53457_v11 }
0x14d0   :  { %47003 = vmatpush3.bf16.msra.mxu1 %v53457_v11  ;;  %v57483_v11 = vld [vmem:[#allocation77_spill] sm:$0xff] }
0x14d1   :  { %47005 = vmatprep.subr.bf16.mxu1 %v53462_v61 }
0x14d4   :  { %47007 = vmatpush3.bf16.msra.mxu1 %v53462_v61  ;;  %v57482_v61 = vld [vmem:[#allocation76_spill] sm:$0xff] }
0x14d5   :  { %47009 = vmatprep.subr.bf16.mxu1 %v53472_v49 }
0x14d8   :  { %47011 = vmatpush3.bf16.msra.mxu1 %v53472_v49  ;;  %v57481_v49 = vld [vmem:[#allocation75_spill] sm:$0xff] }
0x14d9   :  { %47013 = vmatprep.subr.bf16.mxu1 %v53486_v32 }
0x14dc   :  { %47015 = vmatpush3.bf16.msra.mxu1 %v53486_v32  ;;  %v57480_v32 = vld [vmem:[#allocation74_spill] sm:$0xff] }
0x14dd   :  { %47017 = vmatprep.subr.bf16.mxu1 %v53506_v2 }
0x14e0   :  { %47019 = vmatpush3.bf16.msra.mxu1 %v53506_v2  ;;  %v57479_v2 = vld [vmem:[#allocation73_spill] sm:$0xff] }
0x14e1   :  { %47021 = vmatprep.subr.bf16.mxu1 %v57432_v14 }
0x14e3   :  { %40988 = vmatmul.mubr.f32.vlgmr.msra.gmra.mrb[34].mxu1 %v53671_v13  ;;  %v53845_v13 = vsub.f32 %v53667_v50, %v53839_v34  ;;  %v57441_v50 = vld [vmem:[#allocation44_spill] sm:$0xff] }
0x14e4   :  { %47023 = vmatpush3.bf16.msra.mxu1 %v57432_v14  ;;  %41022 = vmatprep.mubr.f32.mxu1 %v13844_v60  ;;  %v57453_v60 = vld [vmem:[#allocation62_spill] sm:$0xff] }
0x14e5   :  { %47025 = vmatprep.subr.bf16.mxu1 %v57433_v39  ;;  %v13852_v54 = vand.u32 4294901760, %v53845_v13 }
0x14e7   :  { %v13853_v30 = vsub.f32 %v53845_v13, %v13852_v54 }
0x14e8   :  { %47027 = vmatpush3.bf16.msra.mxu1 %v57433_v39 }
0x14e9   :  { %47029 = vmatprep.subr.bf16.mxu1 %v57434_v63  ;;  %v13854_v43 = vand.u32 4294901760, %v13853_v30  ;;  %v57454_v30 = vld [vmem:[#allocation63_spill] sm:$0xff] }
0x14ec   :  { %47031 = vmatpush3.bf16.msra.mxu1 %v57434_v63 }
0x14ed   :  { %47033 = vmatprep.subr.bf16.mxu1 %v57435_v35 }
0x14f0   :  { %47035 = vmatpush3.bf16.msra.mxu1 %v57435_v35 }
0x14f1   :  { %47037 = vmatprep.subr.bf16.mxu1 %v57436_v4 }
0x14f4   :  { %47039 = vmatpush3.bf16.msra.mxu1 %v57436_v4 }
0x14f5   :  { %47041 = vmatprep.subr.bf16.mxu1 %v57437_v1 }
0x14f8   :  { %47043 = vmatpush3.bf16.msra.mxu1 %v57437_v1 }
0x14f9   :  { %47045 = vmatprep.subr.bf16.mxu1 %v57438_v17 }
0x14fc   :  { %47047 = vmatpush3.bf16.msra.mxu1 %v57438_v17 }
0x14fd   :  { %47049 = vmatprep.subr.bf16.mxu1 %v57439_v25 }
0x1500   :  { %47051 = vmatpush3.bf16.msra.mxu1 %v57439_v25 }
0x1501   :  { %47053 = vmatprep.subr.bf16.mxu1 %v57440_v24 }
0x1503   :  { %41023 = vmatmul.mubr.f32.vlgmr.msra.gmra.mrb[34].mxu1 %v13854_v43  ;;  %v57455_v43 = vld [vmem:[#allocation64_spill] sm:$0xff] }
0x1504   :  { %47055 = vmatpush3.bf16.msra.mxu1 %v57440_v24  ;;  %41057 = vmatprep.mubr.f32.mxu1 %v53812_v41 }
0x1505   :  { %47057 = vmatprep.subr.bf16.mxu1 %v57441_v50 }
0x1508   :  { %47059 = vmatpush3.bf16.msra.mxu1 %v57441_v50 }
0x1509   :  { %47061 = vmatprep.subr.bf16.mxu1 %v57442_v21 }
0x150c   :  { %47063 = vmatpush3.bf16.msra.mxu1 %v57442_v21 }
0x150d   :  { %47065 = vmatprep.subr.bf16.mxu1 %v57443_v22 }
0x1510   :  { %47067 = vmatpush3.bf16.msra.mxu1 %v57443_v22 }
0x1511   :  { %47069 = vmatprep.subr.bf16.mxu1 %v57444_v58 }
0x1514   :  { %47071 = vmatpush3.bf16.msra.mxu1 %v57444_v58 }
0x1515   :  { %47073 = vmatprep.subr.bf16.mxu1 %v57445_v5 }
0x1518   :  { %47075 = vmatpush3.bf16.msra.mxu1 %v57445_v5 }
0x1519   :  { %47077 = vmatprep.subr.bf16.mxu1 %v57446_v38 }
0x151c   :  { %47079 = vmatpush3.bf16.msra.mxu1 %v57446_v38 }
0x151d   :  { %47081 = vmatprep.subr.bf16.mxu1 %v57447_v59 }
0x1520   :  { %47083 = vmatpush3.bf16.msra.mxu1 %v57447_v59 }
0x1521   :  { %47085 = vmatprep.subr.bf16.mxu1 %v57448_v16 }
0x1523   :  { %41058 = vmatmul.mubr.f32.vlgmr.msra.gmra.mrb[34].mxu1 %v53839_v34 }
0x1524   :  { %47087 = vmatpush3.bf16.msra.mxu1 %v57448_v16  ;;  %41092 = vmatprep.mubr.f32.mxu1 %v53818_v27  ;;  %v57456_v27 = vld [vmem:[#allocation65_spill] sm:$0xff] }
0x1525   :  { %47089 = vmatprep.subr.bf16.mxu1 %v57449_v18 }
0x1528   :  { %47091 = vmatpush3.bf16.msra.mxu1 %v57449_v18 }
0x1529   :  { %47093 = vmatprep.subr.bf16.mxu1 %v57450_v62 }
0x152c   :  { %47095 = vmatpush3.bf16.msra.mxu1 %v57450_v62 }
0x152d   :  { %47097 = vmatprep.subr.bf16.mxu1 %v57451_v3 }
0x1530   :  { %47099 = vmatpush3.bf16.msra.mxu1 %v57451_v3 }
0x1531   :  { %47101 = vmatprep.subr.bf16.mxu1 %v57452_v44 }
0x1534   :  { %47103 = vmatpush3.bf16.msra.mxu1 %v57452_v44 }
0x1535   :  { %47105 = vmatprep.subr.bf16.mxu1 %v57453_v60 }
0x1538   :  { %47107 = vmatpush3.bf16.msra.mxu1 %v57453_v60 }
0x1539   :  { %47109 = vmatprep.subr.bf16.mxu1 %v57454_v30 }
0x153c   :  { %47111 = vmatpush3.bf16.msra.mxu1 %v57454_v30 }
0x153d   :  { %47113 = vmatprep.subr.bf16.mxu1 %v57455_v43 }
0x1540   :  { %47115 = vmatpush3.bf16.msra.mxu1 %v57455_v43 }
0x1541   :  { %47117 = vmatprep.subr.bf16.mxu1 %v57432_v14 }
0x1543   :  { %41093 = vmatmul.mubr.f32.vlgmr.msra.gmra.mrb[34].mxu1 %v53845_v13  ;;  %v57458_v13 = vld [vmem:[#allocation67_spill] sm:$0xff] }
0x1544   :  { %47119 = vmatpush3.bf16.msra.mxu1 %v57432_v14  ;;  %41127 = vmatprep.mubr.f32.mxu1 %v13842_v23  ;;  %v57457_v23 = vld [vmem:[#allocation66_spill] sm:$0xff] }
0x1545   :  { %47121 = vmatprep.subr.bf16.mxu1 %v57433_v39 }
0x1548   :  { %47123 = vmatpush3.bf16.msra.mxu1 %v57433_v39 }
0x1549   :  { %47125 = vmatprep.subr.bf16.mxu1 %v57434_v63 }
0x154c   :  { %47127 = vmatpush3.bf16.msra.mxu1 %v57434_v63 }
0x154d   :  { %47129 = vmatprep.subr.bf16.mxu1 %v57435_v35 }
0x1550   :  { %47131 = vmatpush3.bf16.msra.mxu1 %v57435_v35 }
0x1551   :  { %47133 = vmatprep.subr.bf16.mxu1 %v57436_v4 }
0x1554   :  { %47135 = vmatpush3.bf16.msra.mxu1 %v57436_v4 }
0x1555   :  { %47137 = vmatprep.subr.bf16.mxu1 %v57437_v1 }
0x1558   :  { %47139 = vmatpush3.bf16.msra.mxu1 %v57437_v1 }
0x1559   :  { %47141 = vmatprep.subr.bf16.mxu1 %v57438_v17 }
0x155c   :  { %47143 = vmatpush3.bf16.msra.mxu1 %v57438_v17 }
0x155d   :  { %47145 = vmatprep.subr.bf16.mxu1 %v57439_v25 }
0x1560   :  { %47147 = vmatpush3.bf16.msra.mxu1 %v57439_v25 }
0x1561   :  { %47149 = vmatprep.subr.bf16.mxu1 %v57456_v27 }
0x1563   :  { %41128 = vmatmul.mubr.f32.vlgmr.msra.gmra.mrb[34].mxu1 %v13852_v54  ;;  %v57461_v54 = vld [vmem:[#allocation70_spill] sm:$0xff] }
0x1564   :  { %47151 = vmatpush3.bf16.msra.mxu1 %v57456_v27  ;;  %41162 = vmatprep.mubr.f32.mxu1 %v53812_v41 }
0x1565   :  { %47153 = vmatprep.subr.bf16.mxu1 %v57457_v23 }
0x1568   :  { %47155 = vmatpush3.bf16.msra.mxu1 %v57457_v23 }
0x1569   :  { %47157 = vmatprep.subr.bf16.mxu1 %v57458_v13 }
0x156c   :  { %47159 = vmatpush3.bf16.msra.mxu1 %v57458_v13 }
0x156d   :  { %47161 = vmatprep.subr.bf16.mxu1 %v57459_v33 }
0x1570   :  { %47163 = vmatpush3.bf16.msra.mxu1 %v57459_v33 }
0x1571   :  { %47165 = vmatprep.subr.bf16.mxu1 %v57460_v28 }
0x1574   :  { %47167 = vmatpush3.bf16.msra.mxu1 %v57460_v28 }
0x1575   :  { %47169 = vmatprep.subr.bf16.mxu1 %v57461_v54 }
0x1578   :  { %47171 = vmatpush3.bf16.msra.mxu1 %v57461_v54 }
0x1579   :  { %47173 = vmatprep.subr.bf16.mxu1 %v57462_v42 }
0x157c   :  { %47175 = vmatpush3.bf16.msra.mxu1 %v57462_v42 }
0x157d   :  { %47177 = vmatprep.subr.bf16.mxu1 %v57463_v0 }
0x1580   :  { %47179 = vmatpush3.bf16.msra.mxu1 %v57463_v0 }
0x1581   :  { %47181 = vmatprep.subr.bf16.mxu1 %v57432_v14 }
0x1583   :  { %41163 = vmatmul.mubr.f32.vlgmr.msra.gmra.mrb[34].mxu1 %v53839_v34 }
0x1584   :  { %47183 = vmatpush3.bf16.msra.mxu1 %v57432_v14  ;;  %41197 = vmatprep.mubr.f32.mxu1 %v53812_v41 }
0x1585   :  { %47185 = vmatprep.subr.bf16.mxu1 %v57433_v39 }
0x1588   :  { %47187 = vmatpush3.bf16.msra.mxu1 %v57433_v39 }
0x1589   :  { %47189 = vmatprep.subr.bf16.mxu1 %v57434_v63 }
0x158c   :  { %47191 = vmatpush3.bf16.msra.mxu1 %v57434_v63 }
0x158d   :  { %47193 = vmatprep.subr.bf16.mxu1 %v57435_v35 }
0x1590   :  { %47195 = vmatpush3.bf16.msra.mxu1 %v57435_v35 }
0x1591   :  { %47197 = vmatprep.subr.bf16.mxu1 %v57436_v4 }
0x1594   :  { %47199 = vmatpush3.bf16.msra.mxu1 %v57436_v4 }
0x1595   :  { %47201 = vmatprep.subr.bf16.mxu1 %v57437_v1 }
0x1598   :  { %47203 = vmatpush3.bf16.msra.mxu1 %v57437_v1 }
0x1599   :  { %47205 = vmatprep.subr.bf16.mxu1 %v57438_v17 }
0x159c   :  { %47207 = vmatpush3.bf16.msra.mxu1 %v57438_v17 }
0x159d   :  { %47209 = vmatprep.subr.bf16.mxu1 %v57439_v25 }
0x15a0   :  { %47211 = vmatpush3.bf16.msra.mxu1 %v57439_v25 }
0x15a3   :  { %41198 = vmatmul.mubr.f32.vlgmr.msra.gmra.mrb[34].mxu1 %v53839_v34 }
0x15a4   :  { %41706 = vmatprep.mubr.f32.mxu1 %v52665_v55  ;;  %v57489_v55 = vld [vmem:[#allocation99_spill] sm:$0xff] }
0x1676   :  { %v41199_v41 = vpop.f32.mrb[34].mxu1 }
0x1677   :  { %v14433_v40 = vpop.f32.mrb[35].mxu1 }
0x1678   :  { %14443 = vmax.xlane.f32.xlu1 %v14433_v40 }
0x167c   :  { %14445 = vmax.xlane.f32.xlu1 %v41199_v41 }
0x1705   :  { %v14444_v8 = vpop.xlane.xlu1 %14443 }
0x1706   :  { %v14447_v10 = vsub.f32 %v14433_v40, %v14444_v8  ;;  %v57464_v40 = vld [vmem:[#allocation82_spill] sm:$0xff] }
0x1708   :  { %v14449_v31 = vmul.f32 1.442695, %v14447_v10 }
0x1709   :  { %v14446_v47 = vpop.xlane.xlu1 %14445 }
0x170a   :  { %51072 = vpow2.f32 %v14449_v31  ;;  %v14448_v7 = vsub.f32 %v41199_v41, %v14446_v47  ;;  %v57465_v41 = vld [vmem:[#allocation83_spill] sm:$0xff] }
0x170c   :  { %v14451_v20 = vmul.f32 1.442695, %v14448_v7 }
0x170e   :  { %51074 = vpow2.f32 %v14451_v20 }
0x1714   :  { %v53946_v36 = vpop.eup %51072 }
0x1715   :  { %v53949_v26 = vand.u32 4294901760, %v53946_v36 }
0x1717   :  { %v14535_v34 = vsub.f32 %v53946_v36, %v53949_v26 }
0x1718   :  { %v53953_v12 = vpop.eup %51074 }
0x1719   :  { %v14536_v29 = vand.u32 4294901760, %v14535_v34  ;;  %v53956_v53 = vand.u32 4294901760, %v53953_v12 }
0x171b   :  { %v14537_v10 = vsub.f32 %v14535_v34, %v14536_v29  ;;  %v14545_v47 = vsub.f32 %v53953_v12, %v53956_v53 }
0x171d   :  { %v14538_v7 = vand.u32 4294901760, %v14537_v10  ;;  %v14546_v20 = vand.u32 4294901760, %v14545_v47  ;;  %v57467_v10 = vld [vmem:[#allocation85_spill] sm:$0xff] }
0x171f   :  { %41232 = vmatprep.mubr.f32.mxu0 %v14538_v7  ;;  %v14547_v31 = vsub.f32 %v14545_v47, %v14546_v20  ;;  %v57468_v7 = vld [vmem:[#allocation86_spill] sm:$0xff] }
0x1721   :  { %v14548_v8 = vand.u32 4294901760, %v14547_v31  ;;  %v57469_v31 = vld [vmem:[#allocation87_spill] sm:$0xff] }
0x1723   :  { %41233 = vmatmul.mubr.f32.vlgmr.msra.gmra.mrb[22].mxu0 %v14548_v8  ;;  %v57470_v8 = vld [vmem:[#allocation88_spill] sm:$0xff] }
0x1724   :  { %47247 = vmatpush3.bf16.msra.mxu0 %v57379_v51  ;;  %41267 = vmatprep.mubr.f32.mxu0 %v53949_v26 }
0x1725   :  { %47249 = vmatprep.subr.bf16.mxu0 %v57464_v40 }
0x1728   :  { %47251 = vmatpush3.bf16.msra.mxu0 %v57464_v40 }
0x1729   :  { %47253 = vmatprep.subr.bf16.mxu0 %v57465_v41 }
0x172c   :  { %47255 = vmatpush3.bf16.msra.mxu0 %v57465_v41 }
0x172d   :  { %47257 = vmatprep.subr.bf16.mxu0 %v57466_v46 }
0x1730   :  { %47259 = vmatpush3.bf16.msra.mxu0 %v57466_v46 }
0x1731   :  { %47261 = vmatprep.subr.bf16.mxu0 %v57467_v10 }
0x1734   :  { %47263 = vmatpush3.bf16.msra.mxu0 %v57467_v10 }
0x1735   :  { %47265 = vmatprep.subr.bf16.mxu0 %v57468_v7 }
0x1738   :  { %47267 = vmatpush3.bf16.msra.mxu0 %v57468_v7 }
0x1739   :  { %47269 = vmatprep.subr.bf16.mxu0 %v57469_v31 }
0x173c   :  { %47271 = vmatpush3.bf16.msra.mxu0 %v57469_v31 }
0x173d   :  { %47273 = vmatprep.subr.bf16.mxu0 %v57470_v8 }
0x1740   :  { %47275 = vmatpush3.bf16.msra.mxu0 %v57470_v8 }
0x1741   :  { %47277 = vmatprep.subr.bf16.mxu0 %v57471_v37 }
0x1743   :  { %41268 = vmatmul.mubr.f32.vlgmr.msra.gmra.mrb[22].mxu0 %v53956_v53 }
0x1744   :  { %47279 = vmatpush3.bf16.msra.mxu0 %v57471_v37  ;;  %41302 = vmatprep.mubr.f32.mxu0 %v14535_v34  ;;  %v57477_v34 = vld [vmem:[#allocation95_spill] sm:$0xff] }
0x1745   :  { %47281 = vmatprep.subr.bf16.mxu0 %v57472_v15 }
0x1748   :  { %47283 = vmatpush3.bf16.msra.mxu0 %v57472_v15 }
0x1749   :  { %47285 = vmatprep.subr.bf16.mxu0 %v57473_v52 }
0x174c   :  { %47287 = vmatpush3.bf16.msra.mxu0 %v57473_v52 }
0x174d   :  { %47289 = vmatprep.subr.bf16.mxu0 %v57474_v48 }
0x1750   :  { %47291 = vmatpush3.bf16.msra.mxu0 %v57474_v48 }
0x1751   :  { %47293 = vmatprep.subr.bf16.mxu0 %v57475_v6 }
0x1754   :  { %47295 = vmatpush3.bf16.msra.mxu0 %v57475_v6 }
0x1755   :  { %47297 = vmatprep.subr.bf16.mxu0 %v57476_v57 }
0x1758   :  { %47299 = vmatpush3.bf16.msra.mxu0 %v57476_v57 }
0x1759   :  { %47301 = vmatprep.subr.bf16.mxu0 %v57477_v34 }
0x175c   :  { %47303 = vmatpush3.bf16.msra.mxu0 %v57477_v34  ;;  %v57491_v34 = vld [vmem:[#allocation101_spill] sm:$0xff] }
0x175d   :  { %47305 = vmatprep.subr.bf16.mxu0 %v57478_v9 }
0x1760   :  { %47307 = vmatpush3.bf16.msra.mxu0 %v57478_v9  ;;  %v57490_v9 = vld [vmem:[#allocation100_spill] sm:$0xff] }
0x1761   :  { %47309 = vmatprep.subr.bf16.mxu0 %v57479_v2 }
0x1763   :  { %41303 = vmatmul.mubr.f32.vlgmr.msra.gmra.mrb[22].mxu0 %v14545_v47  ;;  %v57484_v47 = vld [vmem:[#allocation78_spill] sm:$0xff] }
0x1764   :  { %47311 = vmatpush3.bf16.msra.mxu0 %v57479_v2  ;;  %41337 = vmatprep.mubr.f32.mxu0 %v14536_v29  ;;  %v57485_v29 = vld [vmem:[#allocation79_spill] sm:$0xff] }
0x1765   :  { %47313 = vmatprep.subr.bf16.mxu0 %v57480_v32 }
0x1768   :  { %47315 = vmatpush3.bf16.msra.mxu0 %v57480_v32 }
0x1769   :  { %47317 = vmatprep.subr.bf16.mxu0 %v57481_v49 }
0x176c   :  { %47319 = vmatpush3.bf16.msra.mxu0 %v57481_v49 }
0x176d   :  { %47321 = vmatprep.subr.bf16.mxu0 %v57482_v61 }
0x1770   :  { %47323 = vmatpush3.bf16.msra.mxu0 %v57482_v61 }
0x1771   :  { %47325 = vmatprep.subr.bf16.mxu0 %v57483_v11 }
0x1774   :  { %47327 = vmatpush3.bf16.msra.mxu0 %v57483_v11 }
0x1775   :  { %47329 = vmatprep.subr.bf16.mxu0 %v57484_v47 }
0x1778   :  { %47331 = vmatpush3.bf16.msra.mxu0 %v57484_v47 }
0x1779   :  { %47333 = vmatprep.subr.bf16.mxu0 %v57485_v29 }
0x177c   :  { %47335 = vmatpush3.bf16.msra.mxu0 %v57485_v29 }
0x177d   :  { %47337 = vmatprep.subr.bf16.mxu0 %v57486_v56 }
0x1780   :  { %47339 = vmatpush3.bf16.msra.mxu0 %v57486_v56 }
0x1781   :  { %47341 = vmatprep.subr.bf16.mxu0 %v57487_v45 }
0x1783   :  { %41338 = vmatmul.mubr.f32.vlgmr.msra.gmra.mrb[22].mxu0 %v14546_v20  ;;  %v57492_v20 = vld [vmem:[#allocation102_spill] sm:$0xff] }
0x1784   :  { %47343 = vmatpush3.bf16.msra.mxu0 %v57487_v45  ;;  %41372 = vmatprep.mubr.f32.mxu0 %v53949_v26  ;;  %v57493_v45 = vld [vmem:[#allocation103_spill] sm:$0xff] }
0x1785   :  { %47345 = vmatprep.subr.bf16.mxu0 %v57488_v19 }
0x1788   :  { %47347 = vmatpush3.bf16.msra.mxu0 %v57488_v19  ;;  %v57494_v19 = vld [vmem:[#allocation104_spill] sm:$0xff] }
0x1789   :  { %47349 = vmatprep.subr.bf16.mxu0 %v57489_v55 }
0x178c   :  { %47351 = vmatpush3.bf16.msra.mxu0 %v57489_v55 }
0x178d   :  { %47353 = vmatprep.subr.bf16.mxu0 %v57490_v9 }
0x1790   :  { %47355 = vmatpush3.bf16.msra.mxu0 %v57490_v9 }
0x1791   :  { %47357 = vmatprep.subr.bf16.mxu0 %v57491_v34 }
0x1794   :  { %47359 = vmatpush3.bf16.msra.mxu0 %v57491_v34 }
0x1795   :  { %47361 = vmatprep.subr.bf16.mxu0 %v57492_v20 }
0x1798   :  { %47363 = vmatpush3.bf16.msra.mxu0 %v57492_v20 }
0x1799   :  { %47365 = vmatprep.subr.bf16.mxu0 %v57493_v45 }
0x179c   :  { %47367 = vmatpush3.bf16.msra.mxu0 %v57493_v45 }
0x179d   :  { %47369 = vmatprep.subr.bf16.mxu0 %v57494_v19 }
0x17a0   :  { %47371 = vmatpush3.bf16.msra.mxu0 %v57494_v19 }
0x17a1   :  { %47373 = vmatprep.subr.bf16.mxu0 %v57479_v2 }
0x17a3   :  { %41373 = vmatmul.mubr.f32.vlgmr.msra.gmra.mrb[22].mxu0 %v53956_v53 }
0x17a4   :  { %47375 = vmatpush3.bf16.msra.mxu0 %v57479_v2  ;;  %41407 = vmatprep.mubr.f32.mxu0 %v53949_v26  ;;  %v15157_v26 = vpop.trf.xlu0 }
0x17a5   :  { %47377 = vmatprep.subr.bf16.mxu0 %v57480_v32  ;;  %v15174_v19 = vsel %vm1149_vm2, %v15157_v26, 0 }
0x17a6   :  { %v54046_v45 = vand.u32 4294901760, %v15174_v19 }
0x17a8   :  { %47379 = vmatpush3.bf16.msra.mxu0 %v57480_v32  ;;  %v54049_v20 = vsub.f32 %v15174_v19, %v54046_v45  ;;  %v15158_v57 = vpop.trf.xlu0 }
0x17a9   :  { %47381 = vmatprep.subr.bf16.mxu0 %v57481_v49  ;;  %v15177_v26 = vsel %vm1149_vm2, %v15158_v57, 0 }
0x17aa   :  { %v56815_v34 = vand.u32 4294901760, %v54049_v20  ;;  %v54057_v15 = vand.u32 4294901760, %v15177_v26 }
0x17ac   :  { %47383 = vmatpush3.bf16.msra.mxu0 %v57481_v49  ;;  %v15255_v9 = vsub.f32 %v54049_v20, %v56815_v34  ;;  %v15159_v6 = vpop.trf.xlu0 }
0x17ad   :  { %47385 = vmatprep.subr.bf16.mxu0 %v57482_v61  ;;  %v15180_v52 = vsel %vm1149_vm2, %v15159_v6, 0 }
0x17ae   :  { %v15256_v55 = vand.u32 4294901760, %v15255_v9  ;;  %v54059_v37 = vand.u32 4294901760, %v15180_v52  ;;  %v15263_v9 = vsub.f32 %v15177_v26, %v54057_v15 }
0x17b0   :  { %47387 = vmatpush3.bf16.msra.mxu0 %v57482_v61  ;;  %v15160_v19 = vpop.trf.xlu0  ;;  %v15273_v34 = vsub.f32 %v15180_v52, %v54059_v37  ;;  %v15264_v6 = vand.u32 4294901760, %v15263_v9 }
0x17b1   :  { %47389 = vmatprep.subr.bf16.mxu0 %v57483_v11  ;;  %v15183_v8 = vsel %vm1149_vm2, %v15160_v19, 0 }
0x17b2   :  { %v15274_v46 = vand.u32 4294901760, %v15273_v34  ;;  %v15265_v0 = vsub.f32 %v15263_v9, %v15264_v6 }
0x17b4   :  { %47391 = vmatpush3.bf16.msra.mxu0 %v57483_v11  ;;  %v15275_v54 = vsub.f32 %v15273_v34, %v15274_v46 }
0x17b5   :  { %47393 = vmatprep.subr.bf16.mxu0 %v57484_v47 }
0x17b8   :  { %47395 = vmatpush3.bf16.msra.mxu0 %v57484_v47 }
0x17b9   :  { %47397 = vmatprep.subr.bf16.mxu0 %v57485_v29 }
0x17bc   :  { %47399 = vmatpush3.bf16.msra.mxu0 %v57485_v29 }
0x17bd   :  { %47401 = vmatprep.subr.bf16.mxu0 %v57486_v56 }
0x17c0   :  { %47403 = vmatpush3.bf16.msra.mxu0 %v57486_v56 }
0x17c3   :  { %41408 = vmatmul.mubr.f32.vlgmr.msra.gmra.mrb[22].mxu0 %v53956_v53 }
0x17c4   :  { %41414 = vmatprep.mubr.f32.mxu0 %v15256_v55  ;;  %v54063_v55 = vand.u32 4294901760, %v15183_v8 }
0x17c6   :  { %v15283_v7 = vsub.f32 %v15183_v8, %v54063_v55  ;;  %v15276_v8 = vand.u32 4294901760, %v15275_v54  ;;  %v51108_v54 = vld [vmem:[#allocation2 + $0x1c8] sm:$0xff] }
0x17c8   :  { %v15284_v26 = vand.u32 4294901760, %v15283_v7 }
0x1896   :  { %v41409_v48 = vpop.f32.mrb[22].mxu0 }
0x1897   :  { %51076 = vrcp.f32 %v41409_v48  ;;  %v15127_v53 = vpop.f32.mrb[23].mxu0 }
0x1898   :  { %51078 = vrcp.f32 %v15127_v53 }
0x18a1   :  { %v51077_v48 = vpop.eup %51076 }
0x18a2   :  { %v51079_v31 = vpop.eup %51078  ;;  %v15140_v53 = vmul.f32 %v51077_v48, %v53953_v12  ;;  %v15266_v48 = vand.u32 4294901760, %v15265_v0  ;;  %v57495_v0 = vand.u32 4294901760, %v54049_v20 }
0x18a3   :  { %v15138_v57 = vmul.f32 %v51079_v31, %v53946_v36  ;;  %v15285_v36 = vsub.f32 %v15283_v7, %v15284_v26 }
0x18a4   :  { %v15189_v10 = vand.u32 4294901760, %v15140_v53 }
0x18a5   :  { %v15186_v41 = vand.u32 4294901760, %v15138_v57 }
0x18a6   :  { %v15301_v40 = vsub.f32 %v15140_v53, %v15189_v10 }
0x18a7   :  { %v47404_v19 = vpack.c.bf16 %v15189_v10, %v15186_v41  ;;  %v15294_v42 = vsub.f32 %v15138_v57, %v15186_v41  ;;  %v15286_v10 = vand.u32 4294901760, %v15285_v36 }
0x18a8   :  { %v15302_v28 = vand.u32 4294901760, %v15301_v40 }
0x18a9   :  { %47405 = vmatprep.subr.bf16.mxu0 %v47404_v19  ;;  %v15295_v52 = vand.u32 4294901760, %v15294_v42  ;;  %v47412_v33 = vpack.c.bf16 %v15301_v40, %v15294_v42 }
0x18aa   :  { %47407 = vmatpush3.bf16.msra.mxu0 %v47404_v19  ;;  %v15303_v12 = vsub.f32 %v15301_v40, %v15302_v28 }
0x18ab   :  { %v15296_v31 = vsub.f32 %v15294_v42, %v15295_v52  ;;  %v47420_v13 = vpack.c.bf16 %v15302_v28, %v15295_v52  ;;  %v57496_v42 = vld [vmem:[#allocation105_spill] sm:$0xff]  ;;  %v57498_v28 = vld [vmem:[#allocation107_spill] sm:$0xff] }
0x18ac   :  { %v15304_v23 = vand.u32 4294901760, %v15303_v12  ;;  %v51111_v12 = vld [vmem:[#allocation2 + $0x1d0] sm:$0xff] }
0x18ad   :  { %41415 = vmatmul.mubr.f32.vlgmr.msra.gmra.mrb[24].mxu0 %v15266_v48  ;;  %v15297_v27 = vand.u32 4294901760, %v15296_v31 }
0x18ae   :  { %41417 = vmatprep.mubr.f32.mxu0 %v15276_v8 }
0x18af   :  { %v47408_v53 = vpack.c.bf16 %v15304_v23, %v15297_v27  ;;  %v57503_v27 = vld [vmem:[#allocation112_spill] sm:$0xff]  ;;  %v57504_v23 = vld [vmem:[#allocation113_spill] sm:$0xff] }
0x18b1   :  { %41418 = vmatmul.mubr.f32.gmra.mrb[26].mxu0 %v15286_v10  ;;  %47409 = vmatprep.subr.bf16.mxu0 %v47408_v53 }
0x18b2   :  { %47411 = vmatpush3.bf16.msra.mxu0 %v47408_v53  ;;  %41424 = vmatprep.mubr.f32.mxu0 %v54046_v45 }
0x18b3   :  { %47413 = vmatprep.subr.bf16.mxu0 %v47412_v33 }
0x18b5   :  { %41425 = vmatmul.mubr.f32.vlgmr.msra.gmra.mrb[24].mxu0 %v54057_v15 }
0x18b6   :  { %41427 = vmatprep.mubr.f32.mxu0 %v54059_v37  ;;  %47415 = vmatpush3.bf16.msra.mxu0 %v47412_v33  ;;  %v57499_v33 = vld [vmem:[#allocation108_spill] sm:$0xff] }
0x18b7   :  { %47417 = vmatprep.subr.bf16.mxu0 %v47404_v19 }
0x18b9   :  { %41428 = vmatmul.mubr.f32.gmra.mrb[26].mxu0 %v54063_v55 }
0x18ba   :  { %41434 = vmatprep.mubr.f32.mxu0 %v54049_v20 }
0x18bd   :  { %41435 = vmatmul.mubr.f32.vlgmr.msra.gmra.mrb[24].mxu0 %v15263_v9 }
0x18be   :  { %47419 = vmatpush3.bf16.msra.mxu0 %v47404_v19  ;;  %41437 = vmatprep.mubr.f32.mxu0 %v15273_v34 }
0x18bf   :  { %47421 = vmatprep.subr.bf16.mxu0 %v47420_v13 }
0x18c1   :  { %41438 = vmatmul.mubr.f32.gmra.mrb[26].mxu0 %v15283_v7  ;;  %v51109_v7 = vld [vmem:[#allocation2 + $0x1c0] sm:$0xff] }
0x18c2   :  { %41444 = vmatprep.mubr.f32.mxu0 %v57495_v0 }
0x18c5   :  { %41445 = vmatmul.mubr.f32.vlgmr.msra.gmra.mrb[24].mxu0 %v15264_v6  ;;  %v51110_v6 = vld [vmem:[#allocation2 + $0x1d8] sm:$0xff] }
0x18c6   :  { %47423 = vmatpush3.bf16.msra.mxu0 %v47420_v13  ;;  %41447 = vmatprep.mubr.f32.mxu0 %v15274_v46  ;;  %v57497_v46 = vld [vmem:[#allocation106_spill] sm:$0xff] }
0x18c7   :  { %47425 = vmatprep.subr.bf16.mxu0 %v47404_v19 }
0x18c9   :  { %41448 = vmatmul.mubr.f32.gmra.mrb[26].mxu0 %v15284_v26 }
0x18ca   :  { %41454 = vmatprep.mubr.f32.mxu0 %v54046_v45 }
0x18cd   :  { %41455 = vmatmul.mubr.f32.vlgmr.msra.gmra.mrb[24].mxu0 %v54057_v15 }
0x18ce   :  { %47427 = vmatpush3.bf16.msra.mxu0 %v47404_v19  ;;  %41457 = vmatprep.mubr.f32.mxu0 %v54059_v37 }
0x18cf   :  { %47429 = vmatprep.subr.bf16.mxu0 %v57496_v42 }
0x18d1   :  { %41458 = vmatmul.mubr.f32.gmra.mrb[26].mxu0 %v54063_v55 }
0x18d2   :  { %41464 = vmatprep.mubr.f32.mxu0 %v54046_v45  ;;  %v57500_v45 = vld [vmem:[#allocation109_spill] sm:$0xff] }
0x18d5   :  { %41465 = vmatmul.mubr.f32.vlgmr.msra.gmra.mrb[24].mxu0 %v54057_v15  ;;  %v57501_v15 = vld [vmem:[#allocation110_spill] sm:$0xff] }
0x18d6   :  { %41467 = vmatprep.mubr.f32.mxu0 %v54059_v37  ;;  %47431 = vmatpush3.bf16.msra.mxu0 %v57496_v42  ;;  %v57502_v37 = vld [vmem:[#allocation111_spill] sm:$0xff] }
0x18d7   :  { %47433 = vmatprep.subr.bf16.mxu0 %v57497_v46 }
0x18d9   :  { %41468 = vmatmul.mubr.f32.gmra.mrb[26].mxu0 %v54063_v55 }
0x18da   :  { %47435 = vmatpush3.bf16.msra.mxu0 %v57497_v46 }
0x18db   :  { %47437 = vmatprep.subr.bf16.mxu0 %v57498_v28 }
0x18de   :  { %47439 = vmatpush3.bf16.msra.mxu0 %v57498_v28 }
0x18df   :  { %47441 = vmatprep.subr.bf16.mxu0 %v57499_v33 }
0x18e2   :  { %47443 = vmatpush3.bf16.msra.mxu0 %v57499_v33 }
0x18e3   :  { %47445 = vmatprep.subr.bf16.mxu0 %v57500_v45 }
0x18e6   :  { %47447 = vmatpush3.bf16.msra.mxu0 %v57500_v45 }
0x18e7   :  { %47449 = vmatprep.subr.bf16.mxu0 %v57501_v15 }
0x18ea   :  { %47451 = vmatpush3.bf16.msra.mxu0 %v57501_v15 }
0x18eb   :  { %47453 = vmatprep.subr.bf16.mxu0 %v57502_v37 }
0x18ee   :  { %47455 = vmatpush3.bf16.msra.mxu0 %v57502_v37 }
0x18ef   :  { %47457 = vmatprep.subr.bf16.mxu0 %v57503_v27 }
0x18f2   :  { %47459 = vmatpush3.bf16.msra.mxu0 %v57503_v27 }
0x18f3   :  { %47461 = vmatprep.subr.bf16.mxu0 %v57504_v23 }
0x19a8   :  { %v41466_v13 = vpop.f32.mrb[24].mxu0 }
0x19a9   :  { %v15774_v40 = vmul.f32 %v51108_v54, %v41466_v13  ;;  %v15751_v41 = vpop.f32.mrb[25].mxu0 }
0x19aa   :  { %v15773_v34 = vmul.f32 %v51109_v7, %v15751_v41 }
0x19ab   :  { %v54101_v20 = vand.u32 4294901760, %v15774_v40 }
0x19ac   :  { %v54103_v9 = vand.u32 4294901760, %v15773_v34  ;;  %v41469_v55 = vpop.f32.mrb[26].mxu0 }
0x19ad   :  { %v54106_v57 = vsub.f32 %v15774_v40, %v54101_v20  ;;  %v15776_v19 = vmul.f32 %v51110_v6, %v41469_v55  ;;  %v15763_v26 = vpop.f32.mrb[27].mxu0 }
0x19ae   :  { %v54109_v52 = vsub.f32 %v15773_v34, %v54103_v9  ;;  %v15775_v48 = vmul.f32 %v51111_v12, %v15763_v26  ;;  %v57505_v26 = vld [vmem:[#allocation121_spill] sm:$0xff] }
0x19af   :  { %v56832_v36 = vand.u32 4294901760, %v54106_v57  ;;  %v54112_v31 = vand.u32 4294901760, %v15776_v19 }
0x19b0   :  { %v54114_v8 = vand.u32 4294901760, %v15775_v48  ;;  %v15860_v10 = vand.u32 4294901760, %v54109_v52 }
0x19b1   :  { %v15871_v53 = vsub.f32 %v54106_v57, %v56832_v36  ;;  %v54121_v0 = vsub.f32 %v15776_v19, %v54112_v31  ;;  %v57517_v36 = vld [vmem:[#allocation118_spill] sm:$0xff] }
0x19b2   :  { %v54124_v13 = vsub.f32 %v15775_v48, %v54114_v8  ;;  %v15861_v54 = vsub.f32 %v54109_v52, %v15860_v10  ;;  %v57506_v48 = vld [vmem:[#allocation122_spill] sm:$0xff] }
0x19b3   :  { %v56830_v40 = vand.u32 4294901760, %v54121_v0  ;;  %v15872_v34 = vand.u32 4294901760, %v15871_v53  ;;  %v57507_v53 = vld [vmem:[#allocation123_spill] sm:$0xff] }
0x19b4   :  { %v15862_v41 = vand.u32 4294901760, %v15861_v54  ;;  %v56831_v7 = vand.u32 4294901760, %v54124_v13  ;;  %v57508_v54 = vld [vmem:[#allocation124_spill] sm:$0xff] }
0x19b5   :  { %v15891_v55 = vsub.f32 %v54121_v0, %v56830_v40  ;;  %v57515_v40 = vld [vmem:[#allocation127_spill] sm:$0xff] }
0x19b6   :  { %41502 = vmatprep.mubr.f32.mxu0 %v15862_v41  ;;  %v15881_v6 = vsub.f32 %v54124_v13, %v56831_v7  ;;  %v57509_v41 = vld [vmem:[#allocation114_spill] sm:$0xff]  ;;  %v57516_v7 = vld [vmem:[#allocation128_spill] sm:$0xff] }
0x19b7   :  { %41503 = vmatmul.mubr.f32.vlgmr.msra.gmra.mrb[28].mxu0 %v15872_v34  ;;  %v15892_v12 = vand.u32 4294901760, %v15891_v55  ;;  %v57510_v34 = vld [vmem:[#allocation115_spill] sm:$0xff]  ;;  %v57511_v55 = vld [vmem:[#allocation116_spill] sm:$0xff] }
0x19b8   :  { %47463 = vmatpush3.bf16.msra.mxu0 %v57504_v23  ;;  %v15882_v19 = vand.u32 4294901760, %v15881_v6  ;;  %v57512_v6 = vld [vmem:[#allocation117_spill] sm:$0xff] }
0x19b9   :  { %47465 = vmatprep.subr.bf16.mxu0 %v57505_v26 }
0x19ba   :  { %41505 = vmatprep.mubr.f32.mxu0 %v15882_v19  ;;  %v57513_v19 = vld [vmem:[#allocation125_spill] sm:$0xff] }
0x19bb   :  { %41506 = vmatmul.mubr.f32.gmra.mrb[30].mxu0 %v15892_v12  ;;  %v57514_v12 = vld [vmem:[#allocation126_spill] sm:$0xff] }
0x19bc   :  { %47467 = vmatpush3.bf16.msra.mxu0 %v57505_v26  ;;  %41540 = vmatprep.mubr.f32.mxu0 %v54103_v9 }
0x19bd   :  { %47469 = vmatprep.subr.bf16.mxu0 %v57506_v48 }
0x19c0   :  { %47471 = vmatpush3.bf16.msra.mxu0 %v57506_v48 }
0x19c1   :  { %47473 = vmatprep.subr.bf16.mxu0 %v57507_v53 }
0x19c4   :  { %47475 = vmatpush3.bf16.msra.mxu0 %v57507_v53 }
0x19c5   :  { %47477 = vmatprep.subr.bf16.mxu0 %v57508_v54 }
0x19c8   :  { %47479 = vmatpush3.bf16.msra.mxu0 %v57508_v54 }
0x19c9   :  { %47481 = vmatprep.subr.bf16.mxu0 %v57509_v41 }
0x19cc   :  { %47483 = vmatpush3.bf16.msra.mxu0 %v57509_v41 }
0x19cd   :  { %47485 = vmatprep.subr.bf16.mxu0 %v57510_v34 }
0x19d0   :  { %47487 = vmatpush3.bf16.msra.mxu0 %v57510_v34 }
0x19d1   :  { %47489 = vmatprep.subr.bf16.mxu0 %v57511_v55 }
0x19d4   :  { %47491 = vmatpush3.bf16.msra.mxu0 %v57511_v55 }
0x19d5   :  { %47493 = vmatprep.subr.bf16.mxu0 %v57512_v6 }
0x19d7   :  { %41541 = vmatmul.mubr.f32.vlgmr.msra.gmra.mrb[28].mxu0 %v54101_v20 }
0x19d8   :  { %41543 = vmatprep.mubr.f32.mxu0 %v54114_v8  ;;  %47495 = vmatpush3.bf16.msra.mxu0 %v57512_v6  ;;  %v57518_v6 = vld [vmem:[#allocation119_spill] sm:$0xff] }
0x19d9   :  { %47497 = vmatprep.subr.bf16.mxu0 %v57513_v19 }
0x19db   :  { %41544 = vmatmul.mubr.f32.gmra.mrb[30].mxu0 %v54112_v31 }
0x19dc   :  { %47499 = vmatpush3.bf16.msra.mxu0 %v57513_v19  ;;  %41578 = vmatprep.mubr.f32.mxu0 %v54109_v52  ;;  %v57519_v52 = vld [vmem:[#allocation120_spill] sm:$0xff] }
0x19dd   :  { %47501 = vmatprep.subr.bf16.mxu0 %v57514_v12 }
0x19e0   :  { %47503 = vmatpush3.bf16.msra.mxu0 %v57514_v12 }
0x19e1   :  { %47505 = vmatprep.subr.bf16.mxu0 %v57515_v40 }
0x19e4   :  { %47507 = vmatpush3.bf16.msra.mxu0 %v57515_v40  ;;  %v57525_v40 = vld [vmem:[#allocation131_spill] sm:$0xff] }
0x19e5   :  { %47509 = vmatprep.subr.bf16.mxu0 %v57516_v7 }
0x19e8   :  { %47511 = vmatpush3.bf16.msra.mxu0 %v57516_v7  ;;  %v57524_v7 = vand.u32 4294901760, %v54121_v0 }
0x19e9   :  { %47513 = vmatprep.subr.bf16.mxu0 %v57517_v36 }
0x19ec   :  { %47515 = vmatpush3.bf16.msra.mxu0 %v57517_v36  ;;  %v57523_v36 = vld [vmem:[#allocation130_spill] sm:$0xff] }
0x19ed   :  { %47517 = vmatprep.subr.bf16.mxu0 %v57518_v6 }
0x19f0   :  { %47519 = vmatpush3.bf16.msra.mxu0 %v57518_v6  ;;  %v57522_v6 = vand.u32 4294901760, %v54124_v13 }
0x19f1   :  { %47521 = vmatprep.subr.bf16.mxu0 %v57519_v52 }
0x19f4   :  { %47523 = vmatpush3.bf16.msra.mxu0 %v57519_v52  ;;  %v57521_v52 = vand.u32 4294901760, %v54106_v57 }
0x19f5   :  { %47525 = vmatprep.subr.bf16.mxu0 %v57496_v42 }
0x19f7   :  { %41579 = vmatmul.mubr.f32.vlgmr.msra.gmra.mrb[28].mxu0 %v54106_v57  ;;  %v57526_v57 = vld [vmem:[#allocation132_spill] sm:$0xff] }
0x19f8   :  { %41581 = vmatprep.mubr.f32.mxu0 %v54124_v13  ;;  %47527 = vmatpush3.bf16.msra.mxu0 %v57496_v42  ;;  %v57527_v13 = vld [vmem:[#allocation133_spill] sm:$0xff] }
0x19f9   :  { %47529 = vmatprep.subr.bf16.mxu0 %v57497_v46 }
0x19fb   :  { %41582 = vmatmul.mubr.f32.gmra.mrb[30].mxu0 %v54121_v0  ;;  %v57529_v0 = vld [vmem:[#allocation135_spill] sm:$0xff] }
0x19fc   :  { %47531 = vmatpush3.bf16.msra.mxu0 %v57497_v46  ;;  %41616 = vmatprep.mubr.f32.mxu0 %v15860_v10  ;;  %v57520_v10 = vld [vmem:[#allocation129_spill] sm:$0xff] }
0x19fd   :  { %47533 = vmatprep.subr.bf16.mxu0 %v57498_v28 }
0x1a00   :  { %47535 = vmatpush3.bf16.msra.mxu0 %v57498_v28 }
0x1a01   :  { %47537 = vmatprep.subr.bf16.mxu0 %v57499_v33 }
0x1a04   :  { %47539 = vmatpush3.bf16.msra.mxu0 %v57499_v33 }
0x1a05   :  { %47541 = vmatprep.subr.bf16.mxu0 %v57500_v45 }
0x1a08   :  { %47543 = vmatpush3.bf16.msra.mxu0 %v57500_v45 }
0x1a09   :  { %47545 = vmatprep.subr.bf16.mxu0 %v57501_v15 }
0x1a0c   :  { %47547 = vmatpush3.bf16.msra.mxu0 %v57501_v15 }
0x1a0d   :  { %47549 = vmatprep.subr.bf16.mxu0 %v57502_v37 }
0x1a10   :  { %47551 = vmatpush3.bf16.msra.mxu0 %v57502_v37 }
0x1a11   :  { %47553 = vmatprep.subr.bf16.mxu0 %v57503_v27 }
0x1a14   :  { %47555 = vmatpush3.bf16.msra.mxu0 %v57503_v27 }
0x1a15   :  { %47557 = vmatprep.subr.bf16.mxu0 %v57520_v10 }
0x1a17   :  { %41617 = vmatmul.mubr.f32.vlgmr.msra.gmra.mrb[28].mxu0 %v57521_v52  ;;  %v57532_v52 = vld [vmem:[#allocation8_spill] sm:$0xff] }
0x1a18   :  { %41619 = vmatprep.mubr.f32.mxu0 %v57522_v6  ;;  %47559 = vmatpush3.bf16.msra.mxu0 %v57520_v10  ;;  %v57528_v6 = vld [vmem:[#allocation134_spill] sm:$0xff] }
0x1a19   :  { %47561 = vmatprep.subr.bf16.mxu0 %v57523_v36 }
0x1a1b   :  { %41620 = vmatmul.mubr.f32.gmra.mrb[30].mxu0 %v57524_v7  ;;  %v57530_v7 = vld [vmem:[#allocation136_spill] sm:$0xff] }
0x1a1c   :  { %47563 = vmatpush3.bf16.msra.mxu0 %v57523_v36  ;;  %41654 = vmatprep.mubr.f32.mxu0 %v54103_v9 }
0x1a1d   :  { %47565 = vmatprep.subr.bf16.mxu0 %v57525_v40 }
0x1a20   :  { %47567 = vmatpush3.bf16.msra.mxu0 %v57525_v40 }
0x1a21   :  { %47569 = vmatprep.subr.bf16.mxu0 %v57526_v57 }
0x1a24   :  { %47571 = vmatpush3.bf16.msra.mxu0 %v57526_v57 }
0x1a25   :  { %47573 = vmatprep.subr.bf16.mxu0 %v57527_v13 }
0x1a28   :  { %47575 = vmatpush3.bf16.msra.mxu0 %v57527_v13 }
0x1a29   :  { %47577 = vmatprep.subr.bf16.mxu0 %v57528_v6 }
0x1a2c   :  { %47579 = vmatpush3.bf16.msra.mxu0 %v57528_v6  ;;  %v35075_v6 = vld [vmem:[%s56265_s0 + $0x18] sm:$0xff] }
0x1a2d   :  { %47581 = vmatprep.subr.bf16.mxu0 %v57529_v0 }
0x1a30   :  { %47583 = vmatpush3.bf16.msra.mxu0 %v57529_v0 }
0x1a31   :  { %47585 = vmatprep.subr.bf16.mxu0 %v57530_v7 }
0x1a34   :  { %47587 = vmatpush3.bf16.msra.mxu0 %v57530_v7  ;;  %v35074_v7 = vld [vmem:[%s56265_s0 + $0x10] sm:$0xff] }
0x1a35   :  { %47589 = vmatprep.subr.bf16.mxu0 %v57496_v42  ;;  %v17623_v0 = vsel %vm143_vm1, %v35074_v7, 0  ;;  %v57533_v7 = vld [vmem:[#allocation6_spill] sm:$0xff] }
0x1a36   :  { %v17694_v13 = vand.u32 4294901760, %v17623_v0 }
0x1a37   :  { %41655 = vmatmul.mubr.f32.vlgmr.msra.gmra.mrb[28].mxu0 %v54101_v20 }
0x1a38   :  { %41657 = vmatprep.mubr.f32.mxu0 %v54114_v8  ;;  %47591 = vmatpush3.bf16.msra.mxu0 %v57496_v42  ;;  %v17695_v57 = vsub.f32 %v17623_v0, %v17694_v13 }
0x1a39   :  { %47593 = vmatprep.subr.bf16.mxu0 %v57497_v46 }
0x1a3a   :  { %v17696_v36 = vand.u32 4294901760, %v17695_v57 }
0x1a3b   :  { %41658 = vmatmul.mubr.f32.gmra.mrb[30].mxu0 %v54112_v31 }
0x1a3c   :  { %47595 = vmatpush3.bf16.msra.mxu0 %v57497_v46  ;;  %41692 = vmatprep.mubr.f32.mxu0 %v54103_v9  ;;  %v57531_v9 = vld [vmem:[#allocation5_spill] sm:$0xff]  ;;  %v17697_v12 = vsub.f32 %v17695_v57, %v17696_v36 }
0x1a3d   :  { %47597 = vmatprep.subr.bf16.mxu0 %v57498_v28 }
0x1a3e   :  { %v17698_v19 = vand.u32 4294901760, %v17697_v12 }
0x1a40   :  { %47599 = vmatpush3.bf16.msra.mxu0 %v57498_v28  ;;  %v57537_v28 = vld [vmem:[#allocation144_spill] sm:$0xff] }
0x1a41   :  { %47601 = vmatprep.subr.bf16.mxu0 %v57499_v33 }
0x1a44   :  { %47603 = vmatpush3.bf16.msra.mxu0 %v57499_v33 }
0x1a45   :  { %47605 = vmatprep.subr.bf16.mxu0 %v57500_v45 }
0x1a48   :  { %47607 = vmatpush3.bf16.msra.mxu0 %v57500_v45 }
0x1a49   :  { %47609 = vmatprep.subr.bf16.mxu0 %v57501_v15 }
0x1a4c   :  { %47611 = vmatpush3.bf16.msra.mxu0 %v57501_v15 }
0x1a4d   :  { %47613 = vmatprep.subr.bf16.mxu0 %v57502_v37 }
0x1a50   :  { %47615 = vmatpush3.bf16.msra.mxu0 %v57502_v37 }
0x1a51   :  { %47617 = vmatprep.subr.bf16.mxu0 %v57503_v27 }
0x1a54   :  { %47619 = vmatpush3.bf16.msra.mxu0 %v57503_v27 }
0x1a55   :  { %41830 = vmatprep.subr.mxu0 %v57531_v9 }
0x1a57   :  { %41693 = vmatmul.mubr.f32.vlgmr.msra.gmra.mrb[28].mxu0 %v54101_v20  ;;  %v17626_v20 = vsel %vm143_vm1, %v35075_v6, 0  ;;  %v57534_v6 = vld [vmem:[#allocation7_spill] sm:$0xff] }
0x1a58   :  { %41695 = vmatprep.mubr.f32.mxu0 %v54114_v8  ;;  %41831 = vmatpush3.msra.mxu0 %v57531_v9  ;;  %v17704_v8 = vand.u32 4294901760, %v17626_v20 }
0x1a59   :  { %41835 = vmatprep.subr.mxu0 %v57532_v52 }
0x1a5a   :  { %v17705_v40 = vsub.f32 %v17626_v20, %v17704_v8 }
0x1a5b   :  { %41696 = vmatmul.mubr.f32.gmra.mrb[30].mxu0 %v54112_v31 }
0x1a5c   :  { %v17706_v10 = vand.u32 4294901760, %v17705_v40  ;;  %41832 = vmatprep.mubr.f32.mxu0 %v17698_v19 }
0x1a5e   :  { %v17707_v31 = vsub.f32 %v17705_v40, %v17706_v10 }
0x1a60   :  { %v17708_v55 = vand.u32 4294901760, %v17707_v31 }
0x1a62   :  { %41833 = vmatmul.mubr.f32.vlgmr.msra.gmra.mrb[32].mxu0 %v17708_v55  ;;  %v57535_v55 = vld [vmem:[#allocation13_spill] sm:$0xff] }
0x1a63   :  { %41836 = vmatpush3.msra.mxu0 %v57532_v52  ;;  %41837 = vmatprep.mubr.f32.mxu0 %v17694_v13 }
0x1a64   :  { %41840 = vmatprep.subr.mxu0 %v57533_v7 }
0x1a6a   :  { %41838 = vmatmul.mubr.f32.vlgmr.msra.gmra.mrb[32].mxu0 %v17704_v8 }
0x1a6b   :  { %41841 = vmatpush3.msra.mxu0 %v57533_v7  ;;  %41842 = vmatprep.mubr.f32.mxu0 %v17695_v57 }
0x1a6c   :  { %41845 = vmatprep.subr.mxu0 %v57531_v9 }
0x1a72   :  { %41843 = vmatmul.mubr.f32.vlgmr.msra.gmra.mrb[32].mxu0 %v17705_v40  ;;  %v57536_v40 = vld [vmem:[#allocation16_spill] sm:$0xff] }
0x1a73   :  { %41846 = vmatpush3.msra.mxu0 %v57531_v9  ;;  %41847 = vmatprep.mubr.f32.mxu0 %v17696_v36 }
0x1a74   :  { %41850 = vmatprep.subr.mxu0 %v57534_v6 }
0x1a7a   :  { %41848 = vmatmul.mubr.f32.vlgmr.msra.gmra.mrb[32].mxu0 %v17706_v10 }
0x1a7b   :  { %41851 = vmatpush3.msra.mxu0 %v57534_v6  ;;  %41852 = vmatprep.mubr.f32.mxu0 %v17694_v13 }
0x1a7c   :  { %41855 = vmatprep.subr.mxu0 %v57531_v9 }
0x1a82   :  { %41853 = vmatmul.mubr.f32.vlgmr.msra.gmra.mrb[32].mxu0 %v17704_v8 }
0x1a83   :  { %41856 = vmatpush3.msra.mxu0 %v57531_v9  ;;  %41857 = vmatprep.mubr.f32.mxu0 %v17694_v13 }
0x1a84   :  { %41860 = vmatprep.subr.mxu0 %v57535_v55 }
0x1a8a   :  { %41858 = vmatmul.mubr.f32.vlgmr.msra.gmra.mrb[32].mxu0 %v17704_v8 }
0x1a8b   :  { %41861 = vmatpush3.msra.mxu0 %v57535_v55 }
0x1a8c   :  { %41865 = vmatprep.subr.mxu0 %v57536_v40 }
0x1b2a   :  { %v41694_v36 = vpop.f32.mrb[28].mxu0 }
0x1b2b   :  { %v16553_v19 = vand.u32 4294901760, %v41694_v36  ;;  %v16525_v12 = vpop.f32.mrb[29].mxu0 }
0x1b2c   :  { %v16550_v10 = vand.u32 4294901760, %v16525_v12 }
0x1b2d   :  { %v16647_v57 = vsub.f32 %v41694_v36, %v16553_v19 }
0x1b2e   :  { %v47620_v0 = vpack.c.bf16 %v16553_v19, %v16550_v10  ;;  %v16640_v52 = vsub.f32 %v16525_v12, %v16550_v10  ;;  %v41697_v20 = vpop.f32.mrb[30].mxu0 }
0x1b2f   :  { %v16648_v31 = vand.u32 4294901760, %v16647_v57  ;;  %v16559_v7 = vand.u32 4294901760, %v41697_v20  ;;  %v16537_v6 = vpop.f32.mrb[31].mxu0 }
0x1b30   :  { %v16641_v9 = vand.u32 4294901760, %v16640_v52  ;;  %v16556_v13 = vand.u32 4294901760, %v16537_v6  ;;  %47621 = vmatprep.subr.bf16.mxu1 %v47620_v0  ;;  %v47636_v34 = vpack.c.bf16 %v16647_v57, %v16640_v52 }
0x1b31   :  { %v16649_v8 = vsub.f32 %v16647_v57, %v16648_v31  ;;  %v16661_v41 = vsub.f32 %v41697_v20, %v16559_v7  ;;  %47623 = vmatpush3.bf16.msra.mxu1 %v47620_v0 }
0x1b32   :  { %v16642_v54 = vsub.f32 %v16640_v52, %v16641_v9  ;;  %v47624_v53 = vpack.c.bf16 %v16559_v7, %v16556_v13  ;;  %v16654_v48 = vsub.f32 %v16537_v6, %v16556_v13  ;;  %v47652_v26 = vpack.c.bf16 %v16648_v31, %v16641_v9  ;;  %v57538_v52 = vld [vmem:[#allocation137_spill] sm:$0xff]  ;;  %v133_v7 = vld [vmem:[%s56271_s6 + $0x18] sm:$0xff] }
0x1b33   :  { %v16662_v23 = vand.u32 4294901760, %v16661_v41  ;;  %v16650_v27 = vand.u32 4294901760, %v16649_v8  ;;  %v57539_v31 = vld [vmem:[#allocation141_spill] sm:$0xff]  ;;  %v17099_v13 = vand.u32 4294901760, %v133_v7 }
0x1b34   :  { %v16655_v36 = vand.u32 4294901760, %v16654_v48  ;;  %47625 = vmatprep.subr.bf16.mxu1 %v47624_v53  ;;  %v16643_v19 = vand.u32 4294901760, %v16642_v54  ;;  %v47640_v12 = vpack.c.bf16 %v16661_v41, %v16654_v48  ;;  %v57540_v54 = vld [vmem:[#allocation138_spill] sm:$0xff] }
0x1b35   :  { %v16663_v10 = vsub.f32 %v16661_v41, %v16662_v23  ;;  %47627 = vmatpush3.bf16.msra.mxu1 %v47624_v53 }
0x1b36   :  { %v16656_v37 = vsub.f32 %v16654_v48, %v16655_v36  ;;  %v47628_v15 = vpack.c.bf16 %v16650_v27, %v16643_v19  ;;  %v47656_v45 = vpack.c.bf16 %v16662_v23, %v16655_v36  ;;  %v57541_v27 = vld [vmem:[#allocation142_spill] sm:$0xff]  ;;  %v57542_v23 = vld [vmem:[#allocation139_spill] sm:$0xff] }
0x1b37   :  { %v16664_v33 = vand.u32 4294901760, %v16663_v10 }
0x1b38   :  { %41707 = vmatmul.mubr.f32.vlgmr.msra.gmra.mrb[36].mxu1 %v57537_v28  ;;  %47629 = vmatprep.subr.bf16.mxu1 %v47628_v15  ;;  %v16657_v57 = vand.u32 4294901760, %v16656_v37  ;;  %v131_v37 = vld [vmem:[%s56271_s6 + $0x8] sm:$0xff] }
0x1b39   :  { %47631 = vmatpush3.bf16.msra.mxu1 %v47628_v15  ;;  %41717 = vmatprep.mubr.f32.mxu1 %v57538_v52  ;;  %v130_v15 = vld [vmem:[%s56271_s6] sm:$0xff]  ;;  %v17093_v48 = vand.u32 4294901760, %v131_v37 }
0x1b3a   :  { %v47632_v20 = vpack.c.bf16 %v16664_v33, %v16657_v57  ;;  %v57543_v33 = vld [vmem:[#allocation143_spill] sm:$0xff] }
0x1b3b   :  { %v17187_v6 = vsub.f32 %v131_v37, %v17093_v48 }
0x1b3c   :  { %47633 = vmatprep.subr.bf16.mxu1 %v47632_v20 }
0x1b3d   :  { %47635 = vmatpush3.bf16.msra.mxu1 %v47632_v20  ;;  %v17188_v36 = vand.u32 4294901760, %v17187_v6  ;;  %v17201_v20 = vsub.f32 %v133_v7, %v17099_v13 }
0x1b3e   :  { %47637 = vmatprep.subr.bf16.mxu1 %v47636_v34 }
0x1b3f   :  { %v17189_v10 = vsub.f32 %v17187_v6, %v17188_v36 }
0x1b40   :  { %41718 = vmatmul.mubr.f32.vlgmr.msra.gmra.mrb[36].mxu1 %v57539_v31 }
0x1b41   :  { %47639 = vmatpush3.bf16.msra.mxu1 %v47636_v34  ;;  %41728 = vmatprep.mubr.f32.mxu1 %v57540_v54  ;;  %v17190_v37 = vand.u32 4294901760, %v17189_v10  ;;  %v35077_v10 = vld [vmem:[%s56266_s1 + $0x18] sm:$0xff] }
0x1b42   :  { %47641 = vmatprep.subr.bf16.mxu1 %v47640_v12 }
0x1b45   :  { %47643 = vmatpush3.bf16.msra.mxu1 %v47640_v12 }
0x1b46   :  { %47645 = vmatprep.subr.bf16.mxu1 %v47620_v0 }
0x1b48   :  { %41729 = vmatmul.mubr.f32.vlgmr.msra.gmra.mrb[36].mxu1 %v57541_v27 }
0x1b49   :  { %47647 = vmatpush3.bf16.msra.mxu1 %v47620_v0  ;;  %41739 = vmatprep.mubr.f32.mxu1 %v57542_v23 }
0x1b4a   :  { %47649 = vmatprep.subr.bf16.mxu1 %v47624_v53 }
0x1b4d   :  { %47651 = vmatpush3.bf16.msra.mxu1 %v47624_v53 }
0x1b4e   :  { %47653 = vmatprep.subr.bf16.mxu1 %v47652_v26 }
0x1b50   :  { %41740 = vmatmul.mubr.f32.vlgmr.msra.gmra.mrb[36].mxu1 %v57543_v33 }
0x1b51   :  { %47655 = vmatpush3.bf16.msra.mxu1 %v47652_v26  ;;  %41750 = vmatprep.mubr.f32.mxu1 %v57538_v52 }
0x1b52   :  { %47657 = vmatprep.subr.bf16.mxu1 %v47656_v45 }
0x1b55   :  { %47659 = vmatpush3.bf16.msra.mxu1 %v47656_v45  ;;  %v17090_v45 = vand.u32 4294901760, %v130_v15 }
0x1b56   :  { %47661 = vmatprep.subr.bf16.mxu1 %v47620_v0 }
0x1b57   :  { %v54280_v34 = vpack.c.bf16 %v17093_v48, %v17090_v45  ;;  %v17202_v48 = vand.u32 4294901760, %v17201_v20 }
0x1b58   :  { %41751 = vmatmul.mubr.f32.vlgmr.msra.gmra.mrb[36].mxu1 %v57539_v31 }
0x1b59   :  { %47663 = vmatpush3.bf16.msra.mxu1 %v47620_v0  ;;  %41761 = vmatprep.mubr.f32.mxu1 %v57538_v52  ;;  %57544 = vst [vmem:[#allocation73_spill] sm:$0xff] %v54280_v34  ;;  %v17180_v0 = vsub.f32 %v130_v15, %v17090_v45  ;;  %v17203_v27 = vsub.f32 %v17201_v20, %v17202_v48 }
0x1b5a   :  { %47665 = vmatprep.subr.bf16.mxu1 %v47624_v53 }
0x1b5b   :  { %v17181_v8 = vand.u32 4294901760, %v17180_v0 }
0x1b5d   :  { %47667 = vmatpush3.bf16.msra.mxu1 %v47624_v53  ;;  %v54276_v26 = vpop.f32.mrb[32].mxu0  ;;  %v132_v53 = vld [vmem:[%s56271_s6 + $0x10] sm:$0xff]  ;;  %v17182_v12 = vsub.f32 %v17180_v0, %v17181_v8 }
0x1b5e   :  { %v54278_v41 = vpop.f32.mrb[33].mxu0  ;;  %47669 = vmatprep.subr.bf16.mxu1 %v54280_v34  ;;  %v17096_v9 = vand.u32 4294901760, %v132_v53 }
0x1b5f   :  { %v17183_v15 = vand.u32 4294901760, %v17182_v12  ;;  %v35076_v12 = vld [vmem:[%s56266_s1 + $0x10] sm:$0xff] }
0x1b60   :  { %41762 = vmatmul.mubr.f32.vlgmr.msra.gmra.mrb[36].mxu1 %v57539_v31  ;;  %v54290_v19 = vpack.c.bf16 %v17099_v13, %v17096_v9  ;;  %v17194_v57 = vsub.f32 %v132_v53, %v17096_v9  ;;  %v17204_v31 = vand.u32 4294901760, %v17203_v27  ;;  %v54299_v53 = vpack.c.bf16 %v17187_v6, %v17180_v0 }
0x1b61   :  { %47671 = vmatpush3.bf16.msra.mxu1 %v54280_v34  ;;  %v54294_v33 = vpack.c.bf16 %v17190_v37, %v17183_v15  ;;  %v54303_v9 = vpack.c.bf16 %v17188_v36, %v17181_v8  ;;  %v18121_v27 = vsel %vm143_vm1, %v35076_v12, 0  ;;  %v57553_v12 = vld [vmem:[#allocation37_spill] sm:$0xff] }
0x1b62   :  { %57545 = vst [vmem:[#allocation74_spill] sm:$0xff] %v54290_v19  ;;  %47673 = vmatprep.subr.bf16.mxu1 %v54290_v19  ;;  %v17195_v45 = vand.u32 4294901760, %v17194_v57  ;;  %57548 = vst [vmem:[#allocation77_spill] sm:$0xff] %v54299_v53  ;;  %v54301_v7 = vpack.c.bf16 %v17201_v20, %v17194_v57 }
0x1b63   :  { %57546 = vst [vmem:[#allocation75_spill] sm:$0xff] %v54294_v33  ;;  %57550 = vst [vmem:[#allocation105_spill] sm:$0xff] %v54303_v9 }
0x1b64   :  { %v17196_v23 = vsub.f32 %v17194_v57, %v17195_v45  ;;  %57549 = vst [vmem:[#allocation78_spill] sm:$0xff] %v54301_v7  ;;  %v54305_v13 = vpack.c.bf16 %v17202_v48, %v17195_v45  ;;  %v57552_v45 = vld [vmem:[#allocation14_spill] sm:$0xff] }
0x1b65   :  { %47675 = vmatpush3.bf16.msra.mxu1 %v54290_v19 }
0x1b66   :  { %47677 = vmatprep.subr.bf16.mxu1 %v54294_v33  ;;  %v17197_v54 = vand.u32 4294901760, %v17196_v23  ;;  %57551 = vst [vmem:[#allocation106_spill] sm:$0xff] %v54305_v13 }
0x1b68   :  { %v54297_v52 = vpack.c.bf16 %v17204_v31, %v17197_v54  ;;  %v18124_v31 = vsel %vm143_vm1, %v35077_v10, 0  ;;  %v18192_v54 = vand.u32 4294901760, %v18121_v27 }
0x1b69   :  { %v18202_v23 = vand.u32 4294901760, %v18124_v31 }
0x1b6a   :  { %57547 = vst [vmem:[#allocation76_spill] sm:$0xff] %v54297_v52  ;;  %v18193_v0 = vsub.f32 %v18121_v27, %v18192_v54 }
0x1b6b   :  { %v18203_v6 = vsub.f32 %v18124_v31, %v18202_v23  ;;  %v57554_v31 = vld [vmem:[#allocation38_spill] sm:$0xff] }
0x1b6c   :  { %v18194_v8 = vand.u32 4294901760, %v18193_v0 }
0x1b6d   :  { %v18204_v36 = vand.u32 4294901760, %v18203_v6 }
0x1b6e   :  { %v18195_v57 = vsub.f32 %v18193_v0, %v18194_v8 }
0x1b6f   :  { %v18205_v20 = vsub.f32 %v18203_v6, %v18204_v36 }
0x1b70   :  { %v18196_v15 = vand.u32 4294901760, %v18195_v57 }
0x1b71   :  { %v18206_v37 = vand.u32 4294901760, %v18205_v20  ;;  %v57555_v20 = vld [vmem:[#allocation15_spill] sm:$0xff] }
0x1b72   :  { %41862 = vmatprep.mubr.f32.mxu0 %v18196_v15 }
0x1b73   :  { %41863 = vmatmul.mubr.f32.vlgmr.msra.gmra.mrb[34].mxu0 %v18206_v37 }
0x1b74   :  { %41866 = vmatpush3.msra.mxu0 %v57536_v40  ;;  %41867 = vmatprep.mubr.f32.mxu0 %v18192_v54 }
0x1b75   :  { %41870 = vmatprep.subr.mxu0 %v57552_v45 }
0x1b7b   :  { %41868 = vmatmul.mubr.f32.vlgmr.msra.gmra.mrb[34].mxu0 %v18202_v23 }
0x1b7c   :  { %41871 = vmatpush3.msra.mxu0 %v57552_v45  ;;  %41872 = vmatprep.mubr.f32.mxu0 %v18193_v0 }
0x1b7d   :  { %41875 = vmatprep.subr.mxu0 %v57535_v55 }
0x1b83   :  { %41873 = vmatmul.mubr.f32.vlgmr.msra.gmra.mrb[34].mxu0 %v18203_v6 }
0x1b84   :  { %41876 = vmatpush3.msra.mxu0 %v57535_v55  ;;  %41877 = vmatprep.mubr.f32.mxu0 %v18194_v8 }
0x1b85   :  { %41880 = vmatprep.subr.mxu0 %v57555_v20 }
0x1b8b   :  { %41878 = vmatmul.mubr.f32.vlgmr.msra.gmra.mrb[34].mxu0 %v18204_v36  ;;  %v57556_v36 = vld [vmem:[#allocation24_spill] sm:$0xff] }
0x1b8c   :  { %41881 = vmatpush3.msra.mxu0 %v57555_v20  ;;  %41882 = vmatprep.mubr.f32.mxu0 %v18192_v54 }
0x1b8d   :  { %41885 = vmatprep.subr.mxu0 %v57535_v55 }
0x1b93   :  { %41883 = vmatmul.mubr.f32.vlgmr.msra.gmra.mrb[34].mxu0 %v18202_v23 }
0x1b94   :  { %41886 = vmatpush3.msra.mxu0 %v57535_v55  ;;  %41887 = vmatprep.mubr.f32.mxu0 %v18192_v54  ;;  %v51112_v55 = vld [vmem:[%s56268_s3] ss:$0 sm:$0xff] }
0x1b95   :  { %47741 = vmatprep.subr.bf16.mxu0 %v57556_v36  ;;  %v54348_v54 = vadd.f32 %v51112_v55, %v54276_v26 }
0x1b9b   :  { %41888 = vmatmul.mubr.f32.vlgmr.msra.gmra.mrb[34].mxu0 %v18202_v23  ;;  %v57558_v23 = vld [vmem:[#allocation29_spill] sm:$0xff] }
0x1b9c   :  { %47743 = vmatpush3.bf16.msra.mxu0 %v57556_v36 }
0x1c33   :  { %v41763_v48 = vpop.f32.mrb[36].mxu1 }
0x1c34   :  { %v50340_v10 = vadd.f32 %v41763_v48, %v57553_v12  ;;  %v17067_v27 = vpop.f32.mrb[37].mxu1 }
0x1c35   :  { %v50341_v57 = vadd.f32 %v17067_v27, %v57554_v31  ;;  %v57557_v31 = vld [vmem:[#allocation28_spill] sm:$0xff] }
0x1c36   :  { %v17087_v40 = vsel %vm1660_vm3, %v50340_v10, 0  ;;  %47745 = vmatprep.subr.bf16.mxu0 %v57557_v31 }
0x1c37   :  { %v54324_v15 = vand.u32 4294901760, %v17087_v40  ;;  %v17084_v0 = vsel %vm1660_vm3, %v50341_v57, 0  ;;  %47747 = vmatpush3.bf16.msra.mxu0 %v57557_v31  ;;  %v18619_v57 = vand.u32 4294901760, %v54348_v54 }
0x1c38   :  { %v17158_v37 = vand.u32 4294901760, %v17084_v0  ;;  %47749 = vmatprep.subr.bf16.mxu0 %v57558_v23 }
0x1c39   :  { %v17169_v45 = vsub.f32 %v17087_v40, %v54324_v15  ;;  %v18711_v26 = vsub.f32 %v54348_v54, %v18619_v57 }
0x1c3a   :  { %v17159_v28 = vsub.f32 %v17084_v0, %v17158_v37 }
0x1c3b   :  { %v17170_v48 = vand.u32 4294901760, %v17169_v45  ;;  %v18712_v0 = vand.u32 4294901760, %v18711_v26 }
0x1c3c   :  { %v17160_v12 = vand.u32 4294901760, %v17159_v28 }
0x1c3d   :  { %v17171_v6 = vsub.f32 %v17169_v45, %v17170_v48 }
0x1c3e   :  { %v17161_v8 = vsub.f32 %v17159_v28, %v17160_v12 }
0x1c3f   :  { %v17172_v27 = vand.u32 4294901760, %v17171_v6 }
0x1c40   :  { %v17162_v10 = vand.u32 4294901760, %v17161_v8 }
0x1c42   :  { %41772 = vmatprep.mubr.f32.mxu1 %v17162_v10 }
0x1c43   :  { %41773 = vmatmul.mubr.f32.vlgmr.msra.gmra.mrb[38].mxu1 %v17172_v27  ;;  %v57559_v27 = vld [vmem:[#allocation12_spill] sm:$0xff] }
0x1c44   :  { %47679 = vmatpush3.bf16.msra.mxu1 %v54294_v33  ;;  %41783 = vmatprep.mubr.f32.mxu1 %v17158_v37 }
0x1c45   :  { %47681 = vmatprep.subr.bf16.mxu1 %v54297_v52 }
0x1c48   :  { %47683 = vmatpush3.bf16.msra.mxu1 %v54297_v52 }
0x1c49   :  { %47685 = vmatprep.subr.bf16.mxu1 %v54299_v53 }
0x1c4b   :  { %41784 = vmatmul.mubr.f32.vlgmr.msra.gmra.mrb[38].mxu1 %v54324_v15 }
0x1c4c   :  { %47687 = vmatpush3.bf16.msra.mxu1 %v54299_v53  ;;  %41794 = vmatprep.mubr.f32.mxu1 %v17159_v28  ;;  %v54351_v28 = vadd.f32 %v51112_v55, %v54278_v41  ;;  %v57560_v55 = vld [vmem:[#allocation20_spill] sm:$0xff] }
0x1c4d   :  { %47689 = vmatprep.subr.bf16.mxu1 %v54301_v7 }
0x1c4e   :  { %v18616_v40 = vand.u32 4294901760, %v54351_v28 }
0x1c50   :  { %47691 = vmatpush3.bf16.msra.mxu1 %v54301_v7  ;;  %v18704_v41 = vsub.f32 %v54351_v28, %v18616_v40 }
0x1c51   :  { %47693 = vmatprep.subr.bf16.mxu1 %v54280_v34 }
0x1c52   :  { %v18705_v20 = vand.u32 4294901760, %v18704_v41 }
0x1c53   :  { %41795 = vmatmul.mubr.f32.vlgmr.msra.gmra.mrb[38].mxu1 %v17169_v45 }
0x1c54   :  { %47695 = vmatpush3.bf16.msra.mxu1 %v54280_v34  ;;  %41805 = vmatprep.mubr.f32.mxu1 %v17160_v12  ;;  %v18706_v45 = vsub.f32 %v18704_v41, %v18705_v20  ;;  %v18713_v12 = vsub.f32 %v18711_v26, %v18712_v0 }
0x1c55   :  { %47697 = vmatprep.subr.bf16.mxu1 %v54290_v19 }
0x1c56   :  { %v18707_v6 = vand.u32 4294901760, %v18706_v45  ;;  %v18714_v8 = vand.u32 4294901760, %v18713_v12  ;;  %v57564_v45 = vld [vmem:[#allocation18_spill] sm:$0xff]  ;;  %v57565_v12 = vld [vmem:[#allocation11_spill] sm:$0xff] }
0x1c58   :  { %47699 = vmatpush3.bf16.msra.mxu1 %v54290_v19  ;;  %v47720_v10 = vpack.c.bf16 %v18714_v8, %v18707_v6  ;;  %v57566_v6 = vld [vmem:[#allocation19_spill] sm:$0xff] }
0x1c59   :  { %47701 = vmatprep.subr.bf16.mxu1 %v54303_v9 }
0x1c5b   :  { %41806 = vmatmul.mubr.f32.vlgmr.msra.gmra.mrb[38].mxu1 %v17170_v48  ;;  %v47716_v48 = vpack.c.bf16 %v18619_v57, %v18616_v40  ;;  %v57562_v57 = vld [vmem:[#allocation17_spill] sm:$0xff]  ;;  %v57563_v40 = vld [vmem:[#allocation10_spill] sm:$0xff] }
0x1c5c   :  { %47703 = vmatpush3.bf16.msra.mxu1 %v54303_v9  ;;  %41816 = vmatprep.mubr.f32.mxu1 %v17158_v37 }
0x1c5d   :  { %47705 = vmatprep.subr.bf16.mxu1 %v54305_v13 }
0x1c60   :  { %47707 = vmatpush3.bf16.msra.mxu1 %v54305_v13  ;;  %v47724_v13 = vpack.c.bf16 %v18711_v26, %v18704_v41  ;;  %v57568_v26 = vld [vmem:[#allocation25_spill] sm:$0xff] }
0x1c61   :  { %47709 = vmatprep.subr.bf16.mxu1 %v54280_v34  ;;  %v57569_v41 = vld [vmem:[#allocation21_spill] sm:$0xff] }
0x1c63   :  { %41817 = vmatmul.mubr.f32.vlgmr.msra.gmra.mrb[38].mxu1 %v54324_v15 }
0x1c64   :  { %47711 = vmatpush3.bf16.msra.mxu1 %v54280_v34  ;;  %41827 = vmatprep.mubr.f32.mxu1 %v17158_v37  ;;  %v57561_v37 = vld [vmem:[#allocation9_spill] sm:$0xff] }
0x1c65   :  { %47713 = vmatprep.subr.bf16.mxu1 %v54290_v19 }
0x1c68   :  { %47715 = vmatpush3.bf16.msra.mxu1 %v54290_v19 }
0x1c69   :  { %47717 = vmatprep.subr.bf16.mxu1 %v47716_v48 }
0x1c6b   :  { %41828 = vmatmul.mubr.f32.vlgmr.msra.gmra.mrb[38].mxu1 %v54324_v15  ;;  %v47732_v15 = vpack.c.bf16 %v18712_v0, %v18705_v20 }
0x1c6c   :  { %47719 = vmatpush3.bf16.msra.mxu1 %v47716_v48  ;;  %41894 = vmatprep.mubr.f32.mxu1 %v57559_v27 }
0x1c6d   :  { %47721 = vmatprep.subr.bf16.mxu1 %v47720_v10 }
0x1c6e   :  { %v54388_v20 = vpop.f32.mrb[34].mxu0 }
0x1c6f   :  { %41895 = vmatmul.mubr.f32.vlgmr.msra.gmra.mrb[40].mxu1 %v57560_v55  ;;  %57570 = vst [vmem:[#allocation5_spill] sm:$0xff] %v54388_v20  ;;  %v54390_v0 = vpop.f32.mrb[35].mxu0 }
0x1c70   :  { %47723 = vmatpush3.bf16.msra.mxu1 %v47720_v10  ;;  %41901 = vmatprep.mubr.f32.mxu1 %v57561_v37  ;;  %57571 = vst [vmem:[#allocation8_spill] sm:$0xff] %v54390_v0 }
0x1c71   :  { %47725 = vmatprep.subr.bf16.mxu1 %v47724_v13 }
0x1c77   :  { %41902 = vmatmul.mubr.f32.vlgmr.msra.gmra.mrb[40].mxu1 %v57562_v57 }
0x1c78   :  { %47727 = vmatpush3.bf16.msra.mxu1 %v47724_v13  ;;  %41908 = vmatprep.mubr.f32.mxu1 %v57563_v40  ;;  %v57567_v13 = vld [vmem:[#allocation22_spill] sm:$0xff] }
0x1c79   :  { %47729 = vmatprep.subr.bf16.mxu1 %v47716_v48 }
0x1c7f   :  { %41909 = vmatmul.mubr.f32.vlgmr.msra.gmra.mrb[40].mxu1 %v57564_v45 }
0x1c80   :  { %47731 = vmatpush3.bf16.msra.mxu1 %v47716_v48  ;;  %41915 = vmatprep.mubr.f32.mxu1 %v57565_v12  ;;  %v57581_v12 = vld [vmem:[#allocation32_spill] sm:$0xff] }
0x1c81   :  { %47733 = vmatprep.subr.bf16.mxu1 %v47732_v15 }
0x1c87   :  { %41916 = vmatmul.mubr.f32.vlgmr.msra.gmra.mrb[40].mxu1 %v57566_v6 }
0x1c88   :  { %47735 = vmatpush3.bf16.msra.mxu1 %v47732_v15  ;;  %41922 = vmatprep.mubr.f32.mxu1 %v57561_v37 }
0x1c89   :  { %47737 = vmatprep.subr.bf16.mxu1 %v47716_v48 }
0x1c8f   :  { %41923 = vmatmul.mubr.f32.vlgmr.msra.gmra.mrb[40].mxu1 %v57562_v57 }
0x1c90   :  { %47739 = vmatpush3.bf16.msra.mxu1 %v47716_v48  ;;  %41929 = vmatprep.mubr.f32.mxu1 %v57561_v37  ;;  %v35073_v48 = vld [vmem:[%s56272_s7] ss:$0 sm:$0xff] }
0x1c91   :  { %47789 = vmatprep.subr.bf16.mxu1 %v57567_v13 }
0x1c97   :  { %41930 = vmatmul.mubr.f32.vlgmr.msra.gmra.mrb[40].mxu1 %v57562_v57 }
0x1c98   :  { %47791 = vmatpush3.bf16.msra.mxu1 %v57567_v13 }
0x1c99   :  { %47793 = vmatprep.subr.bf16.mxu1 %v57568_v26 }
0x1c9c   :  { %47795 = vmatpush3.bf16.msra.mxu1 %v57568_v26 }
0x1c9d   :  { %47797 = vmatprep.subr.bf16.mxu1 %v57569_v41 }
0x1d3e   :  { %v41829_v8 = vpop.f32.mrb[38].mxu1 }
0x1d3f   :  { %v50342_v10 = vadd.f32 %v41829_v8, %v35073_v48  ;;  %v17607_v15 = vpop.f32.mrb[39].mxu1 }
0x1d40   :  { %v50343_v9 = vadd.f32 %v35073_v48, %v17607_v15 }
0x1d41   :  { %17618 = vst.msk [vmem:[%s56274_s9 + $0x8] sm:$0xff] %vm143_vm1, %v50342_v10 }
0x1d42   :  { %17617 = vst.msk [vmem:[%s56274_s9] sm:$0xff] %vm143_vm1, %v50343_v9 }
0x1d6a   :  { %v54403_v7 = vpop.f32.mrb[40].mxu1 }
0x1d6b   :  { %57572 = vst [vmem:[#allocation6_spill] sm:$0xff] %v54403_v7  ;;  %v54407_v53 = vsub.f32 %v54348_v54, %v54403_v7  ;;  %v54409_v52 = vpop.f32.mrb[41].mxu1 }
0x1d6c   :  { %57573 = vst [vmem:[#allocation7_spill] sm:$0xff] %v54409_v52  ;;  %v54413_v48 = vsub.f32 %v54351_v28, %v54409_v52 }
0x1d6d   :  { %v19123_v8 = vsel %vm1660_vm3, %v54407_v53, 0 }
0x1d6e   :  { %v54417_v10 = vand.u32 4294901760, %v19123_v8  ;;  %v19120_v9 = vsel %vm1660_vm3, %v54413_v48, 0 }
0x1d6f   :  { %v54421_v15 = vand.u32 4294901760, %v19120_v9 }
0x1d70   :  { %v19205_v33 = vsub.f32 %v19123_v8, %v54417_v10  ;;  %v57574_v8 = vld [vmem:[#allocation30_spill] sm:$0xff] }
0x1d71   :  { %v19195_v54 = vsub.f32 %v19120_v9, %v54421_v15  ;;  %v57575_v9 = vld [vmem:[#allocation23_spill] sm:$0xff] }
0x1d72   :  { %v19206_v19 = vand.u32 4294901760, %v19205_v33 }
0x1d73   :  { %v19196_v34 = vand.u32 4294901760, %v19195_v54 }
0x1d74   :  { %v19207_v7 = vsub.f32 %v19205_v33, %v19206_v19 }
0x1d75   :  { %v19197_v6 = vsub.f32 %v19195_v54, %v19196_v34 }
0x1d76   :  { %v19208_v52 = vand.u32 4294901760, %v19207_v7  ;;  %v57576_v7 = vld [vmem:[#allocation31_spill] sm:$0xff] }
0x1d77   :  { %v19198_v28 = vand.u32 4294901760, %v19197_v6  ;;  %v57577_v6 = vld [vmem:[#allocation26_spill] sm:$0xff] }
0x1d79   :  { %41940 = vmatprep.mubr.f32.mxu0 %v19198_v28  ;;  %42006 = vmatprep.mubr.f32.mxu1 %v19198_v28  ;;  %v57579_v28 = vld [vmem:[#allocation27_spill] sm:$0xff] }
0x1d7a   :  { %41941 = vmatmul.mubr.f32.vlgmr.msra.gmra.mrb[36].mxu0 %v19208_v52  ;;  %42007 = vmatmul.mubr.f32.vlgmr.msra.gmra.mrb[42].mxu1 %v19208_v52  ;;  %v57578_v52 = vld [vmem:[#allocation33_spill] sm:$0xff] }
0x1d7b   :  { %47751 = vmatpush3.bf16.msra.mxu0 %v57558_v23  ;;  %41951 = vmatprep.mubr.f32.mxu0 %v54421_v15 }
0x1d7c   :  { %47799 = vmatpush3.bf16.msra.mxu1 %v57569_v41  ;;  %42017 = vmatprep.mubr.f32.mxu1 %v54421_v15 }
0x1d7d   :  { %47753 = vmatprep.subr.bf16.mxu0 %v57574_v8  ;;  %47801 = vmatprep.subr.bf16.mxu1 %v57575_v9 }
0x1d7f   :  { %47755 = vmatpush3.bf16.msra.mxu0 %v57574_v8 }
0x1d80   :  { %47803 = vmatpush3.bf16.msra.mxu1 %v57575_v9  ;;  %47757 = vmatprep.subr.bf16.mxu0 %v57576_v7 }
0x1d81   :  { %47805 = vmatprep.subr.bf16.mxu1 %v57577_v6 }
0x1d82   :  { %41952 = vmatmul.mubr.f32.vlgmr.msra.gmra.mrb[36].mxu0 %v54417_v10 }
0x1d83   :  { %42018 = vmatmul.mubr.f32.vlgmr.msra.gmra.mrb[42].mxu1 %v54417_v10  ;;  %47759 = vmatpush3.bf16.msra.mxu0 %v57576_v7 }
0x1d84   :  { %41962 = vmatprep.mubr.f32.mxu0 %v19195_v54  ;;  %47807 = vmatpush3.bf16.msra.mxu1 %v57577_v6 }
0x1d85   :  { %42028 = vmatprep.mubr.f32.mxu1 %v19195_v54  ;;  %47761 = vmatprep.subr.bf16.mxu0 %v57578_v52  ;;  %v57580_v54 = vld [vmem:[#allocation35_spill] sm:$0xff] }
0x1d86   :  { %47809 = vmatprep.subr.bf16.mxu1 %v57579_v28 }
0x1d87   :  { %47763 = vmatpush3.bf16.msra.mxu0 %v57578_v52 }
0x1d88   :  { %47811 = vmatpush3.bf16.msra.mxu1 %v57579_v28  ;;  %47765 = vmatprep.subr.bf16.mxu0 %v57556_v36 }
0x1d89   :  { %47813 = vmatprep.subr.bf16.mxu1 %v57567_v13 }
0x1d8a   :  { %41963 = vmatmul.mubr.f32.vlgmr.msra.gmra.mrb[36].mxu0 %v19205_v33 }
0x1d8b   :  { %42029 = vmatmul.mubr.f32.vlgmr.msra.gmra.mrb[42].mxu1 %v19205_v33  ;;  %47767 = vmatpush3.bf16.msra.mxu0 %v57556_v36  ;;  %v57582_v33 = vld [vmem:[#allocation36_spill] sm:$0xff] }
0x1d8c   :  { %41973 = vmatprep.mubr.f32.mxu0 %v19196_v34  ;;  %47815 = vmatpush3.bf16.msra.mxu1 %v57567_v13 }
0x1d8d   :  { %42039 = vmatprep.mubr.f32.mxu1 %v19196_v34  ;;  %47769 = vmatprep.subr.bf16.mxu0 %v57557_v31  ;;  %v57583_v34 = vld [vmem:[#allocation34_spill] sm:$0xff] }
0x1d8e   :  { %47817 = vmatprep.subr.bf16.mxu1 %v57568_v26 }
0x1d8f   :  { %47771 = vmatpush3.bf16.msra.mxu0 %v57557_v31 }
0x1d90   :  { %47819 = vmatpush3.bf16.msra.mxu1 %v57568_v26  ;;  %47773 = vmatprep.subr.bf16.mxu0 %v57580_v54 }
0x1d91   :  { %47821 = vmatprep.subr.bf16.mxu1 %v57581_v12 }
0x1d92   :  { %41974 = vmatmul.mubr.f32.vlgmr.msra.gmra.mrb[36].mxu0 %v19206_v19 }
0x1d93   :  { %42040 = vmatmul.mubr.f32.vlgmr.msra.gmra.mrb[42].mxu1 %v19206_v19  ;;  %47775 = vmatpush3.bf16.msra.mxu0 %v57580_v54 }
0x1d94   :  { %41984 = vmatprep.mubr.f32.mxu0 %v54421_v15  ;;  %47823 = vmatpush3.bf16.msra.mxu1 %v57581_v12 }
0x1d95   :  { %42050 = vmatprep.mubr.f32.mxu1 %v54421_v15  ;;  %47777 = vmatprep.subr.bf16.mxu0 %v57582_v33 }
0x1d96   :  { %47825 = vmatprep.subr.bf16.mxu1 %v57583_v34 }
0x1d97   :  { %47779 = vmatpush3.bf16.msra.mxu0 %v57582_v33 }
0x1d98   :  { %47827 = vmatpush3.bf16.msra.mxu1 %v57583_v34  ;;  %47781 = vmatprep.subr.bf16.mxu0 %v57556_v36 }
0x1d99   :  { %47829 = vmatprep.subr.bf16.mxu1 %v57567_v13 }
0x1d9a   :  { %41985 = vmatmul.mubr.f32.vlgmr.msra.gmra.mrb[36].mxu0 %v54417_v10 }
0x1d9b   :  { %42051 = vmatmul.mubr.f32.vlgmr.msra.gmra.mrb[42].mxu1 %v54417_v10  ;;  %47783 = vmatpush3.bf16.msra.mxu0 %v57556_v36 }
0x1d9c   :  { %41995 = vmatprep.mubr.f32.mxu0 %v54421_v15  ;;  %47831 = vmatpush3.bf16.msra.mxu1 %v57567_v13 }
0x1d9d   :  { %42061 = vmatprep.mubr.f32.mxu1 %v54421_v15  ;;  %47785 = vmatprep.subr.bf16.mxu0 %v57557_v31 }
0x1d9e   :  { %47833 = vmatprep.subr.bf16.mxu1 %v57568_v26 }
0x1d9f   :  { %47787 = vmatpush3.bf16.msra.mxu0 %v57557_v31 }
0x1da0   :  { %47835 = vmatpush3.bf16.msra.mxu1 %v57568_v26  ;;  %47837 = vmatprep.subr.bf16.mxu0 %v57432_v14 }
0x1da1   :  { %48029 = vmatprep.subr.bf16.mxu1 %v57479_v2 }
0x1da2   :  { %41996 = vmatmul.mubr.f32.vlgmr.msra.gmra.mrb[36].mxu0 %v54417_v10 }
0x1da3   :  { %42062 = vmatmul.mubr.f32.vlgmr.msra.gmra.mrb[42].mxu1 %v54417_v10  ;;  %47839 = vmatpush3.bf16.msra.mxu0 %v57432_v14 }
0x1da4   :  { %47841 = vmatprep.subr.bf16.mxu0 %v57433_v39  ;;  %48031 = vmatpush3.bf16.msra.mxu1 %v57479_v2 }
0x1da5   :  { %48033 = vmatprep.subr.bf16.mxu1 %v57480_v32 }
0x1da7   :  { %47843 = vmatpush3.bf16.msra.mxu0 %v57433_v39 }
0x1da8   :  { %47845 = vmatprep.subr.bf16.mxu0 %v57434_v63  ;;  %48035 = vmatpush3.bf16.msra.mxu1 %v57480_v32 }
0x1da9   :  { %48037 = vmatprep.subr.bf16.mxu1 %v57481_v49 }
0x1dab   :  { %47847 = vmatpush3.bf16.msra.mxu0 %v57434_v63 }
0x1dac   :  { %47849 = vmatprep.subr.bf16.mxu0 %v57435_v35  ;;  %48039 = vmatpush3.bf16.msra.mxu1 %v57481_v49 }
0x1dad   :  { %48041 = vmatprep.subr.bf16.mxu1 %v57482_v61 }
0x1daf   :  { %47851 = vmatpush3.bf16.msra.mxu0 %v57435_v35 }
0x1db0   :  { %47853 = vmatprep.subr.bf16.mxu0 %v57436_v4  ;;  %48043 = vmatpush3.bf16.msra.mxu1 %v57482_v61 }
0x1db1   :  { %48045 = vmatprep.subr.bf16.mxu1 %v57483_v11 }
0x1db3   :  { %47855 = vmatpush3.bf16.msra.mxu0 %v57436_v4 }
0x1db4   :  { %47857 = vmatprep.subr.bf16.mxu0 %v57437_v1  ;;  %48047 = vmatpush3.bf16.msra.mxu1 %v57483_v11 }
0x1db5   :  { %48049 = vmatprep.subr.bf16.mxu1 %v57484_v47 }
0x1db7   :  { %47859 = vmatpush3.bf16.msra.mxu0 %v57437_v1 }
0x1db8   :  { %47861 = vmatprep.subr.bf16.mxu0 %v57438_v17  ;;  %48051 = vmatpush3.bf16.msra.mxu1 %v57484_v47 }
0x1db9   :  { %48053 = vmatprep.subr.bf16.mxu1 %v57485_v29 }
0x1dbb   :  { %47863 = vmatpush3.bf16.msra.mxu0 %v57438_v17 }
0x1dbc   :  { %47865 = vmatprep.subr.bf16.mxu0 %v57439_v25  ;;  %48055 = vmatpush3.bf16.msra.mxu1 %v57485_v29 }
0x1dbd   :  { %48057 = vmatprep.subr.bf16.mxu1 %v57486_v56 }
0x1dbf   :  { %47867 = vmatpush3.bf16.msra.mxu0 %v57439_v25 }
0x1dc0   :  { %47869 = vmatprep.subr.bf16.mxu0 %v57440_v24  ;;  %48059 = vmatpush3.bf16.msra.mxu1 %v57486_v56 }
0x1dc1   :  { %48061 = vmatprep.subr.bf16.mxu1 %v57379_v51 }
0x1e75   :  { %v41997_v19 = vpop.f32.mrb[36].mxu0 }
0x1e76   :  { %v20182_v10 = vmul.f32 %v41997_v19, %v41997_v19  ;;  %v42063_v15 = vpop.f32.mrb[42].mxu1  ;;  %v19643_v45 = vpop.f32.mrb[37].mxu0 }
0x1e77   :  { %v20184_v40 = vmul.f32 %v42063_v15, %v42063_v15  ;;  %v20181_v57 = vmul.f32 %v19643_v45, %v19643_v45  ;;  %v20171_v37 = vpop.f32.mrb[43].mxu1 }
0x1e78   :  { %v20183_v55 = vmul.f32 %v20171_v37, %v20171_v37  ;;  %v57586_v37 = vld [vmem:[#allocation67_spill] sm:$0xff] }
0x1e79   :  { %v20186_v27 = vadd.f32 %v20184_v40, %v20182_v10  ;;  %v57588_v40 = vld [vmem:[#allocation69_spill] sm:$0xff] }
0x1e7a   :  { %v20185_v0 = vadd.f32 %v20183_v55, %v20181_v57  ;;  %v57585_v55 = vld [vmem:[#allocation66_spill] sm:$0xff]  ;;  %v57587_v57 = vld [vmem:[#allocation68_spill] sm:$0xff] }
0x1e7b   :  { %v54509_v20 = vand.u32 4294901760, %v20186_v27 }
0x1e7c   :  { %v54511_v34 = vand.u32 4294901760, %v20185_v0 }
0x1e7d   :  { %v54514_v12 = vsub.f32 %v20186_v27, %v54509_v20  ;;  %v57584_v27 = vld [vmem:[#allocation65_spill] sm:$0xff] }
0x1e7e   :  { %v20269_v28 = vsub.f32 %v20185_v0, %v54511_v34  ;;  %v57591_v0 = vld [vmem:[#allocation72_spill] sm:$0xff] }
0x1e7f   :  { %v20280_v6 = vand.u32 4294901760, %v54514_v12 }
0x1e80   :  { %v20270_v19 = vand.u32 4294901760, %v20269_v28 }
0x1e81   :  { %v20281_v9 = vsub.f32 %v54514_v12, %v20280_v6 }
0x1e82   :  { %v20271_v15 = vsub.f32 %v20269_v28, %v20270_v19 }
0x1e83   :  { %v20282_v41 = vand.u32 4294901760, %v20281_v9 }
0x1e84   :  { %v20272_v45 = vand.u32 4294901760, %v20271_v15 }
0x1e86   :  { %42096 = vmatprep.mubr.f32.mxu0 %v20272_v45 }
0x1e87   :  { %42097 = vmatmul.mubr.f32.vlgmr.msra.gmra.mrb[38].mxu0 %v20282_v41  ;;  %v57590_v41 = vld [vmem:[#allocation71_spill] sm:$0xff] }
0x1e88   :  { %47871 = vmatpush3.bf16.msra.mxu0 %v57440_v24  ;;  %42131 = vmatprep.mubr.f32.mxu0 %v54511_v34 }
0x1e89   :  { %47873 = vmatprep.subr.bf16.mxu0 %v57441_v50 }
0x1e8c   :  { %47875 = vmatpush3.bf16.msra.mxu0 %v57441_v50 }
0x1e8d   :  { %47877 = vmatprep.subr.bf16.mxu0 %v57442_v21 }
0x1e90   :  { %47879 = vmatpush3.bf16.msra.mxu0 %v57442_v21 }
0x1e91   :  { %47881 = vmatprep.subr.bf16.mxu0 %v57443_v22 }
0x1e94   :  { %47883 = vmatpush3.bf16.msra.mxu0 %v57443_v22 }
0x1e95   :  { %47885 = vmatprep.subr.bf16.mxu0 %v57444_v58 }
0x1e98   :  { %47887 = vmatpush3.bf16.msra.mxu0 %v57444_v58 }
0x1e99   :  { %47889 = vmatprep.subr.bf16.mxu0 %v57445_v5 }
0x1e9c   :  { %47891 = vmatpush3.bf16.msra.mxu0 %v57445_v5 }
0x1e9d   :  { %47893 = vmatprep.subr.bf16.mxu0 %v57446_v38 }
0x1ea0   :  { %47895 = vmatpush3.bf16.msra.mxu0 %v57446_v38 }
0x1ea1   :  { %47897 = vmatprep.subr.bf16.mxu0 %v57447_v59 }
0x1ea4   :  { %47899 = vmatpush3.bf16.msra.mxu0 %v57447_v59 }
0x1ea5   :  { %47901 = vmatprep.subr.bf16.mxu0 %v57448_v16 }
0x1ea7   :  { %42132 = vmatmul.mubr.f32.vlgmr.msra.gmra.mrb[38].mxu0 %v54509_v20 }
0x1ea8   :  { %47903 = vmatpush3.bf16.msra.mxu0 %v57448_v16  ;;  %42166 = vmatprep.mubr.f32.mxu0 %v20269_v28 }
0x1ea9   :  { %47905 = vmatprep.subr.bf16.mxu0 %v57449_v18 }
0x1eac   :  { %47907 = vmatpush3.bf16.msra.mxu0 %v57449_v18 }
0x1ead   :  { %47909 = vmatprep.subr.bf16.mxu0 %v57450_v62 }
0x1eb0   :  { %47911 = vmatpush3.bf16.msra.mxu0 %v57450_v62 }
0x1eb1   :  { %47913 = vmatprep.subr.bf16.mxu0 %v57451_v3 }
0x1eb4   :  { %47915 = vmatpush3.bf16.msra.mxu0 %v57451_v3 }
0x1eb5   :  { %47917 = vmatprep.subr.bf16.mxu0 %v57452_v44 }
0x1eb8   :  { %47919 = vmatpush3.bf16.msra.mxu0 %v57452_v44 }
0x1eb9   :  { %47921 = vmatprep.subr.bf16.mxu0 %v57453_v60 }
0x1ebc   :  { %47923 = vmatpush3.bf16.msra.mxu0 %v57453_v60 }
0x1ebd   :  { %47925 = vmatprep.subr.bf16.mxu0 %v57454_v30 }
0x1ec0   :  { %47927 = vmatpush3.bf16.msra.mxu0 %v57454_v30 }
0x1ec1   :  { %47929 = vmatprep.subr.bf16.mxu0 %v57455_v43 }
0x1ec4   :  { %47931 = vmatpush3.bf16.msra.mxu0 %v57455_v43 }
0x1ec5   :  { %47933 = vmatprep.subr.bf16.mxu0 %v57432_v14 }
0x1ec7   :  { %42167 = vmatmul.mubr.f32.vlgmr.msra.gmra.mrb[38].mxu0 %v54514_v12  ;;  %v57589_v12 = vld [vmem:[#allocation70_spill] sm:$0xff] }
0x1ec8   :  { %47935 = vmatpush3.bf16.msra.mxu0 %v57432_v14  ;;  %42201 = vmatprep.mubr.f32.mxu0 %v20270_v19 }
0x1ec9   :  { %47937 = vmatprep.subr.bf16.mxu0 %v57433_v39 }
0x1ecc   :  { %47939 = vmatpush3.bf16.msra.mxu0 %v57433_v39 }
0x1ecd   :  { %47941 = vmatprep.subr.bf16.mxu0 %v57434_v63 }
0x1ed0   :  { %47943 = vmatpush3.bf16.msra.mxu0 %v57434_v63 }
0x1ed1   :  { %47945 = vmatprep.subr.bf16.mxu0 %v57435_v35 }
0x1ed4   :  { %47947 = vmatpush3.bf16.msra.mxu0 %v57435_v35 }
0x1ed5   :  { %47949 = vmatprep.subr.bf16.mxu0 %v57436_v4 }
0x1ed8   :  { %47951 = vmatpush3.bf16.msra.mxu0 %v57436_v4 }
0x1ed9   :  { %47953 = vmatprep.subr.bf16.mxu0 %v57437_v1 }
0x1edc   :  { %47955 = vmatpush3.bf16.msra.mxu0 %v57437_v1 }
0x1edd   :  { %47957 = vmatprep.subr.bf16.mxu0 %v57438_v17 }
0x1ee0   :  { %47959 = vmatpush3.bf16.msra.mxu0 %v57438_v17 }
0x1ee1   :  { %47961 = vmatprep.subr.bf16.mxu0 %v57439_v25 }
0x1ee4   :  { %47963 = vmatpush3.bf16.msra.mxu0 %v57439_v25 }
0x1ee5   :  { %47965 = vmatprep.subr.bf16.mxu0 %v57584_v27 }
0x1ee7   :  { %42202 = vmatmul.mubr.f32.vlgmr.msra.gmra.mrb[38].mxu0 %v20280_v6 }
0x1ee8   :  { %47967 = vmatpush3.bf16.msra.mxu0 %v57584_v27  ;;  %42236 = vmatprep.mubr.f32.mxu0 %v54511_v34 }
0x1ee9   :  { %47969 = vmatprep.subr.bf16.mxu0 %v57585_v55 }
0x1eec   :  { %47971 = vmatpush3.bf16.msra.mxu0 %v57585_v55 }
0x1eed   :  { %47973 = vmatprep.subr.bf16.mxu0 %v57586_v37 }
0x1ef0   :  { %47975 = vmatpush3.bf16.msra.mxu0 %v57586_v37 }
0x1ef1   :  { %47977 = vmatprep.subr.bf16.mxu0 %v57587_v57 }
0x1ef4   :  { %47979 = vmatpush3.bf16.msra.mxu0 %v57587_v57 }
0x1ef5   :  { %47981 = vmatprep.subr.bf16.mxu0 %v57588_v40 }
0x1ef8   :  { %47983 = vmatpush3.bf16.msra.mxu0 %v57588_v40  ;;  %v57594_v40 = vld [vmem:[#allocation84_spill] sm:$0xff] }
0x1ef9   :  { %47985 = vmatprep.subr.bf16.mxu0 %v57589_v12 }
0x1efc   :  { %47987 = vmatpush3.bf16.msra.mxu0 %v57589_v12 }
0x1efd   :  { %47989 = vmatprep.subr.bf16.mxu0 %v57590_v41 }
0x1f00   :  { %47991 = vmatpush3.bf16.msra.mxu0 %v57590_v41 }
0x1f01   :  { %47993 = vmatprep.subr.bf16.mxu0 %v57591_v0 }
0x1f04   :  { %47995 = vmatpush3.bf16.msra.mxu0 %v57591_v0 }
0x1f05   :  { %47997 = vmatprep.subr.bf16.mxu0 %v57432_v14 }
0x1f07   :  { %42237 = vmatmul.mubr.f32.vlgmr.msra.gmra.mrb[38].mxu0 %v54509_v20 }
0x1f08   :  { %47999 = vmatpush3.bf16.msra.mxu0 %v57432_v14  ;;  %42271 = vmatprep.mubr.f32.mxu0 %v54511_v34 }
0x1f09   :  { %48001 = vmatprep.subr.bf16.mxu0 %v57433_v39 }
0x1f0c   :  { %48003 = vmatpush3.bf16.msra.mxu0 %v57433_v39 }
0x1f0d   :  { %48005 = vmatprep.subr.bf16.mxu0 %v57434_v63 }
0x1f10   :  { %48007 = vmatpush3.bf16.msra.mxu0 %v57434_v63 }
0x1f11   :  { %48009 = vmatprep.subr.bf16.mxu0 %v57435_v35 }
0x1f14   :  { %48011 = vmatpush3.bf16.msra.mxu0 %v57435_v35 }
0x1f15   :  { %48013 = vmatprep.subr.bf16.mxu0 %v57436_v4 }
0x1f18   :  { %48015 = vmatpush3.bf16.msra.mxu0 %v57436_v4 }
0x1f19   :  { %48017 = vmatprep.subr.bf16.mxu0 %v57437_v1 }
0x1f1c   :  { %48019 = vmatpush3.bf16.msra.mxu0 %v57437_v1 }
0x1f1d   :  { %48021 = vmatprep.subr.bf16.mxu0 %v57438_v17 }
0x1f20   :  { %48023 = vmatpush3.bf16.msra.mxu0 %v57438_v17 }
0x1f21   :  { %48025 = vmatprep.subr.bf16.mxu0 %v57439_v25 }
0x1f24   :  { %48027 = vmatpush3.bf16.msra.mxu0 %v57439_v25 }
0x1f27   :  { %42272 = vmatmul.mubr.f32.vlgmr.msra.gmra.mrb[38].mxu0 %v54509_v20 }
0x1ffa   :  { %v42273_v9 = vpop.f32.mrb[38].mxu0 }
0x1ffb   :  { %v20861_v6 = vpop.f32.mrb[39].mxu0 }
0x1ffc   :  { %20871 = vmax.xlane.f32.xlu1 %v20861_v6 }
0x2000   :  { %20873 = vmax.xlane.f32.xlu1 %v42273_v9 }
0x2033   :  { %21569 = vxpose.xlu1.b32.start [1/2] (short) (narrow) %v54413_v48, 32 }
0x2037   :  { %21570 = vxpose.xlu1.b32.end [2/2] (short) (narrow) %v54407_v53, 32 }
0x2089   :  { %v20872_v28 = vpop.xlane.xlu1 %20871 }
0x208a   :  { %v20875_v34 = vsub.f32 %v20861_v6, %v20872_v28 }
0x208c   :  { %v20877_v10 = vmul.f32 1.442695, %v20875_v34 }
0x208d   :  { %v20874_v19 = vpop.xlane.xlu1 %20873 }
0x208e   :  { %51080 = vpow2.f32 %v20877_v10  ;;  %v20876_v15 = vsub.f32 %v42273_v9, %v20874_v19 }
0x2090   :  { %v20879_v45 = vmul.f32 1.442695, %v20876_v15  ;;  %v57592_v15 = vld [vmem:[#allocation82_spill] sm:$0xff] }
0x2092   :  { %51082 = vpow2.f32 %v20879_v45  ;;  %v57593_v45 = vld [vmem:[#allocation83_spill] sm:$0xff] }
0x2098   :  { %v54607_v0 = vpop.eup %51080 }
0x2099   :  { %v54610_v20 = vand.u32 4294901760, %v54607_v0 }
0x209b   :  { %v20963_v41 = vsub.f32 %v54607_v0, %v54610_v20 }
0x209c   :  { %v54614_v12 = vpop.eup %51082 }
0x209d   :  { %v20964_v48 = vand.u32 4294901760, %v20963_v41  ;;  %v54617_v53 = vand.u32 4294901760, %v54614_v12 }
0x209f   :  { %v20965_v6 = vsub.f32 %v20963_v41, %v20964_v48  ;;  %v20973_v9 = vsub.f32 %v54614_v12, %v54617_v53 }
0x20a1   :  { %v20966_v28 = vand.u32 4294901760, %v20965_v6  ;;  %v20974_v34 = vand.u32 4294901760, %v20973_v9  ;;  %v57595_v6 = vld [vmem:[#allocation85_spill] sm:$0xff] }
0x20a3   :  { %42306 = vmatprep.mubr.f32.mxu1 %v20966_v28  ;;  %v20975_v10 = vsub.f32 %v20973_v9, %v20974_v34  ;;  %v57596_v28 = vld [vmem:[#allocation86_spill] sm:$0xff] }
0x20a5   :  { %v20976_v19 = vand.u32 4294901760, %v20975_v10  ;;  %v57597_v10 = vld [vmem:[#allocation87_spill] sm:$0xff] }
0x20a7   :  { %42307 = vmatmul.mubr.f32.vlgmr.msra.gmra.mrb[44].mxu1 %v20976_v19  ;;  %v57598_v19 = vld [vmem:[#allocation88_spill] sm:$0xff] }
0x20a8   :  { %48063 = vmatpush3.bf16.msra.mxu1 %v57379_v51  ;;  %42341 = vmatprep.mubr.f32.mxu1 %v54610_v20 }
0x20a9   :  { %48065 = vmatprep.subr.bf16.mxu1 %v57592_v15 }
0x20ac   :  { %48067 = vmatpush3.bf16.msra.mxu1 %v57592_v15 }
0x20ad   :  { %48069 = vmatprep.subr.bf16.mxu1 %v57593_v45 }
0x20b0   :  { %48071 = vmatpush3.bf16.msra.mxu1 %v57593_v45  ;;  %v57599_v45 = vld [vmem:[#allocation89_spill] sm:$0xff] }
0x20b1   :  { %48073 = vmatprep.subr.bf16.mxu1 %v57594_v40 }
0x20b4   :  { %48075 = vmatpush3.bf16.msra.mxu1 %v57594_v40  ;;  %v57604_v40 = vld [vmem:[#allocation94_spill] sm:$0xff] }
0x20b5   :  { %48077 = vmatprep.subr.bf16.mxu1 %v57595_v6 }
0x20b8   :  { %48079 = vmatpush3.bf16.msra.mxu1 %v57595_v6  ;;  %v57600_v6 = vld [vmem:[#allocation90_spill] sm:$0xff] }
0x20b9   :  { %48081 = vmatprep.subr.bf16.mxu1 %v57596_v28 }
0x20bc   :  { %48083 = vmatpush3.bf16.msra.mxu1 %v57596_v28  ;;  %v57601_v28 = vld [vmem:[#allocation91_spill] sm:$0xff] }
0x20bd   :  { %48085 = vmatprep.subr.bf16.mxu1 %v57597_v10 }
0x20c0   :  { %48087 = vmatpush3.bf16.msra.mxu1 %v57597_v10  ;;  %v57602_v10 = vld [vmem:[#allocation92_spill] sm:$0xff] }
0x20c1   :  { %48089 = vmatprep.subr.bf16.mxu1 %v57598_v19 }
0x20c4   :  { %48091 = vmatpush3.bf16.msra.mxu1 %v57598_v19  ;;  %v57603_v19 = vld [vmem:[#allocation93_spill] sm:$0xff] }
0x20c5   :  { %48093 = vmatprep.subr.bf16.mxu1 %v57599_v45 }
0x20c7   :  { %42342 = vmatmul.mubr.f32.vlgmr.msra.gmra.mrb[44].mxu1 %v54617_v53 }
0x20c8   :  { %48095 = vmatpush3.bf16.msra.mxu1 %v57599_v45  ;;  %42376 = vmatprep.mubr.f32.mxu1 %v20963_v41  ;;  %v57605_v41 = vld [vmem:[#allocation95_spill] sm:$0xff] }
0x20c9   :  { %48097 = vmatprep.subr.bf16.mxu1 %v57600_v6 }
0x20cc   :  { %48099 = vmatpush3.bf16.msra.mxu1 %v57600_v6  ;;  %v57606_v6 = vld [vmem:[#allocation96_spill] sm:$0xff] }
0x20cd   :  { %48101 = vmatprep.subr.bf16.mxu1 %v57601_v28 }
0x20d0   :  { %48103 = vmatpush3.bf16.msra.mxu1 %v57601_v28 }
0x20d1   :  { %48105 = vmatprep.subr.bf16.mxu1 %v57602_v10 }
0x20d4   :  { %48107 = vmatpush3.bf16.msra.mxu1 %v57602_v10 }
0x20d5   :  { %48109 = vmatprep.subr.bf16.mxu1 %v57603_v19 }
0x20d8   :  { %48111 = vmatpush3.bf16.msra.mxu1 %v57603_v19 }
0x20d9   :  { %48113 = vmatprep.subr.bf16.mxu1 %v57604_v40 }
0x20dc   :  { %48115 = vmatpush3.bf16.msra.mxu1 %v57604_v40  ;;  %v57611_v40 = vld [vmem:[#allocation101_spill] sm:$0xff] }
0x20dd   :  { %48117 = vmatprep.subr.bf16.mxu1 %v57605_v41 }
0x20e0   :  { %48119 = vmatpush3.bf16.msra.mxu1 %v57605_v41  ;;  %v57610_v41 = vld [vmem:[#allocation100_spill] sm:$0xff] }
0x20e1   :  { %48121 = vmatprep.subr.bf16.mxu1 %v57606_v6 }
0x20e4   :  { %48123 = vmatpush3.bf16.msra.mxu1 %v57606_v6  ;;  %v57609_v6 = vld [vmem:[#allocation99_spill] sm:$0xff] }
0x20e5   :  { %48125 = vmatprep.subr.bf16.mxu1 %v57479_v2 }
0x20e7   :  { %42377 = vmatmul.mubr.f32.vlgmr.msra.gmra.mrb[44].mxu1 %v20973_v9  ;;  %v57608_v9 = vld [vmem:[#allocation98_spill] sm:$0xff] }
0x20e8   :  { %48127 = vmatpush3.bf16.msra.mxu1 %v57479_v2  ;;  %42411 = vmatprep.mubr.f32.mxu1 %v20964_v48  ;;  %v57607_v48 = vld [vmem:[#allocation97_spill] sm:$0xff] }
0x20e9   :  { %48129 = vmatprep.subr.bf16.mxu1 %v57480_v32 }
0x20ec   :  { %48131 = vmatpush3.bf16.msra.mxu1 %v57480_v32 }
0x20ed   :  { %48133 = vmatprep.subr.bf16.mxu1 %v57481_v49 }
0x20f0   :  { %48135 = vmatpush3.bf16.msra.mxu1 %v57481_v49 }
0x20f1   :  { %48137 = vmatprep.subr.bf16.mxu1 %v57482_v61 }
0x20f4   :  { %48139 = vmatpush3.bf16.msra.mxu1 %v57482_v61 }
0x20f5   :  { %48141 = vmatprep.subr.bf16.mxu1 %v57483_v11 }
0x20f8   :  { %48143 = vmatpush3.bf16.msra.mxu1 %v57483_v11 }
0x20f9   :  { %48145 = vmatprep.subr.bf16.mxu1 %v57484_v47 }
0x20fc   :  { %48147 = vmatpush3.bf16.msra.mxu1 %v57484_v47 }
0x20fd   :  { %48149 = vmatprep.subr.bf16.mxu1 %v57485_v29 }
0x2100   :  { %48151 = vmatpush3.bf16.msra.mxu1 %v57485_v29 }
0x2101   :  { %48153 = vmatprep.subr.bf16.mxu1 %v57486_v56 }
0x2104   :  { %48155 = vmatpush3.bf16.msra.mxu1 %v57486_v56 }
0x2105   :  { %48157 = vmatprep.subr.bf16.mxu1 %v57607_v48 }
0x2107   :  { %42412 = vmatmul.mubr.f32.vlgmr.msra.gmra.mrb[44].mxu1 %v20974_v34  ;;  %v57612_v34 = vld [vmem:[#allocation102_spill] sm:$0xff] }
0x2108   :  { %48159 = vmatpush3.bf16.msra.mxu1 %v57607_v48  ;;  %42446 = vmatprep.mubr.f32.mxu1 %v54610_v20  ;;  %v57613_v48 = vld [vmem:[#allocation103_spill] sm:$0xff] }
0x2109   :  { %48161 = vmatprep.subr.bf16.mxu1 %v57608_v9 }
0x210c   :  { %48163 = vmatpush3.bf16.msra.mxu1 %v57608_v9  ;;  %v57614_v9 = vld [vmem:[#allocation104_spill] sm:$0xff] }
0x210d   :  { %48165 = vmatprep.subr.bf16.mxu1 %v57609_v6 }
0x2110   :  { %48167 = vmatpush3.bf16.msra.mxu1 %v57609_v6  ;;  %v21585_v6 = vpop.trf.xlu1 }
0x2111   :  { %48169 = vmatprep.subr.bf16.mxu1 %v57610_v41  ;;  %v21602_v19 = vsel %vm1149_vm2, %v21585_v6, 0 }
0x2112   :  { %v54724_v10 = vand.u32 4294901760, %v21602_v19 }
0x2114   :  { %48171 = vmatpush3.bf16.msra.mxu1 %v57610_v41  ;;  %v57621_v41 = vld [vmem:[#allocation113_spill] sm:$0xff]  ;;  %v54727_v28 = vsub.f32 %v21602_v19, %v54724_v10  ;;  %v21586_v37 = vpop.trf.xlu1 }
0x2115   :  { %48173 = vmatprep.subr.bf16.mxu1 %v57611_v40  ;;  %v21605_v6 = vsel %vm1149_vm2, %v21586_v37, 0 }
0x2116   :  { %v56927_v45 = vand.u32 4294901760, %v54727_v28  ;;  %v54735_v60 = vand.u32 4294901760, %v21605_v6 }
0x2118   :  { %48175 = vmatpush3.bf16.msra.mxu1 %v57611_v40  ;;  %v57620_v40 = vld [vmem:[#allocation112_spill] sm:$0xff]  ;;  %v21683_v15 = vsub.f32 %v54727_v28, %v56927_v45  ;;  %v21587_v55 = vpop.trf.xlu1 }
0x2119   :  { %48177 = vmatprep.subr.bf16.mxu1 %v57612_v34  ;;  %v21608_v30 = vsel %vm1149_vm2, %v21587_v55, 0 }
0x211a   :  { %v21684_v57 = vand.u32 4294901760, %v21683_v15  ;;  %v54737_v44 = vand.u32 4294901760, %v21608_v30  ;;  %v21691_v15 = vsub.f32 %v21605_v6, %v54735_v60 }
0x211c   :  { %48179 = vmatpush3.bf16.msra.mxu1 %v57612_v34  ;;  %v57618_v34 = vld [vmem:[#allocation110_spill] sm:$0xff]  ;;  %42488 = vmatprep.mubr.f32.mxu0 %v21684_v57  ;;  %v21588_v19 = vpop.trf.xlu1  ;;  %v21701_v45 = vsub.f32 %v21608_v30, %v54737_v44  ;;  %v21692_v55 = vand.u32 4294901760, %v21691_v15 }
0x211d   :  { %48181 = vmatprep.subr.bf16.mxu1 %v57613_v48  ;;  %v21611_v3 = vsel %vm1149_vm2, %v21588_v19, 0 }
0x211e   :  { %v54741_v57 = vand.u32 4294901760, %v21611_v3  ;;  %v21702_v59 = vand.u32 4294901760, %v21701_v45  ;;  %v21693_v58 = vsub.f32 %v21691_v15, %v21692_v55 }
0x2120   :  { %48183 = vmatpush3.bf16.msra.mxu1 %v57613_v48  ;;  %v57617_v48 = vld [vmem:[#allocation109_spill] sm:$0xff]  ;;  %v21711_v18 = vsub.f32 %v21611_v3, %v54741_v57  ;;  %v21703_v21 = vsub.f32 %v21701_v45, %v21702_v59 }
0x2121   :  { %48185 = vmatprep.subr.bf16.mxu1 %v57614_v9 }
0x2122   :  { %v21712_v6 = vand.u32 4294901760, %v21711_v18  ;;  %v21704_v3 = vand.u32 4294901760, %v21703_v21 }
0x2124   :  { %48187 = vmatpush3.bf16.msra.mxu1 %v57614_v9  ;;  %v57616_v9 = vld [vmem:[#allocation108_spill] sm:$0xff] }
0x2125   :  { %48189 = vmatprep.subr.bf16.mxu1 %v57479_v2 }
0x2127   :  { %42447 = vmatmul.mubr.f32.vlgmr.msra.gmra.mrb[44].mxu1 %v54617_v53 }
0x2128   :  { %48191 = vmatpush3.bf16.msra.mxu1 %v57479_v2  ;;  %42481 = vmatprep.mubr.f32.mxu1 %v54610_v20  ;;  %v57615_v20 = vld [vmem:[#allocation107_spill] sm:$0xff] }
0x2129   :  { %48193 = vmatprep.subr.bf16.mxu1 %v57480_v32 }
0x212c   :  { %48195 = vmatpush3.bf16.msra.mxu1 %v57480_v32 }
0x212d   :  { %48197 = vmatprep.subr.bf16.mxu1 %v57481_v49 }
0x2130   :  { %48199 = vmatpush3.bf16.msra.mxu1 %v57481_v49 }
0x2131   :  { %48201 = vmatprep.subr.bf16.mxu1 %v57482_v61 }
0x2134   :  { %48203 = vmatpush3.bf16.msra.mxu1 %v57482_v61 }
0x2135   :  { %48205 = vmatprep.subr.bf16.mxu1 %v57483_v11 }
0x2138   :  { %48207 = vmatpush3.bf16.msra.mxu1 %v57483_v11 }
0x2139   :  { %48209 = vmatprep.subr.bf16.mxu1 %v57484_v47 }
0x213c   :  { %48211 = vmatpush3.bf16.msra.mxu1 %v57484_v47 }
0x213d   :  { %48213 = vmatprep.subr.bf16.mxu1 %v57485_v29 }
0x2140   :  { %48215 = vmatpush3.bf16.msra.mxu1 %v57485_v29 }
0x2141   :  { %48217 = vmatprep.subr.bf16.mxu1 %v57486_v56 }
0x2144   :  { %48219 = vmatpush3.bf16.msra.mxu1 %v57486_v56 }
0x2145   :  { %48245 = vmatprep.subr.bf16.mxu1 %v57496_v42 }
0x2147   :  { %42482 = vmatmul.mubr.f32.vlgmr.msra.gmra.mrb[44].mxu1 %v54617_v53  ;;  %v57619_v53 = vld [vmem:[#allocation111_spill] sm:$0xff] }
0x2148   :  { %48247 = vmatpush3.bf16.msra.mxu1 %v57496_v42 }
0x2149   :  { %48249 = vmatprep.subr.bf16.mxu1 %v57497_v46 }
0x214c   :  { %48251 = vmatpush3.bf16.msra.mxu1 %v57497_v46 }
0x214d   :  { %48253 = vmatprep.subr.bf16.mxu1 %v57615_v20 }
0x2150   :  { %48255 = vmatpush3.bf16.msra.mxu1 %v57615_v20 }
0x2151   :  { %48257 = vmatprep.subr.bf16.mxu1 %v57616_v9 }
0x2154   :  { %48259 = vmatpush3.bf16.msra.mxu1 %v57616_v9 }
0x2155   :  { %48261 = vmatprep.subr.bf16.mxu1 %v57617_v48 }
0x2158   :  { %48263 = vmatpush3.bf16.msra.mxu1 %v57617_v48 }
0x2159   :  { %48265 = vmatprep.subr.bf16.mxu1 %v57618_v34 }
0x215c   :  { %48267 = vmatpush3.bf16.msra.mxu1 %v57618_v34 }
0x215d   :  { %48269 = vmatprep.subr.bf16.mxu1 %v57619_v53 }
0x2160   :  { %48271 = vmatpush3.bf16.msra.mxu1 %v57619_v53 }
0x2161   :  { %48273 = vmatprep.subr.bf16.mxu1 %v57620_v40 }
0x2164   :  { %48275 = vmatpush3.bf16.msra.mxu1 %v57620_v40 }
0x2165   :  { %48277 = vmatprep.subr.bf16.mxu1 %v57621_v41 }
0x221a   :  { %v42483_v27 = vpop.f32.mrb[44].mxu1 }
0x221b   :  { %51084 = vrcp.f32 %v42483_v27  ;;  %v21555_v43 = vpop.f32.mrb[45].mxu1 }
0x221c   :  { %51086 = vrcp.f32 %v21555_v43 }
0x2225   :  { %v51085_v27 = vpop.eup %51084 }
0x2226   :  { %v51087_v62 = vpop.eup %51086  ;;  %v21568_v43 = vmul.f32 %v51085_v27, %v54614_v12  ;;  %v21694_v27 = vand.u32 4294901760, %v21693_v58 }
0x2227   :  { %v21566_v37 = vmul.f32 %v51087_v62, %v54607_v0  ;;  %v21713_v62 = vsub.f32 %v21711_v18, %v21712_v6 }
0x2228   :  { %v21617_v16 = vand.u32 4294901760, %v21568_v43 }
0x2229   :  { %v21614_v38 = vand.u32 4294901760, %v21566_v37 }
0x222a   :  { %v21729_v5 = vsub.f32 %v21568_v43, %v21617_v16 }
0x222b   :  { %v48220_v19 = vpack.c.bf16 %v21617_v16, %v21614_v38  ;;  %v21722_v22 = vsub.f32 %v21566_v37, %v21614_v38  ;;  %v21714_v16 = vand.u32 4294901760, %v21713_v62 }
0x222c   :  { %v21730_v50 = vand.u32 4294901760, %v21729_v5 }
0x222d   :  { %48221 = vmatprep.subr.bf16.mxu0 %v48220_v19  ;;  %v21723_v30 = vand.u32 4294901760, %v21722_v22  ;;  %v48228_v24 = vpack.c.bf16 %v21729_v5, %v21722_v22 }
0x222e   :  { %48223 = vmatpush3.bf16.msra.mxu0 %v48220_v19  ;;  %v21731_v12 = vsub.f32 %v21729_v5, %v21730_v50 }
0x222f   :  { %v21724_v0 = vsub.f32 %v21722_v22, %v21723_v30  ;;  %v48236_v25 = vpack.c.bf16 %v21730_v50, %v21723_v30  ;;  %v51114_v22 = vld [vmem:[#allocation2 + $0x1c0] sm:$0xff] }
0x2230   :  { %v21732_v17 = vand.u32 4294901760, %v21731_v12 }
0x2231   :  { %42489 = vmatmul.mubr.f32.vlgmr.msra.gmra.mrb[40].mxu0 %v21694_v27  ;;  %v21725_v1 = vand.u32 4294901760, %v21724_v0 }
0x2232   :  { %42491 = vmatprep.mubr.f32.mxu0 %v21704_v3 }
0x2233   :  { %v48224_v43 = vpack.c.bf16 %v21732_v17, %v21725_v1  ;;  %v57622_v1 = vand.u32 4294901760, %v54727_v28  ;;  %v57623_v17 = vld [vmem:[#allocation140_spill] sm:$0xff] }
0x2235   :  { %42492 = vmatmul.mubr.f32.gmra.mrb[42].mxu0 %v21714_v16  ;;  %48225 = vmatprep.subr.bf16.mxu0 %v48224_v43 }
0x2236   :  { %48227 = vmatpush3.bf16.msra.mxu0 %v48224_v43  ;;  %42498 = vmatprep.mubr.f32.mxu0 %v54724_v10 }
0x2237   :  { %48229 = vmatprep.subr.bf16.mxu0 %v48228_v24 }
0x2239   :  { %42499 = vmatmul.mubr.f32.vlgmr.msra.gmra.mrb[40].mxu0 %v54735_v60 }
0x223a   :  { %42501 = vmatprep.mubr.f32.mxu0 %v54737_v44  ;;  %48231 = vmatpush3.bf16.msra.mxu0 %v48228_v24  ;;  %v51113_v24 = vld [vmem:[#allocation2 + $0x1c8] sm:$0xff] }
0x223b   :  { %48233 = vmatprep.subr.bf16.mxu0 %v48220_v19 }
0x223d   :  { %42502 = vmatmul.mubr.f32.gmra.mrb[42].mxu0 %v54741_v57 }
0x223e   :  { %42508 = vmatprep.mubr.f32.mxu0 %v54727_v28 }
0x2241   :  { %42509 = vmatmul.mubr.f32.vlgmr.msra.gmra.mrb[40].mxu0 %v21691_v15 }
0x2242   :  { %48235 = vmatpush3.bf16.msra.mxu0 %v48220_v19  ;;  %42511 = vmatprep.mubr.f32.mxu0 %v21701_v45 }
0x2243   :  { %48237 = vmatprep.subr.bf16.mxu0 %v48236_v25 }
0x2245   :  { %42512 = vmatmul.mubr.f32.gmra.mrb[42].mxu0 %v21711_v18 }
0x2246   :  { %42518 = vmatprep.mubr.f32.mxu0 %v57622_v1 }
0x2249   :  { %42519 = vmatmul.mubr.f32.vlgmr.msra.gmra.mrb[40].mxu0 %v21692_v55 }
0x224a   :  { %48239 = vmatpush3.bf16.msra.mxu0 %v48236_v25  ;;  %42521 = vmatprep.mubr.f32.mxu0 %v21702_v59 }
0x224b   :  { %48241 = vmatprep.subr.bf16.mxu0 %v48220_v19 }
0x224d   :  { %42522 = vmatmul.mubr.f32.gmra.mrb[42].mxu0 %v21712_v6 }
0x224e   :  { %42528 = vmatprep.mubr.f32.mxu0 %v54724_v10 }
0x2251   :  { %42529 = vmatmul.mubr.f32.vlgmr.msra.gmra.mrb[40].mxu0 %v54735_v60 }
0x2252   :  { %48243 = vmatpush3.bf16.msra.mxu0 %v48220_v19  ;;  %42531 = vmatprep.mubr.f32.mxu0 %v54737_v44 }
0x2255   :  { %42532 = vmatmul.mubr.f32.gmra.mrb[42].mxu0 %v54741_v57 }
0x2256   :  { %42538 = vmatprep.mubr.f32.mxu0 %v54724_v10  ;;  %v51116_v10 = vld [vmem:[#allocation2 + $0x1d0] sm:$0xff] }
0x2259   :  { %42539 = vmatmul.mubr.f32.vlgmr.msra.gmra.mrb[40].mxu0 %v54735_v60  ;;  %v51115_v60 = vld [vmem:[#allocation2 + $0x1d8] sm:$0xff] }
0x225a   :  { %42541 = vmatprep.mubr.f32.mxu0 %v54737_v44 }
0x225d   :  { %42542 = vmatmul.mubr.f32.gmra.mrb[42].mxu0 %v54741_v57 }
0x225e   :  { %42780 = vmatprep.mubr.f32.mxu0 %v57623_v17 }
0x232c   :  { %v42540_v25 = vpop.f32.mrb[40].mxu0 }
0x232d   :  { %v22202_v50 = vmul.f32 %v51113_v24, %v42540_v25  ;;  %v22179_v21 = vpop.f32.mrb[41].mxu0  ;;  %v57624_v24 = vld [vmem:[#allocation121_spill] sm:$0xff] }
0x232e   :  { %v22201_v58 = vmul.f32 %v51114_v22, %v22179_v21  ;;  %v57625_v21 = vld [vmem:[#allocation122_spill] sm:$0xff]  ;;  %v57626_v22 = vld [vmem:[#allocation123_spill] sm:$0xff] }
0x232f   :  { %v54763_v5 = vand.u32 4294901760, %v22202_v50 }
0x2330   :  { %v54765_v38 = vand.u32 4294901760, %v22201_v58  ;;  %v42543_v59 = vpop.f32.mrb[42].mxu0 }
0x2331   :  { %v54768_v18 = vsub.f32 %v22202_v50, %v54763_v5  ;;  %v22204_v44 = vmul.f32 %v51115_v60, %v42543_v59  ;;  %v22191_v45 = vpop.f32.mrb[43].mxu0  ;;  %v57628_v59 = vld [vmem:[#allocation114_spill] sm:$0xff]  ;;  %v57629_v60 = vld [vmem:[#allocation115_spill] sm:$0xff] }
0x2332   :  { %v54771_v28 = vsub.f32 %v22201_v58, %v54765_v38  ;;  %v22203_v15 = vmul.f32 %v51116_v10, %v22191_v45  ;;  %v57627_v58 = vld [vmem:[#allocation124_spill] sm:$0xff]  ;;  %v57631_v45 = vld [vmem:[#allocation117_spill] sm:$0xff] }
0x2333   :  { %v22298_v57 = vand.u32 4294901760, %v54768_v18  ;;  %v54774_v37 = vand.u32 4294901760, %v22204_v44  ;;  %v57632_v10 = vld [vmem:[#allocation125_spill] sm:$0xff] }
0x2334   :  { %v54776_v55 = vand.u32 4294901760, %v22203_v15  ;;  %v22288_v19 = vand.u32 4294901760, %v54771_v28 }
0x2335   :  { %v22299_v6 = vsub.f32 %v54768_v18, %v22298_v57  ;;  %v54783_v30 = vsub.f32 %v22204_v44, %v54774_v37  ;;  %v57630_v44 = vld [vmem:[#allocation116_spill] sm:$0xff] }
0x2336   :  { %v54786_v12 = vsub.f32 %v22203_v15, %v54776_v55  ;;  %v22289_v27 = vsub.f32 %v54771_v28, %v22288_v19  ;;  %v57633_v15 = vld [vmem:[#allocation126_spill] sm:$0xff] }
0x2337   :  { %v22318_v62 = vand.u32 4294901760, %v54783_v30  ;;  %v22300_v16 = vand.u32 4294901760, %v22299_v6  ;;  %v57634_v6 = vld [vmem:[#allocation127_spill] sm:$0xff] }
0x2338   :  { %v22290_v0 = vand.u32 4294901760, %v22289_v27  ;;  %v22308_v3 = vand.u32 4294901760, %v54786_v12  ;;  %v57635_v27 = vld [vmem:[#allocation128_spill] sm:$0xff] }
0x2339   :  { %v22319_v43 = vsub.f32 %v54783_v30, %v22318_v62 }
0x233a   :  { %42576 = vmatprep.mubr.f32.mxu1 %v22290_v0  ;;  %v22309_v1 = vsub.f32 %v54786_v12, %v22308_v3  ;;  %v57636_v0 = vld [vmem:[#allocation118_spill] sm:$0xff] }
0x233b   :  { %42577 = vmatmul.mubr.f32.vlgmr.msra.gmra.mrb[46].mxu1 %v22300_v16  ;;  %v22320_v50 = vand.u32 4294901760, %v22319_v43  ;;  %v57637_v16 = vld [vmem:[#allocation119_spill] sm:$0xff]  ;;  %v57640_v43 = vld [vmem:[#allocation130_spill] sm:$0xff] }
0x233c   :  { %48279 = vmatpush3.bf16.msra.mxu1 %v57621_v41  ;;  %v22310_v25 = vand.u32 4294901760, %v22309_v1  ;;  %v57641_v1 = vld [vmem:[#allocation131_spill] sm:$0xff] }
0x233d   :  { %48281 = vmatprep.subr.bf16.mxu1 %v57624_v24 }
0x233e   :  { %42579 = vmatprep.mubr.f32.mxu1 %v22310_v25 }
0x233f   :  { %42580 = vmatmul.mubr.f32.gmra.mrb[48].mxu1 %v22320_v50 }
0x2340   :  { %48283 = vmatpush3.bf16.msra.mxu1 %v57624_v24  ;;  %42614 = vmatprep.mubr.f32.mxu1 %v54765_v38 }
0x2341   :  { %48285 = vmatprep.subr.bf16.mxu1 %v57625_v21 }
0x2344   :  { %48287 = vmatpush3.bf16.msra.mxu1 %v57625_v21 }
0x2345   :  { %48289 = vmatprep.subr.bf16.mxu1 %v57626_v22 }
0x2348   :  { %48291 = vmatpush3.bf16.msra.mxu1 %v57626_v22 }
0x2349   :  { %48293 = vmatprep.subr.bf16.mxu1 %v57627_v58 }
0x234c   :  { %48295 = vmatpush3.bf16.msra.mxu1 %v57627_v58  ;;  %v57647_v58 = vld [vmem:[#allocation144_spill] sm:$0xff] }
0x234d   :  { %48297 = vmatprep.subr.bf16.mxu1 %v57628_v59 }
0x2350   :  { %48299 = vmatpush3.bf16.msra.mxu1 %v57628_v59 }
0x2351   :  { %48301 = vmatprep.subr.bf16.mxu1 %v57629_v60 }
0x2354   :  { %48303 = vmatpush3.bf16.msra.mxu1 %v57629_v60 }
0x2355   :  { %48305 = vmatprep.subr.bf16.mxu1 %v57630_v44 }
0x2358   :  { %48307 = vmatpush3.bf16.msra.mxu1 %v57630_v44 }
0x2359   :  { %48309 = vmatprep.subr.bf16.mxu1 %v57631_v45 }
0x235b   :  { %42615 = vmatmul.mubr.f32.vlgmr.msra.gmra.mrb[46].mxu1 %v54763_v5 }
0x235c   :  { %42617 = vmatprep.mubr.f32.mxu1 %v54776_v55  ;;  %48311 = vmatpush3.bf16.msra.mxu1 %v57631_v45 }
0x235d   :  { %48313 = vmatprep.subr.bf16.mxu1 %v57632_v10 }
0x235f   :  { %42618 = vmatmul.mubr.f32.gmra.mrb[48].mxu1 %v54774_v37 }
0x2360   :  { %48315 = vmatpush3.bf16.msra.mxu1 %v57632_v10  ;;  %42652 = vmatprep.mubr.f32.mxu1 %v54771_v28  ;;  %v57638_v28 = vld [vmem:[#allocation120_spill] sm:$0xff] }
0x2361   :  { %48317 = vmatprep.subr.bf16.mxu1 %v57633_v15 }
0x2364   :  { %48319 = vmatpush3.bf16.msra.mxu1 %v57633_v15 }
0x2365   :  { %48321 = vmatprep.subr.bf16.mxu1 %v57634_v6 }
0x2368   :  { %48323 = vmatpush3.bf16.msra.mxu1 %v57634_v6 }
0x2369   :  { %48325 = vmatprep.subr.bf16.mxu1 %v57635_v27 }
0x236c   :  { %48327 = vmatpush3.bf16.msra.mxu1 %v57635_v27 }
0x236d   :  { %48329 = vmatprep.subr.bf16.mxu1 %v57636_v0 }
0x2370   :  { %48331 = vmatpush3.bf16.msra.mxu1 %v57636_v0 }
0x2371   :  { %48333 = vmatprep.subr.bf16.mxu1 %v57637_v16 }
0x2374   :  { %48335 = vmatpush3.bf16.msra.mxu1 %v57637_v16 }
0x2375   :  { %48337 = vmatprep.subr.bf16.mxu1 %v57638_v28 }
0x2378   :  { %48339 = vmatpush3.bf16.msra.mxu1 %v57638_v28 }
0x2379   :  { %48341 = vmatprep.subr.bf16.mxu1 %v57496_v42 }
0x237b   :  { %42653 = vmatmul.mubr.f32.vlgmr.msra.gmra.mrb[46].mxu1 %v54768_v18  ;;  %v57642_v18 = vld [vmem:[#allocation132_spill] sm:$0xff] }
0x237c   :  { %42655 = vmatprep.mubr.f32.mxu1 %v54786_v12  ;;  %48343 = vmatpush3.bf16.msra.mxu1 %v57496_v42  ;;  %v57644_v12 = vld [vmem:[#allocation134_spill] sm:$0xff] }
0x237d   :  { %48345 = vmatprep.subr.bf16.mxu1 %v57497_v46 }
0x237f   :  { %42656 = vmatmul.mubr.f32.gmra.mrb[48].mxu1 %v54783_v30  ;;  %v57645_v30 = vld [vmem:[#allocation135_spill] sm:$0xff] }
0x2380   :  { %48347 = vmatpush3.bf16.msra.mxu1 %v57497_v46  ;;  %42690 = vmatprep.mubr.f32.mxu1 %v22288_v19  ;;  %v57639_v19 = vld [vmem:[#allocation129_spill] sm:$0xff] }
0x2381   :  { %48349 = vmatprep.subr.bf16.mxu1 %v57615_v20 }
0x2384   :  { %48351 = vmatpush3.bf16.msra.mxu1 %v57615_v20 }
0x2385   :  { %48353 = vmatprep.subr.bf16.mxu1 %v57616_v9 }
0x2388   :  { %48355 = vmatpush3.bf16.msra.mxu1 %v57616_v9 }
0x2389   :  { %48357 = vmatprep.subr.bf16.mxu1 %v57617_v48 }
0x238c   :  { %48359 = vmatpush3.bf16.msra.mxu1 %v57617_v48 }
0x238d   :  { %48361 = vmatprep.subr.bf16.mxu1 %v57618_v34 }
0x2390   :  { %48363 = vmatpush3.bf16.msra.mxu1 %v57618_v34 }
0x2391   :  { %48365 = vmatprep.subr.bf16.mxu1 %v57619_v53 }
0x2394   :  { %48367 = vmatpush3.bf16.msra.mxu1 %v57619_v53 }
0x2395   :  { %48369 = vmatprep.subr.bf16.mxu1 %v57620_v40 }
0x2398   :  { %48371 = vmatpush3.bf16.msra.mxu1 %v57620_v40 }
0x2399   :  { %48373 = vmatprep.subr.bf16.mxu1 %v57639_v19 }
0x239b   :  { %42691 = vmatmul.mubr.f32.vlgmr.msra.gmra.mrb[46].mxu1 %v22298_v57  ;;  %v57643_v57 = vld [vmem:[#allocation133_spill] sm:$0xff] }
0x239c   :  { %42693 = vmatprep.mubr.f32.mxu1 %v22308_v3  ;;  %48375 = vmatpush3.bf16.msra.mxu1 %v57639_v19 }
0x239d   :  { %48377 = vmatprep.subr.bf16.mxu1 %v57640_v43 }
0x239f   :  { %42694 = vmatmul.mubr.f32.gmra.mrb[48].mxu1 %v22318_v62  ;;  %v57646_v62 = vld [vmem:[#allocation136_spill] sm:$0xff] }
0x23a0   :  { %48379 = vmatpush3.bf16.msra.mxu1 %v57640_v43  ;;  %42728 = vmatprep.mubr.f32.mxu1 %v54765_v38 }
0x23a1   :  { %48381 = vmatprep.subr.bf16.mxu1 %v57641_v1 }
0x23a4   :  { %48383 = vmatpush3.bf16.msra.mxu1 %v57641_v1 }
0x23a5   :  { %48385 = vmatprep.subr.bf16.mxu1 %v57642_v18 }
0x23a8   :  { %48387 = vmatpush3.bf16.msra.mxu1 %v57642_v18 }
0x23a9   :  { %48389 = vmatprep.subr.bf16.mxu1 %v57643_v57 }
0x23ac   :  { %48391 = vmatpush3.bf16.msra.mxu1 %v57643_v57 }
0x23ad   :  { %48393 = vmatprep.subr.bf16.mxu1 %v57644_v12 }
0x23b0   :  { %48395 = vmatpush3.bf16.msra.mxu1 %v57644_v12 }
0x23b1   :  { %48397 = vmatprep.subr.bf16.mxu1 %v57645_v30 }
0x23b4   :  { %48399 = vmatpush3.bf16.msra.mxu1 %v57645_v30 }
0x23b5   :  { %48401 = vmatprep.subr.bf16.mxu1 %v57646_v62 }
0x23b8   :  { %48403 = vmatpush3.bf16.msra.mxu1 %v57646_v62 }
0x23b9   :  { %48405 = vmatprep.subr.bf16.mxu1 %v57496_v42 }
0x23bb   :  { %42729 = vmatmul.mubr.f32.vlgmr.msra.gmra.mrb[46].mxu1 %v54763_v5 }
0x23bc   :  { %42731 = vmatprep.mubr.f32.mxu1 %v54776_v55  ;;  %48407 = vmatpush3.bf16.msra.mxu1 %v57496_v42 }
0x23bd   :  { %48409 = vmatprep.subr.bf16.mxu1 %v57497_v46 }
0x23bf   :  { %42732 = vmatmul.mubr.f32.gmra.mrb[48].mxu1 %v54774_v37 }
0x23c0   :  { %48411 = vmatpush3.bf16.msra.mxu1 %v57497_v46  ;;  %42766 = vmatprep.mubr.f32.mxu1 %v54765_v38 }
0x23c1   :  { %48413 = vmatprep.subr.bf16.mxu1 %v57615_v20 }
0x23c4   :  { %48415 = vmatpush3.bf16.msra.mxu1 %v57615_v20 }
0x23c5   :  { %48417 = vmatprep.subr.bf16.mxu1 %v57616_v9 }
0x23c8   :  { %48419 = vmatpush3.bf16.msra.mxu1 %v57616_v9 }
0x23c9   :  { %48421 = vmatprep.subr.bf16.mxu1 %v57617_v48 }
0x23cc   :  { %48423 = vmatpush3.bf16.msra.mxu1 %v57617_v48 }
0x23cd   :  { %48425 = vmatprep.subr.bf16.mxu1 %v57618_v34 }
0x23d0   :  { %48427 = vmatpush3.bf16.msra.mxu1 %v57618_v34 }
0x23d1   :  { %48429 = vmatprep.subr.bf16.mxu1 %v57619_v53 }
0x23d4   :  { %48431 = vmatpush3.bf16.msra.mxu1 %v57619_v53 }
0x23d5   :  { %48433 = vmatprep.subr.bf16.mxu1 %v57620_v40 }
0x23d8   :  { %48435 = vmatpush3.bf16.msra.mxu1 %v57620_v40 }
0x23d9   :  { %48773 = vmatprep.subr.bf16.mxu1 %v57479_v2 }
0x23db   :  { %42767 = vmatmul.mubr.f32.vlgmr.msra.gmra.mrb[46].mxu1 %v54763_v5 }
0x23dc   :  { %42769 = vmatprep.mubr.f32.mxu1 %v54776_v55  ;;  %48775 = vmatpush3.bf16.msra.mxu1 %v57479_v2 }
0x23dd   :  { %48777 = vmatprep.subr.bf16.mxu1 %v57480_v32 }
0x23df   :  { %42770 = vmatmul.mubr.f32.gmra.mrb[48].mxu1 %v54774_v37 }
0x23e0   :  { %48779 = vmatpush3.bf16.msra.mxu1 %v57480_v32 }
0x23e1   :  { %48781 = vmatprep.subr.bf16.mxu1 %v57481_v49 }
0x23e4   :  { %48783 = vmatpush3.bf16.msra.mxu1 %v57481_v49 }
0x23e5   :  { %48785 = vmatprep.subr.bf16.mxu1 %v57482_v61 }
0x23e8   :  { %48787 = vmatpush3.bf16.msra.mxu1 %v57482_v61 }
0x23e9   :  { %48789 = vmatprep.subr.bf16.mxu1 %v57483_v11 }
0x23ec   :  { %48791 = vmatpush3.bf16.msra.mxu1 %v57483_v11 }
0x23ed   :  { %48793 = vmatprep.subr.bf16.mxu1 %v57484_v47 }
0x23f0   :  { %48795 = vmatpush3.bf16.msra.mxu1 %v57484_v47 }
0x23f1   :  { %48797 = vmatprep.subr.bf16.mxu1 %v57485_v29 }
0x23f4   :  { %48799 = vmatpush3.bf16.msra.mxu1 %v57485_v29 }
0x23f5   :  { %48801 = vmatprep.subr.bf16.mxu1 %v57486_v56 }
0x23f8   :  { %48803 = vmatpush3.bf16.msra.mxu1 %v57486_v56 }
0x23f9   :  { %48805 = vmatprep.subr.bf16.mxu1 %v57379_v51 }
0x24ae   :  { %v42768_v5 = vpop.f32.mrb[46].mxu1 }
0x24af   :  { %v22979_v38 = vand.u32 4294901760, %v42768_v5  ;;  %v22953_v37 = vpop.f32.mrb[47].mxu1 }
0x24b0   :  { %v22976_v55 = vand.u32 4294901760, %v22953_v37 }
0x24b1   :  { %v23073_v3 = vsub.f32 %v42768_v5, %v22979_v38 }
0x24b2   :  { %v48436_v25 = vpack.c.bf16 %v22979_v38, %v22976_v55  ;;  %v23066_v50 = vsub.f32 %v22953_v37, %v22976_v55  ;;  %v42771_v62 = vpop.f32.mrb[48].mxu1 }
0x24b3   :  { %v23074_v30 = vand.u32 4294901760, %v23073_v3  ;;  %v22985_v12 = vand.u32 4294901760, %v42771_v62  ;;  %v22965_v57 = vpop.f32.mrb[49].mxu1 }
0x24b4   :  { %v23067_v18 = vand.u32 4294901760, %v23066_v50  ;;  %v22982_v1 = vand.u32 4294901760, %v22965_v57  ;;  %48437 = vmatprep.subr.bf16.mxu0 %v48436_v25  ;;  %v48452_v43 = vpack.c.bf16 %v23073_v3, %v23066_v50 }
0x24b5   :  { %v23075_v19 = vsub.f32 %v23073_v3, %v23074_v30  ;;  %v23087_v28 = vsub.f32 %v42771_v62, %v22985_v12  ;;  %48439 = vmatpush3.bf16.msra.mxu0 %v48436_v25 }
0x24b6   :  { %v23068_v16 = vsub.f32 %v23066_v50, %v23067_v18  ;;  %v48440_v0 = vpack.c.bf16 %v22985_v12, %v22982_v1  ;;  %v23080_v27 = vsub.f32 %v22965_v57, %v22982_v1  ;;  %v48468_v6 = vpack.c.bf16 %v23074_v30, %v23067_v18  ;;  %v57648_v12 = vld [vmem:[#allocation137_spill] sm:$0xff] }
0x24b7   :  { %v23088_v15 = vand.u32 4294901760, %v23087_v28  ;;  %v23076_v10 = vand.u32 4294901760, %v23075_v19  ;;  %v57649_v19 = vld [vmem:[#allocation141_spill] sm:$0xff] }
0x24b8   :  { %v23081_v5 = vand.u32 4294901760, %v23080_v27  ;;  %48441 = vmatprep.subr.bf16.mxu0 %v48440_v0  ;;  %v23069_v38 = vand.u32 4294901760, %v23068_v16  ;;  %v48456_v37 = vpack.c.bf16 %v23087_v28, %v23080_v27  ;;  %v57650_v16 = vld [vmem:[#allocation138_spill] sm:$0xff] }
0x24b9   :  { %v23089_v55 = vsub.f32 %v23087_v28, %v23088_v15  ;;  %48443 = vmatpush3.bf16.msra.mxu0 %v48440_v0 }
0x24ba   :  { %v23082_v45 = vsub.f32 %v23080_v27, %v23081_v5  ;;  %v48444_v44 = vpack.c.bf16 %v23076_v10, %v23069_v38  ;;  %v48472_v60 = vpack.c.bf16 %v23088_v15, %v23081_v5  ;;  %v57651_v10 = vld [vmem:[#allocation142_spill] sm:$0xff]  ;;  %v57652_v15 = vld [vmem:[#allocation139_spill] sm:$0xff]  ;;  %v57654_v5 = vld [vmem:[#allocation21_spill] sm:$0xff] }
0x24bb   :  { %v23090_v59 = vand.u32 4294901760, %v23089_v55  ;;  %v57655_v38 = vld [vmem:[#allocation23_spill] sm:$0xff] }
0x24bc   :  { %42781 = vmatmul.mubr.f32.vlgmr.msra.gmra.mrb[44].mxu0 %v57647_v58  ;;  %48445 = vmatprep.subr.bf16.mxu0 %v48444_v44  ;;  %v23083_v62 = vand.u32 4294901760, %v23082_v45  ;;  %v57657_v55 = vld [vmem:[#allocation27_spill] sm:$0xff] }
0x24bd   :  { %48447 = vmatpush3.bf16.msra.mxu0 %v48444_v44  ;;  %42791 = vmatprep.mubr.f32.mxu0 %v57648_v12 }
0x24be   :  { %v48448_v1 = vpack.c.bf16 %v23090_v59, %v23083_v62  ;;  %v57653_v59 = vld [vmem:[#allocation143_spill] sm:$0xff]  ;;  %v57658_v62 = vld [vmem:[#allocation32_spill] sm:$0xff] }
0x24c0   :  { %48449 = vmatprep.subr.bf16.mxu0 %v48448_v1 }
0x24c1   :  { %48451 = vmatpush3.bf16.msra.mxu0 %v48448_v1  ;;  %v57659_v1 = vld [vmem:[#allocation34_spill] sm:$0xff] }
0x24c2   :  { %48453 = vmatprep.subr.bf16.mxu0 %v48452_v43 }
0x24c4   :  { %42792 = vmatmul.mubr.f32.vlgmr.msra.gmra.mrb[44].mxu0 %v57649_v19 }
0x24c5   :  { %48455 = vmatpush3.bf16.msra.mxu0 %v48452_v43  ;;  %42802 = vmatprep.mubr.f32.mxu0 %v57650_v16 }
0x24c6   :  { %48457 = vmatprep.subr.bf16.mxu0 %v48456_v37 }
0x24c9   :  { %48459 = vmatpush3.bf16.msra.mxu0 %v48456_v37  ;;  %v57656_v37 = vld [vmem:[#allocation26_spill] sm:$0xff] }
0x24ca   :  { %48461 = vmatprep.subr.bf16.mxu0 %v48436_v25 }
0x24cc   :  { %42803 = vmatmul.mubr.f32.vlgmr.msra.gmra.mrb[44].mxu0 %v57651_v10 }
0x24cd   :  { %48463 = vmatpush3.bf16.msra.mxu0 %v48436_v25  ;;  %42813 = vmatprep.mubr.f32.mxu0 %v57652_v15 }
0x24ce   :  { %48465 = vmatprep.subr.bf16.mxu0 %v48440_v0 }
0x24d1   :  { %48467 = vmatpush3.bf16.msra.mxu0 %v48440_v0 }
0x24d2   :  { %48469 = vmatprep.subr.bf16.mxu0 %v48468_v6 }
0x24d4   :  { %42814 = vmatmul.mubr.f32.vlgmr.msra.gmra.mrb[44].mxu0 %v57653_v59 }
0x24d5   :  { %48471 = vmatpush3.bf16.msra.mxu0 %v48468_v6  ;;  %42824 = vmatprep.mubr.f32.mxu0 %v57648_v12 }
0x24d6   :  { %48473 = vmatprep.subr.bf16.mxu0 %v48472_v60 }
0x24d9   :  { %48475 = vmatpush3.bf16.msra.mxu0 %v48472_v60 }
0x24da   :  { %48477 = vmatprep.subr.bf16.mxu0 %v48436_v25 }
0x24dc   :  { %42825 = vmatmul.mubr.f32.vlgmr.msra.gmra.mrb[44].mxu0 %v57649_v19 }
0x24dd   :  { %48479 = vmatpush3.bf16.msra.mxu0 %v48436_v25  ;;  %42835 = vmatprep.mubr.f32.mxu0 %v57648_v12 }
0x24de   :  { %48481 = vmatprep.subr.bf16.mxu0 %v48440_v0 }
0x24e1   :  { %48483 = vmatpush3.bf16.msra.mxu0 %v48440_v0 }
0x24e2   :  { %48485 = vmatprep.subr.bf16.mxu0 %v57556_v36 }
0x24e4   :  { %42836 = vmatmul.mubr.f32.vlgmr.msra.gmra.mrb[44].mxu0 %v57649_v19 }
0x24e5   :  { %48487 = vmatpush3.bf16.msra.mxu0 %v57556_v36 }
0x24e6   :  { %48489 = vmatprep.subr.bf16.mxu0 %v57557_v31 }
0x24e9   :  { %48491 = vmatpush3.bf16.msra.mxu0 %v57557_v31 }
0x24ea   :  { %48493 = vmatprep.subr.bf16.mxu0 %v57558_v23 }
0x25b7   :  { %v54931_v60 = vpop.f32.mrb[44].mxu0 }
0x25b8   :  { %v23507_v44 = vsel %vm1660_vm3, %v54931_v60, 0  ;;  %v54935_v45 = vpop.f32.mrb[45].mxu0 }
0x25b9   :  { %v54937_v6 = vand.u32 4294901760, %v23507_v44  ;;  %v23504_v27 = vsel %vm1660_vm3, %v54935_v45, 0 }
0x25ba   :  { %v54941_v0 = vand.u32 4294901760, %v23504_v27 }
0x25bb   :  { %v23589_v28 = vsub.f32 %v23507_v44, %v54937_v6  ;;  %v57660_v44 = vld [vmem:[#allocation51_spill] sm:$0xff] }
0x25bc   :  { %v23579_v43 = vsub.f32 %v23504_v27, %v54941_v0  ;;  %v57662_v27 = vld [vmem:[#allocation57_spill] sm:$0xff] }
0x25bd   :  { %v23590_v18 = vand.u32 4294901760, %v23589_v28 }
0x25be   :  { %v23580_v57 = vand.u32 4294901760, %v23579_v43 }
0x25bf   :  { %v23591_v30 = vsub.f32 %v23589_v28, %v23590_v18 }
0x25c0   :  { %v23581_v3 = vsub.f32 %v23579_v43, %v23580_v57 }
0x25c1   :  { %v23592_v50 = vand.u32 4294901760, %v23591_v30 }
0x25c2   :  { %v23582_v25 = vand.u32 4294901760, %v23581_v3 }
0x25c4   :  { %42846 = vmatprep.mubr.f32.mxu0 %v23582_v25 }
0x25c5   :  { %42847 = vmatmul.mubr.f32.vlgmr.msra.gmra.mrb[46].mxu0 %v23592_v50 }
0x25c6   :  { %48495 = vmatpush3.bf16.msra.mxu0 %v57558_v23  ;;  %42857 = vmatprep.mubr.f32.mxu0 %v54941_v0 }
0x25c7   :  { %48497 = vmatprep.subr.bf16.mxu0 %v57574_v8 }
0x25ca   :  { %48499 = vmatpush3.bf16.msra.mxu0 %v57574_v8 }
0x25cb   :  { %48501 = vmatprep.subr.bf16.mxu0 %v57576_v7 }
0x25cd   :  { %42858 = vmatmul.mubr.f32.vlgmr.msra.gmra.mrb[46].mxu0 %v54937_v6 }
0x25ce   :  { %48503 = vmatpush3.bf16.msra.mxu0 %v57576_v7  ;;  %42868 = vmatprep.mubr.f32.mxu0 %v23579_v43 }
0x25cf   :  { %48505 = vmatprep.subr.bf16.mxu0 %v57578_v52 }
0x25d2   :  { %48507 = vmatpush3.bf16.msra.mxu0 %v57578_v52 }
0x25d3   :  { %48509 = vmatprep.subr.bf16.mxu0 %v57556_v36 }
0x25d5   :  { %42869 = vmatmul.mubr.f32.vlgmr.msra.gmra.mrb[46].mxu0 %v23589_v28 }
0x25d6   :  { %48511 = vmatpush3.bf16.msra.mxu0 %v57556_v36  ;;  %42879 = vmatprep.mubr.f32.mxu0 %v23580_v57 }
0x25d7   :  { %48513 = vmatprep.subr.bf16.mxu0 %v57557_v31 }
0x25da   :  { %48515 = vmatpush3.bf16.msra.mxu0 %v57557_v31 }
0x25db   :  { %48517 = vmatprep.subr.bf16.mxu0 %v57580_v54 }
0x25dd   :  { %42880 = vmatmul.mubr.f32.vlgmr.msra.gmra.mrb[46].mxu0 %v23590_v18 }
0x25de   :  { %48519 = vmatpush3.bf16.msra.mxu0 %v57580_v54  ;;  %42890 = vmatprep.mubr.f32.mxu0 %v54941_v0 }
0x25df   :  { %48521 = vmatprep.subr.bf16.mxu0 %v57582_v33 }
0x25e2   :  { %48523 = vmatpush3.bf16.msra.mxu0 %v57582_v33 }
0x25e3   :  { %48525 = vmatprep.subr.bf16.mxu0 %v57556_v36 }
0x25e5   :  { %42891 = vmatmul.mubr.f32.vlgmr.msra.gmra.mrb[46].mxu0 %v54937_v6 }
0x25e6   :  { %48527 = vmatpush3.bf16.msra.mxu0 %v57556_v36  ;;  %42901 = vmatprep.mubr.f32.mxu0 %v54941_v0 }
0x25e7   :  { %48529 = vmatprep.subr.bf16.mxu0 %v57557_v31 }
0x25ea   :  { %48531 = vmatpush3.bf16.msra.mxu0 %v57557_v31 }
0x25eb   :  { %48533 = vmatprep.subr.bf16.mxu0 %v57567_v13 }
0x25ed   :  { %42902 = vmatmul.mubr.f32.vlgmr.msra.gmra.mrb[46].mxu0 %v54937_v6 }
0x25ee   :  { %48535 = vmatpush3.bf16.msra.mxu0 %v57567_v13  ;;  %42912 = vmatprep.mubr.f32.mxu0 %v23582_v25 }
0x25ef   :  { %48537 = vmatprep.subr.bf16.mxu0 %v57568_v26 }
0x25f2   :  { %48539 = vmatpush3.bf16.msra.mxu0 %v57568_v26 }
0x25f3   :  { %48541 = vmatprep.subr.bf16.mxu0 %v57654_v5 }
0x25f5   :  { %42913 = vmatmul.mubr.f32.vlgmr.msra.gmra.mrb[48].mxu0 %v23592_v50 }
0x25f6   :  { %48543 = vmatpush3.bf16.msra.mxu0 %v57654_v5  ;;  %42923 = vmatprep.mubr.f32.mxu0 %v54941_v0 }
0x25f7   :  { %48545 = vmatprep.subr.bf16.mxu0 %v57655_v38 }
0x25fa   :  { %48547 = vmatpush3.bf16.msra.mxu0 %v57655_v38 }
0x25fb   :  { %48549 = vmatprep.subr.bf16.mxu0 %v57656_v37 }
0x25fd   :  { %42924 = vmatmul.mubr.f32.vlgmr.msra.gmra.mrb[48].mxu0 %v54937_v6 }
0x25fe   :  { %48551 = vmatpush3.bf16.msra.mxu0 %v57656_v37  ;;  %42934 = vmatprep.mubr.f32.mxu0 %v23579_v43 }
0x25ff   :  { %48553 = vmatprep.subr.bf16.mxu0 %v57657_v55 }
0x2602   :  { %48555 = vmatpush3.bf16.msra.mxu0 %v57657_v55 }
0x2603   :  { %48557 = vmatprep.subr.bf16.mxu0 %v57567_v13 }
0x2605   :  { %42935 = vmatmul.mubr.f32.vlgmr.msra.gmra.mrb[48].mxu0 %v23589_v28 }
0x2606   :  { %48559 = vmatpush3.bf16.msra.mxu0 %v57567_v13  ;;  %42945 = vmatprep.mubr.f32.mxu0 %v23580_v57 }
0x2607   :  { %48561 = vmatprep.subr.bf16.mxu0 %v57568_v26 }
0x260a   :  { %48563 = vmatpush3.bf16.msra.mxu0 %v57568_v26 }
0x260b   :  { %48565 = vmatprep.subr.bf16.mxu0 %v57658_v62 }
0x260d   :  { %42946 = vmatmul.mubr.f32.vlgmr.msra.gmra.mrb[48].mxu0 %v23590_v18 }
0x260e   :  { %48567 = vmatpush3.bf16.msra.mxu0 %v57658_v62  ;;  %42956 = vmatprep.mubr.f32.mxu0 %v54941_v0 }
0x260f   :  { %48569 = vmatprep.subr.bf16.mxu0 %v57659_v1 }
0x2612   :  { %48571 = vmatpush3.bf16.msra.mxu0 %v57659_v1 }
0x2613   :  { %48573 = vmatprep.subr.bf16.mxu0 %v57567_v13 }
0x2615   :  { %42957 = vmatmul.mubr.f32.vlgmr.msra.gmra.mrb[48].mxu0 %v54937_v6 }
0x2616   :  { %48575 = vmatpush3.bf16.msra.mxu0 %v57567_v13  ;;  %42967 = vmatprep.mubr.f32.mxu0 %v54941_v0  ;;  %v57663_v0 = vld [vmem:[#allocation41_spill] sm:$0xff] }
0x2617   :  { %48577 = vmatprep.subr.bf16.mxu0 %v57568_v26 }
0x261a   :  { %48579 = vmatpush3.bf16.msra.mxu0 %v57568_v26 }
0x261b   :  { %48581 = vmatprep.subr.bf16.mxu0 %v57432_v14 }
0x261d   :  { %42968 = vmatmul.mubr.f32.vlgmr.msra.gmra.mrb[48].mxu0 %v54937_v6  ;;  %v57661_v6 = vld [vmem:[#allocation56_spill] sm:$0xff] }
0x261e   :  { %48583 = vmatpush3.bf16.msra.mxu0 %v57432_v14 }
0x261f   :  { %48585 = vmatprep.subr.bf16.mxu0 %v57433_v39 }
0x2622   :  { %48587 = vmatpush3.bf16.msra.mxu0 %v57433_v39 }
0x2623   :  { %48589 = vmatprep.subr.bf16.mxu0 %v57434_v63 }
0x2626   :  { %48591 = vmatpush3.bf16.msra.mxu0 %v57434_v63 }
0x2627   :  { %48593 = vmatprep.subr.bf16.mxu0 %v57435_v35 }
0x262a   :  { %48595 = vmatpush3.bf16.msra.mxu0 %v57435_v35 }
0x262b   :  { %48597 = vmatprep.subr.bf16.mxu0 %v57436_v4 }
0x262e   :  { %48599 = vmatpush3.bf16.msra.mxu0 %v57436_v4 }
0x262f   :  { %48601 = vmatprep.subr.bf16.mxu0 %v57660_v44 }
0x2632   :  { %48603 = vmatpush3.bf16.msra.mxu0 %v57660_v44 }
0x2633   :  { %48605 = vmatprep.subr.bf16.mxu0 %v57661_v6 }
0x2636   :  { %48607 = vmatpush3.bf16.msra.mxu0 %v57661_v6 }
0x2637   :  { %48609 = vmatprep.subr.bf16.mxu0 %v57662_v27 }
0x263a   :  { %48611 = vmatpush3.bf16.msra.mxu0 %v57662_v27 }
0x263b   :  { %48613 = vmatprep.subr.bf16.mxu0 %v57663_v0 }
0x26c0   :  { %v42903_v28 = vpop.f32.mrb[46].mxu0 }
0x26c1   :  { %v24027_v43 = vpop.f32.mrb[47].mxu0  ;;  %v24566_v57 = vmul.f32 %v42903_v28, %v42903_v28 }
0x26c2   :  { %v24565_v25 = vmul.f32 %v24027_v43, %v24027_v43 }
0x26f0   :  { %v42969_v18 = vpop.f32.mrb[48].mxu0 }
0x26f1   :  { %v24568_v30 = vmul.f32 %v42969_v18, %v42969_v18  ;;  %v24555_v3 = vpop.f32.mrb[49].mxu0 }
0x26f2   :  { %v24567_v50 = vmul.f32 %v24555_v3, %v24555_v3  ;;  %v57669_v3 = vld [vmem:[#allocation53_spill] sm:$0xff] }
0x26f3   :  { %v24570_v1 = vadd.f32 %v24568_v30, %v24566_v57  ;;  %v57664_v57 = vld [vmem:[#allocation44_spill] sm:$0xff]  ;;  %v57667_v30 = vld [vmem:[#allocation49_spill] sm:$0xff] }
0x26f4   :  { %v24569_v62 = vadd.f32 %v24567_v50, %v24565_v25  ;;  %v57670_v25 = vld [vmem:[#allocation54_spill] sm:$0xff]  ;;  %v57671_v50 = vld [vmem:[#allocation55_spill] sm:$0xff] }
0x26f5   :  { %v55017_v55 = vand.u32 4294901760, %v24570_v1 }
0x26f6   :  { %v55019_v37 = vand.u32 4294901760, %v24569_v62 }
0x26f7   :  { %v55022_v38 = vsub.f32 %v24570_v1, %v55017_v55  ;;  %v57665_v1 = vld [vmem:[#allocation47_spill] sm:$0xff] }
0x26f8   :  { %v24653_v33 = vsub.f32 %v24569_v62, %v55019_v37  ;;  %v57666_v62 = vld [vmem:[#allocation48_spill] sm:$0xff] }
0x26f9   :  { %v24664_v54 = vand.u32 4294901760, %v55022_v38 }
0x26fa   :  { %v24654_v52 = vand.u32 4294901760, %v24653_v33 }
0x26fb   :  { %v24665_v28 = vsub.f32 %v55022_v38, %v24664_v54 }
0x26fc   :  { %v24655_v18 = vsub.f32 %v24653_v33, %v24654_v52 }
0x26fd   :  { %v24666_v43 = vand.u32 4294901760, %v24665_v28  ;;  %v57672_v28 = vld [vmem:[#allocation58_spill] sm:$0xff] }
0x26fe   :  { %v24656_v7 = vand.u32 4294901760, %v24655_v18  ;;  %v57673_v18 = vld [vmem:[#allocation59_spill] sm:$0xff] }
0x2700   :  { %43002 = vmatprep.mubr.f32.mxu0 %v24656_v7  ;;  %v57668_v7 = vld [vmem:[#allocation52_spill] sm:$0xff] }
0x2701   :  { %43003 = vmatmul.mubr.f32.vlgmr.msra.gmra.mrb[50].mxu0 %v24666_v43  ;;  %v57674_v43 = vld [vmem:[#allocation60_spill] sm:$0xff] }
0x2702   :  { %48615 = vmatpush3.bf16.msra.mxu0 %v57663_v0  ;;  %43037 = vmatprep.mubr.f32.mxu0 %v55019_v37 }
0x2703   :  { %48617 = vmatprep.subr.bf16.mxu0 %v57664_v57 }
0x2706   :  { %48619 = vmatpush3.bf16.msra.mxu0 %v57664_v57 }
0x2707   :  { %48621 = vmatprep.subr.bf16.mxu0 %v57665_v1 }
0x270a   :  { %48623 = vmatpush3.bf16.msra.mxu0 %v57665_v1 }
0x270b   :  { %48625 = vmatprep.subr.bf16.mxu0 %v57666_v62 }
0x270e   :  { %48627 = vmatpush3.bf16.msra.mxu0 %v57666_v62 }
0x270f   :  { %48629 = vmatprep.subr.bf16.mxu0 %v57667_v30 }
0x2712   :  { %48631 = vmatpush3.bf16.msra.mxu0 %v57667_v30 }
0x2713   :  { %48633 = vmatprep.subr.bf16.mxu0 %v57668_v7 }
0x2716   :  { %48635 = vmatpush3.bf16.msra.mxu0 %v57668_v7  ;;  %v57689_v7 = vld [vmem:[#allocation84_spill] sm:$0xff] }
0x2717   :  { %48637 = vmatprep.subr.bf16.mxu0 %v57669_v3 }
0x271a   :  { %48639 = vmatpush3.bf16.msra.mxu0 %v57669_v3  ;;  %v57676_v3 = vld [vmem:[#allocation62_spill] sm:$0xff] }
0x271b   :  { %48641 = vmatprep.subr.bf16.mxu0 %v57670_v25 }
0x271e   :  { %48643 = vmatpush3.bf16.msra.mxu0 %v57670_v25  ;;  %v57675_v25 = vld [vmem:[#allocation61_spill] sm:$0xff] }
0x271f   :  { %48645 = vmatprep.subr.bf16.mxu0 %v57671_v50 }
0x2721   :  { %43038 = vmatmul.mubr.f32.vlgmr.msra.gmra.mrb[50].mxu0 %v55017_v55 }
0x2722   :  { %48647 = vmatpush3.bf16.msra.mxu0 %v57671_v50  ;;  %43072 = vmatprep.mubr.f32.mxu0 %v24653_v33  ;;  %v57677_v33 = vld [vmem:[#allocation63_spill] sm:$0xff] }
0x2723   :  { %48649 = vmatprep.subr.bf16.mxu0 %v57672_v28 }
0x2726   :  { %48651 = vmatpush3.bf16.msra.mxu0 %v57672_v28  ;;  %v57678_v28 = vld [vmem:[#allocation64_spill] sm:$0xff] }
0x2727   :  { %48653 = vmatprep.subr.bf16.mxu0 %v57673_v18 }
0x272a   :  { %48655 = vmatpush3.bf16.msra.mxu0 %v57673_v18 }
0x272b   :  { %48657 = vmatprep.subr.bf16.mxu0 %v57674_v43 }
0x272e   :  { %48659 = vmatpush3.bf16.msra.mxu0 %v57674_v43 }
0x272f   :  { %48661 = vmatprep.subr.bf16.mxu0 %v57675_v25 }
0x2732   :  { %48663 = vmatpush3.bf16.msra.mxu0 %v57675_v25 }
0x2733   :  { %48665 = vmatprep.subr.bf16.mxu0 %v57676_v3 }
0x2736   :  { %48667 = vmatpush3.bf16.msra.mxu0 %v57676_v3  ;;  %v57683_v3 = vld [vmem:[#allocation69_spill] sm:$0xff] }
0x2737   :  { %48669 = vmatprep.subr.bf16.mxu0 %v57677_v33 }
0x273a   :  { %48671 = vmatpush3.bf16.msra.mxu0 %v57677_v33  ;;  %v57682_v33 = vld [vmem:[#allocation68_spill] sm:$0xff] }
0x273b   :  { %48673 = vmatprep.subr.bf16.mxu0 %v57678_v28 }
0x273e   :  { %48675 = vmatpush3.bf16.msra.mxu0 %v57678_v28  ;;  %v57681_v28 = vld [vmem:[#allocation67_spill] sm:$0xff] }
0x273f   :  { %48677 = vmatprep.subr.bf16.mxu0 %v57432_v14 }
0x2741   :  { %43073 = vmatmul.mubr.f32.vlgmr.msra.gmra.mrb[50].mxu0 %v55022_v38  ;;  %v57680_v38 = vld [vmem:[#allocation66_spill] sm:$0xff] }
0x2742   :  { %48679 = vmatpush3.bf16.msra.mxu0 %v57432_v14  ;;  %43107 = vmatprep.mubr.f32.mxu0 %v24654_v52  ;;  %v57679_v52 = vld [vmem:[#allocation65_spill] sm:$0xff] }
0x2743   :  { %48681 = vmatprep.subr.bf16.mxu0 %v57433_v39 }
0x2746   :  { %48683 = vmatpush3.bf16.msra.mxu0 %v57433_v39 }
0x2747   :  { %48685 = vmatprep.subr.bf16.mxu0 %v57434_v63 }
0x274a   :  { %48687 = vmatpush3.bf16.msra.mxu0 %v57434_v63 }
0x274b   :  { %48689 = vmatprep.subr.bf16.mxu0 %v57435_v35 }
0x274e   :  { %48691 = vmatpush3.bf16.msra.mxu0 %v57435_v35 }
0x274f   :  { %48693 = vmatprep.subr.bf16.mxu0 %v57436_v4 }
0x2752   :  { %48695 = vmatpush3.bf16.msra.mxu0 %v57436_v4 }
0x2753   :  { %48697 = vmatprep.subr.bf16.mxu0 %v57660_v44 }
0x2756   :  { %48699 = vmatpush3.bf16.msra.mxu0 %v57660_v44 }
0x2757   :  { %48701 = vmatprep.subr.bf16.mxu0 %v57661_v6 }
0x275a   :  { %48703 = vmatpush3.bf16.msra.mxu0 %v57661_v6 }
0x275b   :  { %48705 = vmatprep.subr.bf16.mxu0 %v57662_v27 }
0x275e   :  { %48707 = vmatpush3.bf16.msra.mxu0 %v57662_v27 }
0x275f   :  { %48709 = vmatprep.subr.bf16.mxu0 %v57679_v52 }
0x2761   :  { %43108 = vmatmul.mubr.f32.vlgmr.msra.gmra.mrb[50].mxu0 %v24664_v54  ;;  %v57684_v54 = vld [vmem:[#allocation70_spill] sm:$0xff] }
0x2762   :  { %48711 = vmatpush3.bf16.msra.mxu0 %v57679_v52  ;;  %43142 = vmatprep.mubr.f32.mxu0 %v55019_v37  ;;  %v57685_v52 = vld [vmem:[#allocation71_spill] sm:$0xff] }
0x2763   :  { %48713 = vmatprep.subr.bf16.mxu0 %v57680_v38 }
0x2766   :  { %48715 = vmatpush3.bf16.msra.mxu0 %v57680_v38  ;;  %v57686_v38 = vld [vmem:[#allocation72_spill] sm:$0xff] }
0x2767   :  { %48717 = vmatprep.subr.bf16.mxu0 %v57681_v28 }
0x276a   :  { %48719 = vmatpush3.bf16.msra.mxu0 %v57681_v28 }
0x276b   :  { %48721 = vmatprep.subr.bf16.mxu0 %v57682_v33 }
0x276e   :  { %48723 = vmatpush3.bf16.msra.mxu0 %v57682_v33 }
0x276f   :  { %48725 = vmatprep.subr.bf16.mxu0 %v57683_v3 }
0x2772   :  { %48727 = vmatpush3.bf16.msra.mxu0 %v57683_v3 }
0x2773   :  { %48729 = vmatprep.subr.bf16.mxu0 %v57684_v54 }
0x2776   :  { %48731 = vmatpush3.bf16.msra.mxu0 %v57684_v54 }
0x2777   :  { %48733 = vmatprep.subr.bf16.mxu0 %v57685_v52 }
0x277a   :  { %48735 = vmatpush3.bf16.msra.mxu0 %v57685_v52 }
0x277b   :  { %48737 = vmatprep.subr.bf16.mxu0 %v57686_v38 }
0x277e   :  { %48739 = vmatpush3.bf16.msra.mxu0 %v57686_v38 }
0x277f   :  { %48741 = vmatprep.subr.bf16.mxu0 %v57432_v14 }
0x2781   :  { %43143 = vmatmul.mubr.f32.vlgmr.msra.gmra.mrb[50].mxu0 %v55017_v55 }
0x2782   :  { %48743 = vmatpush3.bf16.msra.mxu0 %v57432_v14  ;;  %43177 = vmatprep.mubr.f32.mxu0 %v55019_v37 }
0x2783   :  { %48745 = vmatprep.subr.bf16.mxu0 %v57433_v39 }
0x2786   :  { %48747 = vmatpush3.bf16.msra.mxu0 %v57433_v39 }
0x2787   :  { %48749 = vmatprep.subr.bf16.mxu0 %v57434_v63 }
0x278a   :  { %48751 = vmatpush3.bf16.msra.mxu0 %v57434_v63 }
0x278b   :  { %48753 = vmatprep.subr.bf16.mxu0 %v57435_v35 }
0x278e   :  { %48755 = vmatpush3.bf16.msra.mxu0 %v57435_v35 }
0x278f   :  { %48757 = vmatprep.subr.bf16.mxu0 %v57436_v4 }
0x2792   :  { %48759 = vmatpush3.bf16.msra.mxu0 %v57436_v4 }
0x2793   :  { %48761 = vmatprep.subr.bf16.mxu0 %v57660_v44 }
0x2796   :  { %48763 = vmatpush3.bf16.msra.mxu0 %v57660_v44 }
0x2797   :  { %48765 = vmatprep.subr.bf16.mxu0 %v57661_v6 }
0x279a   :  { %48767 = vmatpush3.bf16.msra.mxu0 %v57661_v6 }
0x279b   :  { %48769 = vmatprep.subr.bf16.mxu0 %v57662_v27 }
0x279e   :  { %48771 = vmatpush3.bf16.msra.mxu0 %v57662_v27 }
0x27a1   :  { %43178 = vmatmul.mubr.f32.vlgmr.msra.gmra.mrb[50].mxu0 %v55017_v55 }
0x2874   :  { %v43179_v37 = vpop.f32.mrb[50].mxu0 }
0x2875   :  { %25257 = vmax.xlane.f32.xlu1 %v43179_v37  ;;  %v25245_v38 = vpop.f32.mrb[51].mxu0 }
0x2876   :  { %25255 = vmax.xlane.f32.xlu0 %v25245_v38 }
0x28a3   :  { %25953 = vxpose.xlu0.b32.start [1/2] (short) (narrow) %v54935_v45, 32 }
0x28a7   :  { %25954 = vxpose.xlu0.b32.end [2/2] (short) (narrow) %v54931_v60, 32 }
0x2902   :  { %v25258_v52 = vpop.xlane.xlu1 %25257 }
0x2903   :  { %v25260_v54 = vsub.f32 %v43179_v37, %v25258_v52  ;;  %v25256_v3 = vpop.xlane.xlu0 %25255  ;;  %v57688_v37 = vld [vmem:[#allocation83_spill] sm:$0xff] }
0x2904   :  { %v25259_v33 = vsub.f32 %v25245_v38, %v25256_v3 }
0x2905   :  { %v25263_v28 = vmul.f32 1.442695, %v25260_v54  ;;  %v57687_v54 = vld [vmem:[#allocation82_spill] sm:$0xff] }
0x2906   :  { %v25261_v25 = vmul.f32 1.442695, %v25259_v33 }
0x2907   :  { %51088 = vpow2.f32 %v25263_v28 }
0x2908   :  { %51090 = vpow2.f32 %v25261_v25 }
0x2911   :  { %v55115_v43 = vpop.eup %51088 }
0x2912   :  { %v55117_v18 = vpop.eup %51090  ;;  %v55120_v55 = vand.u32 4294901760, %v55115_v43 }
0x2913   :  { %v55123_v50 = vand.u32 4294901760, %v55117_v18 }
0x2914   :  { %v55127_v60 = vsub.f32 %v55115_v43, %v55120_v55 }
0x2915   :  { %v25347_v45 = vsub.f32 %v55117_v18, %v55123_v50 }
0x2916   :  { %v25358_v3 = vand.u32 4294901760, %v55127_v60 }
0x2917   :  { %v25348_v25 = vand.u32 4294901760, %v25347_v45 }
0x2918   :  { %v25359_v28 = vsub.f32 %v55127_v60, %v25358_v3 }
0x2919   :  { %v25349_v33 = vsub.f32 %v25347_v45, %v25348_v25 }
0x291a   :  { %v25360_v38 = vand.u32 4294901760, %v25359_v28  ;;  %v57691_v28 = vld [vmem:[#allocation86_spill] sm:$0xff] }
0x291b   :  { %v25350_v52 = vand.u32 4294901760, %v25349_v33  ;;  %v57690_v33 = vld [vmem:[#allocation85_spill] sm:$0xff] }
0x291d   :  { %43212 = vmatprep.mubr.f32.mxu1 %v25350_v52  ;;  %v57692_v52 = vld [vmem:[#allocation87_spill] sm:$0xff] }
0x291e   :  { %43213 = vmatmul.mubr.f32.vlgmr.msra.gmra.mrb[50].mxu1 %v25360_v38  ;;  %v57693_v38 = vld [vmem:[#allocation88_spill] sm:$0xff] }
0x291f   :  { %48807 = vmatpush3.bf16.msra.mxu1 %v57379_v51  ;;  %43247 = vmatprep.mubr.f32.mxu1 %v55123_v50 }
0x2920   :  { %48809 = vmatprep.subr.bf16.mxu1 %v57687_v54 }
0x2923   :  { %48811 = vmatpush3.bf16.msra.mxu1 %v57687_v54 }
0x2924   :  { %48813 = vmatprep.subr.bf16.mxu1 %v57688_v37 }
0x2927   :  { %48815 = vmatpush3.bf16.msra.mxu1 %v57688_v37  ;;  %v57694_v37 = vld [vmem:[#allocation89_spill] sm:$0xff] }
0x2928   :  { %48817 = vmatprep.subr.bf16.mxu1 %v57689_v7 }
0x292b   :  { %48819 = vmatpush3.bf16.msra.mxu1 %v57689_v7  ;;  %v57699_v7 = vld [vmem:[#allocation94_spill] sm:$0xff] }
0x292c   :  { %48821 = vmatprep.subr.bf16.mxu1 %v57690_v33 }
0x292f   :  { %48823 = vmatpush3.bf16.msra.mxu1 %v57690_v33  ;;  %v57695_v33 = vld [vmem:[#allocation90_spill] sm:$0xff] }
0x2930   :  { %48825 = vmatprep.subr.bf16.mxu1 %v57691_v28 }
0x2933   :  { %48827 = vmatpush3.bf16.msra.mxu1 %v57691_v28  ;;  %v57696_v28 = vld [vmem:[#allocation91_spill] sm:$0xff] }
0x2934   :  { %48829 = vmatprep.subr.bf16.mxu1 %v57692_v52 }
0x2937   :  { %48831 = vmatpush3.bf16.msra.mxu1 %v57692_v52  ;;  %v57697_v52 = vld [vmem:[#allocation92_spill] sm:$0xff] }
0x2938   :  { %48833 = vmatprep.subr.bf16.mxu1 %v57693_v38 }
0x293b   :  { %48835 = vmatpush3.bf16.msra.mxu1 %v57693_v38  ;;  %v57698_v38 = vld [vmem:[#allocation93_spill] sm:$0xff] }
0x293c   :  { %48837 = vmatprep.subr.bf16.mxu1 %v57694_v37 }
0x293e   :  { %43248 = vmatmul.mubr.f32.vlgmr.msra.gmra.mrb[50].mxu1 %v55120_v55 }
0x293f   :  { %48839 = vmatpush3.bf16.msra.mxu1 %v57694_v37  ;;  %43282 = vmatprep.mubr.f32.mxu1 %v25347_v45  ;;  %v57700_v45 = vld [vmem:[#allocation95_spill] sm:$0xff] }
0x2940   :  { %48841 = vmatprep.subr.bf16.mxu1 %v57695_v33 }
0x2943   :  { %48843 = vmatpush3.bf16.msra.mxu1 %v57695_v33  ;;  %v57701_v33 = vld [vmem:[#allocation96_spill] sm:$0xff] }
0x2944   :  { %48845 = vmatprep.subr.bf16.mxu1 %v57696_v28 }
0x2947   :  { %48847 = vmatpush3.bf16.msra.mxu1 %v57696_v28 }
0x2948   :  { %48849 = vmatprep.subr.bf16.mxu1 %v57697_v52 }
0x294b   :  { %48851 = vmatpush3.bf16.msra.mxu1 %v57697_v52 }
0x294c   :  { %48853 = vmatprep.subr.bf16.mxu1 %v57698_v38 }
0x294f   :  { %48855 = vmatpush3.bf16.msra.mxu1 %v57698_v38 }
0x2950   :  { %48857 = vmatprep.subr.bf16.mxu1 %v57699_v7 }
0x2953   :  { %48859 = vmatpush3.bf16.msra.mxu1 %v57699_v7  ;;  %v57706_v7 = vld [vmem:[#allocation101_spill] sm:$0xff] }
0x2954   :  { %48861 = vmatprep.subr.bf16.mxu1 %v57700_v45 }
0x2957   :  { %48863 = vmatpush3.bf16.msra.mxu1 %v57700_v45  ;;  %v57705_v45 = vld [vmem:[#allocation100_spill] sm:$0xff] }
0x2958   :  { %48865 = vmatprep.subr.bf16.mxu1 %v57701_v33 }
0x295b   :  { %48867 = vmatpush3.bf16.msra.mxu1 %v57701_v33  ;;  %v57704_v33 = vld [vmem:[#allocation99_spill] sm:$0xff] }
0x295c   :  { %48869 = vmatprep.subr.bf16.mxu1 %v57479_v2 }
0x295e   :  { %43283 = vmatmul.mubr.f32.vlgmr.msra.gmra.mrb[50].mxu1 %v55127_v60  ;;  %v57702_v60 = vld [vmem:[#allocation97_spill] sm:$0xff] }
0x295f   :  { %48871 = vmatpush3.bf16.msra.mxu1 %v57479_v2  ;;  %43317 = vmatprep.mubr.f32.mxu1 %v25348_v25  ;;  %v57703_v25 = vld [vmem:[#allocation98_spill] sm:$0xff] }
0x2960   :  { %48873 = vmatprep.subr.bf16.mxu1 %v57480_v32 }
0x2963   :  { %48875 = vmatpush3.bf16.msra.mxu1 %v57480_v32 }
0x2964   :  { %48877 = vmatprep.subr.bf16.mxu1 %v57481_v49 }
0x2967   :  { %48879 = vmatpush3.bf16.msra.mxu1 %v57481_v49 }
0x2968   :  { %48881 = vmatprep.subr.bf16.mxu1 %v57482_v61 }
0x296b   :  { %48883 = vmatpush3.bf16.msra.mxu1 %v57482_v61 }
0x296c   :  { %48885 = vmatprep.subr.bf16.mxu1 %v57483_v11 }
0x296f   :  { %48887 = vmatpush3.bf16.msra.mxu1 %v57483_v11 }
0x2970   :  { %48889 = vmatprep.subr.bf16.mxu1 %v57484_v47 }
0x2973   :  { %48891 = vmatpush3.bf16.msra.mxu1 %v57484_v47 }
0x2974   :  { %48893 = vmatprep.subr.bf16.mxu1 %v57485_v29 }
0x2977   :  { %48895 = vmatpush3.bf16.msra.mxu1 %v57485_v29 }
0x2978   :  { %48897 = vmatprep.subr.bf16.mxu1 %v57486_v56 }
0x297b   :  { %48899 = vmatpush3.bf16.msra.mxu1 %v57486_v56 }
0x297c   :  { %48901 = vmatprep.subr.bf16.mxu1 %v57702_v60 }
0x297e   :  { %43318 = vmatmul.mubr.f32.vlgmr.msra.gmra.mrb[50].mxu1 %v25358_v3  ;;  %v57707_v3 = vld [vmem:[#allocation102_spill] sm:$0xff] }
0x297f   :  { %48903 = vmatpush3.bf16.msra.mxu1 %v57702_v60  ;;  %43352 = vmatprep.mubr.f32.mxu1 %v55123_v50  ;;  %v57708_v60 = vld [vmem:[#allocation103_spill] sm:$0xff] }
0x2980   :  { %48905 = vmatprep.subr.bf16.mxu1 %v57703_v25 }
0x2983   :  { %48907 = vmatpush3.bf16.msra.mxu1 %v57703_v25  ;;  %v57709_v25 = vld [vmem:[#allocation104_spill] sm:$0xff] }
0x2984   :  { %48909 = vmatprep.subr.bf16.mxu1 %v57704_v33 }
0x2987   :  { %48911 = vmatpush3.bf16.msra.mxu1 %v57704_v33 }
0x2988   :  { %48913 = vmatprep.subr.bf16.mxu1 %v57705_v45 }
0x298b   :  { %48915 = vmatpush3.bf16.msra.mxu1 %v57705_v45 }
0x298c   :  { %48917 = vmatprep.subr.bf16.mxu1 %v57706_v7 }
0x298f   :  { %48919 = vmatpush3.bf16.msra.mxu1 %v57706_v7 }
0x2990   :  { %48921 = vmatprep.subr.bf16.mxu1 %v57707_v3 }
0x2993   :  { %48923 = vmatpush3.bf16.msra.mxu1 %v57707_v3 }
0x2994   :  { %48925 = vmatprep.subr.bf16.mxu1 %v57708_v60 }
0x2997   :  { %48927 = vmatpush3.bf16.msra.mxu1 %v57708_v60 }
0x2998   :  { %48929 = vmatprep.subr.bf16.mxu1 %v57709_v25 }
0x299b   :  { %48931 = vmatpush3.bf16.msra.mxu1 %v57709_v25 }
0x299c   :  { %48933 = vmatprep.subr.bf16.mxu1 %v57479_v2 }
0x299e   :  { %43353 = vmatmul.mubr.f32.vlgmr.msra.gmra.mrb[50].mxu1 %v55120_v55 }
0x299f   :  { %48935 = vmatpush3.bf16.msra.mxu1 %v57479_v2  ;;  %43387 = vmatprep.mubr.f32.mxu1 %v55123_v50  ;;  %v25969_v50 = vpop.trf.xlu0 }
0x29a0   :  { %48937 = vmatprep.subr.bf16.mxu1 %v57480_v32 }
0x29a3   :  { %48939 = vmatpush3.bf16.msra.mxu1 %v57480_v32  ;;  %v25970_v33 = vpop.trf.xlu0 }
0x29a4   :  { %48941 = vmatprep.subr.bf16.mxu1 %v57481_v49 }
0x29a7   :  { %48943 = vmatpush3.bf16.msra.mxu1 %v57481_v49  ;;  %v25971_v38 = vpop.trf.xlu0 }
0x29a8   :  { %48945 = vmatprep.subr.bf16.mxu1 %v57482_v61  ;;  %v25992_v37 = vsel %vm1149_vm2, %v25971_v38, 0 }
0x29a9   :  { %v55250_v30 = vand.u32 4294901760, %v25992_v37 }
0x29ab   :  { %48947 = vmatpush3.bf16.msra.mxu1 %v57482_v61 }
0x29ac   :  { %48949 = vmatprep.subr.bf16.mxu1 %v57483_v11 }
0x29af   :  { %48951 = vmatpush3.bf16.msra.mxu1 %v57483_v11 }
0x29b0   :  { %48953 = vmatprep.subr.bf16.mxu1 %v57484_v47 }
0x29b3   :  { %48955 = vmatpush3.bf16.msra.mxu1 %v57484_v47 }
0x29b4   :  { %48957 = vmatprep.subr.bf16.mxu1 %v57485_v29 }
0x29b7   :  { %48959 = vmatpush3.bf16.msra.mxu1 %v57485_v29 }
0x29b8   :  { %48961 = vmatprep.subr.bf16.mxu1 %v57486_v56 }
0x29bb   :  { %48963 = vmatpush3.bf16.msra.mxu1 %v57486_v56 }
0x29bc   :  { %48989 = vmatprep.subr.bf16.mxu1 %v57496_v42 }
0x29be   :  { %43388 = vmatmul.mubr.f32.vlgmr.msra.gmra.mrb[50].mxu1 %v55120_v55  ;;  %v25986_v55 = vsel %vm1149_vm2, %v25969_v50, 0  ;;  %v25989_v50 = vsel %vm1149_vm2, %v25970_v33, 0 }
0x29bf   :  { %48991 = vmatpush3.bf16.msra.mxu1 %v57496_v42  ;;  %v55237_v25 = vand.u32 4294901760, %v25986_v55  ;;  %v55248_v54 = vand.u32 4294901760, %v25989_v50 }
0x29c0   :  { %48993 = vmatprep.subr.bf16.mxu1 %v57497_v46 }
0x29c1   :  { %v55240_v60 = vsub.f32 %v25986_v55, %v55237_v25  ;;  %v25972_v55 = vpop.trf.xlu0 }
0x29c2   :  { %v25995_v62 = vsel %vm1149_vm2, %v25972_v55, 0 }
0x29c3   :  { %48995 = vmatpush3.bf16.msra.mxu1 %v57497_v46  ;;  %v57015_v3 = vand.u32 4294901760, %v55240_v60 }
0x29c4   :  { %48997 = vmatprep.subr.bf16.mxu1 %v57615_v20 }
0x29c5   :  { %v26067_v7 = vsub.f32 %v55240_v60, %v57015_v3  ;;  %v26085_v3 = vsub.f32 %v25992_v37, %v55250_v30 }
0x29c7   :  { %48999 = vmatpush3.bf16.msra.mxu1 %v57615_v20  ;;  %v26068_v45 = vand.u32 4294901760, %v26067_v7  ;;  %v26075_v7 = vsub.f32 %v25989_v50, %v55248_v54  ;;  %v26086_v27 = vand.u32 4294901760, %v26085_v3 }
0x29c8   :  { %49001 = vmatprep.subr.bf16.mxu1 %v57616_v9 }
0x29c9   :  { %43394 = vmatprep.mubr.f32.mxu0 %v26068_v45  ;;  %v55254_v45 = vand.u32 4294901760, %v25995_v62  ;;  %v26076_v38 = vand.u32 4294901760, %v26075_v7  ;;  %v26087_v63 = vsub.f32 %v26085_v3, %v26086_v27 }
0x29cb   :  { %49003 = vmatpush3.bf16.msra.mxu1 %v57616_v9  ;;  %v26095_v57 = vsub.f32 %v25995_v62, %v55254_v45  ;;  %v26077_v4 = vsub.f32 %v26075_v7, %v26076_v38  ;;  %v26088_v62 = vand.u32 4294901760, %v26087_v63 }
0x29cc   :  { %49005 = vmatprep.subr.bf16.mxu1 %v57617_v48 }
0x29cd   :  { %v26096_v50 = vand.u32 4294901760, %v26095_v57 }
0x29cf   :  { %49007 = vmatpush3.bf16.msra.mxu1 %v57617_v48 }
0x29d0   :  { %49009 = vmatprep.subr.bf16.mxu1 %v57618_v34 }
0x29d3   :  { %49011 = vmatpush3.bf16.msra.mxu1 %v57618_v34 }
0x29d4   :  { %49013 = vmatprep.subr.bf16.mxu1 %v57619_v53 }
0x29d7   :  { %49015 = vmatpush3.bf16.msra.mxu1 %v57619_v53 }
0x29d8   :  { %49017 = vmatprep.subr.bf16.mxu1 %v57620_v40 }
0x29db   :  { %49019 = vmatpush3.bf16.msra.mxu1 %v57620_v40 }
0x29dc   :  { %49021 = vmatprep.subr.bf16.mxu1 %v57621_v41 }
0x2a91   :  { %v43389_v52 = vpop.f32.mrb[50].mxu1 }
0x2a92   :  { %51092 = vrcp.f32 %v43389_v52  ;;  %v25939_v28 = vpop.f32.mrb[51].mxu1 }
0x2a93   :  { %51094 = vrcp.f32 %v25939_v28 }
0x2a9c   :  { %v51093_v52 = vpop.eup %51092 }
0x2a9d   :  { %v51095_v1 = vpop.eup %51094  ;;  %v25952_v28 = vmul.f32 %v51093_v52, %v55115_v43  ;;  %v26078_v52 = vand.u32 4294901760, %v26077_v4 }
0x2a9e   :  { %v25950_v33 = vmul.f32 %v51095_v1, %v55117_v18  ;;  %v26097_v1 = vsub.f32 %v26095_v57, %v26096_v50 }
0x2a9f   :  { %v26001_v0 = vand.u32 4294901760, %v25952_v28 }
0x2aa0   :  { %v25998_v6 = vand.u32 4294901760, %v25950_v33 }
0x2aa1   :  { %v26113_v44 = vsub.f32 %v25952_v28, %v26001_v0 }
0x2aa2   :  { %v48964_v55 = vpack.c.bf16 %v26001_v0, %v25998_v6  ;;  %v26106_v35 = vsub.f32 %v25950_v33, %v25998_v6  ;;  %v26098_v0 = vand.u32 4294901760, %v26097_v1 }
0x2aa3   :  { %v26114_v39 = vand.u32 4294901760, %v26113_v44 }
0x2aa4   :  { %48965 = vmatprep.subr.bf16.mxu0 %v48964_v55  ;;  %v26107_v37 = vand.u32 4294901760, %v26106_v35  ;;  %v48972_v14 = vpack.c.bf16 %v26113_v44, %v26106_v35 }
0x2aa5   :  { %48967 = vmatpush3.bf16.msra.mxu0 %v48964_v55  ;;  %v26115_v43 = vsub.f32 %v26113_v44, %v26114_v39 }
0x2aa6   :  { %v26108_v18 = vsub.f32 %v26106_v35, %v26107_v37  ;;  %v48980_v51 = vpack.c.bf16 %v26114_v39, %v26107_v37  ;;  %v51118_v35 = vld [vmem:[#allocation2 + $0x1c0] sm:$0xff] }
0x2aa7   :  { %v26116_v56 = vand.u32 4294901760, %v26115_v43 }
0x2aa8   :  { %43395 = vmatmul.mubr.f32.vlgmr.msra.gmra.mrb[52].mxu0 %v26078_v52  ;;  %v26109_v29 = vand.u32 4294901760, %v26108_v18 }
0x2aa9   :  { %43397 = vmatprep.mubr.f32.mxu0 %v26088_v62 }
0x2aaa   :  { %v48968_v28 = vpack.c.bf16 %v26116_v56, %v26109_v29  ;;  %v57710_v56 = vand.u32 4294901760, %v55240_v60 }
0x2aac   :  { %43398 = vmatmul.mubr.f32.gmra.mrb[54].mxu0 %v26098_v0  ;;  %48969 = vmatprep.subr.bf16.mxu0 %v48968_v28 }
0x2aad   :  { %48971 = vmatpush3.bf16.msra.mxu0 %v48968_v28  ;;  %43404 = vmatprep.mubr.f32.mxu0 %v55237_v25 }
0x2aae   :  { %48973 = vmatprep.subr.bf16.mxu0 %v48972_v14 }
0x2ab0   :  { %43405 = vmatmul.mubr.f32.vlgmr.msra.gmra.mrb[52].mxu0 %v55248_v54 }
0x2ab1   :  { %43407 = vmatprep.mubr.f32.mxu0 %v55250_v30  ;;  %48975 = vmatpush3.bf16.msra.mxu0 %v48972_v14  ;;  %v51117_v14 = vld [vmem:[#allocation2 + $0x1c8] sm:$0xff] }
0x2ab2   :  { %48977 = vmatprep.subr.bf16.mxu0 %v48964_v55 }
0x2ab4   :  { %43408 = vmatmul.mubr.f32.gmra.mrb[54].mxu0 %v55254_v45 }
0x2ab5   :  { %43414 = vmatprep.mubr.f32.mxu0 %v55240_v60 }
0x2ab8   :  { %43415 = vmatmul.mubr.f32.vlgmr.msra.gmra.mrb[52].mxu0 %v26075_v7 }
0x2ab9   :  { %48979 = vmatpush3.bf16.msra.mxu0 %v48964_v55  ;;  %43417 = vmatprep.mubr.f32.mxu0 %v26085_v3 }
0x2aba   :  { %48981 = vmatprep.subr.bf16.mxu0 %v48980_v51 }
0x2abc   :  { %43418 = vmatmul.mubr.f32.gmra.mrb[54].mxu0 %v26095_v57  ;;  %v51119_v57 = vld [vmem:[#allocation2 + $0x1d8] sm:$0xff] }
0x2abd   :  { %43424 = vmatprep.mubr.f32.mxu0 %v57710_v56 }
0x2ac0   :  { %43425 = vmatmul.mubr.f32.vlgmr.msra.gmra.mrb[52].mxu0 %v26076_v38 }
0x2ac1   :  { %48983 = vmatpush3.bf16.msra.mxu0 %v48980_v51  ;;  %43427 = vmatprep.mubr.f32.mxu0 %v26086_v27 }
0x2ac2   :  { %48985 = vmatprep.subr.bf16.mxu0 %v48964_v55 }
0x2ac4   :  { %43428 = vmatmul.mubr.f32.gmra.mrb[54].mxu0 %v26096_v50 }
0x2ac5   :  { %43434 = vmatprep.mubr.f32.mxu0 %v55237_v25 }
0x2ac8   :  { %43435 = vmatmul.mubr.f32.vlgmr.msra.gmra.mrb[52].mxu0 %v55248_v54 }
0x2ac9   :  { %48987 = vmatpush3.bf16.msra.mxu0 %v48964_v55  ;;  %43437 = vmatprep.mubr.f32.mxu0 %v55250_v30 }
0x2acc   :  { %43438 = vmatmul.mubr.f32.gmra.mrb[54].mxu0 %v55254_v45 }
0x2acd   :  { %43444 = vmatprep.mubr.f32.mxu0 %v55237_v25  ;;  %v51120_v25 = vld [vmem:[#allocation2 + $0x1d0] sm:$0xff] }
0x2ad0   :  { %43445 = vmatmul.mubr.f32.vlgmr.msra.gmra.mrb[52].mxu0 %v55248_v54 }
0x2ad1   :  { %43447 = vmatprep.mubr.f32.mxu0 %v55250_v30 }
0x2ad4   :  { %43448 = vmatmul.mubr.f32.gmra.mrb[54].mxu0 %v55254_v45 }
0x2ad5   :  { %43686 = vmatprep.mubr.f32.mxu0 %v57623_v17 }
0x2ba3   :  { %v43446_v51 = vpop.f32.mrb[52].mxu0 }
0x2ba4   :  { %v26586_v39 = vmul.f32 %v51117_v14, %v43446_v51  ;;  %v26563_v63 = vpop.f32.mrb[53].mxu0  ;;  %v57711_v14 = vld [vmem:[#allocation124_spill] sm:$0xff] }
0x2ba5   :  { %v26585_v4 = vmul.f32 %v51118_v35, %v26563_v63  ;;  %v57713_v63 = vld [vmem:[#allocation115_spill] sm:$0xff]  ;;  %v57714_v35 = vld [vmem:[#allocation116_spill] sm:$0xff] }
0x2ba6   :  { %v55276_v29 = vand.u32 4294901760, %v26586_v39 }
0x2ba7   :  { %v55278_v44 = vand.u32 4294901760, %v26585_v4  ;;  %v43449_v6 = vpop.f32.mrb[54].mxu0 }
0x2ba8   :  { %v55281_v27 = vsub.f32 %v26586_v39, %v55276_v29  ;;  %v26588_v30 = vmul.f32 %v51119_v57, %v43449_v6  ;;  %v26575_v54 = vpop.f32.mrb[55].mxu0  ;;  %v57712_v39 = vld [vmem:[#allocation114_spill] sm:$0xff]  ;;  %v57716_v6 = vld [vmem:[#allocation125_spill] sm:$0xff] }
0x2ba9   :  { %v55284_v60 = vsub.f32 %v26585_v4, %v55278_v44  ;;  %v26587_v3 = vmul.f32 %v51120_v25, %v26575_v54  ;;  %v57715_v4 = vld [vmem:[#allocation117_spill] sm:$0xff]  ;;  %v57717_v57 = vld [vmem:[#allocation126_spill] sm:$0xff]  ;;  %v57719_v54 = vld [vmem:[#allocation128_spill] sm:$0xff] }
0x2baa   :  { %v26682_v7 = vand.u32 4294901760, %v55281_v27  ;;  %v55287_v45 = vand.u32 4294901760, %v26588_v30  ;;  %v57720_v25 = vld [vmem:[#allocation118_spill] sm:$0xff] }
0x2bab   :  { %v55289_v33 = vand.u32 4294901760, %v26587_v3  ;;  %v26672_v38 = vand.u32 4294901760, %v55284_v60 }
0x2bac   :  { %v26683_v55 = vsub.f32 %v55281_v27, %v26682_v7  ;;  %v55296_v50 = vsub.f32 %v26588_v30, %v55287_v45  ;;  %v57718_v30 = vld [vmem:[#allocation127_spill] sm:$0xff] }
0x2bad   :  { %v55299_v37 = vsub.f32 %v26587_v3, %v55289_v33  ;;  %v26673_v43 = vsub.f32 %v55284_v60, %v26672_v38  ;;  %v57721_v3 = vld [vmem:[#allocation119_spill] sm:$0xff] }
0x2bae   :  { %v26702_v52 = vand.u32 4294901760, %v55296_v50  ;;  %v26684_v62 = vand.u32 4294901760, %v26683_v55  ;;  %v57724_v55 = vld [vmem:[#allocation130_spill] sm:$0xff] }
0x2baf   :  { %v26674_v1 = vand.u32 4294901760, %v26673_v43  ;;  %v26692_v18 = vand.u32 4294901760, %v55299_v37  ;;  %v57725_v43 = vld [vmem:[#allocation131_spill] sm:$0xff] }
0x2bb0   :  { %v26703_v0 = vsub.f32 %v55296_v50, %v26702_v52 }
0x2bb1   :  { %43482 = vmatprep.mubr.f32.mxu1 %v26674_v1  ;;  %v26693_v28 = vsub.f32 %v55299_v37, %v26692_v18 }
0x2bb2   :  { %43483 = vmatmul.mubr.f32.vlgmr.msra.gmra.mrb[52].mxu1 %v26684_v62  ;;  %v26704_v51 = vand.u32 4294901760, %v26703_v0 }
0x2bb3   :  { %49023 = vmatpush3.bf16.msra.mxu1 %v57621_v41  ;;  %v26694_v56 = vand.u32 4294901760, %v26693_v28 }
0x2bb4   :  { %49025 = vmatprep.subr.bf16.mxu1 %v57624_v24 }
0x2bb5   :  { %43485 = vmatprep.mubr.f32.mxu1 %v26694_v56 }
0x2bb6   :  { %43486 = vmatmul.mubr.f32.gmra.mrb[54].mxu1 %v26704_v51 }
0x2bb7   :  { %49027 = vmatpush3.bf16.msra.mxu1 %v57624_v24  ;;  %43520 = vmatprep.mubr.f32.mxu1 %v55278_v44 }
0x2bb8   :  { %49029 = vmatprep.subr.bf16.mxu1 %v57625_v21 }
0x2bbb   :  { %49031 = vmatpush3.bf16.msra.mxu1 %v57625_v21 }
0x2bbc   :  { %49033 = vmatprep.subr.bf16.mxu1 %v57626_v22 }
0x2bbf   :  { %49035 = vmatpush3.bf16.msra.mxu1 %v57626_v22 }
0x2bc0   :  { %49037 = vmatprep.subr.bf16.mxu1 %v57711_v14 }
0x2bc3   :  { %49039 = vmatpush3.bf16.msra.mxu1 %v57711_v14 }
0x2bc4   :  { %49041 = vmatprep.subr.bf16.mxu1 %v57712_v39 }
0x2bc7   :  { %49043 = vmatpush3.bf16.msra.mxu1 %v57712_v39 }
0x2bc8   :  { %49045 = vmatprep.subr.bf16.mxu1 %v57713_v63 }
0x2bcb   :  { %49047 = vmatpush3.bf16.msra.mxu1 %v57713_v63 }
0x2bcc   :  { %49049 = vmatprep.subr.bf16.mxu1 %v57714_v35 }
0x2bcf   :  { %49051 = vmatpush3.bf16.msra.mxu1 %v57714_v35 }
0x2bd0   :  { %49053 = vmatprep.subr.bf16.mxu1 %v57715_v4 }
0x2bd2   :  { %43521 = vmatmul.mubr.f32.vlgmr.msra.gmra.mrb[52].mxu1 %v55276_v29 }
0x2bd3   :  { %43523 = vmatprep.mubr.f32.mxu1 %v55289_v33  ;;  %49055 = vmatpush3.bf16.msra.mxu1 %v57715_v4 }
0x2bd4   :  { %49057 = vmatprep.subr.bf16.mxu1 %v57716_v6 }
0x2bd6   :  { %43524 = vmatmul.mubr.f32.gmra.mrb[54].mxu1 %v55287_v45 }
0x2bd7   :  { %49059 = vmatpush3.bf16.msra.mxu1 %v57716_v6  ;;  %43558 = vmatprep.mubr.f32.mxu1 %v55284_v60  ;;  %v57722_v60 = vld [vmem:[#allocation120_spill] sm:$0xff] }
0x2bd8   :  { %49061 = vmatprep.subr.bf16.mxu1 %v57717_v57 }
0x2bdb   :  { %49063 = vmatpush3.bf16.msra.mxu1 %v57717_v57 }
0x2bdc   :  { %49065 = vmatprep.subr.bf16.mxu1 %v57718_v30 }
0x2bdf   :  { %49067 = vmatpush3.bf16.msra.mxu1 %v57718_v30 }
0x2be0   :  { %49069 = vmatprep.subr.bf16.mxu1 %v57719_v54 }
0x2be3   :  { %49071 = vmatpush3.bf16.msra.mxu1 %v57719_v54 }
0x2be4   :  { %49073 = vmatprep.subr.bf16.mxu1 %v57720_v25 }
0x2be7   :  { %49075 = vmatpush3.bf16.msra.mxu1 %v57720_v25 }
0x2be8   :  { %49077 = vmatprep.subr.bf16.mxu1 %v57721_v3 }
0x2beb   :  { %49079 = vmatpush3.bf16.msra.mxu1 %v57721_v3 }
0x2bec   :  { %49081 = vmatprep.subr.bf16.mxu1 %v57722_v60 }
0x2bef   :  { %49083 = vmatpush3.bf16.msra.mxu1 %v57722_v60 }
0x2bf0   :  { %49085 = vmatprep.subr.bf16.mxu1 %v57496_v42 }
0x2bf2   :  { %43559 = vmatmul.mubr.f32.vlgmr.msra.gmra.mrb[52].mxu1 %v55281_v27  ;;  %v57726_v27 = vld [vmem:[#allocation132_spill] sm:$0xff] }
0x2bf3   :  { %43561 = vmatprep.mubr.f32.mxu1 %v55299_v37  ;;  %49087 = vmatpush3.bf16.msra.mxu1 %v57496_v42  ;;  %v57728_v37 = vld [vmem:[#allocation134_spill] sm:$0xff] }
0x2bf4   :  { %49089 = vmatprep.subr.bf16.mxu1 %v57497_v46 }
0x2bf6   :  { %43562 = vmatmul.mubr.f32.gmra.mrb[54].mxu1 %v55296_v50  ;;  %v57729_v50 = vld [vmem:[#allocation135_spill] sm:$0xff] }
0x2bf7   :  { %49091 = vmatpush3.bf16.msra.mxu1 %v57497_v46  ;;  %43596 = vmatprep.mubr.f32.mxu1 %v26672_v38  ;;  %v57723_v38 = vld [vmem:[#allocation129_spill] sm:$0xff] }
0x2bf8   :  { %49093 = vmatprep.subr.bf16.mxu1 %v57615_v20 }
0x2bfb   :  { %49095 = vmatpush3.bf16.msra.mxu1 %v57615_v20 }
0x2bfc   :  { %49097 = vmatprep.subr.bf16.mxu1 %v57616_v9 }
0x2bff   :  { %49099 = vmatpush3.bf16.msra.mxu1 %v57616_v9 }
0x2c00   :  { %49101 = vmatprep.subr.bf16.mxu1 %v57617_v48 }
0x2c03   :  { %49103 = vmatpush3.bf16.msra.mxu1 %v57617_v48 }
0x2c04   :  { %49105 = vmatprep.subr.bf16.mxu1 %v57618_v34 }
0x2c07   :  { %49107 = vmatpush3.bf16.msra.mxu1 %v57618_v34 }
0x2c08   :  { %49109 = vmatprep.subr.bf16.mxu1 %v57619_v53 }
0x2c0b   :  { %49111 = vmatpush3.bf16.msra.mxu1 %v57619_v53 }
0x2c0c   :  { %49113 = vmatprep.subr.bf16.mxu1 %v57620_v40 }
0x2c0f   :  { %49115 = vmatpush3.bf16.msra.mxu1 %v57620_v40 }
0x2c10   :  { %49117 = vmatprep.subr.bf16.mxu1 %v57723_v38 }
0x2c12   :  { %43597 = vmatmul.mubr.f32.vlgmr.msra.gmra.mrb[52].mxu1 %v26682_v7  ;;  %v57727_v7 = vld [vmem:[#allocation133_spill] sm:$0xff] }
0x2c13   :  { %43599 = vmatprep.mubr.f32.mxu1 %v26692_v18  ;;  %49119 = vmatpush3.bf16.msra.mxu1 %v57723_v38 }
0x2c14   :  { %49121 = vmatprep.subr.bf16.mxu1 %v57724_v55 }
0x2c16   :  { %43600 = vmatmul.mubr.f32.gmra.mrb[54].mxu1 %v26702_v52  ;;  %v57730_v52 = vld [vmem:[#allocation136_spill] sm:$0xff] }
0x2c17   :  { %49123 = vmatpush3.bf16.msra.mxu1 %v57724_v55  ;;  %43634 = vmatprep.mubr.f32.mxu1 %v55278_v44 }
0x2c18   :  { %49125 = vmatprep.subr.bf16.mxu1 %v57725_v43 }
0x2c1b   :  { %49127 = vmatpush3.bf16.msra.mxu1 %v57725_v43 }
0x2c1c   :  { %49129 = vmatprep.subr.bf16.mxu1 %v57726_v27 }
0x2c1f   :  { %49131 = vmatpush3.bf16.msra.mxu1 %v57726_v27 }
0x2c20   :  { %49133 = vmatprep.subr.bf16.mxu1 %v57727_v7 }
0x2c23   :  { %49135 = vmatpush3.bf16.msra.mxu1 %v57727_v7 }
0x2c24   :  { %49137 = vmatprep.subr.bf16.mxu1 %v57728_v37 }
0x2c27   :  { %49139 = vmatpush3.bf16.msra.mxu1 %v57728_v37 }
0x2c28   :  { %49141 = vmatprep.subr.bf16.mxu1 %v57729_v50 }
0x2c2b   :  { %49143 = vmatpush3.bf16.msra.mxu1 %v57729_v50 }
0x2c2c   :  { %49145 = vmatprep.subr.bf16.mxu1 %v57730_v52 }
0x2c2f   :  { %49147 = vmatpush3.bf16.msra.mxu1 %v57730_v52 }
0x2c30   :  { %49149 = vmatprep.subr.bf16.mxu1 %v57496_v42 }
0x2c32   :  { %43635 = vmatmul.mubr.f32.vlgmr.msra.gmra.mrb[52].mxu1 %v55276_v29 }
0x2c33   :  { %43637 = vmatprep.mubr.f32.mxu1 %v55289_v33  ;;  %49151 = vmatpush3.bf16.msra.mxu1 %v57496_v42 }
0x2c34   :  { %49153 = vmatprep.subr.bf16.mxu1 %v57497_v46 }
0x2c36   :  { %43638 = vmatmul.mubr.f32.gmra.mrb[54].mxu1 %v55287_v45 }
0x2c37   :  { %49155 = vmatpush3.bf16.msra.mxu1 %v57497_v46  ;;  %43672 = vmatprep.mubr.f32.mxu1 %v55278_v44 }
0x2c38   :  { %49157 = vmatprep.subr.bf16.mxu1 %v57615_v20 }
0x2c3b   :  { %49159 = vmatpush3.bf16.msra.mxu1 %v57615_v20 }
0x2c3c   :  { %49161 = vmatprep.subr.bf16.mxu1 %v57616_v9 }
0x2c3f   :  { %49163 = vmatpush3.bf16.msra.mxu1 %v57616_v9 }
0x2c40   :  { %49165 = vmatprep.subr.bf16.mxu1 %v57617_v48 }
0x2c43   :  { %49167 = vmatpush3.bf16.msra.mxu1 %v57617_v48 }
0x2c44   :  { %49169 = vmatprep.subr.bf16.mxu1 %v57618_v34 }
0x2c47   :  { %49171 = vmatpush3.bf16.msra.mxu1 %v57618_v34 }
0x2c48   :  { %49173 = vmatprep.subr.bf16.mxu1 %v57619_v53 }
0x2c4b   :  { %49175 = vmatpush3.bf16.msra.mxu1 %v57619_v53 }
0x2c4c   :  { %49177 = vmatprep.subr.bf16.mxu1 %v57620_v40 }
0x2c4f   :  { %49179 = vmatpush3.bf16.msra.mxu1 %v57620_v40 }
0x2c50   :  { %49397 = vmatprep.subr.bf16.mxu1 %v57567_v13 }
0x2c52   :  { %43673 = vmatmul.mubr.f32.vlgmr.msra.gmra.mrb[52].mxu1 %v55276_v29 }
0x2c53   :  { %43675 = vmatprep.mubr.f32.mxu1 %v55289_v33  ;;  %49399 = vmatpush3.bf16.msra.mxu1 %v57567_v13 }
0x2c54   :  { %49401 = vmatprep.subr.bf16.mxu1 %v57568_v26 }
0x2c56   :  { %43676 = vmatmul.mubr.f32.gmra.mrb[54].mxu1 %v55287_v45 }
0x2c57   :  { %49403 = vmatpush3.bf16.msra.mxu1 %v57568_v26 }
0x2c58   :  { %49405 = vmatprep.subr.bf16.mxu1 %v57654_v5 }
0x2d25   :  { %v43674_v44 = vpop.f32.mrb[52].mxu1 }
0x2d26   :  { %v27363_v1 = vand.u32 4294901760, %v43674_v44  ;;  %v27337_v18 = vpop.f32.mrb[53].mxu1 }
0x2d27   :  { %v27360_v62 = vand.u32 4294901760, %v27337_v18 }
0x2d28   :  { %v27457_v0 = vsub.f32 %v43674_v44, %v27363_v1 }
0x2d29   :  { %v55416_v28 = vpack.c.bf16 %v27363_v1, %v27360_v62  ;;  %v27450_v29 = vsub.f32 %v27337_v18, %v27360_v62  ;;  %v43677_v56 = vpop.f32.mrb[54].mxu1 }
0x2d2a   :  { %v27458_v33 = vand.u32 4294901760, %v27457_v0  ;;  %v27369_v51 = vand.u32 4294901760, %v43677_v56  ;;  %v27349_v52 = vpop.f32.mrb[55].mxu1 }
0x2d2b   :  { %v27451_v50 = vand.u32 4294901760, %v27450_v29  ;;  %v27366_v37 = vand.u32 4294901760, %v27349_v52  ;;  %49181 = vmatprep.subr.bf16.mxu0 %v55416_v28  ;;  %v49196_v45 = vpack.c.bf16 %v27457_v0, %v27450_v29 }
0x2d2c   :  { %v27459_v7 = vsub.f32 %v27457_v0, %v27458_v33  ;;  %v27471_v27 = vsub.f32 %v43677_v56, %v27369_v51  ;;  %49183 = vmatpush3.bf16.msra.mxu0 %v55416_v28 }
0x2d2d   :  { %v27452_v43 = vsub.f32 %v27450_v29, %v27451_v50  ;;  %v49184_v55 = vpack.c.bf16 %v27369_v51, %v27366_v37  ;;  %v27464_v38 = vsub.f32 %v27349_v52, %v27366_v37  ;;  %v49212_v44 = vpack.c.bf16 %v27458_v33, %v27451_v50 }
0x2d2e   :  { %v27472_v1 = vand.u32 4294901760, %v27471_v27  ;;  %v27460_v60 = vand.u32 4294901760, %v27459_v7 }
0x2d2f   :  { %v27465_v18 = vand.u32 4294901760, %v27464_v38  ;;  %49185 = vmatprep.subr.bf16.mxu0 %v49184_v55  ;;  %v27453_v62 = vand.u32 4294901760, %v27452_v43  ;;  %v49200_v3 = vpack.c.bf16 %v27471_v27, %v27464_v38 }
0x2d30   :  { %v27473_v25 = vsub.f32 %v27471_v27, %v27472_v1  ;;  %49187 = vmatpush3.bf16.msra.mxu0 %v49184_v55 }
0x2d31   :  { %v27466_v54 = vsub.f32 %v27464_v38, %v27465_v18  ;;  %v49188_v30 = vpack.c.bf16 %v27460_v60, %v27453_v62  ;;  %v49216_v57 = vpack.c.bf16 %v27472_v1, %v27465_v18  ;;  %v57736_v18 = vld [vmem:[#allocation17_spill] sm:$0xff]  ;;  %v57737_v62 = vld [vmem:[#allocation10_spill] sm:$0xff] }
0x2d32   :  { %v27474_v6 = vand.u32 4294901760, %v27473_v25 }
0x2d33   :  { %43687 = vmatmul.mubr.f32.vlgmr.msra.gmra.mrb[56].mxu0 %v57647_v58  ;;  %49189 = vmatprep.subr.bf16.mxu0 %v49188_v30  ;;  %v27467_v0 = vand.u32 4294901760, %v27466_v54  ;;  %v51121_v54 = vld [vmem:[%s56270_s5] ss:$0 sm:$0xff] }
0x2d34   :  { %49191 = vmatpush3.bf16.msra.mxu0 %v49188_v30  ;;  %43697 = vmatprep.mubr.f32.mxu0 %v57648_v12  ;;  %v57731_v30 = vld [vmem:[#allocation5_spill] sm:$0xff] }
0x2d35   :  { %v49192_v37 = vpack.c.bf16 %v27474_v6, %v27467_v0  ;;  %v55429_v25 = vadd.f32 %v51121_v54, %v57731_v30  ;;  %v57732_v6 = vld [vmem:[#allocation8_spill] sm:$0xff] }
0x2d36   :  { %v55432_v60 = vadd.f32 %v51121_v54, %v57732_v6  ;;  %v57740_v54 = vld [vmem:[#allocation19_spill] sm:$0xff] }
0x2d37   :  { %49193 = vmatprep.subr.bf16.mxu0 %v49192_v37 }
0x2d38   :  { %49195 = vmatpush3.bf16.msra.mxu0 %v49192_v37  ;;  %v27888_v38 = vand.u32 4294901760, %v55432_v60  ;;  %v57739_v37 = vld [vmem:[#allocation11_spill] sm:$0xff] }
0x2d39   :  { %49197 = vmatprep.subr.bf16.mxu0 %v49196_v45 }
0x2d3a   :  { %v27976_v27 = vsub.f32 %v55432_v60, %v27888_v38 }
0x2d3b   :  { %43698 = vmatmul.mubr.f32.vlgmr.msra.gmra.mrb[56].mxu0 %v57649_v19 }
0x2d3c   :  { %49199 = vmatpush3.bf16.msra.mxu0 %v49196_v45  ;;  %43708 = vmatprep.mubr.f32.mxu0 %v57650_v16  ;;  %v27977_v7 = vand.u32 4294901760, %v27976_v27 }
0x2d3d   :  { %49201 = vmatprep.subr.bf16.mxu0 %v49200_v3 }
0x2d3e   :  { %v27978_v52 = vsub.f32 %v27976_v27, %v27977_v7 }
0x2d40   :  { %49203 = vmatpush3.bf16.msra.mxu0 %v49200_v3  ;;  %v27891_v3 = vand.u32 4294901760, %v55429_v25  ;;  %v27979_v33 = vand.u32 4294901760, %v27978_v52 }
0x2d41   :  { %49205 = vmatprep.subr.bf16.mxu0 %v55416_v28 }
0x2d42   :  { %v27983_v43 = vsub.f32 %v55429_v25, %v27891_v3  ;;  %v49228_v56 = vpack.c.bf16 %v27891_v3, %v27888_v38 }
0x2d43   :  { %43709 = vmatmul.mubr.f32.vlgmr.msra.gmra.mrb[56].mxu0 %v57651_v10 }
0x2d44   :  { %49207 = vmatpush3.bf16.msra.mxu0 %v55416_v28  ;;  %43719 = vmatprep.mubr.f32.mxu0 %v57652_v15  ;;  %v27984_v50 = vand.u32 4294901760, %v27983_v43  ;;  %v49236_v1 = vpack.c.bf16 %v27983_v43, %v27976_v27 }
0x2d45   :  { %49209 = vmatprep.subr.bf16.mxu0 %v49184_v55 }
0x2d46   :  { %v27985_v29 = vsub.f32 %v27983_v43, %v27984_v50  ;;  %v49244_v0 = vpack.c.bf16 %v27984_v50, %v27977_v7 }
0x2d48   :  { %49211 = vmatpush3.bf16.msra.mxu0 %v49184_v55  ;;  %v27986_v51 = vand.u32 4294901760, %v27985_v29 }
0x2d49   :  { %49213 = vmatprep.subr.bf16.mxu0 %v49212_v44 }
0x2d4a   :  { %v49232_v45 = vpack.c.bf16 %v27986_v51, %v27979_v33 }
0x2d4b   :  { %43720 = vmatmul.mubr.f32.vlgmr.msra.gmra.mrb[56].mxu0 %v57653_v59 }
0x2d4c   :  { %49215 = vmatpush3.bf16.msra.mxu0 %v49212_v44  ;;  %43730 = vmatprep.mubr.f32.mxu0 %v57648_v12  ;;  %v57734_v44 = vld [vmem:[#allocation20_spill] sm:$0xff] }
0x2d4d   :  { %49217 = vmatprep.subr.bf16.mxu0 %v49216_v57 }
0x2d50   :  { %49219 = vmatpush3.bf16.msra.mxu0 %v49216_v57  ;;  %v57733_v57 = vld [vmem:[#allocation12_spill] sm:$0xff] }
0x2d51   :  { %49221 = vmatprep.subr.bf16.mxu0 %v55416_v28 }
0x2d53   :  { %43731 = vmatmul.mubr.f32.vlgmr.msra.gmra.mrb[56].mxu0 %v57649_v19 }
0x2d54   :  { %49223 = vmatpush3.bf16.msra.mxu0 %v55416_v28  ;;  %43741 = vmatprep.mubr.f32.mxu0 %v57648_v12  ;;  %v57735_v28 = vld [vmem:[#allocation9_spill] sm:$0xff] }
0x2d55   :  { %49225 = vmatprep.subr.bf16.mxu0 %v49184_v55 }
0x2d58   :  { %49227 = vmatpush3.bf16.msra.mxu0 %v49184_v55  ;;  %v57738_v55 = vld [vmem:[#allocation18_spill] sm:$0xff] }
0x2d59   :  { %49229 = vmatprep.subr.bf16.mxu0 %v49228_v56 }
0x2d5b   :  { %43742 = vmatmul.mubr.f32.vlgmr.msra.gmra.mrb[56].mxu0 %v57649_v19 }
0x2d5c   :  { %49231 = vmatpush3.bf16.msra.mxu0 %v49228_v56  ;;  %43748 = vmatprep.mubr.f32.mxu0 %v57733_v57  ;;  %v57741_v57 = vld [vmem:[#allocation31_spill] sm:$0xff] }
0x2d5d   :  { %49233 = vmatprep.subr.bf16.mxu0 %v49232_v45 }
0x2d5f   :  { %43749 = vmatmul.mubr.f32.vlgmr.msra.gmra.mrb[58].mxu0 %v57734_v44  ;;  %v57742_v44 = vld [vmem:[#allocation33_spill] sm:$0xff] }
0x2d60   :  { %49235 = vmatpush3.bf16.msra.mxu0 %v49232_v45  ;;  %43755 = vmatprep.mubr.f32.mxu0 %v57735_v28 }
0x2d61   :  { %49237 = vmatprep.subr.bf16.mxu0 %v49236_v1 }
0x2d67   :  { %43756 = vmatmul.mubr.f32.vlgmr.msra.gmra.mrb[58].mxu0 %v57736_v18 }
0x2d68   :  { %49239 = vmatpush3.bf16.msra.mxu0 %v49236_v1  ;;  %43762 = vmatprep.mubr.f32.mxu0 %v57737_v62  ;;  %v57743_v1 = vld [vmem:[#allocation35_spill] sm:$0xff] }
0x2d69   :  { %49241 = vmatprep.subr.bf16.mxu0 %v49228_v56 }
0x2d6f   :  { %43763 = vmatmul.mubr.f32.vlgmr.msra.gmra.mrb[58].mxu0 %v57738_v55  ;;  %v57745_v55 = vld [vmem:[#allocation6_spill] sm:$0xff] }
0x2d70   :  { %49243 = vmatpush3.bf16.msra.mxu0 %v49228_v56  ;;  %43769 = vmatprep.mubr.f32.mxu0 %v57739_v37 }
0x2d71   :  { %49245 = vmatprep.subr.bf16.mxu0 %v49244_v0 }
0x2d77   :  { %43770 = vmatmul.mubr.f32.vlgmr.msra.gmra.mrb[58].mxu0 %v57740_v54 }
0x2d78   :  { %49247 = vmatpush3.bf16.msra.mxu0 %v49244_v0  ;;  %43776 = vmatprep.mubr.f32.mxu0 %v57735_v28 }
0x2d79   :  { %49249 = vmatprep.subr.bf16.mxu0 %v49228_v56 }
0x2d7f   :  { %43777 = vmatmul.mubr.f32.vlgmr.msra.gmra.mrb[58].mxu0 %v57736_v18 }
0x2d80   :  { %49251 = vmatpush3.bf16.msra.mxu0 %v49228_v56  ;;  %43783 = vmatprep.mubr.f32.mxu0 %v57735_v28  ;;  %v57744_v28 = vld [vmem:[#allocation36_spill] sm:$0xff] }
0x2d81   :  { %49253 = vmatprep.subr.bf16.mxu0 %v57556_v36 }
0x2d87   :  { %43784 = vmatmul.mubr.f32.vlgmr.msra.gmra.mrb[58].mxu0 %v57736_v18 }
0x2d88   :  { %49255 = vmatpush3.bf16.msra.mxu0 %v57556_v36 }
0x2d89   :  { %49257 = vmatprep.subr.bf16.mxu0 %v57557_v31 }
0x2d8c   :  { %49259 = vmatpush3.bf16.msra.mxu0 %v57557_v31 }
0x2d8d   :  { %49261 = vmatprep.subr.bf16.mxu0 %v57558_v23 }
0x2e2e   :  { %v55465_v30 = vpop.f32.mrb[56].mxu0 }
0x2e2f   :  { %v28395_v6 = vsel %vm1660_vm3, %v55465_v30, 0  ;;  %v55469_v3 = vpop.f32.mrb[57].mxu0 }
0x2e30   :  { %v55471_v38 = vand.u32 4294901760, %v28395_v6  ;;  %v28392_v43 = vsel %vm1660_vm3, %v55469_v3, 0 }
0x2e31   :  { %v55475_v27 = vand.u32 4294901760, %v28392_v43 }
0x2e32   :  { %v55478_v7 = vsub.f32 %v28395_v6, %v55471_v38  ;;  %v57747_v6 = vld [vmem:[#allocation7_spill] sm:$0xff] }
0x2e33   :  { %v55481_v50 = vsub.f32 %v28392_v43, %v55475_v27 }
0x2e34   :  { %v55484_v52 = vand.u32 4294901760, %v55478_v7 }
0x2e35   :  { %v55487_v29 = vand.u32 4294901760, %v55481_v50 }
0x2e36   :  { %v28479_v56 = vsub.f32 %v55478_v7, %v55484_v52 }
0x2e37   :  { %v28469_v33 = vsub.f32 %v55481_v50, %v55487_v29 }
0x2e38   :  { %v28480_v45 = vand.u32 4294901760, %v28479_v56 }
0x2e39   :  { %v28470_v51 = vand.u32 4294901760, %v28469_v33 }
0x2e3b   :  { %43794 = vmatprep.mubr.f32.mxu0 %v28470_v51 }
0x2e3c   :  { %43795 = vmatmul.mubr.f32.vlgmr.msra.gmra.mrb[60].mxu0 %v28480_v45 }
0x2e3d   :  { %49263 = vmatpush3.bf16.msra.mxu0 %v57558_v23  ;;  %43805 = vmatprep.mubr.f32.mxu0 %v55475_v27 }
0x2e3e   :  { %49265 = vmatprep.subr.bf16.mxu0 %v57574_v8 }
0x2e41   :  { %49267 = vmatpush3.bf16.msra.mxu0 %v57574_v8 }
0x2e42   :  { %49269 = vmatprep.subr.bf16.mxu0 %v57741_v57 }
0x2e44   :  { %43806 = vmatmul.mubr.f32.vlgmr.msra.gmra.mrb[60].mxu0 %v55471_v38 }
0x2e45   :  { %49271 = vmatpush3.bf16.msra.mxu0 %v57741_v57  ;;  %43816 = vmatprep.mubr.f32.mxu0 %v55481_v50 }
0x2e46   :  { %49273 = vmatprep.subr.bf16.mxu0 %v57742_v44 }
0x2e49   :  { %49275 = vmatpush3.bf16.msra.mxu0 %v57742_v44 }
0x2e4a   :  { %49277 = vmatprep.subr.bf16.mxu0 %v57556_v36 }
0x2e4c   :  { %43817 = vmatmul.mubr.f32.vlgmr.msra.gmra.mrb[60].mxu0 %v55478_v7 }
0x2e4d   :  { %49279 = vmatpush3.bf16.msra.mxu0 %v57556_v36  ;;  %43827 = vmatprep.mubr.f32.mxu0 %v55487_v29 }
0x2e4e   :  { %49281 = vmatprep.subr.bf16.mxu0 %v57557_v31 }
0x2e51   :  { %49283 = vmatpush3.bf16.msra.mxu0 %v57557_v31 }
0x2e52   :  { %49285 = vmatprep.subr.bf16.mxu0 %v57743_v1 }
0x2e54   :  { %43828 = vmatmul.mubr.f32.vlgmr.msra.gmra.mrb[60].mxu0 %v55484_v52 }
0x2e55   :  { %49287 = vmatpush3.bf16.msra.mxu0 %v57743_v1  ;;  %43838 = vmatprep.mubr.f32.mxu0 %v55475_v27 }
0x2e56   :  { %49289 = vmatprep.subr.bf16.mxu0 %v57744_v28 }
0x2e59   :  { %49291 = vmatpush3.bf16.msra.mxu0 %v57744_v28 }
0x2e5a   :  { %v43785_v18 = vpop.f32.mrb[58].mxu0  ;;  %49293 = vmatprep.subr.bf16.mxu0 %v57556_v36 }
0x2e5b   :  { %v28390_v62 = vsub.f32 %v55429_v25, %v43785_v18  ;;  %v55518_v0 = vadd.f32 %v43785_v18, %v57745_v55  ;;  %v28379_v37 = vpop.f32.mrb[59].mxu0 }
0x2e5c   :  { %v28389_v54 = vsub.f32 %v55432_v60, %v28379_v37  ;;  %v55522_v43 = vadd.f32 %v28379_v37, %v57747_v6  ;;  %43839 = vmatmul.mubr.f32.vlgmr.msra.gmra.mrb[60].mxu0 %v55471_v38 }
0x2e5d   :  { %57746 = vst [vmem:[#allocation13_spill] sm:$0xff] %v55518_v0  ;;  %v29457_v56 = vsel %vm1660_vm3, %v28390_v62, 0  ;;  %49295 = vmatpush3.bf16.msra.mxu0 %v57556_v36  ;;  %43849 = vmatprep.mubr.f32.mxu0 %v55475_v27 }
0x2e5e   :  { %57748 = vst [vmem:[#allocation16_spill] sm:$0xff] %v55522_v43  ;;  %v55528_v33 = vand.u32 4294901760, %v29457_v56  ;;  %v29454_v25 = vsel %vm1660_vm3, %v28389_v54, 0  ;;  %49297 = vmatprep.subr.bf16.mxu0 %v57557_v31 }
0x2e5f   :  { %v55532_v18 = vand.u32 4294901760, %v29454_v25 }
0x2e60   :  { %v55535_v60 = vsub.f32 %v29457_v56, %v55528_v33 }
0x2e61   :  { %v55538_v55 = vsub.f32 %v29454_v25, %v55532_v18  ;;  %49299 = vmatpush3.bf16.msra.mxu0 %v57557_v31 }
0x2e62   :  { %v55542_v62 = vand.u32 4294901760, %v55535_v60  ;;  %49301 = vmatprep.subr.bf16.mxu0 %v57567_v13 }
0x2e63   :  { %v55546_v37 = vand.u32 4294901760, %v55538_v55 }
0x2e64   :  { %43850 = vmatmul.mubr.f32.vlgmr.msra.gmra.mrb[60].mxu0 %v55471_v38  ;;  %v29541_v54 = vsub.f32 %v55535_v60, %v55542_v62 }
0x2e65   :  { %49303 = vmatpush3.bf16.msra.mxu0 %v57567_v13  ;;  %43860 = vmatprep.mubr.f32.mxu0 %v28470_v51  ;;  %v29531_v6 = vsub.f32 %v55538_v55, %v55546_v37  ;;  %v57749_v51 = vld [vmem:[#allocation23_spill] sm:$0xff] }
0x2e66   :  { %49305 = vmatprep.subr.bf16.mxu0 %v57568_v26  ;;  %v55557_v25 = vand.u32 4294901760, %v29541_v54  ;;  %v57750_v54 = vld [vmem:[#allocation26_spill] sm:$0xff] }
0x2e67   :  { %v55555_v56 = vand.u32 4294901760, %v29531_v6 }
0x2e69   :  { %49307 = vmatpush3.bf16.msra.mxu0 %v57568_v26  ;;  %43992 = vmatprep.mubr.f32.mxu1 %v55555_v56 }
0x2e6a   :  { %43993 = vmatmul.mubr.f32.vlgmr.msra.gmra.mrb[56].mxu1 %v55557_v25  ;;  %49309 = vmatprep.subr.bf16.mxu0 %v57654_v5 }
0x2e6b   :  { %49407 = vmatpush3.bf16.msra.mxu1 %v57654_v5  ;;  %44003 = vmatprep.mubr.f32.mxu1 %v55532_v18 }
0x2e6c   :  { %43861 = vmatmul.mubr.f32.vlgmr.msra.gmra.mrb[62].mxu0 %v28480_v45  ;;  %49409 = vmatprep.subr.bf16.mxu1 %v57749_v51  ;;  %v57764_v45 = vld [vmem:[#allocation150_spill] sm:$0xff] }
0x2e6d   :  { %49311 = vmatpush3.bf16.msra.mxu0 %v57654_v5  ;;  %43871 = vmatprep.mubr.f32.mxu0 %v55475_v27  ;;  %v57751_v5 = vld [vmem:[#allocation27_spill] sm:$0xff] }
0x2e6e   :  { %49313 = vmatprep.subr.bf16.mxu0 %v57749_v51 }
0x2e6f   :  { %49411 = vmatpush3.bf16.msra.mxu1 %v57749_v51 }
0x2e70   :  { %49413 = vmatprep.subr.bf16.mxu1 %v57750_v54 }
0x2e71   :  { %49315 = vmatpush3.bf16.msra.mxu0 %v57749_v51 }
0x2e72   :  { %44004 = vmatmul.mubr.f32.vlgmr.msra.gmra.mrb[56].mxu1 %v55528_v33  ;;  %49317 = vmatprep.subr.bf16.mxu0 %v57750_v54 }
0x2e73   :  { %49415 = vmatpush3.bf16.msra.mxu1 %v57750_v54  ;;  %44014 = vmatprep.mubr.f32.mxu1 %v55538_v55 }
0x2e74   :  { %43872 = vmatmul.mubr.f32.vlgmr.msra.gmra.mrb[62].mxu0 %v55471_v38  ;;  %49417 = vmatprep.subr.bf16.mxu1 %v57751_v5 }
0x2e75   :  { %49319 = vmatpush3.bf16.msra.mxu0 %v57750_v54  ;;  %43882 = vmatprep.mubr.f32.mxu0 %v55481_v50  ;;  %v57752_v50 = vld [vmem:[#allocation32_spill] sm:$0xff] }
0x2e76   :  { %49321 = vmatprep.subr.bf16.mxu0 %v57751_v5 }
0x2e77   :  { %49419 = vmatpush3.bf16.msra.mxu1 %v57751_v5 }
0x2e78   :  { %49421 = vmatprep.subr.bf16.mxu1 %v57567_v13 }
0x2e79   :  { %49323 = vmatpush3.bf16.msra.mxu0 %v57751_v5 }
0x2e7a   :  { %44015 = vmatmul.mubr.f32.vlgmr.msra.gmra.mrb[56].mxu1 %v55535_v60  ;;  %49325 = vmatprep.subr.bf16.mxu0 %v57567_v13 }
0x2e7b   :  { %49423 = vmatpush3.bf16.msra.mxu1 %v57567_v13  ;;  %44025 = vmatprep.mubr.f32.mxu1 %v55546_v37 }
0x2e7c   :  { %43883 = vmatmul.mubr.f32.vlgmr.msra.gmra.mrb[62].mxu0 %v55478_v7  ;;  %49425 = vmatprep.subr.bf16.mxu1 %v57568_v26  ;;  %v57753_v7 = vld [vmem:[#allocation34_spill] sm:$0xff] }
0x2e7d   :  { %49327 = vmatpush3.bf16.msra.mxu0 %v57567_v13  ;;  %43893 = vmatprep.mubr.f32.mxu0 %v55487_v29  ;;  %v57763_v29 = vld [vmem:[#allocation149_spill] sm:$0xff] }
0x2e7e   :  { %49329 = vmatprep.subr.bf16.mxu0 %v57568_v26 }
0x2e7f   :  { %49427 = vmatpush3.bf16.msra.mxu1 %v57568_v26 }
0x2e80   :  { %49429 = vmatprep.subr.bf16.mxu1 %v57752_v50 }
0x2e81   :  { %49331 = vmatpush3.bf16.msra.mxu0 %v57568_v26 }
0x2e82   :  { %44026 = vmatmul.mubr.f32.vlgmr.msra.gmra.mrb[56].mxu1 %v55542_v62  ;;  %49333 = vmatprep.subr.bf16.mxu0 %v57752_v50 }
0x2e83   :  { %49431 = vmatpush3.bf16.msra.mxu1 %v57752_v50  ;;  %44036 = vmatprep.mubr.f32.mxu1 %v55532_v18 }
0x2e84   :  { %43894 = vmatmul.mubr.f32.vlgmr.msra.gmra.mrb[62].mxu0 %v55484_v52  ;;  %49433 = vmatprep.subr.bf16.mxu1 %v57753_v7  ;;  %v57761_v52 = vld [vmem:[#allocation147_spill] sm:$0xff] }
0x2e85   :  { %49335 = vmatpush3.bf16.msra.mxu0 %v57752_v50  ;;  %43904 = vmatprep.mubr.f32.mxu0 %v55475_v27 }
0x2e86   :  { %49337 = vmatprep.subr.bf16.mxu0 %v57753_v7 }
0x2e87   :  { %49435 = vmatpush3.bf16.msra.mxu1 %v57753_v7 }
0x2e88   :  { %49437 = vmatprep.subr.bf16.mxu1 %v57567_v13 }
0x2e89   :  { %49339 = vmatpush3.bf16.msra.mxu0 %v57753_v7 }
0x2e8a   :  { %44037 = vmatmul.mubr.f32.vlgmr.msra.gmra.mrb[56].mxu1 %v55528_v33  ;;  %49341 = vmatprep.subr.bf16.mxu0 %v57567_v13 }
0x2e8b   :  { %49439 = vmatpush3.bf16.msra.mxu1 %v57567_v13  ;;  %44047 = vmatprep.mubr.f32.mxu1 %v55532_v18 }
0x2e8c   :  { %43905 = vmatmul.mubr.f32.vlgmr.msra.gmra.mrb[62].mxu0 %v55471_v38  ;;  %49441 = vmatprep.subr.bf16.mxu1 %v57568_v26 }
0x2e8d   :  { %49343 = vmatpush3.bf16.msra.mxu0 %v57567_v13  ;;  %43915 = vmatprep.mubr.f32.mxu0 %v55475_v27  ;;  %v57755_v13 = vld [vmem:[#allocation80_spill] sm:$0xff]  ;;  %v57759_v27 = vld [vmem:[#allocation145_spill] sm:$0xff] }
0x2e8e   :  { %49345 = vmatprep.subr.bf16.mxu0 %v57568_v26 }
0x2e8f   :  { %49443 = vmatpush3.bf16.msra.mxu1 %v57568_v26 }
0x2e90   :  { %49829 = vmatprep.subr.bf16.mxu1 %v57479_v2 }
0x2e91   :  { %49347 = vmatpush3.bf16.msra.mxu0 %v57568_v26  ;;  %v57756_v26 = vld [vmem:[#allocation81_spill] sm:$0xff] }
0x2e92   :  { %44048 = vmatmul.mubr.f32.vlgmr.msra.gmra.mrb[56].mxu1 %v55528_v33  ;;  %49349 = vmatprep.subr.bf16.mxu0 %v57556_v36 }
0x2e93   :  { %49831 = vmatpush3.bf16.msra.mxu1 %v57479_v2 }
0x2e94   :  { %43916 = vmatmul.mubr.f32.vlgmr.msra.gmra.mrb[62].mxu0 %v55471_v38  ;;  %49833 = vmatprep.subr.bf16.mxu1 %v57480_v32  ;;  %v57758_v38 = vld [vmem:[#allocation40_spill] sm:$0xff] }
0x2e95   :  { %49351 = vmatpush3.bf16.msra.mxu0 %v57556_v36  ;;  %43926 = vmatprep.mubr.f32.mxu0 %v55555_v56 }
0x2e96   :  { %49353 = vmatprep.subr.bf16.mxu0 %v57557_v31 }
0x2e97   :  { %49835 = vmatpush3.bf16.msra.mxu1 %v57480_v32 }
0x2e98   :  { %49837 = vmatprep.subr.bf16.mxu1 %v57481_v49 }
0x2e99   :  { %49355 = vmatpush3.bf16.msra.mxu0 %v57557_v31 }
0x2e9a   :  { %49357 = vmatprep.subr.bf16.mxu0 %v57558_v23 }
0x2e9b   :  { %49839 = vmatpush3.bf16.msra.mxu1 %v57481_v49 }
0x2e9c   :  { %43927 = vmatmul.mubr.f32.vlgmr.msra.gmra.mrb[64].mxu0 %v55557_v25  ;;  %49841 = vmatprep.subr.bf16.mxu1 %v57482_v61 }
0x2e9d   :  { %49359 = vmatpush3.bf16.msra.mxu0 %v57558_v23  ;;  %43937 = vmatprep.mubr.f32.mxu0 %v55532_v18  ;;  %v57754_v23 = vld [vmem:[#allocation79_spill] sm:$0xff] }
0x2e9e   :  { %49361 = vmatprep.subr.bf16.mxu0 %v57574_v8 }
0x2e9f   :  { %49843 = vmatpush3.bf16.msra.mxu1 %v57482_v61 }
0x2ea0   :  { %49845 = vmatprep.subr.bf16.mxu1 %v57483_v11 }
0x2ea1   :  { %49363 = vmatpush3.bf16.msra.mxu0 %v57574_v8  ;;  %v57757_v8 = vld [vmem:[#allocation39_spill] sm:$0xff] }
0x2ea2   :  { %49365 = vmatprep.subr.bf16.mxu0 %v57741_v57 }
0x2ea3   :  { %49847 = vmatpush3.bf16.msra.mxu1 %v57483_v11 }
0x2ea4   :  { %43938 = vmatmul.mubr.f32.vlgmr.msra.gmra.mrb[64].mxu0 %v55528_v33  ;;  %49849 = vmatprep.subr.bf16.mxu1 %v57484_v47 }
0x2ea5   :  { %49367 = vmatpush3.bf16.msra.mxu0 %v57741_v57  ;;  %43948 = vmatprep.mubr.f32.mxu0 %v55538_v55  ;;  %v57765_v57 = vld [vmem:[#allocation151_spill] sm:$0xff] }
0x2ea6   :  { %49369 = vmatprep.subr.bf16.mxu0 %v57742_v44 }
0x2ea7   :  { %49851 = vmatpush3.bf16.msra.mxu1 %v57484_v47 }
0x2ea8   :  { %49853 = vmatprep.subr.bf16.mxu1 %v57754_v23 }
0x2ea9   :  { %49371 = vmatpush3.bf16.msra.mxu0 %v57742_v44 }
0x2eaa   :  { %49373 = vmatprep.subr.bf16.mxu0 %v57556_v36 }
0x2eab   :  { %49855 = vmatpush3.bf16.msra.mxu1 %v57754_v23 }
0x2eac   :  { %43949 = vmatmul.mubr.f32.vlgmr.msra.gmra.mrb[64].mxu0 %v55535_v60  ;;  %49857 = vmatprep.subr.bf16.mxu1 %v57755_v13 }
0x2ead   :  { %49375 = vmatpush3.bf16.msra.mxu0 %v57556_v36  ;;  %43959 = vmatprep.mubr.f32.mxu0 %v55546_v37 }
0x2eae   :  { %49377 = vmatprep.subr.bf16.mxu0 %v57557_v31 }
0x2eaf   :  { %49859 = vmatpush3.bf16.msra.mxu1 %v57755_v13 }
0x2eb0   :  { %49861 = vmatprep.subr.bf16.mxu1 %v57756_v26 }
0x2eb1   :  { %49379 = vmatpush3.bf16.msra.mxu0 %v57557_v31 }
0x2eb2   :  { %49381 = vmatprep.subr.bf16.mxu0 %v57743_v1 }
0x2eb4   :  { %43960 = vmatmul.mubr.f32.vlgmr.msra.gmra.mrb[64].mxu0 %v55542_v62 }
0x2eb5   :  { %49383 = vmatpush3.bf16.msra.mxu0 %v57743_v1  ;;  %43970 = vmatprep.mubr.f32.mxu0 %v55532_v18 }
0x2eb6   :  { %49385 = vmatprep.subr.bf16.mxu0 %v57744_v28 }
0x2eb9   :  { %49387 = vmatpush3.bf16.msra.mxu0 %v57744_v28 }
0x2eba   :  { %49389 = vmatprep.subr.bf16.mxu0 %v57556_v36 }
0x2ebc   :  { %43971 = vmatmul.mubr.f32.vlgmr.msra.gmra.mrb[64].mxu0 %v55528_v33 }
0x2ebd   :  { %49391 = vmatpush3.bf16.msra.mxu0 %v57556_v36  ;;  %43981 = vmatprep.mubr.f32.mxu0 %v55532_v18  ;;  %v57760_v36 = vld [vmem:[#allocation146_spill] sm:$0xff] }
0x2ebe   :  { %49393 = vmatprep.subr.bf16.mxu0 %v57557_v31 }
0x2ec1   :  { %49395 = vmatpush3.bf16.msra.mxu0 %v57557_v31  ;;  %v57762_v31 = vld [vmem:[#allocation148_spill] sm:$0xff] }
0x2ec2   :  { %49445 = vmatprep.subr.bf16.mxu0 %v57757_v8 }
0x2ec4   :  { %43982 = vmatmul.mubr.f32.vlgmr.msra.gmra.mrb[64].mxu0 %v55528_v33 }
0x2ec5   :  { %49447 = vmatpush3.bf16.msra.mxu0 %v57757_v8 }
0x2ec6   :  { %49449 = vmatprep.subr.bf16.mxu0 %v57758_v38 }
0x2ec9   :  { %49451 = vmatpush3.bf16.msra.mxu0 %v57758_v38 }
0x2eca   :  { %49453 = vmatprep.subr.bf16.mxu0 %v57759_v27 }
0x2ecd   :  { %49455 = vmatpush3.bf16.msra.mxu0 %v57759_v27 }
0x2ece   :  { %49457 = vmatprep.subr.bf16.mxu0 %v57760_v36 }
0x2ed1   :  { %49459 = vmatpush3.bf16.msra.mxu0 %v57760_v36 }
0x2ed2   :  { %49461 = vmatprep.subr.bf16.mxu0 %v57761_v52 }
0x2ed5   :  { %49463 = vmatpush3.bf16.msra.mxu0 %v57761_v52 }
0x2ed6   :  { %49465 = vmatprep.subr.bf16.mxu0 %v57762_v31 }
0x2ed9   :  { %49467 = vmatpush3.bf16.msra.mxu0 %v57762_v31 }
0x2eda   :  { %49469 = vmatprep.subr.bf16.mxu0 %v57763_v29 }
0x2edd   :  { %49471 = vmatpush3.bf16.msra.mxu0 %v57763_v29 }
0x2ede   :  { %49473 = vmatprep.subr.bf16.mxu0 %v57764_v45 }
0x2ee1   :  { %49475 = vmatpush3.bf16.msra.mxu0 %v57764_v45 }
0x2ee2   :  { %49477 = vmatprep.subr.bf16.mxu0 %v57765_v57 }
0x2f37   :  { %v43851_v44 = vpop.f32.mrb[60].mxu0 }
0x2f38   :  { %v28915_v1 = vpop.f32.mrb[61].mxu0 }
0x2f65   :  { %v44049_v28 = vpop.f32.mrb[56].mxu1 }
0x2f66   :  { %v30522_v33 = vmul.f32 %v44049_v28, %v43851_v44  ;;  %v30505_v18 = vpop.f32.mrb[57].mxu1 }
0x2f67   :  { %v43917_v60 = vpop.f32.mrb[62].mxu0  ;;  %v30521_v55 = vmul.f32 %v30505_v18, %v28915_v1 }
0x2f68   :  { %v30518_v62 = vmul.f32 %v44049_v28, %v43917_v60  ;;  %v29443_v37 = vpop.f32.mrb[63].mxu0 }
0x2f69   :  { %v30517_v6 = vmul.f32 %v30505_v18, %v29443_v37 }
0x2f97   :  { %v43983_v56 = vpop.f32.mrb[64].mxu0 }
0x2f98   :  { %v30516_v25 = vmul.f32 %v43983_v56, %v43851_v44  ;;  %v30524_v51 = vmul.f32 %v43983_v56, %v43917_v60  ;;  %v29977_v54 = vpop.f32.mrb[65].mxu0  ;;  %v57770_v56 = vld [vmem:[#allocation156_spill] sm:$0xff] }
0x2f99   :  { %v30515_v5 = vmul.f32 %v29977_v54, %v28915_v1  ;;  %v30523_v50 = vmul.f32 %v29977_v54, %v29443_v37  ;;  %v57774_v54 = vld [vmem:[#allocation160_spill] sm:$0xff] }
0x2f9a   :  { %v55691_v7 = vadd.f32 %v30518_v62, %v30516_v25  ;;  %v30526_v43 = vsub.f32 %v30522_v33, %v30524_v51  ;;  %v57772_v25 = vld [vmem:[#allocation158_spill] sm:$0xff]  ;;  %v57773_v51 = vld [vmem:[#allocation159_spill] sm:$0xff] }
0x2f9b   :  { %v55693_v0 = vadd.f32 %v30517_v6, %v30515_v5  ;;  %v30525_v59 = vsub.f32 %v30521_v55, %v30523_v50  ;;  %v57766_v55 = vld [vmem:[#allocation152_spill] sm:$0xff]  ;;  %v57769_v6 = vld [vmem:[#allocation155_spill] sm:$0xff]  ;;  %v57775_v5 = vld [vmem:[#allocation161_spill] sm:$0xff] }
0x2f9c   :  { %v55695_v15 = vand.u32 4294901760, %v30526_v43  ;;  %v57776_v50 = vld [vmem:[#allocation162_spill] sm:$0xff] }
0x2f9d   :  { %v55697_v10 = vand.u32 4294901760, %v30525_v59 }
0x2f9e   :  { %v55700_v28 = vsub.f32 %v30526_v43, %v55695_v15  ;;  %v57767_v43 = vld [vmem:[#allocation153_spill] sm:$0xff] }
0x2f9f   :  { %v30609_v18 = vsub.f32 %v30525_v59, %v55697_v10  ;;  %v57768_v59 = vld [vmem:[#allocation154_spill] sm:$0xff] }
0x2fa0   :  { %v30620_v44 = vand.u32 4294901760, %v55700_v28 }
0x2fa1   :  { %v30610_v60 = vand.u32 4294901760, %v30609_v18 }
0x2fa2   :  { %v30621_v1 = vsub.f32 %v55700_v28, %v30620_v44 }
0x2fa3   :  { %v30611_v62 = vsub.f32 %v30609_v18, %v30610_v60 }
0x2fa4   :  { %v30622_v33 = vand.u32 4294901760, %v30621_v1  ;;  %v57777_v1 = vld [vmem:[#allocation163_spill] sm:$0xff] }
0x2fa5   :  { %v30612_v37 = vand.u32 4294901760, %v30611_v62  ;;  %v57778_v62 = vld [vmem:[#allocation164_spill] sm:$0xff] }
0x2fa7   :  { %44082 = vmatprep.mubr.f32.mxu0 %v30612_v37  ;;  %v57780_v37 = vld [vmem:[#allocation166_spill] sm:$0xff] }
0x2fa8   :  { %44083 = vmatmul.mubr.f32.vlgmr.msra.gmra.mrb[66].mxu0 %v30622_v33  ;;  %v57783_v33 = vld [vmem:[#allocation169_spill] sm:$0xff] }
0x2fa9   :  { %49479 = vmatpush3.bf16.msra.mxu0 %v57765_v57  ;;  %44117 = vmatprep.mubr.f32.mxu0 %v55697_v10  ;;  %v57771_v57 = vld [vmem:[#allocation157_spill] sm:$0xff] }
0x2faa   :  { %49481 = vmatprep.subr.bf16.mxu0 %v57766_v55 }
0x2fad   :  { %49483 = vmatpush3.bf16.msra.mxu0 %v57766_v55  ;;  %v57784_v55 = vld [vmem:[#allocation170_spill] sm:$0xff] }
0x2fae   :  { %49485 = vmatprep.subr.bf16.mxu0 %v57767_v43 }
0x2fb1   :  { %49487 = vmatpush3.bf16.msra.mxu0 %v57767_v43  ;;  %v57785_v43 = vld [vmem:[#allocation171_spill] sm:$0xff] }
0x2fb2   :  { %49489 = vmatprep.subr.bf16.mxu0 %v57768_v59 }
0x2fb5   :  { %49491 = vmatpush3.bf16.msra.mxu0 %v57768_v59  ;;  %v57787_v59 = vld [vmem:[#allocation173_spill] sm:$0xff] }
0x2fb6   :  { %49493 = vmatprep.subr.bf16.mxu0 %v57769_v6 }
0x2fb9   :  { %49495 = vmatpush3.bf16.msra.mxu0 %v57769_v6  ;;  %v57788_v6 = vld [vmem:[#allocation174_spill] sm:$0xff] }
0x2fba   :  { %49497 = vmatprep.subr.bf16.mxu0 %v57770_v56 }
0x2fbd   :  { %49499 = vmatpush3.bf16.msra.mxu0 %v57770_v56  ;;  %v55784_v56 = vand.u32 4294901760, %v55693_v0 }
0x2fbe   :  { %49501 = vmatprep.subr.bf16.mxu0 %v57771_v57 }
0x2fc1   :  { %49503 = vmatpush3.bf16.msra.mxu0 %v57771_v57  ;;  %v57794_v57 = vld [vmem:[#allocation51_spill] sm:$0xff] }
0x2fc2   :  { %49505 = vmatprep.subr.bf16.mxu0 %v57772_v25 }
0x2fc5   :  { %49507 = vmatpush3.bf16.msra.mxu0 %v57772_v25  ;;  %v57795_v25 = vld [vmem:[#allocation56_spill] sm:$0xff] }
0x2fc6   :  { %49509 = vmatprep.subr.bf16.mxu0 %v57773_v51 }
0x2fc8   :  { %44118 = vmatmul.mubr.f32.vlgmr.msra.gmra.mrb[66].mxu0 %v55695_v15 }
0x2fc9   :  { %49511 = vmatpush3.bf16.msra.mxu0 %v57773_v51  ;;  %44152 = vmatprep.mubr.f32.mxu0 %v30609_v18  ;;  %v57779_v18 = vld [vmem:[#allocation165_spill] sm:$0xff] }
0x2fca   :  { %49513 = vmatprep.subr.bf16.mxu0 %v57774_v54 }
0x2fcd   :  { %49515 = vmatpush3.bf16.msra.mxu0 %v57774_v54  ;;  %v57796_v54 = vld [vmem:[#allocation57_spill] sm:$0xff] }
0x2fce   :  { %49517 = vmatprep.subr.bf16.mxu0 %v57775_v5 }
0x2fd1   :  { %49519 = vmatpush3.bf16.msra.mxu0 %v57775_v5 }
0x2fd2   :  { %49521 = vmatprep.subr.bf16.mxu0 %v57776_v50 }
0x2fd5   :  { %49523 = vmatpush3.bf16.msra.mxu0 %v57776_v50 }
0x2fd6   :  { %49525 = vmatprep.subr.bf16.mxu0 %v57777_v1 }
0x2fd9   :  { %49527 = vmatpush3.bf16.msra.mxu0 %v57777_v1  ;;  %v57797_v1 = vld [vmem:[#allocation41_spill] sm:$0xff] }
0x2fda   :  { %49529 = vmatprep.subr.bf16.mxu0 %v57778_v62 }
0x2fdd   :  { %49531 = vmatpush3.bf16.msra.mxu0 %v57778_v62  ;;  %v57799_v62 = vld [vmem:[#allocation47_spill] sm:$0xff] }
0x2fde   :  { %49533 = vmatprep.subr.bf16.mxu0 %v57779_v18 }
0x2fe1   :  { %49535 = vmatpush3.bf16.msra.mxu0 %v57779_v18  ;;  %v57800_v18 = vld [vmem:[#allocation48_spill] sm:$0xff] }
0x2fe2   :  { %49537 = vmatprep.subr.bf16.mxu0 %v57780_v37 }
0x2fe5   :  { %49539 = vmatpush3.bf16.msra.mxu0 %v57780_v37  ;;  %v57801_v37 = vld [vmem:[#allocation49_spill] sm:$0xff] }
0x2fe6   :  { %49541 = vmatprep.subr.bf16.mxu0 %v57757_v8 }
0x2fe8   :  { %44153 = vmatmul.mubr.f32.vlgmr.msra.gmra.mrb[66].mxu0 %v55700_v28  ;;  %v57781_v28 = vld [vmem:[#allocation167_spill] sm:$0xff] }
0x2fe9   :  { %49543 = vmatpush3.bf16.msra.mxu0 %v57757_v8  ;;  %44187 = vmatprep.mubr.f32.mxu0 %v30610_v60  ;;  %v57782_v60 = vld [vmem:[#allocation168_spill] sm:$0xff] }
0x2fea   :  { %49545 = vmatprep.subr.bf16.mxu0 %v57758_v38 }
0x2fed   :  { %49547 = vmatpush3.bf16.msra.mxu0 %v57758_v38 }
0x2fee   :  { %49549 = vmatprep.subr.bf16.mxu0 %v57759_v27 }
0x2ff1   :  { %49551 = vmatpush3.bf16.msra.mxu0 %v57759_v27 }
0x2ff2   :  { %49553 = vmatprep.subr.bf16.mxu0 %v57760_v36 }
0x2ff5   :  { %49555 = vmatpush3.bf16.msra.mxu0 %v57760_v36 }
0x2ff6   :  { %49557 = vmatprep.subr.bf16.mxu0 %v57761_v52 }
0x2ff9   :  { %49559 = vmatpush3.bf16.msra.mxu0 %v57761_v52 }
0x2ffa   :  { %49561 = vmatprep.subr.bf16.mxu0 %v57762_v31 }
0x2ffd   :  { %49563 = vmatpush3.bf16.msra.mxu0 %v57762_v31 }
0x2ffe   :  { %49565 = vmatprep.subr.bf16.mxu0 %v57763_v29 }
0x3001   :  { %49567 = vmatpush3.bf16.msra.mxu0 %v57763_v29 }
0x3002   :  { %49569 = vmatprep.subr.bf16.mxu0 %v57764_v45 }
0x3005   :  { %49571 = vmatpush3.bf16.msra.mxu0 %v57764_v45 }
0x3006   :  { %49573 = vmatprep.subr.bf16.mxu0 %v57781_v28 }
0x3008   :  { %44188 = vmatmul.mubr.f32.vlgmr.msra.gmra.mrb[66].mxu0 %v30620_v44  ;;  %v57786_v44 = vld [vmem:[#allocation172_spill] sm:$0xff] }
0x3009   :  { %49575 = vmatpush3.bf16.msra.mxu0 %v57781_v28  ;;  %44222 = vmatprep.mubr.f32.mxu0 %v55697_v10  ;;  %v57802_v28 = vld [vmem:[#allocation52_spill] sm:$0xff] }
0x300a   :  { %49577 = vmatprep.subr.bf16.mxu0 %v57782_v60 }
0x300d   :  { %49579 = vmatpush3.bf16.msra.mxu0 %v57782_v60  ;;  %v57803_v60 = vld [vmem:[#allocation53_spill] sm:$0xff] }
0x300e   :  { %49581 = vmatprep.subr.bf16.mxu0 %v57783_v33 }
0x3011   :  { %49583 = vmatpush3.bf16.msra.mxu0 %v57783_v33  ;;  %v57804_v33 = vld [vmem:[#allocation54_spill] sm:$0xff] }
0x3012   :  { %49585 = vmatprep.subr.bf16.mxu0 %v57784_v55 }
0x3015   :  { %49587 = vmatpush3.bf16.msra.mxu0 %v57784_v55  ;;  %v57805_v55 = vld [vmem:[#allocation55_spill] sm:$0xff] }
0x3016   :  { %49589 = vmatprep.subr.bf16.mxu0 %v57785_v43 }
0x3019   :  { %49591 = vmatpush3.bf16.msra.mxu0 %v57785_v43  ;;  %v57806_v43 = vld [vmem:[#allocation58_spill] sm:$0xff] }
0x301a   :  { %49593 = vmatprep.subr.bf16.mxu0 %v57786_v44 }
0x301d   :  { %49595 = vmatpush3.bf16.msra.mxu0 %v57786_v44  ;;  %v57807_v44 = vld [vmem:[#allocation59_spill] sm:$0xff] }
0x301e   :  { %49597 = vmatprep.subr.bf16.mxu0 %v57787_v59 }
0x3021   :  { %49599 = vmatpush3.bf16.msra.mxu0 %v57787_v59  ;;  %v57808_v59 = vld [vmem:[#allocation60_spill] sm:$0xff] }
0x3022   :  { %49601 = vmatprep.subr.bf16.mxu0 %v57788_v6 }
0x3025   :  { %49603 = vmatpush3.bf16.msra.mxu0 %v57788_v6  ;;  %v57809_v6 = vld [vmem:[#allocation61_spill] sm:$0xff] }
0x3026   :  { %49605 = vmatprep.subr.bf16.mxu0 %v57757_v8 }
0x3028   :  { %44223 = vmatmul.mubr.f32.vlgmr.msra.gmra.mrb[66].mxu0 %v55695_v15 }
0x3029   :  { %49607 = vmatpush3.bf16.msra.mxu0 %v57757_v8  ;;  %44257 = vmatprep.mubr.f32.mxu0 %v55697_v10  ;;  %v55790_v10 = vsub.f32 %v55693_v0, %v55784_v56 }
0x302a   :  { %49609 = vmatprep.subr.bf16.mxu0 %v57758_v38 }
0x302b   :  { %v31294_v8 = vand.u32 4294901760, %v55790_v10 }
0x302d   :  { %49611 = vmatpush3.bf16.msra.mxu0 %v57758_v38  ;;  %v31295_v38 = vsub.f32 %v55790_v10, %v31294_v8 }
0x302e   :  { %49613 = vmatprep.subr.bf16.mxu0 %v57759_v27 }
0x302f   :  { %v31296_v0 = vand.u32 4294901760, %v31295_v38  ;;  %v57810_v38 = vld [vmem:[#allocation62_spill] sm:$0xff] }
0x3031   :  { %49615 = vmatpush3.bf16.msra.mxu0 %v57759_v27  ;;  %v57789_v27 = vld [vmem:[#allocation42_spill] sm:$0xff] }
0x3032   :  { %49617 = vmatprep.subr.bf16.mxu0 %v57760_v36 }
0x3035   :  { %49619 = vmatpush3.bf16.msra.mxu0 %v57760_v36  ;;  %v57790_v36 = vld [vmem:[#allocation43_spill] sm:$0xff] }
0x3036   :  { %49621 = vmatprep.subr.bf16.mxu0 %v57761_v52 }
0x3039   :  { %49623 = vmatpush3.bf16.msra.mxu0 %v57761_v52  ;;  %v57791_v52 = vld [vmem:[#allocation45_spill] sm:$0xff] }
0x303a   :  { %49625 = vmatprep.subr.bf16.mxu0 %v57762_v31 }
0x303d   :  { %49627 = vmatpush3.bf16.msra.mxu0 %v57762_v31  ;;  %v57792_v31 = vld [vmem:[#allocation46_spill] sm:$0xff] }
0x303e   :  { %49629 = vmatprep.subr.bf16.mxu0 %v57763_v29 }
0x3041   :  { %49631 = vmatpush3.bf16.msra.mxu0 %v57763_v29  ;;  %v55811_v29 = vand.u32 4294901760, %v55691_v7 }
0x3042   :  { %49633 = vmatprep.subr.bf16.mxu0 %v57764_v45 }
0x3045   :  { %49635 = vmatpush3.bf16.msra.mxu0 %v57764_v45  ;;  %v57793_v45 = vld [vmem:[#allocation50_spill] sm:$0xff] }
0x3046   :  { %49637 = vmatprep.subr.bf16.mxu0 %v57789_v27 }
0x3048   :  { %44258 = vmatmul.mubr.f32.vlgmr.msra.gmra.mrb[66].mxu0 %v55695_v15  ;;  %v55817_v15 = vsub.f32 %v55691_v7, %v55811_v29  ;;  %v57798_v7 = vld [vmem:[#allocation44_spill] sm:$0xff] }
0x3049   :  { %49639 = vmatpush3.bf16.msra.mxu0 %v57789_v27  ;;  %44292 = vmatprep.mubr.f32.mxu0 %v31296_v0  ;;  %v57811_v0 = vld [vmem:[#allocation63_spill] sm:$0xff] }
0x304a   :  { %49641 = vmatprep.subr.bf16.mxu0 %v57790_v36  ;;  %v31304_v51 = vand.u32 4294901760, %v55817_v15 }
0x304c   :  { %v31305_v5 = vsub.f32 %v55817_v15, %v31304_v51 }
0x304d   :  { %49643 = vmatpush3.bf16.msra.mxu0 %v57790_v36 }
0x304e   :  { %49645 = vmatprep.subr.bf16.mxu0 %v57791_v52  ;;  %v31306_v50 = vand.u32 4294901760, %v31305_v5  ;;  %v57812_v5 = vld [vmem:[#allocation64_spill] sm:$0xff] }
0x3051   :  { %49647 = vmatpush3.bf16.msra.mxu0 %v57791_v52 }
0x3052   :  { %49649 = vmatprep.subr.bf16.mxu0 %v57792_v31 }
0x3055   :  { %49651 = vmatpush3.bf16.msra.mxu0 %v57792_v31 }
0x3056   :  { %49653 = vmatprep.subr.bf16.mxu0 %v57793_v45 }
0x3059   :  { %49655 = vmatpush3.bf16.msra.mxu0 %v57793_v45 }
0x305a   :  { %49657 = vmatprep.subr.bf16.mxu0 %v57794_v57 }
0x305d   :  { %49659 = vmatpush3.bf16.msra.mxu0 %v57794_v57 }
0x305e   :  { %49661 = vmatprep.subr.bf16.mxu0 %v57795_v25 }
0x3061   :  { %49663 = vmatpush3.bf16.msra.mxu0 %v57795_v25 }
0x3062   :  { %49665 = vmatprep.subr.bf16.mxu0 %v57796_v54 }
0x3065   :  { %49667 = vmatpush3.bf16.msra.mxu0 %v57796_v54 }
0x3066   :  { %49669 = vmatprep.subr.bf16.mxu0 %v57797_v1 }
0x3068   :  { %44293 = vmatmul.mubr.f32.vlgmr.msra.gmra.mrb[66].mxu0 %v31306_v50  ;;  %v57816_v50 = vld [vmem:[#allocation68_spill] sm:$0xff] }
0x3069   :  { %49671 = vmatpush3.bf16.msra.mxu0 %v57797_v1  ;;  %44327 = vmatprep.mubr.f32.mxu0 %v55784_v56  ;;  %v57817_v1 = vld [vmem:[#allocation69_spill] sm:$0xff] }
0x306a   :  { %49673 = vmatprep.subr.bf16.mxu0 %v57798_v7 }
0x306d   :  { %49675 = vmatpush3.bf16.msra.mxu0 %v57798_v7  ;;  %v57819_v7 = vld [vmem:[#allocation71_spill] sm:$0xff] }
0x306e   :  { %49677 = vmatprep.subr.bf16.mxu0 %v57799_v62 }
0x3071   :  { %49679 = vmatpush3.bf16.msra.mxu0 %v57799_v62  ;;  %v57820_v62 = vld [vmem:[#allocation72_spill] sm:$0xff] }
0x3072   :  { %49681 = vmatprep.subr.bf16.mxu0 %v57800_v18 }
0x3075   :  { %49683 = vmatpush3.bf16.msra.mxu0 %v57800_v18 }
0x3076   :  { %49685 = vmatprep.subr.bf16.mxu0 %v57801_v37 }
0x3079   :  { %49687 = vmatpush3.bf16.msra.mxu0 %v57801_v37 }
0x307a   :  { %49689 = vmatprep.subr.bf16.mxu0 %v57802_v28 }
0x307d   :  { %49691 = vmatpush3.bf16.msra.mxu0 %v57802_v28 }
0x307e   :  { %49693 = vmatprep.subr.bf16.mxu0 %v57803_v60 }
0x3081   :  { %49695 = vmatpush3.bf16.msra.mxu0 %v57803_v60 }
0x3082   :  { %49697 = vmatprep.subr.bf16.mxu0 %v57804_v33 }
0x3085   :  { %49699 = vmatpush3.bf16.msra.mxu0 %v57804_v33 }
0x3086   :  { %49701 = vmatprep.subr.bf16.mxu0 %v57805_v55 }
0x3088   :  { %44328 = vmatmul.mubr.f32.vlgmr.msra.gmra.mrb[66].mxu0 %v55811_v29 }
0x3089   :  { %49703 = vmatpush3.bf16.msra.mxu0 %v57805_v55  ;;  %44362 = vmatprep.mubr.f32.mxu0 %v55790_v10  ;;  %v57813_v10 = vld [vmem:[#allocation65_spill] sm:$0xff] }
0x308a   :  { %49705 = vmatprep.subr.bf16.mxu0 %v57806_v43 }
0x308d   :  { %49707 = vmatpush3.bf16.msra.mxu0 %v57806_v43 }
0x308e   :  { %49709 = vmatprep.subr.bf16.mxu0 %v57807_v44 }
0x3091   :  { %49711 = vmatpush3.bf16.msra.mxu0 %v57807_v44  ;;  %v57821_v44 = vld [vmem:[#allocation82_spill] sm:$0xff] }
0x3092   :  { %49713 = vmatprep.subr.bf16.mxu0 %v57808_v59 }
0x3095   :  { %49715 = vmatpush3.bf16.msra.mxu0 %v57808_v59  ;;  %v57822_v59 = vld [vmem:[#allocation83_spill] sm:$0xff] }
0x3096   :  { %49717 = vmatprep.subr.bf16.mxu0 %v57809_v6 }
0x3099   :  { %49719 = vmatpush3.bf16.msra.mxu0 %v57809_v6  ;;  %v57823_v6 = vld [vmem:[#allocation84_spill] sm:$0xff] }
0x309a   :  { %49721 = vmatprep.subr.bf16.mxu0 %v57810_v38 }
0x309d   :  { %49723 = vmatpush3.bf16.msra.mxu0 %v57810_v38  ;;  %v57824_v38 = vld [vmem:[#allocation85_spill] sm:$0xff] }
0x309e   :  { %49725 = vmatprep.subr.bf16.mxu0 %v57811_v0 }
0x30a1   :  { %49727 = vmatpush3.bf16.msra.mxu0 %v57811_v0  ;;  %v57825_v0 = vld [vmem:[#allocation86_spill] sm:$0xff] }
0x30a2   :  { %49729 = vmatprep.subr.bf16.mxu0 %v57812_v5 }
0x30a5   :  { %49731 = vmatpush3.bf16.msra.mxu0 %v57812_v5  ;;  %v57827_v5 = vld [vmem:[#allocation88_spill] sm:$0xff] }
0x30a6   :  { %49733 = vmatprep.subr.bf16.mxu0 %v57789_v27 }
0x30a8   :  { %44363 = vmatmul.mubr.f32.vlgmr.msra.gmra.mrb[66].mxu0 %v55817_v15  ;;  %v57815_v15 = vld [vmem:[#allocation67_spill] sm:$0xff] }
0x30a9   :  { %49735 = vmatpush3.bf16.msra.mxu0 %v57789_v27  ;;  %44397 = vmatprep.mubr.f32.mxu0 %v31294_v8  ;;  %v57814_v8 = vld [vmem:[#allocation66_spill] sm:$0xff] }
0x30aa   :  { %49737 = vmatprep.subr.bf16.mxu0 %v57790_v36 }
0x30ad   :  { %49739 = vmatpush3.bf16.msra.mxu0 %v57790_v36 }
0x30ae   :  { %49741 = vmatprep.subr.bf16.mxu0 %v57791_v52 }
0x30b1   :  { %49743 = vmatpush3.bf16.msra.mxu0 %v57791_v52 }
0x30b2   :  { %49745 = vmatprep.subr.bf16.mxu0 %v57792_v31 }
0x30b5   :  { %49747 = vmatpush3.bf16.msra.mxu0 %v57792_v31 }
0x30b6   :  { %49749 = vmatprep.subr.bf16.mxu0 %v57793_v45 }
0x30b9   :  { %49751 = vmatpush3.bf16.msra.mxu0 %v57793_v45 }
0x30ba   :  { %49753 = vmatprep.subr.bf16.mxu0 %v57794_v57 }
0x30bd   :  { %49755 = vmatpush3.bf16.msra.mxu0 %v57794_v57 }
0x30be   :  { %49757 = vmatprep.subr.bf16.mxu0 %v57795_v25 }
0x30c1   :  { %49759 = vmatpush3.bf16.msra.mxu0 %v57795_v25 }
0x30c2   :  { %49761 = vmatprep.subr.bf16.mxu0 %v57796_v54 }
0x30c5   :  { %49763 = vmatpush3.bf16.msra.mxu0 %v57796_v54 }
0x30c6   :  { %49765 = vmatprep.subr.bf16.mxu0 %v57813_v10 }
0x30c8   :  { %44398 = vmatmul.mubr.f32.vlgmr.msra.gmra.mrb[66].mxu0 %v31304_v51  ;;  %v57818_v51 = vld [vmem:[#allocation70_spill] sm:$0xff] }
0x30c9   :  { %49767 = vmatpush3.bf16.msra.mxu0 %v57813_v10  ;;  %44432 = vmatprep.mubr.f32.mxu0 %v55784_v56  ;;  %v57828_v10 = vld [vmem:[#allocation89_spill] sm:$0xff] }
0x30ca   :  { %49769 = vmatprep.subr.bf16.mxu0 %v57814_v8 }
0x30cd   :  { %49771 = vmatpush3.bf16.msra.mxu0 %v57814_v8  ;;  %v57829_v8 = vld [vmem:[#allocation90_spill] sm:$0xff] }
0x30ce   :  { %49773 = vmatprep.subr.bf16.mxu0 %v57815_v15 }
0x30d1   :  { %49775 = vmatpush3.bf16.msra.mxu0 %v57815_v15  ;;  %v57830_v15 = vld [vmem:[#allocation91_spill] sm:$0xff] }
0x30d2   :  { %49777 = vmatprep.subr.bf16.mxu0 %v57816_v50 }
0x30d5   :  { %49779 = vmatpush3.bf16.msra.mxu0 %v57816_v50  ;;  %v57831_v50 = vld [vmem:[#allocation92_spill] sm:$0xff] }
0x30d6   :  { %49781 = vmatprep.subr.bf16.mxu0 %v57817_v1 }
0x30d9   :  { %49783 = vmatpush3.bf16.msra.mxu0 %v57817_v1  ;;  %v57832_v1 = vld [vmem:[#allocation93_spill] sm:$0xff] }
0x30da   :  { %49785 = vmatprep.subr.bf16.mxu0 %v57818_v51 }
0x30dd   :  { %49787 = vmatpush3.bf16.msra.mxu0 %v57818_v51  ;;  %v57833_v51 = vld [vmem:[#allocation94_spill] sm:$0xff] }
0x30de   :  { %49789 = vmatprep.subr.bf16.mxu0 %v57819_v7 }
0x30e1   :  { %49791 = vmatpush3.bf16.msra.mxu0 %v57819_v7  ;;  %v57834_v7 = vld [vmem:[#allocation95_spill] sm:$0xff] }
0x30e2   :  { %49793 = vmatprep.subr.bf16.mxu0 %v57820_v62 }
0x30e5   :  { %49795 = vmatpush3.bf16.msra.mxu0 %v57820_v62  ;;  %v57835_v62 = vld [vmem:[#allocation96_spill] sm:$0xff] }
0x30e6   :  { %49797 = vmatprep.subr.bf16.mxu0 %v57789_v27 }
0x30e8   :  { %44433 = vmatmul.mubr.f32.vlgmr.msra.gmra.mrb[66].mxu0 %v55811_v29 }
0x30e9   :  { %49799 = vmatpush3.bf16.msra.mxu0 %v57789_v27  ;;  %44467 = vmatprep.mubr.f32.mxu0 %v55784_v56 }
0x30ea   :  { %49801 = vmatprep.subr.bf16.mxu0 %v57790_v36 }
0x30ed   :  { %49803 = vmatpush3.bf16.msra.mxu0 %v57790_v36 }
0x30ee   :  { %49805 = vmatprep.subr.bf16.mxu0 %v57791_v52 }
0x30f1   :  { %49807 = vmatpush3.bf16.msra.mxu0 %v57791_v52 }
0x30f2   :  { %49809 = vmatprep.subr.bf16.mxu0 %v57792_v31 }
0x30f5   :  { %49811 = vmatpush3.bf16.msra.mxu0 %v57792_v31 }
0x30f6   :  { %49813 = vmatprep.subr.bf16.mxu0 %v57793_v45 }
0x30f9   :  { %49815 = vmatpush3.bf16.msra.mxu0 %v57793_v45 }
0x30fa   :  { %49817 = vmatprep.subr.bf16.mxu0 %v57794_v57 }
0x30fd   :  { %49819 = vmatpush3.bf16.msra.mxu0 %v57794_v57 }
0x30fe   :  { %49821 = vmatprep.subr.bf16.mxu0 %v57795_v25 }
0x3101   :  { %49823 = vmatpush3.bf16.msra.mxu0 %v57795_v25 }
0x3102   :  { %49825 = vmatprep.subr.bf16.mxu0 %v57796_v54 }
0x3105   :  { %49827 = vmatpush3.bf16.msra.mxu0 %v57796_v54 }
0x3108   :  { %44468 = vmatmul.mubr.f32.vlgmr.msra.gmra.mrb[66].mxu0 %v55811_v29 }
0x3109   :  { %44976 = vmatprep.mubr.f32.mxu0 %v57623_v17 }
0x31db   :  { %v44469_v56 = vpop.f32.mrb[66].mxu0 }
0x31dc   :  { %31897 = vmax.xlane.f32.xlu0 %v44469_v56  ;;  %v31885_v27 = vpop.f32.mrb[67].mxu0 }
0x31dd   :  { %31895 = vmax.xlane.f32.xlu1 %v31885_v27 }
0x3210   :  { %32593 = vxpose.xlu1.b32.start [1/2] (short) (narrow) %v55469_v3, 32 }
0x3214   :  { %32594 = vxpose.xlu1.b32.end [2/2] (short) (narrow) %v55465_v30, 32 }
0x3269   :  { %v31898_v36 = vpop.xlane.xlu0 %31897 }
0x326a   :  { %v31900_v52 = vsub.f32 %v44469_v56, %v31898_v36  ;;  %v31896_v31 = vpop.xlane.xlu1 %31895  ;;  %v57836_v56 = vld [vmem:[#allocation97_spill] sm:$0xff]  ;;  %v57838_v36 = vld [vmem:[#allocation99_spill] sm:$0xff] }
0x326b   :  { %v31899_v45 = vsub.f32 %v31885_v27, %v31896_v31  ;;  %v57837_v27 = vld [vmem:[#allocation98_spill] sm:$0xff]  ;;  %v57840_v31 = vld [vmem:[#allocation101_spill] sm:$0xff] }
0x326c   :  { %v31903_v57 = vmul.f32 1.442695, %v31900_v52  ;;  %v57839_v52 = vld [vmem:[#allocation100_spill] sm:$0xff] }
0x326d   :  { %v31901_v25 = vmul.f32 1.442695, %v31899_v45  ;;  %v57841_v45 = vld [vmem:[#allocation102_spill] sm:$0xff] }
0x326e   :  { %51096 = vpow2.f32 %v31903_v57  ;;  %v57842_v57 = vld [vmem:[#allocation103_spill] sm:$0xff] }
0x326f   :  { %51098 = vpow2.f32 %v31901_v25  ;;  %v57843_v25 = vld [vmem:[#allocation104_spill] sm:$0xff] }
0x3278   :  { %v55920_v54 = vpop.eup %51096 }
0x3279   :  { %v55922_v29 = vpop.eup %51098  ;;  %v55925_v17 = vand.u32 4294901760, %v55920_v54 }
0x327a   :  { %v55928_v18 = vand.u32 4294901760, %v55922_v29 }
0x327b   :  { %v55932_v30 = vsub.f32 %v55920_v54, %v55925_v17 }
0x327c   :  { %v31987_v3 = vsub.f32 %v55922_v29, %v55928_v18 }
0x327d   :  { %v31998_v37 = vand.u32 4294901760, %v55932_v30 }
0x327e   :  { %v31988_v28 = vand.u32 4294901760, %v31987_v3 }
0x327f   :  { %v31999_v60 = vsub.f32 %v55932_v30, %v31998_v37 }
0x3280   :  { %v31989_v33 = vsub.f32 %v31987_v3, %v31988_v28 }
0x3281   :  { %v32000_v43 = vand.u32 4294901760, %v31999_v60 }
0x3282   :  { %v31990_v55 = vand.u32 4294901760, %v31989_v33 }
0x3284   :  { %44502 = vmatprep.mubr.f32.mxu1 %v31990_v55 }
0x3285   :  { %44503 = vmatmul.mubr.f32.vlgmr.msra.gmra.mrb[58].mxu1 %v32000_v43 }
0x3286   :  { %49863 = vmatpush3.bf16.msra.mxu1 %v57756_v26  ;;  %44537 = vmatprep.mubr.f32.mxu1 %v55928_v18  ;;  %v57826_v26 = vld [vmem:[#allocation87_spill] sm:$0xff] }
0x3287   :  { %49865 = vmatprep.subr.bf16.mxu1 %v57821_v44 }
0x328a   :  { %49867 = vmatpush3.bf16.msra.mxu1 %v57821_v44 }
0x328b   :  { %49869 = vmatprep.subr.bf16.mxu1 %v57822_v59 }
0x328e   :  { %49871 = vmatpush3.bf16.msra.mxu1 %v57822_v59 }
0x328f   :  { %49873 = vmatprep.subr.bf16.mxu1 %v57823_v6 }
0x3292   :  { %49875 = vmatpush3.bf16.msra.mxu1 %v57823_v6 }
0x3293   :  { %49877 = vmatprep.subr.bf16.mxu1 %v57824_v38 }
0x3296   :  { %49879 = vmatpush3.bf16.msra.mxu1 %v57824_v38 }
0x3297   :  { %49881 = vmatprep.subr.bf16.mxu1 %v57825_v0 }
0x329a   :  { %49883 = vmatpush3.bf16.msra.mxu1 %v57825_v0 }
0x329b   :  { %49885 = vmatprep.subr.bf16.mxu1 %v57826_v26 }
0x329e   :  { %49887 = vmatpush3.bf16.msra.mxu1 %v57826_v26 }
0x329f   :  { %49889 = vmatprep.subr.bf16.mxu1 %v57827_v5 }
0x32a2   :  { %49891 = vmatpush3.bf16.msra.mxu1 %v57827_v5 }
0x32a3   :  { %49893 = vmatprep.subr.bf16.mxu1 %v57828_v10 }
0x32a5   :  { %44538 = vmatmul.mubr.f32.vlgmr.msra.gmra.mrb[58].mxu1 %v55925_v17 }
0x32a6   :  { %49895 = vmatpush3.bf16.msra.mxu1 %v57828_v10  ;;  %44572 = vmatprep.mubr.f32.mxu1 %v31987_v3 }
0x32a7   :  { %49897 = vmatprep.subr.bf16.mxu1 %v57829_v8 }
0x32aa   :  { %49899 = vmatpush3.bf16.msra.mxu1 %v57829_v8 }
0x32ab   :  { %49901 = vmatprep.subr.bf16.mxu1 %v57830_v15 }
0x32ae   :  { %49903 = vmatpush3.bf16.msra.mxu1 %v57830_v15 }
0x32af   :  { %49905 = vmatprep.subr.bf16.mxu1 %v57831_v50 }
0x32b2   :  { %49907 = vmatpush3.bf16.msra.mxu1 %v57831_v50 }
0x32b3   :  { %49909 = vmatprep.subr.bf16.mxu1 %v57832_v1 }
0x32b6   :  { %49911 = vmatpush3.bf16.msra.mxu1 %v57832_v1 }
0x32b7   :  { %49913 = vmatprep.subr.bf16.mxu1 %v57833_v51 }
0x32ba   :  { %49915 = vmatpush3.bf16.msra.mxu1 %v57833_v51 }
0x32bb   :  { %49917 = vmatprep.subr.bf16.mxu1 %v57834_v7 }
0x32be   :  { %49919 = vmatpush3.bf16.msra.mxu1 %v57834_v7 }
0x32bf   :  { %49921 = vmatprep.subr.bf16.mxu1 %v57835_v62 }
0x32c2   :  { %49923 = vmatpush3.bf16.msra.mxu1 %v57835_v62 }
0x32c3   :  { %49925 = vmatprep.subr.bf16.mxu1 %v57479_v2 }
0x32c5   :  { %44573 = vmatmul.mubr.f32.vlgmr.msra.gmra.mrb[58].mxu1 %v55932_v30 }
0x32c6   :  { %49927 = vmatpush3.bf16.msra.mxu1 %v57479_v2  ;;  %44607 = vmatprep.mubr.f32.mxu1 %v31988_v28 }
0x32c7   :  { %49929 = vmatprep.subr.bf16.mxu1 %v57480_v32 }
0x32ca   :  { %49931 = vmatpush3.bf16.msra.mxu1 %v57480_v32 }
0x32cb   :  { %49933 = vmatprep.subr.bf16.mxu1 %v57481_v49 }
0x32ce   :  { %49935 = vmatpush3.bf16.msra.mxu1 %v57481_v49 }
0x32cf   :  { %49937 = vmatprep.subr.bf16.mxu1 %v57482_v61 }
0x32d2   :  { %49939 = vmatpush3.bf16.msra.mxu1 %v57482_v61 }
0x32d3   :  { %49941 = vmatprep.subr.bf16.mxu1 %v57483_v11 }
0x32d6   :  { %49943 = vmatpush3.bf16.msra.mxu1 %v57483_v11 }
0x32d7   :  { %49945 = vmatprep.subr.bf16.mxu1 %v57484_v47 }
0x32da   :  { %49947 = vmatpush3.bf16.msra.mxu1 %v57484_v47 }
0x32db   :  { %49949 = vmatprep.subr.bf16.mxu1 %v57754_v23 }
0x32de   :  { %49951 = vmatpush3.bf16.msra.mxu1 %v57754_v23 }
0x32df   :  { %49953 = vmatprep.subr.bf16.mxu1 %v57755_v13 }
0x32e2   :  { %49955 = vmatpush3.bf16.msra.mxu1 %v57755_v13 }
0x32e3   :  { %49957 = vmatprep.subr.bf16.mxu1 %v57836_v56 }
0x32e5   :  { %44608 = vmatmul.mubr.f32.vlgmr.msra.gmra.mrb[58].mxu1 %v31998_v37 }
0x32e6   :  { %49959 = vmatpush3.bf16.msra.mxu1 %v57836_v56  ;;  %44642 = vmatprep.mubr.f32.mxu1 %v55928_v18 }
0x32e7   :  { %49961 = vmatprep.subr.bf16.mxu1 %v57837_v27 }
0x32ea   :  { %49963 = vmatpush3.bf16.msra.mxu1 %v57837_v27 }
0x32eb   :  { %49965 = vmatprep.subr.bf16.mxu1 %v57838_v36 }
0x32ee   :  { %49967 = vmatpush3.bf16.msra.mxu1 %v57838_v36 }
0x32ef   :  { %49969 = vmatprep.subr.bf16.mxu1 %v57839_v52 }
0x32f2   :  { %49971 = vmatpush3.bf16.msra.mxu1 %v57839_v52 }
0x32f3   :  { %49973 = vmatprep.subr.bf16.mxu1 %v57840_v31 }
0x32f6   :  { %49975 = vmatpush3.bf16.msra.mxu1 %v57840_v31 }
0x32f7   :  { %49977 = vmatprep.subr.bf16.mxu1 %v57841_v45 }
0x32fa   :  { %49979 = vmatpush3.bf16.msra.mxu1 %v57841_v45 }
0x32fb   :  { %49981 = vmatprep.subr.bf16.mxu1 %v57842_v57 }
0x32fe   :  { %49983 = vmatpush3.bf16.msra.mxu1 %v57842_v57 }
0x32ff   :  { %49985 = vmatprep.subr.bf16.mxu1 %v57843_v25 }
0x3302   :  { %49987 = vmatpush3.bf16.msra.mxu1 %v57843_v25 }
0x3303   :  { %49989 = vmatprep.subr.bf16.mxu1 %v57479_v2 }
0x3305   :  { %44643 = vmatmul.mubr.f32.vlgmr.msra.gmra.mrb[58].mxu1 %v55925_v17 }
0x3306   :  { %49991 = vmatpush3.bf16.msra.mxu1 %v57479_v2  ;;  %44677 = vmatprep.mubr.f32.mxu1 %v55928_v18 }
0x3307   :  { %49993 = vmatprep.subr.bf16.mxu1 %v57480_v32 }
0x330a   :  { %49995 = vmatpush3.bf16.msra.mxu1 %v57480_v32  ;;  %v32609_v32 = vpop.trf.xlu1 }
0x330b   :  { %49997 = vmatprep.subr.bf16.mxu1 %v57481_v49 }
0x330e   :  { %49999 = vmatpush3.bf16.msra.mxu1 %v57481_v49  ;;  %v32626_v49 = vsel %vm1149_vm2, %v32609_v32, 0  ;;  %v32610_v18 = vpop.trf.xlu1 }
0x330f   :  { %50001 = vmatprep.subr.bf16.mxu1 %v57482_v61  ;;  %v32629_v3 = vsel %vm1149_vm2, %v32610_v18, 0 }
0x3310   :  { %v56036_v60 = vand.u32 4294901760, %v32629_v3 }
0x3312   :  { %50003 = vmatpush3.bf16.msra.mxu1 %v57482_v61  ;;  %v56025_v61 = vand.u32 4294901760, %v32626_v49  ;;  %v32715_v43 = vsub.f32 %v32629_v3, %v56036_v60 }
0x3313   :  { %50005 = vmatprep.subr.bf16.mxu1 %v57483_v11 }
0x3314   :  { %v32716_v5 = vand.u32 4294901760, %v32715_v43 }
0x3316   :  { %50007 = vmatpush3.bf16.msra.mxu1 %v57483_v11  ;;  %v56028_v11 = vsub.f32 %v32626_v49, %v56025_v61  ;;  %v32717_v7 = vsub.f32 %v32715_v43, %v32716_v5 }
0x3317   :  { %50009 = vmatprep.subr.bf16.mxu1 %v57484_v47 }
0x3318   :  { %v32706_v2 = vand.u32 4294901760, %v56028_v11  ;;  %v32718_v45 = vand.u32 4294901760, %v32717_v7 }
0x331a   :  { %50011 = vmatpush3.bf16.msra.mxu1 %v57484_v47  ;;  %v32707_v47 = vsub.f32 %v56028_v11, %v32706_v2 }
0x331b   :  { %50013 = vmatprep.subr.bf16.mxu1 %v57754_v23 }
0x331e   :  { %50015 = vmatpush3.bf16.msra.mxu1 %v57754_v23  ;;  %v32708_v23 = vand.u32 4294901760, %v32707_v47 }
0x331f   :  { %50017 = vmatprep.subr.bf16.mxu1 %v57755_v13 }
0x3322   :  { %50019 = vmatpush3.bf16.msra.mxu1 %v57755_v13  ;;  %v32611_v13 = vpop.trf.xlu1 }
0x3323   :  { %v32632_v37 = vsel %vm1149_vm2, %v32611_v13, 0 }
0x3324   :  { %v56038_v33 = vand.u32 4294901760, %v32632_v37 }
0x3325   :  { %44678 = vmatmul.mubr.f32.vlgmr.msra.gmra.mrb[58].mxu1 %v55925_v17 }
0x3326   :  { %44684 = vmatprep.mubr.f32.mxu1 %v32708_v23  ;;  %v32612_v28 = vpop.trf.xlu1  ;;  %v32725_v59 = vsub.f32 %v32632_v37, %v56038_v33 }
0x3327   :  { %v32635_v55 = vsel %vm1149_vm2, %v32612_v28, 0 }
0x3328   :  { %v56042_v44 = vand.u32 4294901760, %v32635_v55  ;;  %v32726_v15 = vand.u32 4294901760, %v32725_v59 }
0x332a   :  { %v32735_v10 = vsub.f32 %v32635_v55, %v56042_v44  ;;  %v32727_v27 = vsub.f32 %v32725_v59, %v32726_v15 }
0x332c   :  { %v32736_v62 = vand.u32 4294901760, %v32735_v10  ;;  %v32728_v32 = vand.u32 4294901760, %v32727_v27 }
0x33f8   :  { %v44679_v30 = vpop.f32.mrb[58].mxu1 }
0x33f9   :  { %51100 = vrcp.f32 %v44679_v30  ;;  %v32579_v17 = vpop.f32.mrb[59].mxu1  ;;  %v51123_v30 = vld [vmem:[#allocation2 + $0x1c0] sm:$0xff] }
0x33fa   :  { %51102 = vrcp.f32 %v32579_v17 }
0x3403   :  { %v51101_v6 = vpop.eup %51100 }
0x3404   :  { %v51103_v38 = vpop.eup %51102  ;;  %v32592_v0 = vmul.f32 %v51101_v6, %v55920_v54 }
0x3405   :  { %v32590_v26 = vmul.f32 %v51103_v38, %v55922_v29  ;;  %v32737_v29 = vsub.f32 %v32735_v10, %v32736_v62 }
0x3406   :  { %v32641_v8 = vand.u32 4294901760, %v32592_v0 }
0x3407   :  { %v32638_v50 = vand.u32 4294901760, %v32590_v26  ;;  %v32738_v23 = vand.u32 4294901760, %v32737_v29  ;;  %v57856_v29 = vld [vmem:[#allocation134_spill] sm:$0xff] }
0x3408   :  { %v32753_v1 = vsub.f32 %v32592_v0, %v32641_v8 }
0x3409   :  { %v50020_v51 = vpack.c.bf16 %v32641_v8, %v32638_v50  ;;  %v32746_v56 = vsub.f32 %v32590_v26, %v32638_v50 }
0x340a   :  { %v32754_v36 = vand.u32 4294901760, %v32753_v1 }
0x340b   :  { %50021 = vmatprep.subr.bf16.mxu1 %v50020_v51  ;;  %v32747_v52 = vand.u32 4294901760, %v32746_v56  ;;  %v50028_v31 = vpack.c.bf16 %v32753_v1, %v32746_v56 }
0x340c   :  { %50023 = vmatpush3.bf16.msra.mxu1 %v50020_v51  ;;  %v32755_v54 = vsub.f32 %v32753_v1, %v32754_v36 }
0x340d   :  { %v32748_v57 = vsub.f32 %v32746_v56, %v32747_v52  ;;  %v50036_v25 = vpack.c.bf16 %v32754_v36, %v32747_v52 }
0x340e   :  { %v32756_v49 = vand.u32 4294901760, %v32755_v54  ;;  %v57854_v54 = vld [vmem:[#allocation132_spill] sm:$0xff] }
0x340f   :  { %44685 = vmatmul.mubr.f32.vlgmr.msra.gmra.mrb[60].mxu1 %v32718_v45  ;;  %v32749_v47 = vand.u32 4294901760, %v32748_v57  ;;  %v57855_v45 = vld [vmem:[#allocation133_spill] sm:$0xff]  ;;  %v57857_v57 = vld [vmem:[#allocation135_spill] sm:$0xff] }
0x3410   :  { %44687 = vmatprep.mubr.f32.mxu1 %v32728_v32 }
0x3411   :  { %v50024_v18 = vpack.c.bf16 %v32756_v49, %v32749_v47 }
0x3413   :  { %44688 = vmatmul.mubr.f32.gmra.mrb[62].mxu1 %v32738_v23  ;;  %50025 = vmatprep.subr.bf16.mxu1 %v50024_v18 }
0x3414   :  { %50027 = vmatpush3.bf16.msra.mxu1 %v50024_v18  ;;  %44694 = vmatprep.mubr.f32.mxu1 %v56025_v61 }
0x3415   :  { %50029 = vmatprep.subr.bf16.mxu1 %v50028_v31 }
0x3417   :  { %44695 = vmatmul.mubr.f32.vlgmr.msra.gmra.mrb[60].mxu1 %v56036_v60 }
0x3418   :  { %44697 = vmatprep.mubr.f32.mxu1 %v56038_v33  ;;  %50031 = vmatpush3.bf16.msra.mxu1 %v50028_v31  ;;  %v57853_v31 = vld [vmem:[#allocation131_spill] sm:$0xff] }
0x3419   :  { %50033 = vmatprep.subr.bf16.mxu1 %v50020_v51 }
0x341b   :  { %44698 = vmatmul.mubr.f32.gmra.mrb[62].mxu1 %v56042_v44 }
0x341c   :  { %44704 = vmatprep.mubr.f32.mxu1 %v56028_v11  ;;  %v51122_v11 = vld [vmem:[#allocation2 + $0x1c8] sm:$0xff] }
0x341f   :  { %44705 = vmatmul.mubr.f32.vlgmr.msra.gmra.mrb[60].mxu1 %v32715_v43 }
0x3420   :  { %50035 = vmatpush3.bf16.msra.mxu1 %v50020_v51  ;;  %44707 = vmatprep.mubr.f32.mxu1 %v32725_v59  ;;  %v51125_v59 = vld [vmem:[#allocation2 + $0x1d0] sm:$0xff] }
0x3421   :  { %50037 = vmatprep.subr.bf16.mxu1 %v50036_v25 }
0x3423   :  { %44708 = vmatmul.mubr.f32.gmra.mrb[62].mxu1 %v32735_v10 }
0x3424   :  { %44714 = vmatprep.mubr.f32.mxu1 %v32706_v2 }
0x3427   :  { %44715 = vmatmul.mubr.f32.vlgmr.msra.gmra.mrb[60].mxu1 %v32716_v5 }
0x3428   :  { %50039 = vmatpush3.bf16.msra.mxu1 %v50036_v25  ;;  %44717 = vmatprep.mubr.f32.mxu1 %v32726_v15  ;;  %v57858_v25 = vld [vmem:[#allocation136_spill] sm:$0xff] }
0x3429   :  { %50041 = vmatprep.subr.bf16.mxu1 %v50020_v51 }
0x342b   :  { %44718 = vmatmul.mubr.f32.gmra.mrb[62].mxu1 %v32736_v62 }
0x342c   :  { %44724 = vmatprep.mubr.f32.mxu1 %v56025_v61 }
0x342f   :  { %44725 = vmatmul.mubr.f32.vlgmr.msra.gmra.mrb[60].mxu1 %v56036_v60 }
0x3430   :  { %50043 = vmatpush3.bf16.msra.mxu1 %v50020_v51  ;;  %44727 = vmatprep.mubr.f32.mxu1 %v56038_v33 }
0x3431   :  { %50045 = vmatprep.subr.bf16.mxu1 %v57496_v42 }
0x3433   :  { %44728 = vmatmul.mubr.f32.gmra.mrb[62].mxu1 %v56042_v44 }
0x3434   :  { %44734 = vmatprep.mubr.f32.mxu1 %v56025_v61 }
0x3437   :  { %44735 = vmatmul.mubr.f32.vlgmr.msra.gmra.mrb[60].mxu1 %v56036_v60 }
0x3438   :  { %44737 = vmatprep.mubr.f32.mxu1 %v56038_v33  ;;  %50047 = vmatpush3.bf16.msra.mxu1 %v57496_v42  ;;  %v51124_v33 = vld [vmem:[#allocation2 + $0x1d8] sm:$0xff] }
0x3439   :  { %50049 = vmatprep.subr.bf16.mxu1 %v57497_v46 }
0x343b   :  { %44738 = vmatmul.mubr.f32.gmra.mrb[62].mxu1 %v56042_v44 }
0x343c   :  { %50051 = vmatpush3.bf16.msra.mxu1 %v57497_v46 }
0x343d   :  { %50053 = vmatprep.subr.bf16.mxu1 %v57615_v20 }
0x3440   :  { %50055 = vmatpush3.bf16.msra.mxu1 %v57615_v20 }
0x3441   :  { %50057 = vmatprep.subr.bf16.mxu1 %v57616_v9 }
0x3444   :  { %50059 = vmatpush3.bf16.msra.mxu1 %v57616_v9 }
0x3445   :  { %50061 = vmatprep.subr.bf16.mxu1 %v57617_v48 }
0x3448   :  { %50063 = vmatpush3.bf16.msra.mxu1 %v57617_v48 }
0x3449   :  { %50065 = vmatprep.subr.bf16.mxu1 %v57618_v34 }
0x344c   :  { %50067 = vmatpush3.bf16.msra.mxu1 %v57618_v34 }
0x344d   :  { %50069 = vmatprep.subr.bf16.mxu1 %v57619_v53 }
0x3450   :  { %50071 = vmatpush3.bf16.msra.mxu1 %v57619_v53 }
0x3451   :  { %50073 = vmatprep.subr.bf16.mxu1 %v57620_v40 }
0x3454   :  { %50075 = vmatpush3.bf16.msra.mxu1 %v57620_v40 }
0x3455   :  { %50077 = vmatprep.subr.bf16.mxu1 %v57621_v41 }
0x350a   :  { %v44736_v61 = vpop.f32.mrb[60].mxu1 }
0x350b   :  { %v33226_v2 = vmul.f32 %v51122_v11, %v44736_v61  ;;  %v33203_v13 = vpop.f32.mrb[61].mxu1 }
0x350c   :  { %v33225_v17 = vmul.f32 %v51123_v30, %v33203_v13 }
0x350d   :  { %v56080_v3 = vand.u32 4294901760, %v33226_v2 }
0x350e   :  { %v56082_v37 = vand.u32 4294901760, %v33225_v17  ;;  %v44739_v28 = vpop.f32.mrb[62].mxu1 }
0x350f   :  { %v56085_v60 = vsub.f32 %v33226_v2, %v56080_v3  ;;  %v33228_v55 = vmul.f32 %v51124_v33, %v44739_v28  ;;  %v33215_v43 = vpop.f32.mrb[63].mxu1 }
0x3510   :  { %v56088_v44 = vsub.f32 %v33225_v17, %v56082_v37  ;;  %v33227_v6 = vmul.f32 %v51125_v59, %v33215_v43 }
0x3511   :  { %v33322_v38 = vand.u32 4294901760, %v56085_v60  ;;  %v56091_v0 = vand.u32 4294901760, %v33228_v55 }
0x3512   :  { %v56093_v26 = vand.u32 4294901760, %v33227_v6  ;;  %v33312_v5 = vand.u32 4294901760, %v56088_v44 }
0x3513   :  { %v33323_v10 = vsub.f32 %v56085_v60, %v33322_v38  ;;  %v56100_v8 = vsub.f32 %v33228_v55, %v56091_v0 }
0x3514   :  { %v56103_v15 = vsub.f32 %v33227_v6, %v56093_v26  ;;  %v33313_v50 = vsub.f32 %v56088_v44, %v33312_v5 }
0x3515   :  { %v33342_v1 = vand.u32 4294901760, %v56100_v8  ;;  %v33324_v62 = vand.u32 4294901760, %v33323_v10 }
0x3516   :  { %v33314_v51 = vand.u32 4294901760, %v33313_v50  ;;  %v33332_v7 = vand.u32 4294901760, %v56103_v15  ;;  %v57864_v50 = vld [vmem:[#allocation143_spill] sm:$0xff] }
0x3517   :  { %v33343_v56 = vsub.f32 %v56100_v8, %v33342_v1 }
0x3518   :  { %44772 = vmatprep.mubr.f32.mxu1 %v33314_v51  ;;  %v33333_v27 = vsub.f32 %v56103_v15, %v33332_v7 }
0x3519   :  { %44773 = vmatmul.mubr.f32.vlgmr.msra.gmra.mrb[64].mxu1 %v33324_v62  ;;  %v33344_v52 = vand.u32 4294901760, %v33343_v56  ;;  %v57866_v62 = vld [vmem:[#allocation16_spill] sm:$0xff] }
0x351a   :  { %50079 = vmatpush3.bf16.msra.mxu1 %v57621_v41  ;;  %v33334_v36 = vand.u32 4294901760, %v33333_v27  ;;  %v57844_v41 = vld [vmem:[#allocation125_spill] sm:$0xff] }
0x351b   :  { %50081 = vmatprep.subr.bf16.mxu1 %v57624_v24 }
0x351c   :  { %44775 = vmatprep.mubr.f32.mxu1 %v33334_v36 }
0x351d   :  { %44776 = vmatmul.mubr.f32.gmra.mrb[66].mxu1 %v33344_v52 }
0x351e   :  { %50083 = vmatpush3.bf16.msra.mxu1 %v57624_v24  ;;  %44810 = vmatprep.mubr.f32.mxu1 %v56082_v37  ;;  %v57845_v24 = vld [vmem:[#allocation126_spill] sm:$0xff] }
0x351f   :  { %50085 = vmatprep.subr.bf16.mxu1 %v57625_v21 }
0x3522   :  { %50087 = vmatpush3.bf16.msra.mxu1 %v57625_v21  ;;  %v57846_v21 = vld [vmem:[#allocation127_spill] sm:$0xff] }
0x3523   :  { %50089 = vmatprep.subr.bf16.mxu1 %v57626_v22 }
0x3526   :  { %50091 = vmatpush3.bf16.msra.mxu1 %v57626_v22  ;;  %v57847_v22 = vld [vmem:[#allocation128_spill] sm:$0xff] }
0x3527   :  { %50093 = vmatprep.subr.bf16.mxu1 %v57711_v14 }
0x352a   :  { %50095 = vmatpush3.bf16.msra.mxu1 %v57711_v14  ;;  %v57848_v14 = vld [vmem:[#allocation118_spill] sm:$0xff] }
0x352b   :  { %50097 = vmatprep.subr.bf16.mxu1 %v57712_v39 }
0x352e   :  { %50099 = vmatpush3.bf16.msra.mxu1 %v57712_v39  ;;  %v57849_v39 = vld [vmem:[#allocation119_spill] sm:$0xff] }
0x352f   :  { %50101 = vmatprep.subr.bf16.mxu1 %v57713_v63 }
0x3532   :  { %50103 = vmatpush3.bf16.msra.mxu1 %v57713_v63  ;;  %v57850_v63 = vld [vmem:[#allocation120_spill] sm:$0xff] }
0x3533   :  { %50105 = vmatprep.subr.bf16.mxu1 %v57714_v35 }
0x3536   :  { %50107 = vmatpush3.bf16.msra.mxu1 %v57714_v35  ;;  %v57851_v35 = vld [vmem:[#allocation129_spill] sm:$0xff] }
0x3537   :  { %50109 = vmatprep.subr.bf16.mxu1 %v57715_v4 }
0x3539   :  { %44811 = vmatmul.mubr.f32.vlgmr.msra.gmra.mrb[64].mxu1 %v56080_v3 }
0x353a   :  { %44813 = vmatprep.mubr.f32.mxu1 %v56093_v26  ;;  %50111 = vmatpush3.bf16.msra.mxu1 %v57715_v4  ;;  %v57852_v4 = vld [vmem:[#allocation130_spill] sm:$0xff] }
0x353b   :  { %50113 = vmatprep.subr.bf16.mxu1 %v57844_v41 }
0x353d   :  { %44814 = vmatmul.mubr.f32.gmra.mrb[66].mxu1 %v56091_v0 }
0x353e   :  { %50115 = vmatpush3.bf16.msra.mxu1 %v57844_v41  ;;  %44848 = vmatprep.mubr.f32.mxu1 %v56088_v44 }
0x353f   :  { %50117 = vmatprep.subr.bf16.mxu1 %v57845_v24 }
0x3542   :  { %50119 = vmatpush3.bf16.msra.mxu1 %v57845_v24 }
0x3543   :  { %50121 = vmatprep.subr.bf16.mxu1 %v57846_v21 }
0x3546   :  { %50123 = vmatpush3.bf16.msra.mxu1 %v57846_v21 }
0x3547   :  { %50125 = vmatprep.subr.bf16.mxu1 %v57847_v22 }
0x354a   :  { %50127 = vmatpush3.bf16.msra.mxu1 %v57847_v22 }
0x354b   :  { %50129 = vmatprep.subr.bf16.mxu1 %v57848_v14 }
0x354e   :  { %50131 = vmatpush3.bf16.msra.mxu1 %v57848_v14 }
0x354f   :  { %50133 = vmatprep.subr.bf16.mxu1 %v57849_v39 }
0x3552   :  { %50135 = vmatpush3.bf16.msra.mxu1 %v57849_v39 }
0x3553   :  { %50137 = vmatprep.subr.bf16.mxu1 %v57850_v63 }
0x3556   :  { %50139 = vmatpush3.bf16.msra.mxu1 %v57850_v63 }
0x3557   :  { %50141 = vmatprep.subr.bf16.mxu1 %v57496_v42 }
0x3559   :  { %44849 = vmatmul.mubr.f32.vlgmr.msra.gmra.mrb[64].mxu1 %v56085_v60 }
0x355a   :  { %44851 = vmatprep.mubr.f32.mxu1 %v56103_v15  ;;  %50143 = vmatpush3.bf16.msra.mxu1 %v57496_v42  ;;  %v57862_v15 = vld [vmem:[#allocation142_spill] sm:$0xff] }
0x355b   :  { %50145 = vmatprep.subr.bf16.mxu1 %v57497_v46 }
0x355d   :  { %44852 = vmatmul.mubr.f32.gmra.mrb[66].mxu1 %v56100_v8 }
0x355e   :  { %50147 = vmatpush3.bf16.msra.mxu1 %v57497_v46  ;;  %44886 = vmatprep.mubr.f32.mxu1 %v33312_v5 }
0x355f   :  { %50149 = vmatprep.subr.bf16.mxu1 %v57615_v20 }
0x3562   :  { %50151 = vmatpush3.bf16.msra.mxu1 %v57615_v20 }
0x3563   :  { %50153 = vmatprep.subr.bf16.mxu1 %v57616_v9 }
0x3566   :  { %50155 = vmatpush3.bf16.msra.mxu1 %v57616_v9 }
0x3567   :  { %50157 = vmatprep.subr.bf16.mxu1 %v57617_v48 }
0x356a   :  { %50159 = vmatpush3.bf16.msra.mxu1 %v57617_v48 }
0x356b   :  { %50161 = vmatprep.subr.bf16.mxu1 %v57618_v34 }
0x356e   :  { %50163 = vmatpush3.bf16.msra.mxu1 %v57618_v34 }
0x356f   :  { %50165 = vmatprep.subr.bf16.mxu1 %v57619_v53 }
0x3572   :  { %50167 = vmatpush3.bf16.msra.mxu1 %v57619_v53 }
0x3573   :  { %50169 = vmatprep.subr.bf16.mxu1 %v57620_v40 }
0x3576   :  { %50171 = vmatpush3.bf16.msra.mxu1 %v57620_v40 }
0x3577   :  { %50173 = vmatprep.subr.bf16.mxu1 %v57851_v35 }
0x3579   :  { %44887 = vmatmul.mubr.f32.vlgmr.msra.gmra.mrb[64].mxu1 %v33322_v38 }
0x357a   :  { %44889 = vmatprep.mubr.f32.mxu1 %v33332_v7  ;;  %50175 = vmatpush3.bf16.msra.mxu1 %v57851_v35  ;;  %v57867_v35 = vld [vmem:[#allocation76_spill] sm:$0xff] }
0x357b   :  { %50177 = vmatprep.subr.bf16.mxu1 %v57852_v4 }
0x357d   :  { %44890 = vmatmul.mubr.f32.gmra.mrb[66].mxu1 %v33342_v1  ;;  %v57865_v1 = vld [vmem:[#allocation13_spill] sm:$0xff] }
0x357e   :  { %50179 = vmatpush3.bf16.msra.mxu1 %v57852_v4  ;;  %44924 = vmatprep.mubr.f32.mxu1 %v56082_v37  ;;  %v57868_v4 = vld [vmem:[#allocation77_spill] sm:$0xff] }
0x357f   :  { %50181 = vmatprep.subr.bf16.mxu1 %v57853_v31 }
0x3582   :  { %50183 = vmatpush3.bf16.msra.mxu1 %v57853_v31  ;;  %v57869_v31 = vld [vmem:[#allocation78_spill] sm:$0xff] }
0x3583   :  { %50185 = vmatprep.subr.bf16.mxu1 %v57854_v54 }
0x3586   :  { %50187 = vmatpush3.bf16.msra.mxu1 %v57854_v54  ;;  %v57870_v54 = vld [vmem:[#allocation105_spill] sm:$0xff] }
0x3587   :  { %50189 = vmatprep.subr.bf16.mxu1 %v57855_v45 }
0x358a   :  { %50191 = vmatpush3.bf16.msra.mxu1 %v57855_v45  ;;  %v57871_v45 = vld [vmem:[#allocation106_spill] sm:$0xff] }
0x358b   :  { %50193 = vmatprep.subr.bf16.mxu1 %v57856_v29 }
0x358e   :  { %50195 = vmatpush3.bf16.msra.mxu1 %v57856_v29 }
0x358f   :  { %50197 = vmatprep.subr.bf16.mxu1 %v57857_v57 }
0x3592   :  { %50199 = vmatpush3.bf16.msra.mxu1 %v57857_v57  ;;  %v51126_v57 = vld [vmem:[%s56272_s7] ss:$0 sm:$0xff] }
0x3593   :  { %50201 = vmatprep.subr.bf16.mxu1 %v57858_v25 }
0x3596   :  { %50203 = vmatpush3.bf16.msra.mxu1 %v57858_v25 }
0x3597   :  { %50205 = vmatprep.subr.bf16.mxu1 %v57496_v42 }
0x3599   :  { %44925 = vmatmul.mubr.f32.vlgmr.msra.gmra.mrb[64].mxu1 %v56080_v3 }
0x359a   :  { %44927 = vmatprep.mubr.f32.mxu1 %v56093_v26  ;;  %50207 = vmatpush3.bf16.msra.mxu1 %v57496_v42  ;;  %v57859_v42 = vld [vmem:[#allocation73_spill] sm:$0xff] }
0x359b   :  { %50209 = vmatprep.subr.bf16.mxu1 %v57497_v46 }
0x359d   :  { %44928 = vmatmul.mubr.f32.gmra.mrb[66].mxu1 %v56091_v0 }
0x359e   :  { %50211 = vmatpush3.bf16.msra.mxu1 %v57497_v46  ;;  %44962 = vmatprep.mubr.f32.mxu1 %v56082_v37  ;;  %v57860_v46 = vld [vmem:[#allocation74_spill] sm:$0xff] }
0x359f   :  { %50213 = vmatprep.subr.bf16.mxu1 %v57615_v20 }
0x35a2   :  { %50215 = vmatpush3.bf16.msra.mxu1 %v57615_v20 }
0x35a3   :  { %50217 = vmatprep.subr.bf16.mxu1 %v57616_v9 }
0x35a6   :  { %50219 = vmatpush3.bf16.msra.mxu1 %v57616_v9 }
0x35a7   :  { %50221 = vmatprep.subr.bf16.mxu1 %v57617_v48 }
0x35aa   :  { %50223 = vmatpush3.bf16.msra.mxu1 %v57617_v48  ;;  %v57861_v48 = vld [vmem:[#allocation75_spill] sm:$0xff] }
0x35ab   :  { %50225 = vmatprep.subr.bf16.mxu1 %v57618_v34 }
0x35ae   :  { %50227 = vmatpush3.bf16.msra.mxu1 %v57618_v34 }
0x35af   :  { %50229 = vmatprep.subr.bf16.mxu1 %v57619_v53 }
0x35b2   :  { %50231 = vmatpush3.bf16.msra.mxu1 %v57619_v53 }
0x35b3   :  { %50233 = vmatprep.subr.bf16.mxu1 %v57620_v40 }
0x35b6   :  { %50235 = vmatpush3.bf16.msra.mxu1 %v57620_v40 }
0x35b7   :  { %50285 = vmatprep.subr.bf16.mxu1 %v57859_v42 }
0x35b9   :  { %44963 = vmatmul.mubr.f32.vlgmr.msra.gmra.mrb[64].mxu1 %v56080_v3 }
0x35ba   :  { %44965 = vmatprep.mubr.f32.mxu1 %v56093_v26  ;;  %50287 = vmatpush3.bf16.msra.mxu1 %v57859_v42 }
0x35bb   :  { %50289 = vmatprep.subr.bf16.mxu1 %v57860_v46 }
0x35bd   :  { %44966 = vmatmul.mubr.f32.gmra.mrb[66].mxu1 %v56091_v0 }
0x35be   :  { %50291 = vmatpush3.bf16.msra.mxu1 %v57860_v46 }
0x35bf   :  { %50293 = vmatprep.subr.bf16.mxu1 %v57861_v48 }
0x368c   :  { %v44964_v9 = vpop.f32.mrb[64].mxu1 }
0x368d   :  { %v34005_v34 = vand.u32 4294901760, %v44964_v9  ;;  %v33977_v20 = vpop.f32.mrb[65].mxu1 }
0x368e   :  { %v34002_v40 = vand.u32 4294901760, %v33977_v20 }
0x368f   :  { %v34099_v53 = vsub.f32 %v44964_v9, %v34005_v34 }
0x3690   :  { %v50236_v32 = vpack.c.bf16 %v34005_v34, %v34002_v40  ;;  %v34092_v49 = vsub.f32 %v33977_v20, %v34002_v40  ;;  %v44967_v47 = vpop.f32.mrb[66].mxu1 }
0x3691   :  { %v34100_v23 = vand.u32 4294901760, %v34099_v53  ;;  %v34011_v18 = vand.u32 4294901760, %v44967_v47  ;;  %v33989_v61 = vpop.f32.mrb[67].mxu1 }
0x3692   :  { %v34093_v11 = vand.u32 4294901760, %v34092_v49  ;;  %v34008_v2 = vand.u32 4294901760, %v33989_v61  ;;  %50237 = vmatprep.subr.bf16.mxu0 %v50236_v32  ;;  %v50252_v13 = vpack.c.bf16 %v34099_v53, %v34092_v49 }
0x3693   :  { %v34101_v30 = vsub.f32 %v34099_v53, %v34100_v23  ;;  %v34113_v17 = vsub.f32 %v44967_v47, %v34011_v18  ;;  %50239 = vmatpush3.bf16.msra.mxu0 %v50236_v32 }
0x3694   :  { %v34094_v3 = vsub.f32 %v34092_v49, %v34093_v11  ;;  %v50240_v37 = vpack.c.bf16 %v34011_v18, %v34008_v2  ;;  %v34106_v28 = vsub.f32 %v33989_v61, %v34008_v2  ;;  %v50268_v60 = vpack.c.bf16 %v34100_v23, %v34093_v11 }
0x3695   :  { %v34114_v33 = vand.u32 4294901760, %v34113_v17  ;;  %v34102_v55 = vand.u32 4294901760, %v34101_v30 }
0x3696   :  { %v34107_v43 = vand.u32 4294901760, %v34106_v28  ;;  %50241 = vmatprep.subr.bf16.mxu0 %v50240_v37  ;;  %v34095_v44 = vand.u32 4294901760, %v34094_v3  ;;  %v50256_v59 = vpack.c.bf16 %v34113_v17, %v34106_v28 }
0x3697   :  { %v34115_v6 = vsub.f32 %v34113_v17, %v34114_v33  ;;  %50243 = vmatpush3.bf16.msra.mxu0 %v50240_v37 }
0x3698   :  { %v34108_v38 = vsub.f32 %v34106_v28, %v34107_v43  ;;  %v50244_v0 = vpack.c.bf16 %v34102_v55, %v34095_v44  ;;  %v50272_v26 = vpack.c.bf16 %v34114_v33, %v34107_v43 }
0x3699   :  { %v34116_v5 = vand.u32 4294901760, %v34115_v6 }
0x369a   :  { %44977 = vmatmul.mubr.f32.vlgmr.msra.gmra.mrb[68].mxu0 %v57647_v58  ;;  %50245 = vmatprep.subr.bf16.mxu0 %v50244_v0  ;;  %v34109_v10 = vand.u32 4294901760, %v34108_v38  ;;  %v57863_v58 = vld [vmem:[#allocation139_spill] sm:$0xff] }
0x369b   :  { %50247 = vmatpush3.bf16.msra.mxu0 %v50244_v0  ;;  %44987 = vmatprep.mubr.f32.mxu0 %v57648_v12 }
0x369c   :  { %v50248_v8 = vpack.c.bf16 %v34116_v5, %v34109_v10 }
0x369e   :  { %50249 = vmatprep.subr.bf16.mxu0 %v50248_v8 }
0x369f   :  { %50251 = vmatpush3.bf16.msra.mxu0 %v50248_v8 }
0x36a0   :  { %50253 = vmatprep.subr.bf16.mxu0 %v50252_v13 }
0x36a2   :  { %44988 = vmatmul.mubr.f32.vlgmr.msra.gmra.mrb[68].mxu0 %v57649_v19 }
0x36a3   :  { %50255 = vmatpush3.bf16.msra.mxu0 %v50252_v13  ;;  %44998 = vmatprep.mubr.f32.mxu0 %v57650_v16 }
0x36a4   :  { %50257 = vmatprep.subr.bf16.mxu0 %v50256_v59 }
0x36a7   :  { %50259 = vmatpush3.bf16.msra.mxu0 %v50256_v59 }
0x36a8   :  { %50261 = vmatprep.subr.bf16.mxu0 %v50236_v32 }
0x36aa   :  { %44999 = vmatmul.mubr.f32.vlgmr.msra.gmra.mrb[68].mxu0 %v57862_v15 }
0x36ab   :  { %50263 = vmatpush3.bf16.msra.mxu0 %v50236_v32  ;;  %45009 = vmatprep.mubr.f32.mxu0 %v57863_v58 }
0x36ac   :  { %50265 = vmatprep.subr.bf16.mxu0 %v50240_v37 }
0x36af   :  { %50267 = vmatpush3.bf16.msra.mxu0 %v50240_v37 }
0x36b0   :  { %50269 = vmatprep.subr.bf16.mxu0 %v50268_v60 }
0x36b2   :  { %45010 = vmatmul.mubr.f32.vlgmr.msra.gmra.mrb[68].mxu0 %v57864_v50 }
0x36b3   :  { %50271 = vmatpush3.bf16.msra.mxu0 %v50268_v60  ;;  %45020 = vmatprep.mubr.f32.mxu0 %v57648_v12 }
0x36b4   :  { %50273 = vmatprep.subr.bf16.mxu0 %v50272_v26 }
0x36b7   :  { %50275 = vmatpush3.bf16.msra.mxu0 %v50272_v26 }
0x36b8   :  { %50277 = vmatprep.subr.bf16.mxu0 %v50236_v32 }
0x36ba   :  { %45021 = vmatmul.mubr.f32.vlgmr.msra.gmra.mrb[68].mxu0 %v57649_v19 }
0x36bb   :  { %50279 = vmatpush3.bf16.msra.mxu0 %v50236_v32  ;;  %45031 = vmatprep.mubr.f32.mxu0 %v57648_v12 }
0x36bc   :  { %50281 = vmatprep.subr.bf16.mxu0 %v50240_v37 }
0x36bf   :  { %50283 = vmatpush3.bf16.msra.mxu0 %v50240_v37 }
0x36c2   :  { %45032 = vmatmul.mubr.f32.vlgmr.msra.gmra.mrb[68].mxu0 %v57649_v19 }
0x3795   :  { %v45033_v16 = vpop.f32.mrb[68].mxu0 }
0x3796   :  { %v50348_v51 = vadd.f32 %v45033_v16, %v57865_v1  ;;  %v34519_v7 = vpop.f32.mrb[69].mxu0 }
0x3797   :  { %v50349_v56 = vadd.f32 %v34519_v7, %v57866_v62 }
0x3798   :  { %v34533_v27 = vsel %vm1660_vm3, %v50348_v51, 0 }
0x3799   :  { %v34614_v36 = vand.u32 4294901760, %v34533_v27  ;;  %v34530_v52 = vsel %vm1660_vm3, %v50349_v56, 0 }
0x379a   :  { %v34604_v41 = vand.u32 4294901760, %v34530_v52 }
0x379b   :  { %v34615_v24 = vsub.f32 %v34533_v27, %v34614_v36 }
0x379c   :  { %v34605_v21 = vsub.f32 %v34530_v52, %v34604_v41 }
0x379d   :  { %v34616_v22 = vand.u32 4294901760, %v34615_v24 }
0x379e   :  { %v34606_v12 = vand.u32 4294901760, %v34605_v21 }
0x379f   :  { %v34617_v14 = vsub.f32 %v34615_v24, %v34616_v22 }
0x37a0   :  { %v34607_v39 = vsub.f32 %v34605_v21, %v34606_v12 }
0x37a1   :  { %v34618_v19 = vand.u32 4294901760, %v34617_v14 }
0x37a2   :  { %v34608_v63 = vand.u32 4294901760, %v34607_v39 }
0x37a4   :  { %45042 = vmatprep.mubr.f32.mxu1 %v34608_v63 }
0x37a5   :  { %45043 = vmatmul.mubr.f32.vlgmr.msra.gmra.mrb[68].mxu1 %v34618_v19 }
0x37a6   :  { %50295 = vmatpush3.bf16.msra.mxu1 %v57861_v48  ;;  %45053 = vmatprep.mubr.f32.mxu1 %v34604_v41 }
0x37a7   :  { %50297 = vmatprep.subr.bf16.mxu1 %v57867_v35 }
0x37aa   :  { %50299 = vmatpush3.bf16.msra.mxu1 %v57867_v35 }
0x37ab   :  { %50301 = vmatprep.subr.bf16.mxu1 %v57868_v4 }
0x37ad   :  { %45054 = vmatmul.mubr.f32.vlgmr.msra.gmra.mrb[68].mxu1 %v34614_v36 }
0x37ae   :  { %50303 = vmatpush3.bf16.msra.mxu1 %v57868_v4  ;;  %45064 = vmatprep.mubr.f32.mxu1 %v34605_v21 }
0x37af   :  { %50305 = vmatprep.subr.bf16.mxu1 %v57869_v31 }
0x37b2   :  { %50307 = vmatpush3.bf16.msra.mxu1 %v57869_v31 }
0x37b3   :  { %50309 = vmatprep.subr.bf16.mxu1 %v57859_v42 }
0x37b5   :  { %45065 = vmatmul.mubr.f32.vlgmr.msra.gmra.mrb[68].mxu1 %v34615_v24 }
0x37b6   :  { %50311 = vmatpush3.bf16.msra.mxu1 %v57859_v42  ;;  %45075 = vmatprep.mubr.f32.mxu1 %v34606_v12 }
0x37b7   :  { %50313 = vmatprep.subr.bf16.mxu1 %v57860_v46 }
0x37ba   :  { %50315 = vmatpush3.bf16.msra.mxu1 %v57860_v46 }
0x37bb   :  { %50317 = vmatprep.subr.bf16.mxu1 %v57870_v54 }
0x37bd   :  { %45076 = vmatmul.mubr.f32.vlgmr.msra.gmra.mrb[68].mxu1 %v34616_v22 }
0x37be   :  { %50319 = vmatpush3.bf16.msra.mxu1 %v57870_v54  ;;  %45086 = vmatprep.mubr.f32.mxu1 %v34604_v41 }
0x37bf   :  { %50321 = vmatprep.subr.bf16.mxu1 %v57871_v45 }
0x37c2   :  { %50323 = vmatpush3.bf16.msra.mxu1 %v57871_v45 }
0x37c3   :  { %50325 = vmatprep.subr.bf16.mxu1 %v57859_v42 }
0x37c5   :  { %45087 = vmatmul.mubr.f32.vlgmr.msra.gmra.mrb[68].mxu1 %v34614_v36 }
0x37c6   :  { %50327 = vmatpush3.bf16.msra.mxu1 %v57859_v42  ;;  %45097 = vmatprep.mubr.f32.mxu1 %v34604_v41 }
0x37c7   :  { %50329 = vmatprep.subr.bf16.mxu1 %v57860_v46 }
0x37ca   :  { %50331 = vmatpush3.bf16.msra.mxu1 %v57860_v46 }
0x37cd   :  { %45098 = vmatmul.mubr.f32.vlgmr.msra.gmra.mrb[68].mxu1 %v34614_v36 }
0x38a0   :  { %v45099_v29 = vpop.f32.mrb[68].mxu1 }
0x38a1   :  { %v50350_v25 = vadd.f32 %v51126_v57, %v45099_v29  ;;  %v35053_v48 = vpop.f32.mrb[69].mxu1 }
0x38a2   :  { %v50351_v9 = vadd.f32 %v51126_v57, %v35053_v48 }
0x38a3   :  { %35079 = vst.msk [vmem:[%s56274_s9 + $0x18] sm:$0xff] %vm143_vm1, %v50350_v25 }
0x38a4   :  { %35078 = vst.msk [vmem:[%s56274_s9 + $0x10] sm:$0xff] %vm143_vm1, %v50351_v9 }
0x38a5   :  { %35070 = vsyncpa [#allocation3], 1 }

</bundles_post_ra>
